<compile_context>
chip_gen: v7x
topology: tpu7x:2x2x1
jax: 0.10.0
libtpu: 0.0.40
codegen_flags: <defaults>
</compile_context>

<pallas_src>
import functools

import jax
import jax.numpy as jnp
from jax.experimental import pallas as pl
from jax.experimental.pallas import tpu as pltpu


# ----------------------------------------------------------------------------
# Pallas kernels: out = act(A @ B + bias [+ residual]), (M,N,K)-tiled.
# ----------------------------------------------------------------------------
def _mm_kernel(a_ref, b_ref, bias_ref, o_ref, acc_ref, *, relu):
    k = pl.program_id(2)

    @pl.when(k == 0)
    def _():
        acc_ref[...] = jnp.zeros_like(acc_ref)

    acc_ref[...] += jnp.dot(a_ref[...], b_ref[...],
                            preferred_element_type=jnp.float32)

    @pl.when(k == pl.num_programs(2) - 1)
    def _():
        out = acc_ref[...] + bias_ref[...]
        if relu:
            out = jnp.maximum(out, 0.0)
        o_ref[...] = out.astype(o_ref.dtype)


def _mm_res_kernel(a_ref, b_ref, bias_ref, res_ref, o_ref, acc_ref, *, relu):
    k = pl.program_id(2)

    @pl.when(k == 0)
    def _():
        acc_ref[...] = jnp.zeros_like(acc_ref)

    acc_ref[...] += jnp.dot(a_ref[...], b_ref[...],
                            preferred_element_type=jnp.float32)

    @pl.when(k == pl.num_programs(2) - 1)
    def _():
        out = acc_ref[...] + bias_ref[...] + res_ref[...].astype(jnp.float32)
        if relu:
            out = jnp.maximum(out, 0.0)
        o_ref[...] = out.astype(o_ref.dtype)


def _round_up(x, m):
    return (x + m - 1) // m * m


def _pick_tile(padded_dim, preferred, align):
    """Largest tile <= preferred (multiple of `align`) that divides padded_dim."""
    if padded_dim <= preferred:
        return padded_dim
    t = (preferred // align) * align
    while padded_dim % t:
        t -= align
    return t


def pallas_matmul(a, b, bias, residual=None, relu=False,
                  out_dtype=jnp.bfloat16):
    """a:(M,K) @ b:(K,N) + bias:(N,) [+ residual:(M,N)] [-> relu].

    A/B are cast to bf16 (f32 MXU accumulation); output dtype is `out_dtype`.
    """
    M, K = a.shape
    K2, N = b.shape
    assert K == K2

    Mp = _round_up(M, 16)            # 16: bf16 sublane packing
    Np = _round_up(N, 128)
    Kp = _round_up(K, 128)
    tm = _pick_tile(Mp, 256, 16)
    tn = _pick_tile(Np, 512, 128)
    tk = _pick_tile(Kp, 512, 128)

    a_p = jnp.pad(a.astype(jnp.bfloat16), ((0, Mp - M), (0, Kp - K)))
    b_p = jnp.pad(b.astype(jnp.bfloat16), ((0, Kp - K), (0, Np - N)))
    bias_p = jnp.pad(bias.astype(jnp.float32), (0, Np - N)).reshape(1, Np)

    in_specs = [
        pl.BlockSpec((tm, tk), lambda i, j, k: (i, k)),
        pl.BlockSpec((tk, tn), lambda i, j, k: (k, j)),
        pl.BlockSpec((1, tn), lambda i, j, k: (0, j)),
    ]
    args = [a_p, b_p, bias_p]
    if residual is not None:
        res_p = jnp.pad(residual.astype(jnp.bfloat16),
                        ((0, Mp - M), (0, Np - N)))
        in_specs.append(pl.BlockSpec((tm, tn), lambda i, j, k: (i, j)))
        args.append(res_p)
        kernel = functools.partial(_mm_res_kernel, relu=relu)
    else:
        kernel = functools.partial(_mm_kernel, relu=relu)

    out = pl.pallas_call(
        kernel,
        out_shape=jax.ShapeDtypeStruct((Mp, Np), out_dtype),
        grid_spec=pltpu.PrefetchScalarGridSpec(
            num_scalar_prefetch=0,
            grid=(Mp // tm, Np // tn, Kp // tk),
            in_specs=in_specs,
            out_specs=pl.BlockSpec((tm, tn), lambda i, j, k: (i, j)),
            scratch_shapes=[pltpu.VMEM((tm, tn), jnp.float32)],
        ),
        compiler_params=pltpu.CompilerParams(
            dimension_semantics=("parallel", "parallel", "arbitrary"),
        ),
    )(*args)
    return out[:M, :N]


# ----------------------------------------------------------------------------
# Conv lowering (NHWC im2col in plain JAX, GEMM in Pallas)
# ----------------------------------------------------------------------------
def _im2col_nhwc(x, kh, kw, stride, pad):
    # x: (N, H, W, C) -> (N*OH*OW, kh*kw*C); column order is (i, j, c).
    N, H, W, C = x.shape
    xp = jnp.pad(x, ((0, 0), (pad, pad), (pad, pad), (0, 0)))
    OH = (H + 2 * pad - kh) // stride + 1
    OW = (W + 2 * pad - kw) // stride + 1
    cols = []
    for i in range(kh):
        for j in range(kw):
            cols.append(xp[:, i:i + stride * OH:stride,
                              j:j + stride * OW:stride, :])
    col = jnp.concatenate(cols, axis=-1)          # (N, OH, OW, kh*kw*C)
    return col.reshape(N * OH * OW, kh * kw * C), OH, OW


def conv2d_bn(x, wmat, b, kh, kw, stride, pad, relu=True, residual=None):
    """Folded conv+BN (+residual add) (+ReLU).  x NHWC, wmat (kh*kw*C, OC)."""
    N = x.shape[0]
    OC = wmat.shape[1]
    col, OH, OW = _im2col_nhwc(x, kh, kw, stride, pad)
    res = None
    if residual is not None:
        res = residual.reshape(N * OH * OW, OC)   # NHWC -> pure reshape
    out = pallas_matmul(col, wmat, b, residual=res, relu=relu)
    return out.reshape(N, OH, OW, OC)


def maxpool2d_nhwc(x, k=3, s=2, p=1):
    neg_inf = jnp.array(-jnp.inf, dtype=x.dtype)
    return jax.lax.reduce_window(
        x, neg_inf, jax.lax.max,
        window_dimensions=(1, k, k, 1),
        window_strides=(1, s, s, 1),
        padding=((0, 0), (p, p), (p, p), (0, 0)))


# ----------------------------------------------------------------------------
# Deterministic parameter construction (ResNet18 shapes, BN folded, GEMM-ready)
# ----------------------------------------------------------------------------
def _init_conv(key, oc, ic, kh, kw):
    return 0.05 * jax.random.normal(key, (oc, ic, kh, kw), jnp.float32)


def _init_bn(key, c):
    k1, k2, k3, k4 = jax.random.split(key, 4)
    gamma = 1.0 + 0.1 * jax.random.normal(k1, (c,), jnp.float32)
    beta = 0.1 * jax.random.normal(k2, (c,), jnp.float32)
    mean = 0.1 * jax.random.normal(k3, (c,), jnp.float32)
    var = 0.5 + jax.random.uniform(k4, (c,), jnp.float32)
    return gamma, beta, mean, var


def _fold_to_gemm(w, bn, eps=1e-5):
    """Fold BN into conv and pre-build the (kh*kw*C, OC) bf16 GEMM weight."""
    gamma, beta, mean, var = bn
    scale = gamma / jnp.sqrt(var + eps)
    wf = w * scale[:, None, None, None]
    bf = beta - mean * scale
    oc, c, kh, kw = w.shape
    wmat = wf.transpose(2, 3, 1, 0).reshape(kh * kw * c, oc)   # (i,j,c) order
    return wmat.astype(jnp.bfloat16), bf.astype(jnp.float32)


def _make_layer(key, in_c, out_c, stride):
    blocks = []
    for bidx in range(2):
        s = stride if bidx == 0 else 1
        kk = jax.random.split(jax.random.fold_in(key, bidx), 6)
        blk = {}
        w1 = _init_conv(kk[0], out_c, in_c if bidx == 0 else out_c, 3, 3)
        blk["conv1_wmat"], blk["conv1_b"] = _fold_to_gemm(w1, _init_bn(kk[1], out_c))
        w2 = _init_conv(kk[2], out_c, out_c, 3, 3)
        blk["conv2_wmat"], blk["conv2_b"] = _fold_to_gemm(w2, _init_bn(kk[3], out_c))
        if bidx == 0 and (s != 1 or in_c != out_c):
            wd = _init_conv(kk[4], out_c, in_c, 1, 1)
            blk["down_wmat"], blk["down_b"] = _fold_to_gemm(wd, _init_bn(kk[5], out_c))
        blocks.append(blk)
    return blocks


def init_color_model_params(key, num_colors):
    ks = jax.random.split(key, 8)
    params = {}
    w1 = _init_conv(ks[0], 64, 3, 7, 7)
    params["conv1_wmat"], params["conv1_b"] = _fold_to_gemm(w1, _init_bn(ks[1], 64))
    params["layer1"] = _make_layer(ks[2], 64, 64, 1)
    params["layer2"] = _make_layer(ks[3], 64, 128, 2)
    params["layer3"] = _make_layer(ks[4], 128, 256, 2)
    params["layer4"] = _make_layer(ks[5], 256, 512, 2)
    fc_w = 0.05 * jax.random.normal(ks[6], (num_colors, 512), jnp.float32)
    params["fc_wmat"] = fc_w.T.astype(jnp.bfloat16)            # (512, num_colors)
    params["fc_b"] = 0.05 * jax.random.normal(ks[7], (num_colors,), jnp.float32)
    return params


# ----------------------------------------------------------------------------
# Forward pass (ResNet18 backbone -> flatten -> fc_color -> dropout[eval])
# ----------------------------------------------------------------------------
_LAYER_SPECS = (("layer1", 1), ("layer2", 2), ("layer3", 2), ("layer4", 2))


def _basic_block(x, blk, stride):
    identity = x
    out = conv2d_bn(x, blk["conv1_wmat"], blk["conv1_b"], kh=3, kw=3,
                    stride=stride, pad=1, relu=True)
    if "down_wmat" in blk:
        identity = conv2d_bn(x, blk["down_wmat"], blk["down_b"], kh=1, kw=1,
                             stride=stride, pad=0, relu=False)
    # out = relu(bn2(conv2(out)) + identity) -- add & relu fused in the kernel
    out = conv2d_bn(out, blk["conv2_wmat"], blk["conv2_b"], kh=3, kw=3,
                    stride=1, pad=1, relu=True, residual=identity)
    return out


def color_model_forward(x, params):
    # x arrives NCHW (PyTorch convention); convert to NHWC once.
    x = jnp.transpose(x, (0, 2, 3, 1))
    x = conv2d_bn(x, params["conv1_wmat"], params["conv1_b"], kh=7, kw=7,
                  stride=2, pad=3, relu=True)
    x = maxpool2d_nhwc(x, k=3, s=2, p=1)
    for name, stride in _LAYER_SPECS:
        for bidx, blk in enumerate(params[name]):
            x = _basic_block(x, blk, stride if bidx == 0 else 1)
    x = jnp.mean(x.astype(jnp.float32), axis=(1, 2))        # adaptive avg pool -> (N, 512)
    logits = pallas_matmul(x, params["fc_wmat"], params["fc_b"],
                           relu=False, out_dtype=jnp.float32)
    # Dropout(p=0.4) in eval mode is identity.
    return {"color": logits}


if __name__ == "__main__":
    num_colors = 10
    key = jax.random.PRNGKey(0)
    k_param, k_x = jax.random.split(key)
    params = init_color_model_params(k_param, num_colors)
    x = jax.random.normal(k_x, (2, 3, 64, 64), jnp.float32)   # NCHW, small size
    forward = jax.jit(color_model_forward)
    out = forward(x, params)
    jax.block_until_ready(out["color"])
    assert out["color"].shape == (2, num_colors)
    print("KERNEL_OK")
</pallas_src>

<mosaic_0001>
module attributes {stable_mosaic.version = 11 : i64} {
  func.func @_mm_kernel(%arg0: i32, %arg1: i32, %arg2: i32, %arg3: memref<256x256xbf16, #tpu.memory_space<vmem>>, %arg4: memref<256x128xbf16, #tpu.memory_space<vmem>>, %arg5: memref<1x128xf32, #tpu.memory_space<vmem>>, %arg6: memref<256x128xbf16, #tpu.memory_space<vmem>>, %arg7: memref<256x128xf32, #tpu.memory_space<vmem>>) attributes {dimension_semantics = [#tpu.dimension_semantics<parallel>, #tpu.dimension_semantics<parallel>, #tpu.dimension_semantics<arbitrary>], iteration_bounds = array<i64: 8, 1, 1>, scalar_prefetch = 0 : i64, scratch_operands = 1 : i64, tpu.core_type = #tpu.core_type<tc>, window_params = [{transform_indices = @transform_0, window_bounds = array<i64: 256, 256>}, {transform_indices = @transform_1, window_bounds = array<i64: 256, 128>}, {transform_indices = @transform_2, window_bounds = array<i64: 1, 128>}, {transform_indices = @transform_3, window_bounds = array<i64: 256, 128>}]} {
    %c0_i32 = arith.constant 0 : i32
    %0 = arith.cmpi eq, %arg2, %c0_i32 : i32
    %1 = arith.extui %0 : i1 to i32
    %c0_i32_0 = arith.constant 0 : i32
    %2 = arith.cmpi ne, %1, %c0_i32_0 : i32
    scf.if %2 {
      %cst_10 = arith.constant 0.000000e+00 : f32
      %12 = vector.broadcast %cst_10 : f32 to vector<256x128xf32>
      %c0_11 = arith.constant 0 : index
      %c0_12 = arith.constant 0 : index
      %13 = vector.load %arg7[%c0_11, %c0_12] : memref<256x128xf32, #tpu.memory_space<vmem>>, vector<256x128xf32>
      tpu.vector_store %arg7[%c0_11, %c0_12], %12 {strides = array<i32>} : memref<256x128xf32, #tpu.memory_space<vmem>>, vector<256x128xf32>,
    } else {
    }
    %c0 = arith.constant 0 : index
    %c0_1 = arith.constant 0 : index
    %3 = vector.load %arg7[%c0, %c0_1] : memref<256x128xf32, #tpu.memory_space<vmem>>, vector<256x128xf32>
    %c0_2 = arith.constant 0 : index
    %c0_3 = arith.constant 0 : index
    %4 = vector.load %arg3[%c0_2, %c0_3] : memref<256x256xbf16, #tpu.memory_space<vmem>>, vector<256x256xbf16>
    %c0_4 = arith.constant 0 : index
    %c0_5 = arith.constant 0 : index
    %5 = vector.load %arg4[%c0_4, %c0_5] : memref<256x128xbf16, #tpu.memory_space<vmem>>, vector<256x128xbf16>
    %cst = arith.constant dense<0.000000e+00> : vector<256x128xf32>
    %6 = tpu.matmul %4, %5, %cst {dimension_numbers = #tpu.dot_dimension_numbers<[1], [0], [0], [1], [0, 0, 1, 1], [], []>} : vector<256x256xbf16>, vector<256x128xbf16>, vector<256x128xf32> -> vector<256x128xf32>
    %7 = arith.addf %3, %6 : vector<256x128xf32>
    %c0_6 = arith.constant 0 : index
    %c0_7 = arith.constant 0 : index
    %8 = vector.load %arg7[%c0_6, %c0_7] : memref<256x128xf32, #tpu.memory_space<vmem>>, vector<256x128xf32>
    tpu.vector_store %arg7[%c0_6, %c0_7], %7 {strides = array<i32>} : memref<256x128xf32, #tpu.memory_space<vmem>>, vector<256x128xf32>,
    %c0_i32_8 = arith.constant 0 : i32
    %9 = arith.cmpi eq, %arg2, %c0_i32_8 : i32
    %10 = arith.extui %9 : i1 to i32
    %c0_i32_9 = arith.constant 0 : i32
    %11 = arith.cmpi ne, %10, %c0_i32_9 : i32
    scf.if %11 {
      %c0_10 = arith.constant 0 : index
      %c0_11 = arith.constant 0 : index
      %12 = vector.load %arg7[%c0_10, %c0_11] : memref<256x128xf32, #tpu.memory_space<vmem>>, vector<256x128xf32>
      %c0_12 = arith.constant 0 : index
      %c0_13 = arith.constant 0 : index
      %13 = vector.load %arg5[%c0_12, %c0_13] : memref<1x128xf32, #tpu.memory_space<vmem>>, vector<1x128xf32>
      %14 = vector.broadcast %13 : vector<1x128xf32> to vector<256x128xf32>
      %15 = arith.addf %12, %14 : vector<256x128xf32>
      %cst_14 = arith.constant 0.000000e+00 : f32
      %16 = vector.broadcast %cst_14 : f32 to vector<256x128xf32>
      %17 = arith.maximumf %15, %16 : vector<256x128xf32>
      %18 = arith.truncf %17 : vector<256x128xf32> to vector<256x128xbf16>
      %c0_15 = arith.constant 0 : index
      %c0_16 = arith.constant 0 : index
      %19 = vector.load %arg6[%c0_15, %c0_16] : memref<256x128xbf16, #tpu.memory_space<vmem>>, vector<256x128xbf16>
      tpu.vector_store %arg6[%c0_15, %c0_16], %18 {strides = array<i32>} : memref<256x128xbf16, #tpu.memory_space<vmem>>, vector<256x128xbf16>,
    } else {
    }
    return
  }
  func.func @transform_0(%arg0: i32, %arg1: i32, %arg2: i32) -> (i32, i32) {
    %c0_i32 = arith.constant 0 : i32
    return %arg0, %arg2 : i32, i32
  }
  func.func @transform_1(%arg0: i32, %arg1: i32, %arg2: i32) -> (i32, i32) {
    %c0_i32 = arith.constant 0 : i32
    return %arg2, %arg1 : i32, i32
  }
  func.func @transform_2(%arg0: i32, %arg1: i32, %arg2: i32) -> (i32, i32) {
    %c0_i32 = arith.constant 0 : i32
    %c0_i32_0 = arith.constant 0 : i32
    return %c0_i32, %arg1 : i32, i32
  }
  func.func @transform_3(%arg0: i32, %arg1: i32, %arg2: i32) -> (i32, i32) {
    %c0_i32 = arith.constant 0 : i32
    return %arg0, %arg1 : i32, i32
  }
}

module attributes {stable_mosaic.version = 11 : i64} {
  func.func @_mm_kernel(%arg0: i32, %arg1: i32, %arg2: i32, %arg3: memref<256x128xbf16, #tpu.memory_space<vmem>>, %arg4: memref<128x128xbf16, #tpu.memory_space<vmem>>, %arg5: memref<1x128xf32, #tpu.memory_space<vmem>>, %arg6: memref<256x128xbf16, #tpu.memory_space<vmem>>, %arg7: memref<256x128xf32, #tpu.memory_space<vmem>>) attributes {dimension_semantics = [#tpu.dimension_semantics<parallel>, #tpu.dimension_semantics<parallel>, #tpu.dimension_semantics<arbitrary>], iteration_bounds = array<i64: 2, 1, 5>, scalar_prefetch = 0 : i64, scratch_operands = 1 : i64, tpu.core_type = #tpu.core_type<tc>, window_params = [{transform_indices = @transform_0, window_bounds = array<i64: 256, 128>}, {transform_indices = @transform_1, window_bounds = array<i64: 128, 128>}, {transform_indices = @transform_2, window_bounds = array<i64: 1, 128>}, {transform_indices = @transform_3, window_bounds = array<i64: 256, 128>}]} {
    %c0_i32 = arith.constant 0 : i32
    %0 = arith.cmpi eq, %arg2, %c0_i32 : i32
    %1 = arith.extui %0 : i1 to i32
    %c0_i32_0 = arith.constant 0 : i32
    %2 = arith.cmpi ne, %1, %c0_i32_0 : i32
    scf.if %2 {
      %cst_9 = arith.constant 0.000000e+00 : f32
      %12 = vector.broadcast %cst_9 : f32 to vector<256x128xf32>
      %c0_10 = arith.constant 0 : index
      %c0_11 = arith.constant 0 : index
      %13 = vector.load %arg7[%c0_10, %c0_11] : memref<256x128xf32, #tpu.memory_space<vmem>>, vector<256x128xf32>
      tpu.vector_store %arg7[%c0_10, %c0_11], %12 {strides = array<i32>} : memref<256x128xf32, #tpu.memory_space<vmem>>, vector<256x128xf32>,
    } else {
    }
    %c0 = arith.constant 0 : index
    %c0_1 = arith.constant 0 : index
    %3 = vector.load %arg7[%c0, %c0_1] : memref<256x128xf32, #tpu.memory_space<vmem>>, vector<256x128xf32>
    %c0_2 = arith.constant 0 : index
    %c0_3 = arith.constant 0 : index
    %4 = vector.load %arg3[%c0_2, %c0_3] : memref<256x128xbf16, #tpu.memory_space<vmem>>, vector<256x128xbf16>
    %c0_4 = arith.constant 0 : index
    %c0_5 = arith.constant 0 : index
    %5 = vector.load %arg4[%c0_4, %c0_5] : memref<128x128xbf16, #tpu.memory_space<vmem>>, vector<128x128xbf16>
    %cst = arith.constant dense<0.000000e+00> : vector<256x128xf32>
    %6 = tpu.matmul %4, %5, %cst {dimension_numbers = #tpu.dot_dimension_numbers<[1], [0], [0], [1], [0, 0, 1, 1], [], []>} : vector<256x128xbf16>, vector<128x128xbf16>, vector<256x128xf32> -> vector<256x128xf32>
    %7 = arith.addf %3, %6 : vector<256x128xf32>
    %c0_6 = arith.constant 0 : index
    %c0_7 = arith.constant 0 : index
    %8 = vector.load %arg7[%c0_6, %c0_7] : memref<256x128xf32, #tpu.memory_space<vmem>>, vector<256x128xf32>
    tpu.vector_store %arg7[%c0_6, %c0_7], %7 {strides = array<i32>} : memref<256x128xf32, #tpu.memory_space<vmem>>, vector<256x128xf32>,
    %c4_i32 = arith.constant 4 : i32
    %9 = arith.cmpi eq, %arg2, %c4_i32 : i32
    %10 = arith.extui %9 : i1 to i32
    %c0_i32_8 = arith.constant 0 : i32
    %11 = arith.cmpi ne, %10, %c0_i32_8 : i32
    scf.if %11 {
      %c0_9 = arith.constant 0 : index
      %c0_10 = arith.constant 0 : index
      %12 = vector.load %arg7[%c0_9, %c0_10] : memref<256x128xf32, #tpu.memory_space<vmem>>, vector<256x128xf32>
      %c0_11 = arith.constant 0 : index
      %c0_12 = arith.constant 0 : index
      %13 = vector.load %arg5[%c0_11, %c0_12] : memref<1x128xf32, #tpu.memory_space<vmem>>, vector<1x128xf32>
      %14 = vector.broadcast %13 : vector<1x128xf32> to vector<256x128xf32>
      %15 = arith.addf %12, %14 : vector<256x128xf32>
      %cst_13 = arith.constant 0.000000e+00 : f32
      %16 = vector.broadcast %cst_13 : f32 to vector<256x128xf32>
      %17 = arith.maximumf %15, %16 : vector<256x128xf32>
      %18 = arith.truncf %17 : vector<256x128xf32> to vector<256x128xbf16>
      %c0_14 = arith.constant 0 : index
      %c0_15 = arith.constant 0 : index
      %19 = vector.load %arg6[%c0_14, %c0_15] : memref<256x128xbf16, #tpu.memory_space<vmem>>, vector<256x128xbf16>
      tpu.vector_store %arg6[%c0_14, %c0_15], %18 {strides = array<i32>} : memref<256x128xbf16, #tpu.memory_space<vmem>>, vector<256x128xbf16>,
    } else {
    }
    return
  }
  func.func @transform_0(%arg0: i32, %arg1: i32, %arg2: i32) -> (i32, i32) {
    %c0_i32 = arith.constant 0 : i32
    return %arg0, %arg2 : i32, i32
  }
  func.func @transform_1(%arg0: i32, %arg1: i32, %arg2: i32) -> (i32, i32) {
    %c0_i32 = arith.constant 0 : i32
    return %arg2, %arg1 : i32, i32
  }
  func.func @transform_2(%arg0: i32, %arg1: i32, %arg2: i32) -> (i32, i32) {
    %c0_i32 = arith.constant 0 : i32
    %c0_i32_0 = arith.constant 0 : i32
    return %c0_i32, %arg1 : i32, i32
  }
  func.func @transform_3(%arg0: i32, %arg1: i32, %arg2: i32) -> (i32, i32) {
    %c0_i32 = arith.constant 0 : i32
    return %arg0, %arg1 : i32, i32
  }
}

module attributes {stable_mosaic.version = 11 : i64} {
  func.func @_mm_res_kernel(%arg0: i32, %arg1: i32, %arg2: i32, %arg3: memref<256x128xbf16, #tpu.memory_space<vmem>>, %arg4: memref<128x128xbf16, #tpu.memory_space<vmem>>, %arg5: memref<1x128xf32, #tpu.memory_space<vmem>>, %arg6: memref<256x128xbf16, #tpu.memory_space<vmem>>, %arg7: memref<256x128xbf16, #tpu.memory_space<vmem>>, %arg8: memref<256x128xf32, #tpu.memory_space<vmem>>) attributes {dimension_semantics = [#tpu.dimension_semantics<parallel>, #tpu.dimension_semantics<parallel>, #tpu.dimension_semantics<arbitrary>], iteration_bounds = array<i64: 2, 1, 5>, scalar_prefetch = 0 : i64, scratch_operands = 1 : i64, tpu.core_type = #tpu.core_type<tc>, window_params = [{transform_indices = @transform_0, window_bounds = array<i64: 256, 128>}, {transform_indices = @transform_1, window_bounds = array<i64: 128, 128>}, {transform_indices = @transform_2, window_bounds = array<i64: 1, 128>}, {transform_indices = @transform_3, window_bounds = array<i64: 256, 128>}, {transform_indices = @transform_4, window_bounds = array<i64: 256, 128>}]} {
    %c0_i32 = arith.constant 0 : i32
    %0 = arith.cmpi eq, %arg2, %c0_i32 : i32
    %1 = arith.extui %0 : i1 to i32
    %c0_i32_0 = arith.constant 0 : i32
    %2 = arith.cmpi ne, %1, %c0_i32_0 : i32
    scf.if %2 {
      %cst_9 = arith.constant 0.000000e+00 : f32
      %12 = vector.broadcast %cst_9 : f32 to vector<256x128xf32>
      %c0_10 = arith.constant 0 : index
      %c0_11 = arith.constant 0 : index
      %13 = vector.load %arg8[%c0_10, %c0_11] : memref<256x128xf32, #tpu.memory_space<vmem>>, vector<256x128xf32>
      tpu.vector_store %arg8[%c0_10, %c0_11], %12 {strides = array<i32>} : memref<256x128xf32, #tpu.memory_space<vmem>>, vector<256x128xf32>,
    } else {
    }
    %c0 = arith.constant 0 : index
    %c0_1 = arith.constant 0 : index
    %3 = vector.load %arg8[%c0, %c0_1] : memref<256x128xf32, #tpu.memory_space<vmem>>, vector<256x128xf32>
    %c0_2 = arith.constant 0 : index
    %c0_3 = arith.constant 0 : index
    %4 = vector.load %arg3[%c0_2, %c0_3] : memref<256x128xbf16, #tpu.memory_space<vmem>>, vector<256x128xbf16>
    %c0_4 = arith.constant 0 : index
    %c0_5 = arith.constant 0 : index
    %5 = vector.load %arg4[%c0_4, %c0_5] : memref<128x128xbf16, #tpu.memory_space<vmem>>, vector<128x128xbf16>
    %cst = arith.constant dense<0.000000e+00> : vector<256x128xf32>
    %6 = tpu.matmul %4, %5, %cst {dimension_numbers = #tpu.dot_dimension_numbers<[1], [0], [0], [1], [0, 0, 1, 1], [], []>} : vector<256x128xbf16>, vector<128x128xbf16>, vector<256x128xf32> -> vector<256x128xf32>
    %7 = arith.addf %3, %6 : vector<256x128xf32>
    %c0_6 = arith.constant 0 : index
    %c0_7 = arith.constant 0 : index
    %8 = vector.load %arg8[%c0_6, %c0_7] : memref<256x128xf32, #tpu.memory_space<vmem>>, vector<256x128xf32>
    tpu.vector_store %arg8[%c0_6, %c0_7], %7 {strides = array<i32>} : memref<256x128xf32, #tpu.memory_space<vmem>>, vector<256x128xf32>,
    %c4_i32 = arith.constant 4 : i32
    %9 = arith.cmpi eq, %arg2, %c4_i32 : i32
    %10 = arith.extui %9 : i1 to i32
    %c0_i32_8 = arith.constant 0 : i32
    %11 = arith.cmpi ne, %10, %c0_i32_8 : i32
    scf.if %11 {
      %c0_9 = arith.constant 0 : index
      %c0_10 = arith.constant 0 : index
      %12 = vector.load %arg8[%c0_9, %c0_10] : memref<256x128xf32, #tpu.memory_space<vmem>>, vector<256x128xf32>
      %c0_11 = arith.constant 0 : index
      %c0_12 = arith.constant 0 : index
      %13 = vector.load %arg5[%c0_11, %c0_12] : memref<1x128xf32, #tpu.memory_space<vmem>>, vector<1x128xf32>
      %14 = vector.broadcast %13 : vector<1x128xf32> to vector<256x128xf32>
      %15 = arith.addf %12, %14 : vector<256x128xf32>
      %c0_13 = arith.constant 0 : index
      %c0_14 = arith.constant 0 : index
      %16 = vector.load %arg6[%c0_13, %c0_14] : memref<256x128xbf16, #tpu.memory_space<vmem>>, vector<256x128xbf16>
      %17 = arith.extf %16 : vector<256x128xbf16> to vector<256x128xf32>
      %18 = arith.addf %15, %17 : vector<256x128xf32>
      %cst_15 = arith.constant 0.000000e+00 : f32
      %19 = vector.broadcast %cst_15 : f32 to vector<256x128xf32>
      %20 = arith.maximumf %18, %19 : vector<256x128xf32>
      %21 = arith.truncf %20 : vector<256x128xf32> to vector<256x128xbf16>
      %c0_16 = arith.constant 0 : index
      %c0_17 = arith.constant 0 : index
      %22 = vector.load %arg7[%c0_16, %c0_17] : memref<256x128xbf16, #tpu.memory_space<vmem>>, vector<256x128xbf16>
      tpu.vector_store %arg7[%c0_16, %c0_17], %21 {strides = array<i32>} : memref<256x128xbf16, #tpu.memory_space<vmem>>, vector<256x128xbf16>,
    } else {
    }
    return
  }
  func.func @transform_0(%arg0: i32, %arg1: i32, %arg2: i32) -> (i32, i32) {
    %c0_i32 = arith.constant 0 : i32
    return %arg0, %arg2 : i32, i32
  }
  func.func @transform_1(%arg0: i32, %arg1: i32, %arg2: i32) -> (i32, i32) {
    %c0_i32 = arith.constant 0 : i32
    return %arg2, %arg1 : i32, i32
  }
  func.func @transform_2(%arg0: i32, %arg1: i32, %arg2: i32) -> (i32, i32) {
    %c0_i32 = arith.constant 0 : i32
    %c0_i32_0 = arith.constant 0 : i32
    return %c0_i32, %arg1 : i32, i32
  }
  func.func @transform_3(%arg0: i32, %arg1: i32, %arg2: i32) -> (i32, i32) {
    %c0_i32 = arith.constant 0 : i32
    return %arg0, %arg1 : i32, i32
  }
  func.func @transform_4(%arg0: i32, %arg1: i32, %arg2: i32) -> (i32, i32) {
    %c0_i32 = arith.constant 0 : i32
    return %arg0, %arg1 : i32, i32
  }
}

module attributes {stable_mosaic.version = 11 : i64} {
  func.func @_mm_kernel(%arg0: i32, %arg1: i32, %arg2: i32, %arg3: memref<128x128xbf16, #tpu.memory_space<vmem>>, %arg4: memref<128x128xbf16, #tpu.memory_space<vmem>>, %arg5: memref<1x128xf32, #tpu.memory_space<vmem>>, %arg6: memref<128x128xbf16, #tpu.memory_space<vmem>>, %arg7: memref<128x128xf32, #tpu.memory_space<vmem>>) attributes {dimension_semantics = [#tpu.dimension_semantics<parallel>, #tpu.dimension_semantics<parallel>, #tpu.dimension_semantics<arbitrary>], iteration_bounds = array<i64: 1, 1, 5>, scalar_prefetch = 0 : i64, scratch_operands = 1 : i64, tpu.core_type = #tpu.core_type<tc>, window_params = [{transform_indices = @transform_0, window_bounds = array<i64: 128, 128>}, {transform_indices = @transform_1, window_bounds = array<i64: 128, 128>}, {transform_indices = @transform_2, window_bounds = array<i64: 1, 128>}, {transform_indices = @transform_3, window_bounds = array<i64: 128, 128>}]} {
    %c0_i32 = arith.constant 0 : i32
    %0 = arith.cmpi eq, %arg2, %c0_i32 : i32
    %1 = arith.extui %0 : i1 to i32
    %c0_i32_0 = arith.constant 0 : i32
    %2 = arith.cmpi ne, %1, %c0_i32_0 : i32
    scf.if %2 {
      %cst_9 = arith.constant 0.000000e+00 : f32
      %12 = vector.broadcast %cst_9 : f32 to vector<128x128xf32>
      %c0_10 = arith.constant 0 : index
      %c0_11 = arith.constant 0 : index
      %13 = vector.load %arg7[%c0_10, %c0_11] : memref<128x128xf32, #tpu.memory_space<vmem>>, vector<128x128xf32>
      tpu.vector_store %arg7[%c0_10, %c0_11], %12 {strides = array<i32>} : memref<128x128xf32, #tpu.memory_space<vmem>>, vector<128x128xf32>,
    } else {
    }
    %c0 = arith.constant 0 : index
    %c0_1 = arith.constant 0 : index
    %3 = vector.load %arg7[%c0, %c0_1] : memref<128x128xf32, #tpu.memory_space<vmem>>, vector<128x128xf32>
    %c0_2 = arith.constant 0 : index
    %c0_3 = arith.constant 0 : index
    %4 = vector.load %arg3[%c0_2, %c0_3] : memref<128x128xbf16, #tpu.memory_space<vmem>>, vector<128x128xbf16>
    %c0_4 = arith.constant 0 : index
    %c0_5 = arith.constant 0 : index
    %5 = vector.load %arg4[%c0_4, %c0_5] : memref<128x128xbf16, #tpu.memory_space<vmem>>, vector<128x128xbf16>
    %cst = arith.constant dense<0.000000e+00> : vector<128x128xf32>
    %6 = tpu.matmul %4, %5, %cst {dimension_numbers = #tpu.dot_dimension_numbers<[1], [0], [0], [1], [0, 0, 1, 1], [], []>} : vector<128x128xbf16>, vector<128x128xbf16>, vector<128x128xf32> -> vector<128x128xf32>
    %7 = arith.addf %3, %6 : vector<128x128xf32>
    %c0_6 = arith.constant 0 : index
    %c0_7 = arith.constant 0 : index
    %8 = vector.load %arg7[%c0_6, %c0_7] : memref<128x128xf32, #tpu.memory_space<vmem>>, vector<128x128xf32>
    tpu.vector_store %arg7[%c0_6, %c0_7], %7 {strides = array<i32>} : memref<128x128xf32, #tpu.memory_space<vmem>>, vector<128x128xf32>,
    %c4_i32 = arith.constant 4 : i32
    %9 = arith.cmpi eq, %arg2, %c4_i32 : i32
    %10 = arith.extui %9 : i1 to i32
    %c0_i32_8 = arith.constant 0 : i32
    %11 = arith.cmpi ne, %10, %c0_i32_8 : i32
    scf.if %11 {
      %c0_9 = arith.constant 0 : index
      %c0_10 = arith.constant 0 : index
      %12 = vector.load %arg7[%c0_9, %c0_10] : memref<128x128xf32, #tpu.memory_space<vmem>>, vector<128x128xf32>
      %c0_11 = arith.constant 0 : index
      %c0_12 = arith.constant 0 : index
      %13 = vector.load %arg5[%c0_11, %c0_12] : memref<1x128xf32, #tpu.memory_space<vmem>>, vector<1x128xf32>
      %14 = vector.broadcast %13 : vector<1x128xf32> to vector<128x128xf32>
      %15 = arith.addf %12, %14 : vector<128x128xf32>
      %cst_13 = arith.constant 0.000000e+00 : f32
      %16 = vector.broadcast %cst_13 : f32 to vector<128x128xf32>
      %17 = arith.maximumf %15, %16 : vector<128x128xf32>
      %18 = arith.truncf %17 : vector<128x128xf32> to vector<128x128xbf16>
      %c0_14 = arith.constant 0 : index
      %c0_15 = arith.constant 0 : index
      %19 = vector.load %arg6[%c0_14, %c0_15] : memref<128x128xbf16, #tpu.memory_space<vmem>>, vector<128x128xbf16>
      tpu.vector_store %arg6[%c0_14, %c0_15], %18 {strides = array<i32>} : memref<128x128xbf16, #tpu.memory_space<vmem>>, vector<128x128xbf16>,
    } else {
    }
    return
  }
  func.func @transform_0(%arg0: i32, %arg1: i32, %arg2: i32) -> (i32, i32) {
    %c0_i32 = arith.constant 0 : i32
    return %arg0, %arg2 : i32, i32
  }
  func.func @transform_1(%arg0: i32, %arg1: i32, %arg2: i32) -> (i32, i32) {
    %c0_i32 = arith.constant 0 : i32
    return %arg2, %arg1 : i32, i32
  }
  func.func @transform_2(%arg0: i32, %arg1: i32, %arg2: i32) -> (i32, i32) {
    %c0_i32 = arith.constant 0 : i32
    %c0_i32_0 = arith.constant 0 : i32
    return %c0_i32, %arg1 : i32, i32
  }
  func.func @transform_3(%arg0: i32, %arg1: i32, %arg2: i32) -> (i32, i32) {
    %c0_i32 = arith.constant 0 : i32
    return %arg0, %arg1 : i32, i32
  }
}

module attributes {stable_mosaic.version = 11 : i64} {
  func.func @_mm_kernel(%arg0: i32, %arg1: i32, %arg2: i32, %arg3: memref<128x128xbf16, #tpu.memory_space<vmem>>, %arg4: memref<128x128xbf16, #tpu.memory_space<vmem>>, %arg5: memref<1x128xf32, #tpu.memory_space<vmem>>, %arg6: memref<128x128xbf16, #tpu.memory_space<vmem>>, %arg7: memref<128x128xf32, #tpu.memory_space<vmem>>) attributes {dimension_semantics = [#tpu.dimension_semantics<parallel>, #tpu.dimension_semantics<parallel>, #tpu.dimension_semantics<arbitrary>], iteration_bounds = array<i64: 1, 1, 1>, scalar_prefetch = 0 : i64, scratch_operands = 1 : i64, tpu.core_type = #tpu.core_type<tc>, window_params = [{transform_indices = @transform_0, window_bounds = array<i64: 128, 128>}, {transform_indices = @transform_1, window_bounds = array<i64: 128, 128>}, {transform_indices = @transform_2, window_bounds = array<i64: 1, 128>}, {transform_indices = @transform_3, window_bounds = array<i64: 128, 128>}]} {
    %c0_i32 = arith.constant 0 : i32
    %0 = arith.cmpi eq, %arg2, %c0_i32 : i32
    %1 = arith.extui %0 : i1 to i32
    %c0_i32_0 = arith.constant 0 : i32
    %2 = arith.cmpi ne, %1, %c0_i32_0 : i32
    scf.if %2 {
      %cst_10 = arith.constant 0.000000e+00 : f32
      %12 = vector.broadcast %cst_10 : f32 to vector<128x128xf32>
      %c0_11 = arith.constant 0 : index
      %c0_12 = arith.constant 0 : index
      %13 = vector.load %arg7[%c0_11, %c0_12] : memref<128x128xf32, #tpu.memory_space<vmem>>, vector<128x128xf32>
      tpu.vector_store %arg7[%c0_11, %c0_12], %12 {strides = array<i32>} : memref<128x128xf32, #tpu.memory_space<vmem>>, vector<128x128xf32>,
    } else {
    }
    %c0 = arith.constant 0 : index
    %c0_1 = arith.constant 0 : index
    %3 = vector.load %arg7[%c0, %c0_1] : memref<128x128xf32, #tpu.memory_space<vmem>>, vector<128x128xf32>
    %c0_2 = arith.constant 0 : index
    %c0_3 = arith.constant 0 : index
    %4 = vector.load %arg3[%c0_2, %c0_3] : memref<128x128xbf16, #tpu.memory_space<vmem>>, vector<128x128xbf16>
    %c0_4 = arith.constant 0 : index
    %c0_5 = arith.constant 0 : index
    %5 = vector.load %arg4[%c0_4, %c0_5] : memref<128x128xbf16, #tpu.memory_space<vmem>>, vector<128x128xbf16>
    %cst = arith.constant dense<0.000000e+00> : vector<128x128xf32>
    %6 = tpu.matmul %4, %5, %cst {dimension_numbers = #tpu.dot_dimension_numbers<[1], [0], [0], [1], [0, 0, 1, 1], [], []>} : vector<128x128xbf16>, vector<128x128xbf16>, vector<128x128xf32> -> vector<128x128xf32>
    %7 = arith.addf %3, %6 : vector<128x128xf32>
    %c0_6 = arith.constant 0 : index
    %c0_7 = arith.constant 0 : index
    %8 = vector.load %arg7[%c0_6, %c0_7] : memref<128x128xf32, #tpu.memory_space<vmem>>, vector<128x128xf32>
    tpu.vector_store %arg7[%c0_6, %c0_7], %7 {strides = array<i32>} : memref<128x128xf32, #tpu.memory_space<vmem>>, vector<128x128xf32>,
    %c0_i32_8 = arith.constant 0 : i32
    %9 = arith.cmpi eq, %arg2, %c0_i32_8 : i32
    %10 = arith.extui %9 : i1 to i32
    %c0_i32_9 = arith.constant 0 : i32
    %11 = arith.cmpi ne, %10, %c0_i32_9 : i32
    scf.if %11 {
      %c0_10 = arith.constant 0 : index
      %c0_11 = arith.constant 0 : index
      %12 = vector.load %arg7[%c0_10, %c0_11] : memref<128x128xf32, #tpu.memory_space<vmem>>, vector<128x128xf32>
      %c0_12 = arith.constant 0 : index
      %c0_13 = arith.constant 0 : index
      %13 = vector.load %arg5[%c0_12, %c0_13] : memref<1x128xf32, #tpu.memory_space<vmem>>, vector<1x128xf32>
      %14 = vector.broadcast %13 : vector<1x128xf32> to vector<128x128xf32>
      %15 = arith.addf %12, %14 : vector<128x128xf32>
      %16 = arith.truncf %15 : vector<128x128xf32> to vector<128x128xbf16>
      %c0_14 = arith.constant 0 : index
      %c0_15 = arith.constant 0 : index
      %17 = vector.load %arg6[%c0_14, %c0_15] : memref<128x128xbf16, #tpu.memory_space<vmem>>, vector<128x128xbf16>
      tpu.vector_store %arg6[%c0_14, %c0_15], %16 {strides = array<i32>} : memref<128x128xbf16, #tpu.memory_space<vmem>>, vector<128x128xbf16>,
    } else {
    }
    return
  }
  func.func @transform_0(%arg0: i32, %arg1: i32, %arg2: i32) -> (i32, i32) {
    %c0_i32 = arith.constant 0 : i32
    return %arg0, %arg2 : i32, i32
  }
  func.func @transform_1(%arg0: i32, %arg1: i32, %arg2: i32) -> (i32, i32) {
    %c0_i32 = arith.constant 0 : i32
    return %arg2, %arg1 : i32, i32
  }
  func.func @transform_2(%arg0: i32, %arg1: i32, %arg2: i32) -> (i32, i32) {
    %c0_i32 = arith.constant 0 : i32
    %c0_i32_0 = arith.constant 0 : i32
    return %c0_i32, %arg1 : i32, i32
  }
  func.func @transform_3(%arg0: i32, %arg1: i32, %arg2: i32) -> (i32, i32) {
    %c0_i32 = arith.constant 0 : i32
    return %arg0, %arg1 : i32, i32
  }
}

module attributes {stable_mosaic.version = 11 : i64} {
  func.func @_mm_kernel(%arg0: i32, %arg1: i32, %arg2: i32, %arg3: memref<128x384xbf16, #tpu.memory_space<vmem>>, %arg4: memref<384x128xbf16, #tpu.memory_space<vmem>>, %arg5: memref<1x128xf32, #tpu.memory_space<vmem>>, %arg6: memref<128x128xbf16, #tpu.memory_space<vmem>>, %arg7: memref<128x128xf32, #tpu.memory_space<vmem>>) attributes {dimension_semantics = [#tpu.dimension_semantics<parallel>, #tpu.dimension_semantics<parallel>, #tpu.dimension_semantics<arbitrary>], iteration_bounds = array<i64: 1, 1, 3>, scalar_prefetch = 0 : i64, scratch_operands = 1 : i64, tpu.core_type = #tpu.core_type<tc>, window_params = [{transform_indices = @transform_0, window_bounds = array<i64: 128, 384>}, {transform_indices = @transform_1, window_bounds = array<i64: 384, 128>}, {transform_indices = @transform_2, window_bounds = array<i64: 1, 128>}, {transform_indices = @transform_3, window_bounds = array<i64: 128, 128>}]} {
    %c0_i32 = arith.constant 0 : i32
    %0 = arith.cmpi eq, %arg2, %c0_i32 : i32
    %1 = arith.extui %0 : i1 to i32
    %c0_i32_0 = arith.constant 0 : i32
    %2 = arith.cmpi ne, %1, %c0_i32_0 : i32
    scf.if %2 {
      %cst_9 = arith.constant 0.000000e+00 : f32
      %12 = vector.broadcast %cst_9 : f32 to vector<128x128xf32>
      %c0_10 = arith.constant 0 : index
      %c0_11 = arith.constant 0 : index
      %13 = vector.load %arg7[%c0_10, %c0_11] : memref<128x128xf32, #tpu.memory_space<vmem>>, vector<128x128xf32>
      tpu.vector_store %arg7[%c0_10, %c0_11], %12 {strides = array<i32>} : memref<128x128xf32, #tpu.memory_space<vmem>>, vector<128x128xf32>,
    } else {
    }
    %c0 = arith.constant 0 : index
    %c0_1 = arith.constant 0 : index
    %3 = vector.load %arg7[%c0, %c0_1] : memref<128x128xf32, #tpu.memory_space<vmem>>, vector<128x128xf32>
    %c0_2 = arith.constant 0 : index
    %c0_3 = arith.constant 0 : index
    %4 = vector.load %arg3[%c0_2, %c0_3] : memref<128x384xbf16, #tpu.memory_space<vmem>>, vector<128x384xbf16>
    %c0_4 = arith.constant 0 : index
    %c0_5 = arith.constant 0 : index
    %5 = vector.load %arg4[%c0_4, %c0_5] : memref<384x128xbf16, #tpu.memory_space<vmem>>, vector<384x128xbf16>
    %cst = arith.constant dense<0.000000e+00> : vector<128x128xf32>
    %6 = tpu.matmul %4, %5, %cst {dimension_numbers = #tpu.dot_dimension_numbers<[1], [0], [0], [1], [0, 0, 1, 1], [], []>} : vector<128x384xbf16>, vector<384x128xbf16>, vector<128x128xf32> -> vector<128x128xf32>
    %7 = arith.addf %3, %6 : vector<128x128xf32>
    %c0_6 = arith.constant 0 : index
    %c0_7 = arith.constant 0 : index
    %8 = vector.load %arg7[%c0_6, %c0_7] : memref<128x128xf32, #tpu.memory_space<vmem>>, vector<128x128xf32>
    tpu.vector_store %arg7[%c0_6, %c0_7], %7 {strides = array<i32>} : memref<128x128xf32, #tpu.memory_space<vmem>>, vector<128x128xf32>,
    %c2_i32 = arith.constant 2 : i32
    %9 = arith.cmpi eq, %arg2, %c2_i32 : i32
    %10 = arith.extui %9 : i1 to i32
    %c0_i32_8 = arith.constant 0 : i32
    %11 = arith.cmpi ne, %10, %c0_i32_8 : i32
    scf.if %11 {
      %c0_9 = arith.constant 0 : index
      %c0_10 = arith.constant 0 : index
      %12 = vector.load %arg7[%c0_9, %c0_10] : memref<128x128xf32, #tpu.memory_space<vmem>>, vector<128x128xf32>
      %c0_11 = arith.constant 0 : index
      %c0_12 = arith.constant 0 : index
      %13 = vector.load %arg5[%c0_11, %c0_12] : memref<1x128xf32, #tpu.memory_space<vmem>>, vector<1x128xf32>
      %14 = vector.broadcast %13 : vector<1x128xf32> to vector<128x128xf32>
      %15 = arith.addf %12, %14 : vector<128x128xf32>
      %cst_13 = arith.constant 0.000000e+00 : f32
      %16 = vector.broadcast %cst_13 : f32 to vector<128x128xf32>
      %17 = arith.maximumf %15, %16 : vector<128x128xf32>
      %18 = arith.truncf %17 : vector<128x128xf32> to vector<128x128xbf16>
      %c0_14 = arith.constant 0 : index
      %c0_15 = arith.constant 0 : index
      %19 = vector.load %arg6[%c0_14, %c0_15] : memref<128x128xbf16, #tpu.memory_space<vmem>>, vector<128x128xbf16>
      tpu.vector_store %arg6[%c0_14, %c0_15], %18 {strides = array<i32>} : memref<128x128xbf16, #tpu.memory_space<vmem>>, vector<128x128xbf16>,
    } else {
    }
    return
  }
  func.func @transform_0(%arg0: i32, %arg1: i32, %arg2: i32) -> (i32, i32) {
    %c0_i32 = arith.constant 0 : i32
    return %arg0, %arg2 : i32, i32
  }
  func.func @transform_1(%arg0: i32, %arg1: i32, %arg2: i32) -> (i32, i32) {
    %c0_i32 = arith.constant 0 : i32
    return %arg2, %arg1 : i32, i32
  }
  func.func @transform_2(%arg0: i32, %arg1: i32, %arg2: i32) -> (i32, i32) {
    %c0_i32 = arith.constant 0 : i32
    %c0_i32_0 = arith.constant 0 : i32
    return %c0_i32, %arg1 : i32, i32
  }
  func.func @transform_3(%arg0: i32, %arg1: i32, %arg2: i32) -> (i32, i32) {
    %c0_i32 = arith.constant 0 : i32
    return %arg0, %arg1 : i32, i32
  }
}

module attributes {stable_mosaic.version = 11 : i64} {
  func.func @_mm_res_kernel(%arg0: i32, %arg1: i32, %arg2: i32, %arg3: memref<128x384xbf16, #tpu.memory_space<vmem>>, %arg4: memref<384x128xbf16, #tpu.memory_space<vmem>>, %arg5: memref<1x128xf32, #tpu.memory_space<vmem>>, %arg6: memref<128x128xbf16, #tpu.memory_space<vmem>>, %arg7: memref<128x128xbf16, #tpu.memory_space<vmem>>, %arg8: memref<128x128xf32, #tpu.memory_space<vmem>>) attributes {dimension_semantics = [#tpu.dimension_semantics<parallel>, #tpu.dimension_semantics<parallel>, #tpu.dimension_semantics<arbitrary>], iteration_bounds = array<i64: 1, 1, 3>, scalar_prefetch = 0 : i64, scratch_operands = 1 : i64, tpu.core_type = #tpu.core_type<tc>, window_params = [{transform_indices = @transform_0, window_bounds = array<i64: 128, 384>}, {transform_indices = @transform_1, window_bounds = array<i64: 384, 128>}, {transform_indices = @transform_2, window_bounds = array<i64: 1, 128>}, {transform_indices = @transform_3, window_bounds = array<i64: 128, 128>}, {transform_indices = @transform_4, window_bounds = array<i64: 128, 128>}]} {
    %c0_i32 = arith.constant 0 : i32
    %0 = arith.cmpi eq, %arg2, %c0_i32 : i32
    %1 = arith.extui %0 : i1 to i32
    %c0_i32_0 = arith.constant 0 : i32
    %2 = arith.cmpi ne, %1, %c0_i32_0 : i32
    scf.if %2 {
      %cst_9 = arith.constant 0.000000e+00 : f32
      %12 = vector.broadcast %cst_9 : f32 to vector<128x128xf32>
      %c0_10 = arith.constant 0 : index
      %c0_11 = arith.constant 0 : index
      %13 = vector.load %arg8[%c0_10, %c0_11] : memref<128x128xf32, #tpu.memory_space<vmem>>, vector<128x128xf32>
      tpu.vector_store %arg8[%c0_10, %c0_11], %12 {strides = array<i32>} : memref<128x128xf32, #tpu.memory_space<vmem>>, vector<128x128xf32>,
    } else {
    }
    %c0 = arith.constant 0 : index
    %c0_1 = arith.constant 0 : index
    %3 = vector.load %arg8[%c0, %c0_1] : memref<128x128xf32, #tpu.memory_space<vmem>>, vector<128x128xf32>
    %c0_2 = arith.constant 0 : index
    %c0_3 = arith.constant 0 : index
    %4 = vector.load %arg3[%c0_2, %c0_3] : memref<128x384xbf16, #tpu.memory_space<vmem>>, vector<128x384xbf16>
    %c0_4 = arith.constant 0 : index
    %c0_5 = arith.constant 0 : index
    %5 = vector.load %arg4[%c0_4, %c0_5] : memref<384x128xbf16, #tpu.memory_space<vmem>>, vector<384x128xbf16>
    %cst = arith.constant dense<0.000000e+00> : vector<128x128xf32>
    %6 = tpu.matmul %4, %5, %cst {dimension_numbers = #tpu.dot_dimension_numbers<[1], [0], [0], [1], [0, 0, 1, 1], [], []>} : vector<128x384xbf16>, vector<384x128xbf16>, vector<128x128xf32> -> vector<128x128xf32>
    %7 = arith.addf %3, %6 : vector<128x128xf32>
    %c0_6 = arith.constant 0 : index
    %c0_7 = arith.constant 0 : index
    %8 = vector.load %arg8[%c0_6, %c0_7] : memref<128x128xf32, #tpu.memory_space<vmem>>, vector<128x128xf32>
    tpu.vector_store %arg8[%c0_6, %c0_7], %7 {strides = array<i32>} : memref<128x128xf32, #tpu.memory_space<vmem>>, vector<128x128xf32>,
    %c2_i32 = arith.constant 2 : i32
    %9 = arith.cmpi eq, %arg2, %c2_i32 : i32
    %10 = arith.extui %9 : i1 to i32
    %c0_i32_8 = arith.constant 0 : i32
    %11 = arith.cmpi ne, %10, %c0_i32_8 : i32
    scf.if %11 {
      %c0_9 = arith.constant 0 : index
      %c0_10 = arith.constant 0 : index
      %12 = vector.load %arg8[%c0_9, %c0_10] : memref<128x128xf32, #tpu.memory_space<vmem>>, vector<128x128xf32>
      %c0_11 = arith.constant 0 : index
      %c0_12 = arith.constant 0 : index
      %13 = vector.load %arg5[%c0_11, %c0_12] : memref<1x128xf32, #tpu.memory_space<vmem>>, vector<1x128xf32>
      %14 = vector.broadcast %13 : vector<1x128xf32> to vector<128x128xf32>
      %15 = arith.addf %12, %14 : vector<128x128xf32>
      %c0_13 = arith.constant 0 : index
      %c0_14 = arith.constant 0 : index
      %16 = vector.load %arg6[%c0_13, %c0_14] : memref<128x128xbf16, #tpu.memory_space<vmem>>, vector<128x128xbf16>
      %17 = arith.extf %16 : vector<128x128xbf16> to vector<128x128xf32>
      %18 = arith.addf %15, %17 : vector<128x128xf32>
      %cst_15 = arith.constant 0.000000e+00 : f32
      %19 = vector.broadcast %cst_15 : f32 to vector<128x128xf32>
      %20 = arith.maximumf %18, %19 : vector<128x128xf32>
      %21 = arith.truncf %20 : vector<128x128xf32> to vector<128x128xbf16>
      %c0_16 = arith.constant 0 : index
      %c0_17 = arith.constant 0 : index
      %22 = vector.load %arg7[%c0_16, %c0_17] : memref<128x128xbf16, #tpu.memory_space<vmem>>, vector<128x128xbf16>
      tpu.vector_store %arg7[%c0_16, %c0_17], %21 {strides = array<i32>} : memref<128x128xbf16, #tpu.memory_space<vmem>>, vector<128x128xbf16>,
    } else {
    }
    return
  }
  func.func @transform_0(%arg0: i32, %arg1: i32, %arg2: i32) -> (i32, i32) {
    %c0_i32 = arith.constant 0 : i32
    return %arg0, %arg2 : i32, i32
  }
  func.func @transform_1(%arg0: i32, %arg1: i32, %arg2: i32) -> (i32, i32) {
    %c0_i32 = arith.constant 0 : i32
    return %arg2, %arg1 : i32, i32
  }
  func.func @transform_2(%arg0: i32, %arg1: i32, %arg2: i32) -> (i32, i32) {
    %c0_i32 = arith.constant 0 : i32
    %c0_i32_0 = arith.constant 0 : i32
    return %c0_i32, %arg1 : i32, i32
  }
  func.func @transform_3(%arg0: i32, %arg1: i32, %arg2: i32) -> (i32, i32) {
    %c0_i32 = arith.constant 0 : i32
    return %arg0, %arg1 : i32, i32
  }
  func.func @transform_4(%arg0: i32, %arg1: i32, %arg2: i32) -> (i32, i32) {
    %c0_i32 = arith.constant 0 : i32
    return %arg0, %arg1 : i32, i32
  }
}

module attributes {stable_mosaic.version = 11 : i64} {
  func.func @_mm_kernel(%arg0: i32, %arg1: i32, %arg2: i32, %arg3: memref<32x384xbf16, #tpu.memory_space<vmem>>, %arg4: memref<384x256xbf16, #tpu.memory_space<vmem>>, %arg5: memref<1x256xf32, #tpu.memory_space<vmem>>, %arg6: memref<32x256xbf16, #tpu.memory_space<vmem>>, %arg7: memref<32x256xf32, #tpu.memory_space<vmem>>) attributes {dimension_semantics = [#tpu.dimension_semantics<parallel>, #tpu.dimension_semantics<parallel>, #tpu.dimension_semantics<arbitrary>], iteration_bounds = array<i64: 1, 1, 3>, scalar_prefetch = 0 : i64, scratch_operands = 1 : i64, tpu.core_type = #tpu.core_type<tc>, window_params = [{transform_indices = @transform_0, window_bounds = array<i64: 32, 384>}, {transform_indices = @transform_1, window_bounds = array<i64: 384, 256>}, {transform_indices = @transform_2, window_bounds = array<i64: 1, 256>}, {transform_indices = @transform_3, window_bounds = array<i64: 32, 256>}]} {
    %c0_i32 = arith.constant 0 : i32
    %0 = arith.cmpi eq, %arg2, %c0_i32 : i32
    %1 = arith.extui %0 : i1 to i32
    %c0_i32_0 = arith.constant 0 : i32
    %2 = arith.cmpi ne, %1, %c0_i32_0 : i32
    scf.if %2 {
      %cst_9 = arith.constant 0.000000e+00 : f32
      %12 = vector.broadcast %cst_9 : f32 to vector<32x256xf32>
      %c0_10 = arith.constant 0 : index
      %c0_11 = arith.constant 0 : index
      %13 = vector.load %arg7[%c0_10, %c0_11] : memref<32x256xf32, #tpu.memory_space<vmem>>, vector<32x256xf32>
      tpu.vector_store %arg7[%c0_10, %c0_11], %12 {strides = array<i32>} : memref<32x256xf32, #tpu.memory_space<vmem>>, vector<32x256xf32>,
    } else {
    }
    %c0 = arith.constant 0 : index
    %c0_1 = arith.constant 0 : index
    %3 = vector.load %arg7[%c0, %c0_1] : memref<32x256xf32, #tpu.memory_space<vmem>>, vector<32x256xf32>
    %c0_2 = arith.constant 0 : index
    %c0_3 = arith.constant 0 : index
    %4 = vector.load %arg3[%c0_2, %c0_3] : memref<32x384xbf16, #tpu.memory_space<vmem>>, vector<32x384xbf16>
    %c0_4 = arith.constant 0 : index
    %c0_5 = arith.constant 0 : index
    %5 = vector.load %arg4[%c0_4, %c0_5] : memref<384x256xbf16, #tpu.memory_space<vmem>>, vector<384x256xbf16>
    %cst = arith.constant dense<0.000000e+00> : vector<32x256xf32>
    %6 = tpu.matmul %4, %5, %cst {dimension_numbers = #tpu.dot_dimension_numbers<[1], [0], [0], [1], [0, 0, 1, 1], [], []>} : vector<32x384xbf16>, vector<384x256xbf16>, vector<32x256xf32> -> vector<32x256xf32>
    %7 = arith.addf %3, %6 : vector<32x256xf32>
    %c0_6 = arith.constant 0 : index
    %c0_7 = arith.constant 0 : index
    %8 = vector.load %arg7[%c0_6, %c0_7] : memref<32x256xf32, #tpu.memory_space<vmem>>, vector<32x256xf32>
    tpu.vector_store %arg7[%c0_6, %c0_7], %7 {strides = array<i32>} : memref<32x256xf32, #tpu.memory_space<vmem>>, vector<32x256xf32>,
    %c2_i32 = arith.constant 2 : i32
    %9 = arith.cmpi eq, %arg2, %c2_i32 : i32
    %10 = arith.extui %9 : i1 to i32
    %c0_i32_8 = arith.constant 0 : i32
    %11 = arith.cmpi ne, %10, %c0_i32_8 : i32
    scf.if %11 {
      %c0_9 = arith.constant 0 : index
      %c0_10 = arith.constant 0 : index
      %12 = vector.load %arg7[%c0_9, %c0_10] : memref<32x256xf32, #tpu.memory_space<vmem>>, vector<32x256xf32>
      %c0_11 = arith.constant 0 : index
      %c0_12 = arith.constant 0 : index
      %13 = vector.load %arg5[%c0_11, %c0_12] : memref<1x256xf32, #tpu.memory_space<vmem>>, vector<1x256xf32>
      %14 = vector.broadcast %13 : vector<1x256xf32> to vector<32x256xf32>
      %15 = arith.addf %12, %14 : vector<32x256xf32>
      %cst_13 = arith.constant 0.000000e+00 : f32
      %16 = vector.broadcast %cst_13 : f32 to vector<32x256xf32>
      %17 = arith.maximumf %15, %16 : vector<32x256xf32>
      %18 = arith.truncf %17 : vector<32x256xf32> to vector<32x256xbf16>
      %c0_14 = arith.constant 0 : index
      %c0_15 = arith.constant 0 : index
      %19 = vector.load %arg6[%c0_14, %c0_15] : memref<32x256xbf16, #tpu.memory_space<vmem>>, vector<32x256xbf16>
      tpu.vector_store %arg6[%c0_14, %c0_15], %18 {strides = array<i32>} : memref<32x256xbf16, #tpu.memory_space<vmem>>, vector<32x256xbf16>,
    } else {
    }
    return
  }
  func.func @transform_0(%arg0: i32, %arg1: i32, %arg2: i32) -> (i32, i32) {
    %c0_i32 = arith.constant 0 : i32
    return %arg0, %arg2 : i32, i32
  }
  func.func @transform_1(%arg0: i32, %arg1: i32, %arg2: i32) -> (i32, i32) {
    %c0_i32 = arith.constant 0 : i32
    return %arg2, %arg1 : i32, i32
  }
  func.func @transform_2(%arg0: i32, %arg1: i32, %arg2: i32) -> (i32, i32) {
    %c0_i32 = arith.constant 0 : i32
    %c0_i32_0 = arith.constant 0 : i32
    return %c0_i32, %arg1 : i32, i32
  }
  func.func @transform_3(%arg0: i32, %arg1: i32, %arg2: i32) -> (i32, i32) {
    %c0_i32 = arith.constant 0 : i32
    return %arg0, %arg1 : i32, i32
  }
}

module attributes {stable_mosaic.version = 11 : i64} {
  func.func @_mm_kernel(%arg0: i32, %arg1: i32, %arg2: i32, %arg3: memref<32x128xbf16, #tpu.memory_space<vmem>>, %arg4: memref<128x256xbf16, #tpu.memory_space<vmem>>, %arg5: memref<1x256xf32, #tpu.memory_space<vmem>>, %arg6: memref<32x256xbf16, #tpu.memory_space<vmem>>, %arg7: memref<32x256xf32, #tpu.memory_space<vmem>>) attributes {dimension_semantics = [#tpu.dimension_semantics<parallel>, #tpu.dimension_semantics<parallel>, #tpu.dimension_semantics<arbitrary>], iteration_bounds = array<i64: 1, 1, 1>, scalar_prefetch = 0 : i64, scratch_operands = 1 : i64, tpu.core_type = #tpu.core_type<tc>, window_params = [{transform_indices = @transform_0, window_bounds = array<i64: 32, 128>}, {transform_indices = @transform_1, window_bounds = array<i64: 128, 256>}, {transform_indices = @transform_2, window_bounds = array<i64: 1, 256>}, {transform_indices = @transform_3, window_bounds = array<i64: 32, 256>}]} {
    %c0_i32 = arith.constant 0 : i32
    %0 = arith.cmpi eq, %arg2, %c0_i32 : i32
    %1 = arith.extui %0 : i1 to i32
    %c0_i32_0 = arith.constant 0 : i32
    %2 = arith.cmpi ne, %1, %c0_i32_0 : i32
    scf.if %2 {
      %cst_10 = arith.constant 0.000000e+00 : f32
      %12 = vector.broadcast %cst_10 : f32 to vector<32x256xf32>
      %c0_11 = arith.constant 0 : index
      %c0_12 = arith.constant 0 : index
      %13 = vector.load %arg7[%c0_11, %c0_12] : memref<32x256xf32, #tpu.memory_space<vmem>>, vector<32x256xf32>
      tpu.vector_store %arg7[%c0_11, %c0_12], %12 {strides = array<i32>} : memref<32x256xf32, #tpu.memory_space<vmem>>, vector<32x256xf32>,
    } else {
    }
    %c0 = arith.constant 0 : index
    %c0_1 = arith.constant 0 : index
    %3 = vector.load %arg7[%c0, %c0_1] : memref<32x256xf32, #tpu.memory_space<vmem>>, vector<32x256xf32>
    %c0_2 = arith.constant 0 : index
    %c0_3 = arith.constant 0 : index
    %4 = vector.load %arg3[%c0_2, %c0_3] : memref<32x128xbf16, #tpu.memory_space<vmem>>, vector<32x128xbf16>
    %c0_4 = arith.constant 0 : index
    %c0_5 = arith.constant 0 : index
    %5 = vector.load %arg4[%c0_4, %c0_5] : memref<128x256xbf16, #tpu.memory_space<vmem>>, vector<128x256xbf16>
    %cst = arith.constant dense<0.000000e+00> : vector<32x256xf32>
    %6 = tpu.matmul %4, %5, %cst {dimension_numbers = #tpu.dot_dimension_numbers<[1], [0], [0], [1], [0, 0, 1, 1], [], []>} : vector<32x128xbf16>, vector<128x256xbf16>, vector<32x256xf32> -> vector<32x256xf32>
    %7 = arith.addf %3, %6 : vector<32x256xf32>
    %c0_6 = arith.constant 0 : index
    %c0_7 = arith.constant 0 : index
    %8 = vector.load %arg7[%c0_6, %c0_7] : memref<32x256xf32, #tpu.memory_space<vmem>>, vector<32x256xf32>
    tpu.vector_store %arg7[%c0_6, %c0_7], %7 {strides = array<i32>} : memref<32x256xf32, #tpu.memory_space<vmem>>, vector<32x256xf32>,
    %c0_i32_8 = arith.constant 0 : i32
    %9 = arith.cmpi eq, %arg2, %c0_i32_8 : i32
    %10 = arith.extui %9 : i1 to i32
    %c0_i32_9 = arith.constant 0 : i32
    %11 = arith.cmpi ne, %10, %c0_i32_9 : i32
    scf.if %11 {
      %c0_10 = arith.constant 0 : index
      %c0_11 = arith.constant 0 : index
      %12 = vector.load %arg7[%c0_10, %c0_11] : memref<32x256xf32, #tpu.memory_space<vmem>>, vector<32x256xf32>
      %c0_12 = arith.constant 0 : index
      %c0_13 = arith.constant 0 : index
      %13 = vector.load %arg5[%c0_12, %c0_13] : memref<1x256xf32, #tpu.memory_space<vmem>>, vector<1x256xf32>
      %14 = vector.broadcast %13 : vector<1x256xf32> to vector<32x256xf32>
      %15 = arith.addf %12, %14 : vector<32x256xf32>
      %16 = arith.truncf %15 : vector<32x256xf32> to vector<32x256xbf16>
      %c0_14 = arith.constant 0 : index
      %c0_15 = arith.constant 0 : index
      %17 = vector.load %arg6[%c0_14, %c0_15] : memref<32x256xbf16, #tpu.memory_space<vmem>>, vector<32x256xbf16>
      tpu.vector_store %arg6[%c0_14, %c0_15], %16 {strides = array<i32>} : memref<32x256xbf16, #tpu.memory_space<vmem>>, vector<32x256xbf16>,
    } else {
    }
    return
  }
  func.func @transform_0(%arg0: i32, %arg1: i32, %arg2: i32) -> (i32, i32) {
    %c0_i32 = arith.constant 0 : i32
    return %arg0, %arg2 : i32, i32
  }
  func.func @transform_1(%arg0: i32, %arg1: i32, %arg2: i32) -> (i32, i32) {
    %c0_i32 = arith.constant 0 : i32
    return %arg2, %arg1 : i32, i32
  }
  func.func @transform_2(%arg0: i32, %arg1: i32, %arg2: i32) -> (i32, i32) {
    %c0_i32 = arith.constant 0 : i32
    %c0_i32_0 = arith.constant 0 : i32
    return %c0_i32, %arg1 : i32, i32
  }
  func.func @transform_3(%arg0: i32, %arg1: i32, %arg2: i32) -> (i32, i32) {
    %c0_i32 = arith.constant 0 : i32
    return %arg0, %arg1 : i32, i32
  }
}

module attributes {stable_mosaic.version = 11 : i64} {
  func.func @_mm_res_kernel(%arg0: i32, %arg1: i32, %arg2: i32, %arg3: memref<32x384xbf16, #tpu.memory_space<vmem>>, %arg4: memref<384x256xbf16, #tpu.memory_space<vmem>>, %arg5: memref<1x256xf32, #tpu.memory_space<vmem>>, %arg6: memref<32x256xbf16, #tpu.memory_space<vmem>>, %arg7: memref<32x256xbf16, #tpu.memory_space<vmem>>, %arg8: memref<32x256xf32, #tpu.memory_space<vmem>>) attributes {dimension_semantics = [#tpu.dimension_semantics<parallel>, #tpu.dimension_semantics<parallel>, #tpu.dimension_semantics<arbitrary>], iteration_bounds = array<i64: 1, 1, 6>, scalar_prefetch = 0 : i64, scratch_operands = 1 : i64, tpu.core_type = #tpu.core_type<tc>, window_params = [{transform_indices = @transform_0, window_bounds = array<i64: 32, 384>}, {transform_indices = @transform_1, window_bounds = array<i64: 384, 256>}, {transform_indices = @transform_2, window_bounds = array<i64: 1, 256>}, {transform_indices = @transform_3, window_bounds = array<i64: 32, 256>}, {transform_indices = @transform_4, window_bounds = array<i64: 32, 256>}]} {
    %c0_i32 = arith.constant 0 : i32
    %0 = arith.cmpi eq, %arg2, %c0_i32 : i32
    %1 = arith.extui %0 : i1 to i32
    %c0_i32_0 = arith.constant 0 : i32
    %2 = arith.cmpi ne, %1, %c0_i32_0 : i32
    scf.if %2 {
      %cst_9 = arith.constant 0.000000e+00 : f32
      %12 = vector.broadcast %cst_9 : f32 to vector<32x256xf32>
      %c0_10 = arith.constant 0 : index
      %c0_11 = arith.constant 0 : index
      %13 = vector.load %arg8[%c0_10, %c0_11] : memref<32x256xf32, #tpu.memory_space<vmem>>, vector<32x256xf32>
      tpu.vector_store %arg8[%c0_10, %c0_11], %12 {strides = array<i32>} : memref<32x256xf32, #tpu.memory_space<vmem>>, vector<32x256xf32>,
    } else {
    }
    %c0 = arith.constant 0 : index
    %c0_1 = arith.constant 0 : index
    %3 = vector.load %arg8[%c0, %c0_1] : memref<32x256xf32, #tpu.memory_space<vmem>>, vector<32x256xf32>
    %c0_2 = arith.constant 0 : index
    %c0_3 = arith.constant 0 : index
    %4 = vector.load %arg3[%c0_2, %c0_3] : memref<32x384xbf16, #tpu.memory_space<vmem>>, vector<32x384xbf16>
    %c0_4 = arith.constant 0 : index
    %c0_5 = arith.constant 0 : index
    %5 = vector.load %arg4[%c0_4, %c0_5] : memref<384x256xbf16, #tpu.memory_space<vmem>>, vector<384x256xbf16>
    %cst = arith.constant dense<0.000000e+00> : vector<32x256xf32>
    %6 = tpu.matmul %4, %5, %cst {dimension_numbers = #tpu.dot_dimension_numbers<[1], [0], [0], [1], [0, 0, 1, 1], [], []>} : vector<32x384xbf16>, vector<384x256xbf16>, vector<32x256xf32> -> vector<32x256xf32>
    %7 = arith.addf %3, %6 : vector<32x256xf32>
    %c0_6 = arith.constant 0 : index
    %c0_7 = arith.constant 0 : index
    %8 = vector.load %arg8[%c0_6, %c0_7] : memref<32x256xf32, #tpu.memory_space<vmem>>, vector<32x256xf32>
    tpu.vector_store %arg8[%c0_6, %c0_7], %7 {strides = array<i32>} : memref<32x256xf32, #tpu.memory_space<vmem>>, vector<32x256xf32>,
    %c5_i32 = arith.constant 5 : i32
    %9 = arith.cmpi eq, %arg2, %c5_i32 : i32
    %10 = arith.extui %9 : i1 to i32
    %c0_i32_8 = arith.constant 0 : i32
    %11 = arith.cmpi ne, %10, %c0_i32_8 : i32
    scf.if %11 {
      %c0_9 = arith.constant 0 : index
      %c0_10 = arith.constant 0 : index
      %12 = vector.load %arg8[%c0_9, %c0_10] : memref<32x256xf32, #tpu.memory_space<vmem>>, vector<32x256xf32>
      %c0_11 = arith.constant 0 : index
      %c0_12 = arith.constant 0 : index
      %13 = vector.load %arg5[%c0_11, %c0_12] : memref<1x256xf32, #tpu.memory_space<vmem>>, vector<1x256xf32>
      %14 = vector.broadcast %13 : vector<1x256xf32> to vector<32x256xf32>
      %15 = arith.addf %12, %14 : vector<32x256xf32>
      %c0_13 = arith.constant 0 : index
      %c0_14 = arith.constant 0 : index
      %16 = vector.load %arg6[%c0_13, %c0_14] : memref<32x256xbf16, #tpu.memory_space<vmem>>, vector<32x256xbf16>
      %17 = arith.extf %16 : vector<32x256xbf16> to vector<32x256xf32>
      %18 = arith.addf %15, %17 : vector<32x256xf32>
      %cst_15 = arith.constant 0.000000e+00 : f32
      %19 = vector.broadcast %cst_15 : f32 to vector<32x256xf32>
      %20 = arith.maximumf %18, %19 : vector<32x256xf32>
      %21 = arith.truncf %20 : vector<32x256xf32> to vector<32x256xbf16>
      %c0_16 = arith.constant 0 : index
      %c0_17 = arith.constant 0 : index
      %22 = vector.load %arg7[%c0_16, %c0_17] : memref<32x256xbf16, #tpu.memory_space<vmem>>, vector<32x256xbf16>
      tpu.vector_store %arg7[%c0_16, %c0_17], %21 {strides = array<i32>} : memref<32x256xbf16, #tpu.memory_space<vmem>>, vector<32x256xbf16>,
    } else {
    }
    return
  }
  func.func @transform_0(%arg0: i32, %arg1: i32, %arg2: i32) -> (i32, i32) {
    %c0_i32 = arith.constant 0 : i32
    return %arg0, %arg2 : i32, i32
  }
  func.func @transform_1(%arg0: i32, %arg1: i32, %arg2: i32) -> (i32, i32) {
    %c0_i32 = arith.constant 0 : i32
    return %arg2, %arg1 : i32, i32
  }
  func.func @transform_2(%arg0: i32, %arg1: i32, %arg2: i32) -> (i32, i32) {
    %c0_i32 = arith.constant 0 : i32
    %c0_i32_0 = arith.constant 0 : i32
    return %c0_i32, %arg1 : i32, i32
  }
  func.func @transform_3(%arg0: i32, %arg1: i32, %arg2: i32) -> (i32, i32) {
    %c0_i32 = arith.constant 0 : i32
    return %arg0, %arg1 : i32, i32
  }
  func.func @transform_4(%arg0: i32, %arg1: i32, %arg2: i32) -> (i32, i32) {
    %c0_i32 = arith.constant 0 : i32
    return %arg0, %arg1 : i32, i32
  }
}

module attributes {stable_mosaic.version = 11 : i64} {
  func.func @_mm_kernel(%arg0: i32, %arg1: i32, %arg2: i32, %arg3: memref<32x384xbf16, #tpu.memory_space<vmem>>, %arg4: memref<384x256xbf16, #tpu.memory_space<vmem>>, %arg5: memref<1x256xf32, #tpu.memory_space<vmem>>, %arg6: memref<32x256xbf16, #tpu.memory_space<vmem>>, %arg7: memref<32x256xf32, #tpu.memory_space<vmem>>) attributes {dimension_semantics = [#tpu.dimension_semantics<parallel>, #tpu.dimension_semantics<parallel>, #tpu.dimension_semantics<arbitrary>], iteration_bounds = array<i64: 1, 1, 6>, scalar_prefetch = 0 : i64, scratch_operands = 1 : i64, tpu.core_type = #tpu.core_type<tc>, window_params = [{transform_indices = @transform_0, window_bounds = array<i64: 32, 384>}, {transform_indices = @transform_1, window_bounds = array<i64: 384, 256>}, {transform_indices = @transform_2, window_bounds = array<i64: 1, 256>}, {transform_indices = @transform_3, window_bounds = array<i64: 32, 256>}]} {
    %c0_i32 = arith.constant 0 : i32
    %0 = arith.cmpi eq, %arg2, %c0_i32 : i32
    %1 = arith.extui %0 : i1 to i32
    %c0_i32_0 = arith.constant 0 : i32
    %2 = arith.cmpi ne, %1, %c0_i32_0 : i32
    scf.if %2 {
      %cst_9 = arith.constant 0.000000e+00 : f32
      %12 = vector.broadcast %cst_9 : f32 to vector<32x256xf32>
      %c0_10 = arith.constant 0 : index
      %c0_11 = arith.constant 0 : index
      %13 = vector.load %arg7[%c0_10, %c0_11] : memref<32x256xf32, #tpu.memory_space<vmem>>, vector<32x256xf32>
      tpu.vector_store %arg7[%c0_10, %c0_11], %12 {strides = array<i32>} : memref<32x256xf32, #tpu.memory_space<vmem>>, vector<32x256xf32>,
    } else {
    }
    %c0 = arith.constant 0 : index
    %c0_1 = arith.constant 0 : index
    %3 = vector.load %arg7[%c0, %c0_1] : memref<32x256xf32, #tpu.memory_space<vmem>>, vector<32x256xf32>
    %c0_2 = arith.constant 0 : index
    %c0_3 = arith.constant 0 : index
    %4 = vector.load %arg3[%c0_2, %c0_3] : memref<32x384xbf16, #tpu.memory_space<vmem>>, vector<32x384xbf16>
    %c0_4 = arith.constant 0 : index
    %c0_5 = arith.constant 0 : index
    %5 = vector.load %arg4[%c0_4, %c0_5] : memref<384x256xbf16, #tpu.memory_space<vmem>>, vector<384x256xbf16>
    %cst = arith.constant dense<0.000000e+00> : vector<32x256xf32>
    %6 = tpu.matmul %4, %5, %cst {dimension_numbers = #tpu.dot_dimension_numbers<[1], [0], [0], [1], [0, 0, 1, 1], [], []>} : vector<32x384xbf16>, vector<384x256xbf16>, vector<32x256xf32> -> vector<32x256xf32>
    %7 = arith.addf %3, %6 : vector<32x256xf32>
    %c0_6 = arith.constant 0 : index
    %c0_7 = arith.constant 0 : index
    %8 = vector.load %arg7[%c0_6, %c0_7] : memref<32x256xf32, #tpu.memory_space<vmem>>, vector<32x256xf32>
    tpu.vector_store %arg7[%c0_6, %c0_7], %7 {strides = array<i32>} : memref<32x256xf32, #tpu.memory_space<vmem>>, vector<32x256xf32>,
    %c5_i32 = arith.constant 5 : i32
    %9 = arith.cmpi eq, %arg2, %c5_i32 : i32
    %10 = arith.extui %9 : i1 to i32
    %c0_i32_8 = arith.constant 0 : i32
    %11 = arith.cmpi ne, %10, %c0_i32_8 : i32
    scf.if %11 {
      %c0_9 = arith.constant 0 : index
      %c0_10 = arith.constant 0 : index
      %12 = vector.load %arg7[%c0_9, %c0_10] : memref<32x256xf32, #tpu.memory_space<vmem>>, vector<32x256xf32>
      %c0_11 = arith.constant 0 : index
      %c0_12 = arith.constant 0 : index
      %13 = vector.load %arg5[%c0_11, %c0_12] : memref<1x256xf32, #tpu.memory_space<vmem>>, vector<1x256xf32>
      %14 = vector.broadcast %13 : vector<1x256xf32> to vector<32x256xf32>
      %15 = arith.addf %12, %14 : vector<32x256xf32>
      %cst_13 = arith.constant 0.000000e+00 : f32
      %16 = vector.broadcast %cst_13 : f32 to vector<32x256xf32>
      %17 = arith.maximumf %15, %16 : vector<32x256xf32>
      %18 = arith.truncf %17 : vector<32x256xf32> to vector<32x256xbf16>
      %c0_14 = arith.constant 0 : index
      %c0_15 = arith.constant 0 : index
      %19 = vector.load %arg6[%c0_14, %c0_15] : memref<32x256xbf16, #tpu.memory_space<vmem>>, vector<32x256xbf16>
      tpu.vector_store %arg6[%c0_14, %c0_15], %18 {strides = array<i32>} : memref<32x256xbf16, #tpu.memory_space<vmem>>, vector<32x256xbf16>,
    } else {
    }
    return
  }
  func.func @transform_0(%arg0: i32, %arg1: i32, %arg2: i32) -> (i32, i32) {
    %c0_i32 = arith.constant 0 : i32
    return %arg0, %arg2 : i32, i32
  }
  func.func @transform_1(%arg0: i32, %arg1: i32, %arg2: i32) -> (i32, i32) {
    %c0_i32 = arith.constant 0 : i32
    return %arg2, %arg1 : i32, i32
  }
  func.func @transform_2(%arg0: i32, %arg1: i32, %arg2: i32) -> (i32, i32) {
    %c0_i32 = arith.constant 0 : i32
    %c0_i32_0 = arith.constant 0 : i32
    return %c0_i32, %arg1 : i32, i32
  }
  func.func @transform_3(%arg0: i32, %arg1: i32, %arg2: i32) -> (i32, i32) {
    %c0_i32 = arith.constant 0 : i32
    return %arg0, %arg1 : i32, i32
  }
}

module attributes {stable_mosaic.version = 11 : i64} {
  func.func @_mm_kernel(%arg0: i32, %arg1: i32, %arg2: i32, %arg3: memref<16x384xbf16, #tpu.memory_space<vmem>>, %arg4: memref<384x512xbf16, #tpu.memory_space<vmem>>, %arg5: memref<1x512xf32, #tpu.memory_space<vmem>>, %arg6: memref<16x512xbf16, #tpu.memory_space<vmem>>, %arg7: memref<16x512xf32, #tpu.memory_space<vmem>>) attributes {dimension_semantics = [#tpu.dimension_semantics<parallel>, #tpu.dimension_semantics<parallel>, #tpu.dimension_semantics<arbitrary>], iteration_bounds = array<i64: 1, 1, 6>, scalar_prefetch = 0 : i64, scratch_operands = 1 : i64, tpu.core_type = #tpu.core_type<tc>, window_params = [{transform_indices = @transform_0, window_bounds = array<i64: 16, 384>}, {transform_indices = @transform_1, window_bounds = array<i64: 384, 512>}, {transform_indices = @transform_2, window_bounds = array<i64: 1, 512>}, {transform_indices = @transform_3, window_bounds = array<i64: 16, 512>}]} {
    %c0_i32 = arith.constant 0 : i32
    %0 = arith.cmpi eq, %arg2, %c0_i32 : i32
    %1 = arith.extui %0 : i1 to i32
    %c0_i32_0 = arith.constant 0 : i32
    %2 = arith.cmpi ne, %1, %c0_i32_0 : i32
    scf.if %2 {
      %cst_9 = arith.constant 0.000000e+00 : f32
      %12 = vector.broadcast %cst_9 : f32 to vector<16x512xf32>
      %c0_10 = arith.constant 0 : index
      %c0_11 = arith.constant 0 : index
      %13 = vector.load %arg7[%c0_10, %c0_11] : memref<16x512xf32, #tpu.memory_space<vmem>>, vector<16x512xf32>
      tpu.vector_store %arg7[%c0_10, %c0_11], %12 {strides = array<i32>} : memref<16x512xf32, #tpu.memory_space<vmem>>, vector<16x512xf32>,
    } else {
    }
    %c0 = arith.constant 0 : index
    %c0_1 = arith.constant 0 : index
    %3 = vector.load %arg7[%c0, %c0_1] : memref<16x512xf32, #tpu.memory_space<vmem>>, vector<16x512xf32>
    %c0_2 = arith.constant 0 : index
    %c0_3 = arith.constant 0 : index
    %4 = vector.load %arg3[%c0_2, %c0_3] : memref<16x384xbf16, #tpu.memory_space<vmem>>, vector<16x384xbf16>
    %c0_4 = arith.constant 0 : index
    %c0_5 = arith.constant 0 : index
    %5 = vector.load %arg4[%c0_4, %c0_5] : memref<384x512xbf16, #tpu.memory_space<vmem>>, vector<384x512xbf16>
    %cst = arith.constant dense<0.000000e+00> : vector<16x512xf32>
    %6 = tpu.matmul %4, %5, %cst {dimension_numbers = #tpu.dot_dimension_numbers<[1], [0], [0], [1], [0, 0, 1, 1], [], []>} : vector<16x384xbf16>, vector<384x512xbf16>, vector<16x512xf32> -> vector<16x512xf32>
    %7 = arith.addf %3, %6 : vector<16x512xf32>
    %c0_6 = arith.constant 0 : index
    %c0_7 = arith.constant 0 : index
    %8 = vector.load %arg7[%c0_6, %c0_7] : memref<16x512xf32, #tpu.memory_space<vmem>>, vector<16x512xf32>
    tpu.vector_store %arg7[%c0_6, %c0_7], %7 {strides = array<i32>} : memref<16x512xf32, #tpu.memory_space<vmem>>, vector<16x512xf32>,
    %c5_i32 = arith.constant 5 : i32
    %9 = arith.cmpi eq, %arg2, %c5_i32 : i32
    %10 = arith.extui %9 : i1 to i32
    %c0_i32_8 = arith.constant 0 : i32
    %11 = arith.cmpi ne, %10, %c0_i32_8 : i32
    scf.if %11 {
      %c0_9 = arith.constant 0 : index
      %c0_10 = arith.constant 0 : index
      %12 = vector.load %arg7[%c0_9, %c0_10] : memref<16x512xf32, #tpu.memory_space<vmem>>, vector<16x512xf32>
      %c0_11 = arith.constant 0 : index
      %c0_12 = arith.constant 0 : index
      %13 = vector.load %arg5[%c0_11, %c0_12] : memref<1x512xf32, #tpu.memory_space<vmem>>, vector<1x512xf32>
      %14 = vector.broadcast %13 : vector<1x512xf32> to vector<16x512xf32>
      %15 = arith.addf %12, %14 : vector<16x512xf32>
      %cst_13 = arith.constant 0.000000e+00 : f32
      %16 = vector.broadcast %cst_13 : f32 to vector<16x512xf32>
      %17 = arith.maximumf %15, %16 : vector<16x512xf32>
      %18 = arith.truncf %17 : vector<16x512xf32> to vector<16x512xbf16>
      %c0_14 = arith.constant 0 : index
      %c0_15 = arith.constant 0 : index
      %19 = vector.load %arg6[%c0_14, %c0_15] : memref<16x512xbf16, #tpu.memory_space<vmem>>, vector<16x512xbf16>
      tpu.vector_store %arg6[%c0_14, %c0_15], %18 {strides = array<i32>} : memref<16x512xbf16, #tpu.memory_space<vmem>>, vector<16x512xbf16>,
    } else {
    }
    return
  }
  func.func @transform_0(%arg0: i32, %arg1: i32, %arg2: i32) -> (i32, i32) {
    %c0_i32 = arith.constant 0 : i32
    return %arg0, %arg2 : i32, i32
  }
  func.func @transform_1(%arg0: i32, %arg1: i32, %arg2: i32) -> (i32, i32) {
    %c0_i32 = arith.constant 0 : i32
    return %arg2, %arg1 : i32, i32
  }
  func.func @transform_2(%arg0: i32, %arg1: i32, %arg2: i32) -> (i32, i32) {
    %c0_i32 = arith.constant 0 : i32
    %c0_i32_0 = arith.constant 0 : i32
    return %c0_i32, %arg1 : i32, i32
  }
  func.func @transform_3(%arg0: i32, %arg1: i32, %arg2: i32) -> (i32, i32) {
    %c0_i32 = arith.constant 0 : i32
    return %arg0, %arg1 : i32, i32
  }
}

module attributes {stable_mosaic.version = 11 : i64} {
  func.func @_mm_kernel(%arg0: i32, %arg1: i32, %arg2: i32, %arg3: memref<16x512xbf16, #tpu.memory_space<vmem>>, %arg4: memref<512x512xbf16, #tpu.memory_space<vmem>>, %arg5: memref<1x512xf32, #tpu.memory_space<vmem>>, %arg6: memref<16x512xbf16, #tpu.memory_space<vmem>>, %arg7: memref<16x512xf32, #tpu.memory_space<vmem>>) attributes {dimension_semantics = [#tpu.dimension_semantics<parallel>, #tpu.dimension_semantics<parallel>, #tpu.dimension_semantics<arbitrary>], iteration_bounds = array<i64: 1, 1, 9>, scalar_prefetch = 0 : i64, scratch_operands = 1 : i64, tpu.core_type = #tpu.core_type<tc>, window_params = [{transform_indices = @transform_0, window_bounds = array<i64: 16, 512>}, {transform_indices = @transform_1, window_bounds = array<i64: 512, 512>}, {transform_indices = @transform_2, window_bounds = array<i64: 1, 512>}, {transform_indices = @transform_3, window_bounds = array<i64: 16, 512>}]} {
    %c0_i32 = arith.constant 0 : i32
    %0 = arith.cmpi eq, %arg2, %c0_i32 : i32
    %1 = arith.extui %0 : i1 to i32
    %c0_i32_0 = arith.constant 0 : i32
    %2 = arith.cmpi ne, %1, %c0_i32_0 : i32
    scf.if %2 {
      %cst_9 = arith.constant 0.000000e+00 : f32
      %12 = vector.broadcast %cst_9 : f32 to vector<16x512xf32>
      %c0_10 = arith.constant 0 : index
      %c0_11 = arith.constant 0 : index
      %13 = vector.load %arg7[%c0_10, %c0_11] : memref<16x512xf32, #tpu.memory_space<vmem>>, vector<16x512xf32>
      tpu.vector_store %arg7[%c0_10, %c0_11], %12 {strides = array<i32>} : memref<16x512xf32, #tpu.memory_space<vmem>>, vector<16x512xf32>,
    } else {
    }
    %c0 = arith.constant 0 : index
    %c0_1 = arith.constant 0 : index
    %3 = vector.load %arg7[%c0, %c0_1] : memref<16x512xf32, #tpu.memory_space<vmem>>, vector<16x512xf32>
    %c0_2 = arith.constant 0 : index
    %c0_3 = arith.constant 0 : index
    %4 = vector.load %arg3[%c0_2, %c0_3] : memref<16x512xbf16, #tpu.memory_space<vmem>>, vector<16x512xbf16>
    %c0_4 = arith.constant 0 : index
    %c0_5 = arith.constant 0 : index
    %5 = vector.load %arg4[%c0_4, %c0_5] : memref<512x512xbf16, #tpu.memory_space<vmem>>, vector<512x512xbf16>
    %cst = arith.constant dense<0.000000e+00> : vector<16x512xf32>
    %6 = tpu.matmul %4, %5, %cst {dimension_numbers = #tpu.dot_dimension_numbers<[1], [0], [0], [1], [0, 0, 1, 1], [], []>} : vector<16x512xbf16>, vector<512x512xbf16>, vector<16x512xf32> -> vector<16x512xf32>
    %7 = arith.addf %3, %6 : vector<16x512xf32>
    %c0_6 = arith.constant 0 : index
    %c0_7 = arith.constant 0 : index
    %8 = vector.load %arg7[%c0_6, %c0_7] : memref<16x512xf32, #tpu.memory_space<vmem>>, vector<16x512xf32>
    tpu.vector_store %arg7[%c0_6, %c0_7], %7 {strides = array<i32>} : memref<16x512xf32, #tpu.memory_space<vmem>>, vector<16x512xf32>,
    %c8_i32 = arith.constant 8 : i32
    %9 = arith.cmpi eq, %arg2, %c8_i32 : i32
    %10 = arith.extui %9 : i1 to i32
    %c0_i32_8 = arith.constant 0 : i32
    %11 = arith.cmpi ne, %10, %c0_i32_8 : i32
    scf.if %11 {
      %c0_9 = arith.constant 0 : index
      %c0_10 = arith.constant 0 : index
      %12 = vector.load %arg7[%c0_9, %c0_10] : memref<16x512xf32, #tpu.memory_space<vmem>>, vector<16x512xf32>
      %c0_11 = arith.constant 0 : index
      %c0_12 = arith.constant 0 : index
      %13 = vector.load %arg5[%c0_11, %c0_12] : memref<1x512xf32, #tpu.memory_space<vmem>>, vector<1x512xf32>
      %14 = vector.broadcast %13 : vector<1x512xf32> to vector<16x512xf32>
      %15 = arith.addf %12, %14 : vector<16x512xf32>
      %cst_13 = arith.constant 0.000000e+00 : f32
      %16 = vector.broadcast %cst_13 : f32 to vector<16x512xf32>
      %17 = arith.maximumf %15, %16 : vector<16x512xf32>
      %18 = arith.truncf %17 : vector<16x512xf32> to vector<16x512xbf16>
      %c0_14 = arith.constant 0 : index
      %c0_15 = arith.constant 0 : index
      %19 = vector.load %arg6[%c0_14, %c0_15] : memref<16x512xbf16, #tpu.memory_space<vmem>>, vector<16x512xbf16>
      tpu.vector_store %arg6[%c0_14, %c0_15], %18 {strides = array<i32>} : memref<16x512xbf16, #tpu.memory_space<vmem>>, vector<16x512xbf16>,
    } else {
    }
    return
  }
  func.func @transform_0(%arg0: i32, %arg1: i32, %arg2: i32) -> (i32, i32) {
    %c0_i32 = arith.constant 0 : i32
    return %arg0, %arg2 : i32, i32
  }
  func.func @transform_1(%arg0: i32, %arg1: i32, %arg2: i32) -> (i32, i32) {
    %c0_i32 = arith.constant 0 : i32
    return %arg2, %arg1 : i32, i32
  }
  func.func @transform_2(%arg0: i32, %arg1: i32, %arg2: i32) -> (i32, i32) {
    %c0_i32 = arith.constant 0 : i32
    %c0_i32_0 = arith.constant 0 : i32
    return %c0_i32, %arg1 : i32, i32
  }
  func.func @transform_3(%arg0: i32, %arg1: i32, %arg2: i32) -> (i32, i32) {
    %c0_i32 = arith.constant 0 : i32
    return %arg0, %arg1 : i32, i32
  }
}

module attributes {stable_mosaic.version = 11 : i64} {
  func.func @_mm_kernel(%arg0: i32, %arg1: i32, %arg2: i32, %arg3: memref<16x256xbf16, #tpu.memory_space<vmem>>, %arg4: memref<256x512xbf16, #tpu.memory_space<vmem>>, %arg5: memref<1x512xf32, #tpu.memory_space<vmem>>, %arg6: memref<16x512xbf16, #tpu.memory_space<vmem>>, %arg7: memref<16x512xf32, #tpu.memory_space<vmem>>) attributes {dimension_semantics = [#tpu.dimension_semantics<parallel>, #tpu.dimension_semantics<parallel>, #tpu.dimension_semantics<arbitrary>], iteration_bounds = array<i64: 1, 1, 1>, scalar_prefetch = 0 : i64, scratch_operands = 1 : i64, tpu.core_type = #tpu.core_type<tc>, window_params = [{transform_indices = @transform_0, window_bounds = array<i64: 16, 256>}, {transform_indices = @transform_1, window_bounds = array<i64: 256, 512>}, {transform_indices = @transform_2, window_bounds = array<i64: 1, 512>}, {transform_indices = @transform_3, window_bounds = array<i64: 16, 512>}]} {
    %c0_i32 = arith.constant 0 : i32
    %0 = arith.cmpi eq, %arg2, %c0_i32 : i32
    %1 = arith.extui %0 : i1 to i32
    %c0_i32_0 = arith.constant 0 : i32
    %2 = arith.cmpi ne, %1, %c0_i32_0 : i32
    scf.if %2 {
      %cst_10 = arith.constant 0.000000e+00 : f32
      %12 = vector.broadcast %cst_10 : f32 to vector<16x512xf32>
      %c0_11 = arith.constant 0 : index
      %c0_12 = arith.constant 0 : index
      %13 = vector.load %arg7[%c0_11, %c0_12] : memref<16x512xf32, #tpu.memory_space<vmem>>, vector<16x512xf32>
      tpu.vector_store %arg7[%c0_11, %c0_12], %12 {strides = array<i32>} : memref<16x512xf32, #tpu.memory_space<vmem>>, vector<16x512xf32>,
    } else {
    }
    %c0 = arith.constant 0 : index
    %c0_1 = arith.constant 0 : index
    %3 = vector.load %arg7[%c0, %c0_1] : memref<16x512xf32, #tpu.memory_space<vmem>>, vector<16x512xf32>
    %c0_2 = arith.constant 0 : index
    %c0_3 = arith.constant 0 : index
    %4 = vector.load %arg3[%c0_2, %c0_3] : memref<16x256xbf16, #tpu.memory_space<vmem>>, vector<16x256xbf16>
    %c0_4 = arith.constant 0 : index
    %c0_5 = arith.constant 0 : index
    %5 = vector.load %arg4[%c0_4, %c0_5] : memref<256x512xbf16, #tpu.memory_space<vmem>>, vector<256x512xbf16>
    %cst = arith.constant dense<0.000000e+00> : vector<16x512xf32>
    %6 = tpu.matmul %4, %5, %cst {dimension_numbers = #tpu.dot_dimension_numbers<[1], [0], [0], [1], [0, 0, 1, 1], [], []>} : vector<16x256xbf16>, vector<256x512xbf16>, vector<16x512xf32> -> vector<16x512xf32>
    %7 = arith.addf %3, %6 : vector<16x512xf32>
    %c0_6 = arith.constant 0 : index
    %c0_7 = arith.constant 0 : index
    %8 = vector.load %arg7[%c0_6, %c0_7] : memref<16x512xf32, #tpu.memory_space<vmem>>, vector<16x512xf32>
    tpu.vector_store %arg7[%c0_6, %c0_7], %7 {strides = array<i32>} : memref<16x512xf32, #tpu.memory_space<vmem>>, vector<16x512xf32>,
    %c0_i32_8 = arith.constant 0 : i32
    %9 = arith.cmpi eq, %arg2, %c0_i32_8 : i32
    %10 = arith.extui %9 : i1 to i32
    %c0_i32_9 = arith.constant 0 : i32
    %11 = arith.cmpi ne, %10, %c0_i32_9 : i32
    scf.if %11 {
      %c0_10 = arith.constant 0 : index
      %c0_11 = arith.constant 0 : index
      %12 = vector.load %arg7[%c0_10, %c0_11] : memref<16x512xf32, #tpu.memory_space<vmem>>, vector<16x512xf32>
      %c0_12 = arith.constant 0 : index
      %c0_13 = arith.constant 0 : index
      %13 = vector.load %arg5[%c0_12, %c0_13] : memref<1x512xf32, #tpu.memory_space<vmem>>, vector<1x512xf32>
      %14 = vector.broadcast %13 : vector<1x512xf32> to vector<16x512xf32>
      %15 = arith.addf %12, %14 : vector<16x512xf32>
      %16 = arith.truncf %15 : vector<16x512xf32> to vector<16x512xbf16>
      %c0_14 = arith.constant 0 : index
      %c0_15 = arith.constant 0 : index
      %17 = vector.load %arg6[%c0_14, %c0_15] : memref<16x512xbf16, #tpu.memory_space<vmem>>, vector<16x512xbf16>
      tpu.vector_store %arg6[%c0_14, %c0_15], %16 {strides = array<i32>} : memref<16x512xbf16, #tpu.memory_space<vmem>>, vector<16x512xbf16>,
    } else {
    }
    return
  }
  func.func @transform_0(%arg0: i32, %arg1: i32, %arg2: i32) -> (i32, i32) {
    %c0_i32 = arith.constant 0 : i32
    return %arg0, %arg2 : i32, i32
  }
  func.func @transform_1(%arg0: i32, %arg1: i32, %arg2: i32) -> (i32, i32) {
    %c0_i32 = arith.constant 0 : i32
    return %arg2, %arg1 : i32, i32
  }
  func.func @transform_2(%arg0: i32, %arg1: i32, %arg2: i32) -> (i32, i32) {
    %c0_i32 = arith.constant 0 : i32
    %c0_i32_0 = arith.constant 0 : i32
    return %c0_i32, %arg1 : i32, i32
  }
  func.func @transform_3(%arg0: i32, %arg1: i32, %arg2: i32) -> (i32, i32) {
    %c0_i32 = arith.constant 0 : i32
    return %arg0, %arg1 : i32, i32
  }
}

module attributes {stable_mosaic.version = 11 : i64} {
  func.func @_mm_res_kernel(%arg0: i32, %arg1: i32, %arg2: i32, %arg3: memref<16x512xbf16, #tpu.memory_space<vmem>>, %arg4: memref<512x512xbf16, #tpu.memory_space<vmem>>, %arg5: memref<1x512xf32, #tpu.memory_space<vmem>>, %arg6: memref<16x512xbf16, #tpu.memory_space<vmem>>, %arg7: memref<16x512xbf16, #tpu.memory_space<vmem>>, %arg8: memref<16x512xf32, #tpu.memory_space<vmem>>) attributes {dimension_semantics = [#tpu.dimension_semantics<parallel>, #tpu.dimension_semantics<parallel>, #tpu.dimension_semantics<arbitrary>], iteration_bounds = array<i64: 1, 1, 9>, scalar_prefetch = 0 : i64, scratch_operands = 1 : i64, tpu.core_type = #tpu.core_type<tc>, window_params = [{transform_indices = @transform_0, window_bounds = array<i64: 16, 512>}, {transform_indices = @transform_1, window_bounds = array<i64: 512, 512>}, {transform_indices = @transform_2, window_bounds = array<i64: 1, 512>}, {transform_indices = @transform_3, window_bounds = array<i64: 16, 512>}, {transform_indices = @transform_4, window_bounds = array<i64: 16, 512>}]} {
    %c0_i32 = arith.constant 0 : i32
    %0 = arith.cmpi eq, %arg2, %c0_i32 : i32
    %1 = arith.extui %0 : i1 to i32
    %c0_i32_0 = arith.constant 0 : i32
    %2 = arith.cmpi ne, %1, %c0_i32_0 : i32
    scf.if %2 {
      %cst_9 = arith.constant 0.000000e+00 : f32
      %12 = vector.broadcast %cst_9 : f32 to vector<16x512xf32>
      %c0_10 = arith.constant 0 : index
      %c0_11 = arith.constant 0 : index
      %13 = vector.load %arg8[%c0_10, %c0_11] : memref<16x512xf32, #tpu.memory_space<vmem>>, vector<16x512xf32>
      tpu.vector_store %arg8[%c0_10, %c0_11], %12 {strides = array<i32>} : memref<16x512xf32, #tpu.memory_space<vmem>>, vector<16x512xf32>,
    } else {
    }
    %c0 = arith.constant 0 : index
    %c0_1 = arith.constant 0 : index
    %3 = vector.load %arg8[%c0, %c0_1] : memref<16x512xf32, #tpu.memory_space<vmem>>, vector<16x512xf32>
    %c0_2 = arith.constant 0 : index
    %c0_3 = arith.constant 0 : index
    %4 = vector.load %arg3[%c0_2, %c0_3] : memref<16x512xbf16, #tpu.memory_space<vmem>>, vector<16x512xbf16>
    %c0_4 = arith.constant 0 : index
    %c0_5 = arith.constant 0 : index
    %5 = vector.load %arg4[%c0_4, %c0_5] : memref<512x512xbf16, #tpu.memory_space<vmem>>, vector<512x512xbf16>
    %cst = arith.constant dense<0.000000e+00> : vector<16x512xf32>
    %6 = tpu.matmul %4, %5, %cst {dimension_numbers = #tpu.dot_dimension_numbers<[1], [0], [0], [1], [0, 0, 1, 1], [], []>} : vector<16x512xbf16>, vector<512x512xbf16>, vector<16x512xf32> -> vector<16x512xf32>
    %7 = arith.addf %3, %6 : vector<16x512xf32>
    %c0_6 = arith.constant 0 : index
    %c0_7 = arith.constant 0 : index
    %8 = vector.load %arg8[%c0_6, %c0_7] : memref<16x512xf32, #tpu.memory_space<vmem>>, vector<16x512xf32>
    tpu.vector_store %arg8[%c0_6, %c0_7], %7 {strides = array<i32>} : memref<16x512xf32, #tpu.memory_space<vmem>>, vector<16x512xf32>,
    %c8_i32 = arith.constant 8 : i32
    %9 = arith.cmpi eq, %arg2, %c8_i32 : i32
    %10 = arith.extui %9 : i1 to i32
    %c0_i32_8 = arith.constant 0 : i32
    %11 = arith.cmpi ne, %10, %c0_i32_8 : i32
    scf.if %11 {
      %c0_9 = arith.constant 0 : index
      %c0_10 = arith.constant 0 : index
      %12 = vector.load %arg8[%c0_9, %c0_10] : memref<16x512xf32, #tpu.memory_space<vmem>>, vector<16x512xf32>
      %c0_11 = arith.constant 0 : index
      %c0_12 = arith.constant 0 : index
      %13 = vector.load %arg5[%c0_11, %c0_12] : memref<1x512xf32, #tpu.memory_space<vmem>>, vector<1x512xf32>
      %14 = vector.broadcast %13 : vector<1x512xf32> to vector<16x512xf32>
      %15 = arith.addf %12, %14 : vector<16x512xf32>
      %c0_13 = arith.constant 0 : index
      %c0_14 = arith.constant 0 : index
      %16 = vector.load %arg6[%c0_13, %c0_14] : memref<16x512xbf16, #tpu.memory_space<vmem>>, vector<16x512xbf16>
      %17 = arith.extf %16 : vector<16x512xbf16> to vector<16x512xf32>
      %18 = arith.addf %15, %17 : vector<16x512xf32>
      %cst_15 = arith.constant 0.000000e+00 : f32
      %19 = vector.broadcast %cst_15 : f32 to vector<16x512xf32>
      %20 = arith.maximumf %18, %19 : vector<16x512xf32>
      %21 = arith.truncf %20 : vector<16x512xf32> to vector<16x512xbf16>
      %c0_16 = arith.constant 0 : index
      %c0_17 = arith.constant 0 : index
      %22 = vector.load %arg7[%c0_16, %c0_17] : memref<16x512xbf16, #tpu.memory_space<vmem>>, vector<16x512xbf16>
      tpu.vector_store %arg7[%c0_16, %c0_17], %21 {strides = array<i32>} : memref<16x512xbf16, #tpu.memory_space<vmem>>, vector<16x512xbf16>,
    } else {
    }
    return
  }
  func.func @transform_0(%arg0: i32, %arg1: i32, %arg2: i32) -> (i32, i32) {
    %c0_i32 = arith.constant 0 : i32
    return %arg0, %arg2 : i32, i32
  }
  func.func @transform_1(%arg0: i32, %arg1: i32, %arg2: i32) -> (i32, i32) {
    %c0_i32 = arith.constant 0 : i32
    return %arg2, %arg1 : i32, i32
  }
  func.func @transform_2(%arg0: i32, %arg1: i32, %arg2: i32) -> (i32, i32) {
    %c0_i32 = arith.constant 0 : i32
    %c0_i32_0 = arith.constant 0 : i32
    return %c0_i32, %arg1 : i32, i32
  }
  func.func @transform_3(%arg0: i32, %arg1: i32, %arg2: i32) -> (i32, i32) {
    %c0_i32 = arith.constant 0 : i32
    return %arg0, %arg1 : i32, i32
  }
  func.func @transform_4(%arg0: i32, %arg1: i32, %arg2: i32) -> (i32, i32) {
    %c0_i32 = arith.constant 0 : i32
    return %arg0, %arg1 : i32, i32
  }
}

module attributes {stable_mosaic.version = 11 : i64} {
  func.func @_mm_kernel(%arg0: i32, %arg1: i32, %arg2: i32, %arg3: memref<16x512xbf16, #tpu.memory_space<vmem>>, %arg4: memref<512x128xbf16, #tpu.memory_space<vmem>>, %arg5: memref<1x128xf32, #tpu.memory_space<vmem>>, %arg6: memref<16x128xf32, #tpu.memory_space<vmem>>, %arg7: memref<16x128xf32, #tpu.memory_space<vmem>>) attributes {dimension_semantics = [#tpu.dimension_semantics<parallel>, #tpu.dimension_semantics<parallel>, #tpu.dimension_semantics<arbitrary>], iteration_bounds = array<i64: 1, 1, 1>, scalar_prefetch = 0 : i64, scratch_operands = 1 : i64, tpu.core_type = #tpu.core_type<tc>, window_params = [{transform_indices = @transform_0, window_bounds = array<i64: 16, 512>}, {transform_indices = @transform_1, window_bounds = array<i64: 512, 128>}, {transform_indices = @transform_2, window_bounds = array<i64: 1, 128>}, {transform_indices = @transform_3, window_bounds = array<i64: 16, 128>}]} {
    %c0_i32 = arith.constant 0 : i32
    %0 = arith.cmpi eq, %arg2, %c0_i32 : i32
    %1 = arith.extui %0 : i1 to i32
    %c0_i32_0 = arith.constant 0 : i32
    %2 = arith.cmpi ne, %1, %c0_i32_0 : i32
    scf.if %2 {
      %cst_10 = arith.constant 0.000000e+00 : f32
      %12 = vector.broadcast %cst_10 : f32 to vector<16x128xf32>
      %c0_11 = arith.constant 0 : index
      %c0_12 = arith.constant 0 : index
      %13 = vector.load %arg7[%c0_11, %c0_12] : memref<16x128xf32, #tpu.memory_space<vmem>>, vector<16x128xf32>
      tpu.vector_store %arg7[%c0_11, %c0_12], %12 {strides = array<i32>} : memref<16x128xf32, #tpu.memory_space<vmem>>, vector<16x128xf32>,
    } else {
    }
    %c0 = arith.constant 0 : index
    %c0_1 = arith.constant 0 : index
    %3 = vector.load %arg7[%c0, %c0_1] : memref<16x128xf32, #tpu.memory_space<vmem>>, vector<16x128xf32>
    %c0_2 = arith.constant 0 : index
    %c0_3 = arith.constant 0 : index
    %4 = vector.load %arg3[%c0_2, %c0_3] : memref<16x512xbf16, #tpu.memory_space<vmem>>, vector<16x512xbf16>
    %c0_4 = arith.constant 0 : index
    %c0_5 = arith.constant 0 : index
    %5 = vector.load %arg4[%c0_4, %c0_5] : memref<512x128xbf16, #tpu.memory_space<vmem>>, vector<512x128xbf16>
    %cst = arith.constant dense<0.000000e+00> : vector<16x128xf32>
    %6 = tpu.matmul %4, %5, %cst {dimension_numbers = #tpu.dot_dimension_numbers<[1], [0], [0], [1], [0, 0, 1, 1], [], []>} : vector<16x512xbf16>, vector<512x128xbf16>, vector<16x128xf32> -> vector<16x128xf32>
    %7 = arith.addf %3, %6 : vector<16x128xf32>
    %c0_6 = arith.constant 0 : index
    %c0_7 = arith.constant 0 : index
    %8 = vector.load %arg7[%c0_6, %c0_7] : memref<16x128xf32, #tpu.memory_space<vmem>>, vector<16x128xf32>
    tpu.vector_store %arg7[%c0_6, %c0_7], %7 {strides = array<i32>} : memref<16x128xf32, #tpu.memory_space<vmem>>, vector<16x128xf32>,
    %c0_i32_8 = arith.constant 0 : i32
    %9 = arith.cmpi eq, %arg2, %c0_i32_8 : i32
    %10 = arith.extui %9 : i1 to i32
    %c0_i32_9 = arith.constant 0 : i32
    %11 = arith.cmpi ne, %10, %c0_i32_9 : i32
    scf.if %11 {
      %c0_10 = arith.constant 0 : index
      %c0_11 = arith.constant 0 : index
      %12 = vector.load %arg7[%c0_10, %c0_11] : memref<16x128xf32, #tpu.memory_space<vmem>>, vector<16x128xf32>
      %c0_12 = arith.constant 0 : index
      %c0_13 = arith.constant 0 : index
      %13 = vector.load %arg5[%c0_12, %c0_13] : memref<1x128xf32, #tpu.memory_space<vmem>>, vector<1x128xf32>
      %14 = vector.broadcast %13 : vector<1x128xf32> to vector<16x128xf32>
      %15 = arith.addf %12, %14 : vector<16x128xf32>
      %c0_14 = arith.constant 0 : index
      %c0_15 = arith.constant 0 : index
      %16 = vector.load %arg6[%c0_14, %c0_15] : memref<16x128xf32, #tpu.memory_space<vmem>>, vector<16x128xf32>
      tpu.vector_store %arg6[%c0_14, %c0_15], %15 {strides = array<i32>} : memref<16x128xf32, #tpu.memory_space<vmem>>, vector<16x128xf32>,
    } else {
    }
    return
  }
  func.func @transform_0(%arg0: i32, %arg1: i32, %arg2: i32) -> (i32, i32) {
    %c0_i32 = arith.constant 0 : i32
    return %arg0, %arg2 : i32, i32
  }
  func.func @transform_1(%arg0: i32, %arg1: i32, %arg2: i32) -> (i32, i32) {
    %c0_i32 = arith.constant 0 : i32
    return %arg2, %arg1 : i32, i32
  }
  func.func @transform_2(%arg0: i32, %arg1: i32, %arg2: i32) -> (i32, i32) {
    %c0_i32 = arith.constant 0 : i32
    %c0_i32_0 = arith.constant 0 : i32
    return %c0_i32, %arg1 : i32, i32
  }
  func.func @transform_3(%arg0: i32, %arg1: i32, %arg2: i32) -> (i32, i32) {
    %c0_i32 = arith.constant 0 : i32
    return %arg0, %arg1 : i32, i32
  }
}

</mosaic_0001>

<bundles_post_ra>
// kernel: color_model_forward.21
= control target key start
LH: loop header
LB: loop body
LE: loop exit
PB: predicated region body
PF: predicated region fallthrough
CT: control target
= control target key end

     0   :  { %s1744_s12 = smov 0   ;;  %s1746_s13 = smov 0   ;;  %s1918_s0 = inlined_call_operand.vmem [shape: bf16[2048,256], index: 0, kind: input, shape index: {}]   ;;  %s1919_s1 = inlined_call_operand.vmem [shape: bf16[256,128], index: 1, kind: input, shape index: {}]   ;;  %s1920_s2 = inlined_call_operand.vmem [shape: f32[1,128], index: 2, kind: input, shape index: {}]   ;;  %s1921_s3 = inlined_call_operand.vmem [shape: bf16[2048,128], index: 3, kind: output, shape index: {}]  }
   0x1   :  { %s1748_s14 = smov 0  }
   0x2 LB: > { %s32_s15 = sadd.s32 1, %s1718_s13  ;;  %p1267_p0 = scmp.ge.s32.totalorder %s1722_s14, 1  ;;  %s1722_s14 = sphi %s1748_s14, %s13_s14   ;;  %s1718_s13 = sphi %s1746_s13, %s1923_s13   ;;  %s1714_s12 = sphi %s1744_s12, %s1922_s12  }
   0x3   : > { %p34_p1 = scmp.ge.s32.totalorder %s32_s15, 8  ;;  %p191_p2 = scmp.lt.s32.totalorder %s1722_s14, 9 }
   0x5   : > { %s1925_s15 = smov (%p34_p1, %s32_s15), 0  ;;  %p192_p3 = pnand %p1267_p0, %p191_p2 }
   0x6   : > { %v1636_v0 = vld [vmem:[%s1919_s1 + $0x40] sm:$0xff] (!%p192_p3)   ;;  %s1268_s18 = sshll.u32 (!%p192_p3), %s1714_s12, 5  ;;  %v1638_v2 = vld [vmem:[%s1919_s1 + $0x48] sm:$0xff] (!%p192_p3)   ;;  %v1640_v4 = vld [vmem:[%s1919_s1 + $0x50] sm:$0xff] (!%p192_p3)  }
   0x7   : > { %195 = sbr.rel (%p192_p3) target bundleno = 320 (0x140), region = 32  ;;  %v1637_v1 = vld [vmem:[%s1919_s1] sm:$0xff] (!%p192_p3)   ;;  %1484 = vmatprep.subr.bf16.mxu0 (!%p192_p3), %v1636_v0  ;;  %1596 = vmatprep.subr.bf16.mxu1 (!%p192_p3), %v1636_v0  ;;  %v1639_v3 = vld [vmem:[%s1919_s1 + $0x8] sm:$0xff] (!%p192_p3)   ;;  %p236_p4 = scmp.lt.s32.totalorder (!%p192_p3), %s1268_s18, 255  ;;  %v1641_v5 = vld [vmem:[%s1919_s1 + $0x10] sm:$0xff] (!%p192_p3)  }
   0x8   : > { %1485 = vmatpush3.bf16.msra.mxu0 (!%p192_p3), %v1637_v1  ;;  %1604 = vmatpush3.bf16.msra.mxu1 (!%p192_p3), %v1637_v1  ;;  %v1642_v6 = vld [vmem:[%s1919_s1 + $0x58] sm:$0xff] (!%p192_p3)   ;;  %v1644_v8 = vld [vmem:[%s1919_s1 + $0x60] sm:$0xff] (!%p192_p3)   ;;  %v1646_v10 = vld [vmem:[%s1919_s1 + $0x68] sm:$0xff] (!%p192_p3)  }
   0x9   : > { %1486 = vmatprep.subr.bf16.mxu0 (!%p192_p3), %v1638_v2  ;;  %1597 = vmatprep.subr.bf16.mxu1 (!%p192_p3), %v1638_v2  ;;  %v1643_v7 = vld [vmem:[%s1919_s1 + $0x18] sm:$0xff] (!%p192_p3)   ;;  %v1645_v9 = vld [vmem:[%s1919_s1 + $0x20] sm:$0xff] (!%p192_p3)   ;;  %v1647_v13 = vld [vmem:[%s1919_s1 + $0x28] sm:$0xff] (!%p192_p3)  }
   0xa   : > { %v1648_v14 = vld [vmem:[%s1919_s1 + $0x70] sm:$0xff] (!%p192_p3)   ;;  %v1650_v16 = vld [vmem:[%s1919_s1 + $0x78] sm:$0xff] (!%p192_p3)   ;;  %v1853_v51 = vld [vmem:[%s1920_s2] ss:$0 sm:$0xff] (!%p192_p3) }
   0xb   : > { %v1649_v15 = vld [vmem:[%s1919_s1 + $0x30] sm:$0xff] (!%p192_p3)   ;;  %v1651_v17 = vld [vmem:[%s1919_s1 + $0x38] sm:$0xff] (!%p192_p3)  }
   0xc   : > { %1487 = vmatpush3.bf16.msra.mxu0 (!%p192_p3), %v1639_v3  ;;  %1605 = vmatpush3.bf16.msra.mxu1 (!%p192_p3), %v1639_v3 }
   0xd   : > { %1488 = vmatprep.subr.bf16.mxu0 (!%p192_p3), %v1640_v4  ;;  %1598 = vmatprep.subr.bf16.mxu1 (!%p192_p3), %v1640_v4 }
   0xe   : > { %s1927_s18 = smov (!%p236_p4, %s1268_s18), 255 }
   0xf   : > { %s1356_s6 = sshll.u32 %s1927_s18, 3  ;;  %s1272_s5 = sshll.u32 %s1927_s18, 2 }
  0x10   : > { %1489 = vmatpush3.bf16.msra.mxu0 %v1641_v5  ;;  %1606 = vmatpush3.bf16.msra.mxu1 %v1641_v5  ;;  %s1795_s11 = scalar_lea.vmem %s1918_s0, %s1356_s6  ;;  %s1863_s8 = scalar_lea.vmem %s1921_s3, %s1272_s5 }
  0x11   : > { %1490 = vmatprep.subr.bf16.mxu0 %v1642_v6  ;;  %1599 = vmatprep.subr.bf16.mxu1 %v1642_v6  ;;  %v1654_v11 = vld [vmem:[%s1795_s11 + $0x4] ss:$8 sps:$4 sm:$0xff]   ;;  %v1652_v18 = vld [vmem:[%s1795_s11] ss:$8 sps:$4 sm:$0xff]   ;;  %v1658_v20 = vld [vmem:[%s1795_s11 + $0x14] ss:$8 sps:$4 sm:$0xff]  }
  0x12   : > { %v1657_v12 = vld [vmem:[%s1795_s11 + $0x84] ss:$8 sps:$4 sm:$0xff]   ;;  %688 = vmatprep.mubr.bf16.mxu0 %v1654_v11  ;;  %v1655_v19 = vld [vmem:[%s1795_s11 + $0x80] ss:$8 sps:$4 sm:$0xff]   ;;  %v1660_v21 = vld [vmem:[%s1795_s11 + $0x94] ss:$8 sps:$4 sm:$0xff]  }
  0x13   : > { %752 = vmatprep.mubr.bf16.mxu1 %v1657_v12  ;;  %v1662_v22 = vld [vmem:[%s1795_s11 + $0x10] ss:$8 sps:$4 sm:$0xff]   ;;  %v1664_v24 = vld [vmem:[%s1795_s11 + $0x24] ss:$8 sps:$4 sm:$0xff]   ;;  %v1668_v26 = vld [vmem:[%s1795_s11 + $0x20] ss:$8 sps:$4 sm:$0xff]  }
  0x14   : > { %1491 = vmatpush3.bf16.msra.mxu0 %v1643_v7  ;;  %1607 = vmatpush3.bf16.msra.mxu1 %v1643_v7  ;;  %v1663_v23 = vld [vmem:[%s1795_s11 + $0x90] ss:$8 sps:$4 sm:$0xff]   ;;  %v1666_v25 = vld [vmem:[%s1795_s11 + $0xa4] ss:$8 sps:$4 sm:$0xff]   ;;  %v1669_v27 = vld [vmem:[%s1795_s11 + $0xa0] ss:$8 sps:$4 sm:$0xff]  }
  0x15   : > { %1492 = vmatprep.subr.bf16.mxu0 %v1644_v8  ;;  %1600 = vmatprep.subr.bf16.mxu1 %v1644_v8  ;;  %v1670_v28 = vld [vmem:[%s1795_s11 + $0x34] ss:$8 sps:$4 sm:$0xff]   ;;  %v1674_v30 = vld [vmem:[%s1795_s11 + $0x30] ss:$8 sps:$4 sm:$0xff]   ;;  %v1676_v32 = vld [vmem:[%s1795_s11 + $0x44] ss:$8 sps:$4 sm:$0xff]  }
  0x16   : > { %v1672_v29 = vld [vmem:[%s1795_s11 + $0xb4] ss:$8 sps:$4 sm:$0xff]   ;;  %v1675_v31 = vld [vmem:[%s1795_s11 + $0xb0] ss:$8 sps:$4 sm:$0xff]   ;;  %v1678_v33 = vld [vmem:[%s1795_s11 + $0xc4] ss:$8 sps:$4 sm:$0xff]  }
  0x17   : > { %v1680_v34 = vld [vmem:[%s1795_s11 + $0x40] ss:$8 sps:$4 sm:$0xff]   ;;  %v1682_v36 = vld [vmem:[%s1795_s11 + $0x54] ss:$8 sps:$4 sm:$0xff]   ;;  %v1686_v38 = vld [vmem:[%s1795_s11 + $0x50] ss:$8 sps:$4 sm:$0xff]  }
  0x18   : > { %1493 = vmatpush3.bf16.msra.mxu0 %v1645_v9  ;;  %1608 = vmatpush3.bf16.msra.mxu1 %v1645_v9  ;;  %v1681_v35 = vld [vmem:[%s1795_s11 + $0xc0] ss:$8 sps:$4 sm:$0xff]   ;;  %v1684_v37 = vld [vmem:[%s1795_s11 + $0xd4] ss:$8 sps:$4 sm:$0xff]   ;;  %v1687_v39 = vld [vmem:[%s1795_s11 + $0xd0] ss:$8 sps:$4 sm:$0xff]  }
  0x19   : > { %1494 = vmatprep.subr.bf16.mxu0 %v1646_v10  ;;  %1601 = vmatprep.subr.bf16.mxu1 %v1646_v10  ;;  %v1688_v40 = vld [vmem:[%s1795_s11 + $0x64] ss:$8 sps:$4 sm:$0xff]   ;;  %v1692_v42 = vld [vmem:[%s1795_s11 + $0x60] ss:$8 sps:$4 sm:$0xff]   ;;  %v1694_v44 = vld [vmem:[%s1795_s11 + $0x74] ss:$8 sps:$4 sm:$0xff]  }
  0x1a   : > { %v1690_v41 = vld [vmem:[%s1795_s11 + $0xe4] ss:$8 sps:$4 sm:$0xff]   ;;  %v1693_v43 = vld [vmem:[%s1795_s11 + $0xe0] ss:$8 sps:$4 sm:$0xff]   ;;  %v1696_v45 = vld [vmem:[%s1795_s11 + $0xf4] ss:$8 sps:$4 sm:$0xff]  }
  0x1b   : > { %v1698_v46 = vld [vmem:[%s1795_s11 + $0x70] ss:$8 sps:$4 sm:$0xff]  }
  0x1c   : > { %1495 = vmatpush3.bf16.msra.mxu0 %v1647_v13  ;;  %1609 = vmatpush3.bf16.msra.mxu1 %v1647_v13  ;;  %v1699_v47 = vld [vmem:[%s1795_s11 + $0xf0] ss:$8 sps:$4 sm:$0xff]  }
  0x1d   : > { %1496 = vmatprep.subr.bf16.mxu0 %v1648_v14  ;;  %1602 = vmatprep.subr.bf16.mxu1 %v1648_v14 }
  0x20   : > { %1497 = vmatpush3.bf16.msra.mxu0 %v1649_v15  ;;  %1610 = vmatpush3.bf16.msra.mxu1 %v1649_v15 }
  0x21   : > { %1498 = vmatprep.subr.bf16.mxu0 %v1650_v16  ;;  %1603 = vmatprep.subr.bf16.mxu1 %v1650_v16 }
  0x24   : > { %1499 = vmatpush3.bf16.msra.mxu0 %v1651_v17  ;;  %1611 = vmatpush3.bf16.msra.mxu1 %v1651_v17 }
  0x27   : > { %689 = vmatmul.mubr.bf16.vlgmr.msra.gmra.mrb[0].mxu0 %v1652_v18  ;;  %753 = vmatmul.mubr.bf16.vlgmr.msra.gmra.mrb[0].mxu1 %v1655_v19 }
  0x28   : > { %696 = vmatprep.mubr.bf16.mxu0 %v1658_v20  ;;  %760 = vmatprep.mubr.bf16.mxu1 %v1660_v21 }
  0x2f   : > { %697 = vmatmul.mubr.bf16.gmra.mrb[4].mxu0 %v1662_v22  ;;  %761 = vmatmul.mubr.bf16.gmra.mrb[4].mxu1 %v1663_v23 }
  0x30   : > { %704 = vmatprep.mubr.bf16.mxu0 %v1664_v24  ;;  %768 = vmatprep.mubr.bf16.mxu1 %v1666_v25 }
  0x37   : > { %705 = vmatmul.mubr.bf16.gmra.mrb[8].mxu0 %v1668_v26  ;;  %769 = vmatmul.mubr.bf16.gmra.mrb[8].mxu1 %v1669_v27 }
  0x38   : > { %712 = vmatprep.mubr.bf16.mxu0 %v1670_v28  ;;  %776 = vmatprep.mubr.bf16.mxu1 %v1672_v29 }
  0x3f   : > { %713 = vmatmul.mubr.bf16.gmra.mrb[12].mxu0 %v1674_v30  ;;  %777 = vmatmul.mubr.bf16.gmra.mrb[12].mxu1 %v1675_v31 }
  0x40   : > { %720 = vmatprep.mubr.bf16.mxu0 %v1676_v32  ;;  %784 = vmatprep.mubr.bf16.mxu1 %v1678_v33 }
  0x47   : > { %721 = vmatmul.mubr.bf16.gmra.mrb[16].mxu0 %v1680_v34  ;;  %785 = vmatmul.mubr.bf16.gmra.mrb[16].mxu1 %v1681_v35 }
  0x48   : > { %728 = vmatprep.mubr.bf16.mxu0 %v1682_v36  ;;  %792 = vmatprep.mubr.bf16.mxu1 %v1684_v37 }
  0x4f   : > { %729 = vmatmul.mubr.bf16.gmra.mrb[20].mxu0 %v1686_v38  ;;  %793 = vmatmul.mubr.bf16.gmra.mrb[20].mxu1 %v1687_v39 }
  0x50   : > { %736 = vmatprep.mubr.bf16.mxu0 %v1688_v40  ;;  %800 = vmatprep.mubr.bf16.mxu1 %v1690_v41 }
  0x57   : > { %737 = vmatmul.mubr.bf16.gmra.mrb[24].mxu0 %v1692_v42  ;;  %801 = vmatmul.mubr.bf16.gmra.mrb[24].mxu1 %v1693_v43 }
  0x58   : > { %744 = vmatprep.mubr.bf16.mxu0 %v1694_v44  ;;  %808 = vmatprep.mubr.bf16.mxu1 %v1696_v45 }
  0x5f   : > { %745 = vmatmul.mubr.bf16.gmra.mrb[28].mxu0 %v1698_v46  ;;  %809 = vmatmul.mubr.bf16.gmra.mrb[28].mxu1 %v1699_v47 }
  0xfa   : > { %v1500_v48 = vpop.f32.mrb[0].mxu0  ;;  %v1548_v49 = vpop.f32.mrb[0].mxu1 }
  0xfb   : > { %v1501_v50 = vpop.f32.mrb[1].mxu0  ;;  %v1549_v52 = vpop.f32.mrb[1].mxu1 }
  0xfc   : > { %v1502_v53 = vadd.f32 %v1501_v50, %v1500_v48  ;;  %v1550_v54 = vadd.f32 %v1549_v52, %v1548_v49  ;;  %v1503_v55 = vpop.f32.mrb[2].mxu0  ;;  %v1551_v56 = vpop.f32.mrb[2].mxu1 }
  0xfd   : > { %v1504_v57 = vpop.f32.mrb[3].mxu0  ;;  %v1552_v58 = vpop.f32.mrb[3].mxu1 }
  0xfe   : > { %v923_v59 = vadd.f32 %v1502_v53, %v1853_v51  ;;  %v939_v60 = vadd.f32 %v1550_v54, %v1853_v51  ;;  %v1505_v61 = vadd.f32 %v1504_v57, %v1503_v55  ;;  %v1553_v62 = vadd.f32 %v1552_v58, %v1551_v56 }
 0x100   : > { %v924_v63 = vadd.f32 %v1505_v61, %v1853_v51  ;;  %v940_v0 = vadd.f32 %v1553_v62, %v1853_v51  ;;  %v955_v1 = vmax.f32 %v923_v59, 0.0  ;;  %v971_v2 = vmax.f32 %v939_v60, 0.0 }
 0x102   : > { %v956_v3 = vmax.f32 %v924_v63, 0.0  ;;  %v972_v4 = vmax.f32 %v940_v0, 0.0  ;;  %v1506_v5 = vpop.f32.mrb[4].mxu0  ;;  %v1554_v6 = vpop.f32.mrb[4].mxu1 }
 0x103   : > { %v1507_v7 = vpop.f32.mrb[5].mxu0  ;;  %v1555_v8 = vpop.f32.mrb[5].mxu1 }
 0x104   : > { %v1392_v9 = vpack.c.bf16 %v956_v3, %v955_v1  ;;  %v1432_v10 = vpack.c.bf16 %v972_v4, %v971_v2  ;;  %v1508_v11 = vadd.f32 %v1507_v7, %v1506_v5  ;;  %v1556_v12 = vadd.f32 %v1555_v8, %v1554_v6  ;;  %v1509_v13 = vpop.f32.mrb[6].mxu0  ;;  %v1557_v14 = vpop.f32.mrb[6].mxu1 }
 0x105   : > { %v1510_v15 = vpop.f32.mrb[7].mxu0  ;;  %v1558_v16 = vpop.f32.mrb[7].mxu1 }
 0x106   : > { %1393 = vst [vmem:[%s1863_s8] sm:$0xff] %v1392_v9   ;;  %1476 = vst [vmem:[%s1863_s8 + $0x40] sm:$0xff] %v1432_v10   ;;  %v925_v17 = vadd.f32 %v1508_v11, %v1853_v51  ;;  %v941_v18 = vadd.f32 %v1556_v12, %v1853_v51  ;;  %v1511_v19 = vadd.f32 %v1510_v15, %v1509_v13 }
 0x107   : > { %v1559_v20 = vadd.f32 %v1558_v16, %v1557_v14 }
 0x108   : > { %v926_v21 = vadd.f32 %v1511_v19, %v1853_v51  ;;  %v957_v23 = vmax.f32 %v925_v17, 0.0  ;;  %v973_v24 = vmax.f32 %v941_v18, 0.0 }
 0x109   : > { %v942_v22 = vadd.f32 %v1559_v20, %v1853_v51 }
 0x10a   : > { %v958_v25 = vmax.f32 %v926_v21, 0.0  ;;  %v1512_v27 = vpop.f32.mrb[8].mxu0  ;;  %v1560_v28 = vpop.f32.mrb[8].mxu1 }
 0x10b   : > { %v974_v26 = vmax.f32 %v942_v22, 0.0  ;;  %v1513_v29 = vpop.f32.mrb[9].mxu0  ;;  %v1561_v30 = vpop.f32.mrb[9].mxu1 }
 0x10c   : > { %v1397_v31 = vpack.c.bf16 %v958_v25, %v957_v23  ;;  %v1514_v33 = vadd.f32 %v1513_v29, %v1512_v27  ;;  %v1562_v34 = vadd.f32 %v1561_v30, %v1560_v28  ;;  %v1515_v35 = vpop.f32.mrb[10].mxu0  ;;  %v1563_v36 = vpop.f32.mrb[10].mxu1 }
 0x10d   : > { %v1437_v32 = vpack.c.bf16 %v974_v26, %v973_v24  ;;  %v1516_v37 = vpop.f32.mrb[11].mxu0  ;;  %v1564_v38 = vpop.f32.mrb[11].mxu1 }
 0x10e   : > { %1469 = vst [vmem:[%s1863_s8 + $0x8] sm:$0xff] %v1397_v31   ;;  %v927_v39 = vadd.f32 %v1514_v33, %v1853_v51  ;;  %v943_v40 = vadd.f32 %v1562_v34, %v1853_v51  ;;  %v1517_v41 = vadd.f32 %v1516_v37, %v1515_v35  ;;  %v1565_v42 = vadd.f32 %v1564_v38, %v1563_v36 }
 0x10f   : > { %1477 = vst [vmem:[%s1863_s8 + $0x48] sm:$0xff] %v1437_v32  }
 0x110   : > { %v928_v43 = vadd.f32 %v1517_v41, %v1853_v51  ;;  %v944_v44 = vadd.f32 %v1565_v42, %v1853_v51  ;;  %v959_v45 = vmax.f32 %v927_v39, 0.0  ;;  %v975_v46 = vmax.f32 %v943_v40, 0.0 }
 0x112   : > { %v960_v47 = vmax.f32 %v928_v43, 0.0  ;;  %v976_v48 = vmax.f32 %v944_v44, 0.0  ;;  %v1518_v49 = vpop.f32.mrb[12].mxu0  ;;  %v1566_v50 = vpop.f32.mrb[12].mxu1 }
 0x113   : > { %v1519_v52 = vpop.f32.mrb[13].mxu0  ;;  %v1567_v53 = vpop.f32.mrb[13].mxu1 }
 0x114   : > { %v1402_v54 = vpack.c.bf16 %v960_v47, %v959_v45  ;;  %v1442_v55 = vpack.c.bf16 %v976_v48, %v975_v46  ;;  %v1520_v56 = vadd.f32 %v1519_v52, %v1518_v49  ;;  %v1568_v57 = vadd.f32 %v1567_v53, %v1566_v50  ;;  %v1521_v58 = vpop.f32.mrb[14].mxu0  ;;  %v1569_v59 = vpop.f32.mrb[14].mxu1 }
 0x115   : > { %v1522_v60 = vpop.f32.mrb[15].mxu0  ;;  %v1570_v61 = vpop.f32.mrb[15].mxu1 }
 0x116   : > { %1470 = vst [vmem:[%s1863_s8 + $0x10] sm:$0xff] %v1402_v54   ;;  %1478 = vst [vmem:[%s1863_s8 + $0x50] sm:$0xff] %v1442_v55   ;;  %v929_v62 = vadd.f32 %v1520_v56, %v1853_v51  ;;  %v945_v63 = vadd.f32 %v1568_v57, %v1853_v51  ;;  %v1523_v0 = vadd.f32 %v1522_v60, %v1521_v58 }
 0x117   : > { %v1571_v1 = vadd.f32 %v1570_v61, %v1569_v59 }
 0x118   : > { %v930_v2 = vadd.f32 %v1523_v0, %v1853_v51  ;;  %v961_v4 = vmax.f32 %v929_v62, 0.0  ;;  %v977_v5 = vmax.f32 %v945_v63, 0.0 }
 0x119   : > { %v946_v3 = vadd.f32 %v1571_v1, %v1853_v51 }
 0x11a   : > { %v962_v6 = vmax.f32 %v930_v2, 0.0  ;;  %v1524_v8 = vpop.f32.mrb[16].mxu0  ;;  %v1572_v9 = vpop.f32.mrb[16].mxu1 }
 0x11b   : > { %v978_v7 = vmax.f32 %v946_v3, 0.0  ;;  %v1525_v10 = vpop.f32.mrb[17].mxu0  ;;  %v1573_v11 = vpop.f32.mrb[17].mxu1 }
 0x11c   : > { %v1407_v12 = vpack.c.bf16 %v962_v6, %v961_v4  ;;  %v1526_v14 = vadd.f32 %v1525_v10, %v1524_v8  ;;  %v1574_v15 = vadd.f32 %v1573_v11, %v1572_v9  ;;  %v1527_v16 = vpop.f32.mrb[18].mxu0  ;;  %v1575_v17 = vpop.f32.mrb[18].mxu1 }
 0x11d   : > { %v1447_v13 = vpack.c.bf16 %v978_v7, %v977_v5  ;;  %v1528_v18 = vpop.f32.mrb[19].mxu0  ;;  %v1576_v19 = vpop.f32.mrb[19].mxu1 }
 0x11e   : > { %1471 = vst [vmem:[%s1863_s8 + $0x18] sm:$0xff] %v1407_v12   ;;  %v931_v20 = vadd.f32 %v1526_v14, %v1853_v51  ;;  %v947_v21 = vadd.f32 %v1574_v15, %v1853_v51  ;;  %v1529_v22 = vadd.f32 %v1528_v18, %v1527_v16  ;;  %v1577_v23 = vadd.f32 %v1576_v19, %v1575_v17 }
 0x11f   : > { %1479 = vst [vmem:[%s1863_s8 + $0x58] sm:$0xff] %v1447_v13  }
 0x120   : > { %v932_v24 = vadd.f32 %v1529_v22, %v1853_v51  ;;  %v948_v25 = vadd.f32 %v1577_v23, %v1853_v51  ;;  %v963_v26 = vmax.f32 %v931_v20, 0.0  ;;  %v979_v27 = vmax.f32 %v947_v21, 0.0 }
 0x122   : > { %v964_v28 = vmax.f32 %v932_v24, 0.0  ;;  %v980_v29 = vmax.f32 %v948_v25, 0.0  ;;  %v1530_v30 = vpop.f32.mrb[20].mxu0  ;;  %v1578_v31 = vpop.f32.mrb[20].mxu1 }
 0x123   : > { %v1531_v32 = vpop.f32.mrb[21].mxu0  ;;  %v1579_v33 = vpop.f32.mrb[21].mxu1 }
 0x124   : > { %v1412_v34 = vpack.c.bf16 %v964_v28, %v963_v26  ;;  %v1452_v35 = vpack.c.bf16 %v980_v29, %v979_v27  ;;  %v1532_v36 = vadd.f32 %v1531_v32, %v1530_v30  ;;  %v1580_v37 = vadd.f32 %v1579_v33, %v1578_v31  ;;  %v1533_v38 = vpop.f32.mrb[22].mxu0  ;;  %v1581_v39 = vpop.f32.mrb[22].mxu1 }
 0x125   : > { %v1534_v40 = vpop.f32.mrb[23].mxu0  ;;  %v1582_v41 = vpop.f32.mrb[23].mxu1 }
 0x126   : > { %1472 = vst [vmem:[%s1863_s8 + $0x20] sm:$0xff] %v1412_v34   ;;  %1480 = vst [vmem:[%s1863_s8 + $0x60] sm:$0xff] %v1452_v35   ;;  %v933_v42 = vadd.f32 %v1532_v36, %v1853_v51  ;;  %v949_v43 = vadd.f32 %v1580_v37, %v1853_v51  ;;  %v1535_v44 = vadd.f32 %v1534_v40, %v1533_v38 }
 0x127   : > { %v1583_v45 = vadd.f32 %v1582_v41, %v1581_v39 }
 0x128   : > { %v934_v46 = vadd.f32 %v1535_v44, %v1853_v51  ;;  %v965_v48 = vmax.f32 %v933_v42, 0.0  ;;  %v981_v49 = vmax.f32 %v949_v43, 0.0 }
 0x129   : > { %v950_v47 = vadd.f32 %v1583_v45, %v1853_v51 }
 0x12a   : > { %v966_v50 = vmax.f32 %v934_v46, 0.0  ;;  %v1536_v53 = vpop.f32.mrb[24].mxu0  ;;  %v1584_v54 = vpop.f32.mrb[24].mxu1 }
 0x12b   : > { %v982_v52 = vmax.f32 %v950_v47, 0.0  ;;  %v1537_v55 = vpop.f32.mrb[25].mxu0  ;;  %v1585_v56 = vpop.f32.mrb[25].mxu1 }
 0x12c   : > { %v1417_v57 = vpack.c.bf16 %v966_v50, %v965_v48  ;;  %v1538_v59 = vadd.f32 %v1537_v55, %v1536_v53  ;;  %v1586_v60 = vadd.f32 %v1585_v56, %v1584_v54  ;;  %v1539_v61 = vpop.f32.mrb[26].mxu0  ;;  %v1587_v62 = vpop.f32.mrb[26].mxu1 }
 0x12d   : > { %v1457_v58 = vpack.c.bf16 %v982_v52, %v981_v49  ;;  %v1540_v63 = vpop.f32.mrb[27].mxu0  ;;  %v1588_v0 = vpop.f32.mrb[27].mxu1 }
 0x12e   : > { %1473 = vst [vmem:[%s1863_s8 + $0x28] sm:$0xff] %v1417_v57   ;;  %v935_v1 = vadd.f32 %v1538_v59, %v1853_v51  ;;  %v951_v2 = vadd.f32 %v1586_v60, %v1853_v51  ;;  %v1541_v3 = vadd.f32 %v1540_v63, %v1539_v61  ;;  %v1589_v4 = vadd.f32 %v1588_v0, %v1587_v62 }
 0x12f   : > { %1481 = vst [vmem:[%s1863_s8 + $0x68] sm:$0xff] %v1457_v58  }
 0x130   : > { %v936_v5 = vadd.f32 %v1541_v3, %v1853_v51  ;;  %v952_v6 = vadd.f32 %v1589_v4, %v1853_v51  ;;  %v967_v7 = vmax.f32 %v935_v1, 0.0  ;;  %v983_v8 = vmax.f32 %v951_v2, 0.0 }
 0x132   : > { %v968_v9 = vmax.f32 %v936_v5, 0.0  ;;  %v984_v10 = vmax.f32 %v952_v6, 0.0  ;;  %v1542_v11 = vpop.f32.mrb[28].mxu0  ;;  %v1590_v12 = vpop.f32.mrb[28].mxu1 }
 0x133   : > { %v1543_v13 = vpop.f32.mrb[29].mxu0  ;;  %v1591_v14 = vpop.f32.mrb[29].mxu1 }
 0x134   : > { %v1422_v15 = vpack.c.bf16 %v968_v9, %v967_v7  ;;  %v1462_v16 = vpack.c.bf16 %v984_v10, %v983_v8  ;;  %v1544_v17 = vadd.f32 %v1543_v13, %v1542_v11  ;;  %v1592_v18 = vadd.f32 %v1591_v14, %v1590_v12  ;;  %v1545_v19 = vpop.f32.mrb[30].mxu0  ;;  %v1593_v20 = vpop.f32.mrb[30].mxu1 }
 0x135   : > { %v1546_v21 = vpop.f32.mrb[31].mxu0  ;;  %v1594_v22 = vpop.f32.mrb[31].mxu1 }
 0x136   : > { %1474 = vst [vmem:[%s1863_s8 + $0x30] sm:$0xff] %v1422_v15   ;;  %1482 = vst [vmem:[%s1863_s8 + $0x70] sm:$0xff] %v1462_v16   ;;  %v937_v23 = vadd.f32 %v1544_v17, %v1853_v51  ;;  %v953_v24 = vadd.f32 %v1592_v18, %v1853_v51  ;;  %v1547_v25 = vadd.f32 %v1546_v21, %v1545_v19 }
 0x137   : > { %v1595_v26 = vadd.f32 %v1594_v22, %v1593_v20 }
 0x138   : > { %v938_v27 = vadd.f32 %v1547_v25, %v1853_v51  ;;  %v969_v29 = vmax.f32 %v937_v23, 0.0  ;;  %v985_v30 = vmax.f32 %v953_v24, 0.0 }
 0x139   : > { %v954_v28 = vadd.f32 %v1595_v26, %v1853_v51 }
 0x13a   : > { %v970_v31 = vmax.f32 %v938_v27, 0.0 }
 0x13b   : > { %v986_v32 = vmax.f32 %v954_v28, 0.0 }
 0x13c   : > { %v1427_v33 = vpack.c.bf16 %v970_v31, %v969_v29 }
 0x13d   : > { %v1467_v34 = vpack.c.bf16 %v986_v32, %v985_v30 }
 0x13e   : > { %1475 = vst [vmem:[%s1863_s8 + $0x38] sm:$0xff] %v1427_v33  }
 0x13f   : > { %1483 = vst [vmem:[%s1863_s8 + $0x78] sm:$0xff] %v1467_v34  }
 0x140 PF: > { %s13_s14 = sadd.s32 1, %s1722_s14   ;;  %s1922_s12 = smov %s1718_s13 }
 0x141   : > { %p10_p5 = scmp.ge.s32.totalorder %s13_s14, 10   ;;  %s1923_s13 = smov %s1925_s15 }
 0x143   :  { %12 = sbr.rel (!%p10_p5) target bundleno = 2 (0x2), region = 76 }

// kernel: color_model_forward.22
= control target key start
LH: loop header
LB: loop body
LE: loop exit
PB: predicated region body
PF: predicated region fallthrough
CT: control target
= control target key end

     0   :  { %s1736_s12 = smov 0   ;;  %s1738_s13 = smov 0   ;;  %s1981_s0 = inlined_call_operand.vmem [shape: bf16[512,640], index: 0, kind: input, shape index: {}]   ;;  %s1982_s1 = inlined_call_operand.vmem [shape: bf16[640,128], index: 1, kind: input, shape index: {}]   ;;  %s1983_s2 = inlined_call_operand.vmem [shape: f32[1,128], index: 2, kind: input, shape index: {}]   ;;  %s1984_s3 = inlined_call_operand.vmem [shape: bf16[512,128], index: 3, kind: output, shape index: {}]  }
   0x1   :  { %s1740_s14 = smov 0   ;;  %s1742_s15 = smov 0  }
   0x2   :  { %s1744_s16 = smov 0   ;;  %s1746_s17 = smov 0  }
   0x3   :  { %s1748_s18 = smov 0  }
   0x4 LB: > { %s25_s19 = sadd.s32 1, %s1705_s16  ;;  %s32_s20 = sadd.s32 1, %s1709_s17  ;;  %s1713_s18 = sphi %s1748_s18, %s13_s18   ;;  %s1709_s17 = sphi %s1746_s17, %s1990_s17   ;;  %s1705_s16 = sphi %s1744_s16, %s1989_s16   ;;  %s1701_s15 = sphi %s1742_s15, %s1988_s15   ;;  %s1697_s14 = sphi %s1740_s14, %s1987_s14   ;;  %s1693_s13 = sphi %s1738_s13, %s1986_s13   ;;  %s1689_s12 = sphi %s1736_s12, %s1985_s12  }
   0x5   : > { %p26_p0 = scmp.ge.s32.totalorder %s25_s19, 5  ;;  %p48_p1 = scmp.ne.s32.totalorder %s1693_s13, %s1689_s12 }
   0x6   : > { %p49_p2 = scmp.eq.s32.totalorder %s1713_s18, 0  ;;  %s41_s24 = sadd.s32 1, %s1693_s13 }
   0x7   : > { %s1992_s19 = smov (%p26_p0, %s25_s19), 0  ;;  %s1994_s20 = smov (!%p26_p0, %s32_s20), %s1709_s17 }
   0x8   : > { %p50_p3 = por %p49_p2, %p48_p1  ;;  %p34_p4 = scmp.ge.s32.totalorder %s1994_s20, 2 }
   0x9   : > { %s37_s21 = ssub.s32 %s1705_s16, %s1992_s19  ;;  %p1290_p6 = scmp.ge.s32.totalorder %s1713_s18, 10 }
   0xa   : > { %s1996_s20 = smov (%p34_p4, %s1994_s20), 0 }
   0xb   : > { %s36_s22 = ssub.s32 %s1709_s17, %s1996_s20  ;;  %162 = sbr.rel (%p1290_p6) target bundleno = 46 (0x2e), region = 20 }
   0xc   : > { %s38_s23 = sor.u32 %s37_s21, %s36_s22 }
   0xd   : > { %p39_p5 = scmp.eq.s32.totalorder %s38_s23, 0 }
   0xf   : > { %s1787_s25 = scalar_select %p39_p5, %s1693_s13, %s41_s24  }
  0x12   : > { %165 = sbr.rel (!%p50_p3) target bundleno = 46 (0x2e), region = 24  ;;  %s167_s26 = sand.u32 (%p50_p3), 1, %s1693_s13  }
  0x13   : > { %s1577_s27 = smul.u32 (%p50_p3), 160, %s1709_s17  ;;  %s1291_s28 = sshll.u32 (%p50_p3), %s167_s26, 7 }
  0x14   : > { %s1801_s7 = scalar_lea.vmem (%p50_p3), [#allocation3], %s1291_s28 }
  0x15   : > { %s172_s29 = sadd.s32 (%p50_p3), %s1705_s16, %s1577_s27 }
  0x16   : > { %s1294_s30 = sshll.u32 (%p50_p3), %s172_s29, 2 }
  0x17   : > { %s1796_s6 = scalar_lea.vmem (%p50_p3), %s1981_s0, %s1294_s30 }
  0x18   : > { %v190_v0 = vld [vmem:[%s1796_s6] sm:$0xf] (%p50_p3)  ;;  %v192_v1 = vld [vmem:[%s1796_s6 + $0x14] sm:$0xf] (%p50_p3)  ;;  %v194_v2 = vld [vmem:[%s1796_s6 + $0x28] sm:$0xf] (%p50_p3) }
  0x19   : > { %191 = vst [vmem:[%s1801_s7] sm:$0xf] %v190_v0  ;;  %193 = vst [vmem:[%s1801_s7 + $0x4] sm:$0xf] %v192_v1  ;;  %v196_v3 = vld [vmem:[%s1796_s6 + $0x3c] sm:$0xf] }
  0x1a   : > { %195 = vst [vmem:[%s1801_s7 + $0x8] sm:$0xf] %v194_v2  ;;  %v198_v4 = vld [vmem:[%s1796_s6 + $0x50] sm:$0xf]  ;;  %v200_v5 = vld [vmem:[%s1796_s6 + $0x64] sm:$0xf] }
  0x1b   : > { %197 = vst [vmem:[%s1801_s7 + $0xc] sm:$0xf] %v196_v3  ;;  %199 = vst [vmem:[%s1801_s7 + $0x10] sm:$0xf] %v198_v4  ;;  %v202_v6 = vld [vmem:[%s1796_s6 + $0x78] sm:$0xf] }
  0x1c   : > { %201 = vst [vmem:[%s1801_s7 + $0x14] sm:$0xf] %v200_v5  ;;  %v204_v7 = vld [vmem:[%s1796_s6 + $0x8c] sm:$0xf]  ;;  %v206_v8 = vld [vmem:[%s1796_s6 + $0xa0] sm:$0xf] }
  0x1d   : > { %203 = vst [vmem:[%s1801_s7 + $0x18] sm:$0xf] %v202_v6  ;;  %205 = vst [vmem:[%s1801_s7 + $0x1c] sm:$0xf] %v204_v7  ;;  %v208_v9 = vld [vmem:[%s1796_s6 + $0xb4] sm:$0xf] }
  0x1e   : > { %207 = vst [vmem:[%s1801_s7 + $0x20] sm:$0xf] %v206_v8  ;;  %v210_v10 = vld [vmem:[%s1796_s6 + $0xc8] sm:$0xf]  ;;  %v212_v11 = vld [vmem:[%s1796_s6 + $0xdc] sm:$0xf] }
  0x1f   : > { %209 = vst [vmem:[%s1801_s7 + $0x24] sm:$0xf] %v208_v9  ;;  %211 = vst [vmem:[%s1801_s7 + $0x28] sm:$0xf] %v210_v10  ;;  %v214_v12 = vld [vmem:[%s1796_s6 + $0xf0] sm:$0xf] }
  0x20   : > { %213 = vst [vmem:[%s1801_s7 + $0x2c] sm:$0xf] %v212_v11  ;;  %v216_v13 = vld [vmem:[%s1796_s6 + $0x104] sm:$0xf]  ;;  %v218_v14 = vld [vmem:[%s1796_s6 + $0x118] sm:$0xf] }
  0x21   : > { %215 = vst [vmem:[%s1801_s7 + $0x30] sm:$0xf] %v214_v12  ;;  %217 = vst [vmem:[%s1801_s7 + $0x34] sm:$0xf] %v216_v13  ;;  %v220_v15 = vld [vmem:[%s1796_s6 + $0x12c] sm:$0xf] }
  0x22   : > { %219 = vst [vmem:[%s1801_s7 + $0x38] sm:$0xf] %v218_v14  ;;  %v222_v16 = vld [vmem:[%s1796_s6 + $0x140] sm:$0xf]  ;;  %v224_v17 = vld [vmem:[%s1796_s6 + $0x154] sm:$0xf] }
  0x23   : > { %221 = vst [vmem:[%s1801_s7 + $0x3c] sm:$0xf] %v220_v15  ;;  %223 = vst [vmem:[%s1801_s7 + $0x40] sm:$0xf] %v222_v16  ;;  %v226_v18 = vld [vmem:[%s1796_s6 + $0x168] sm:$0xf] }
  0x24   : > { %225 = vst [vmem:[%s1801_s7 + $0x44] sm:$0xf] %v224_v17  ;;  %v228_v19 = vld [vmem:[%s1796_s6 + $0x17c] sm:$0xf]  ;;  %v230_v20 = vld [vmem:[%s1796_s6 + $0x190] sm:$0xf] }
  0x25   : > { %227 = vst [vmem:[%s1801_s7 + $0x48] sm:$0xf] %v226_v18  ;;  %229 = vst [vmem:[%s1801_s7 + $0x4c] sm:$0xf] %v228_v19  ;;  %v232_v21 = vld [vmem:[%s1796_s6 + $0x1a4] sm:$0xf] }
  0x26   : > { %231 = vst [vmem:[%s1801_s7 + $0x50] sm:$0xf] %v230_v20  ;;  %v234_v22 = vld [vmem:[%s1796_s6 + $0x1b8] sm:$0xf]  ;;  %v236_v23 = vld [vmem:[%s1796_s6 + $0x1cc] sm:$0xf] }
  0x27   : > { %233 = vst [vmem:[%s1801_s7 + $0x54] sm:$0xf] %v232_v21  ;;  %235 = vst [vmem:[%s1801_s7 + $0x58] sm:$0xf] %v234_v22  ;;  %v238_v24 = vld [vmem:[%s1796_s6 + $0x1e0] sm:$0xf] }
  0x28   : > { %237 = vst [vmem:[%s1801_s7 + $0x5c] sm:$0xf] %v236_v23  ;;  %v240_v25 = vld [vmem:[%s1796_s6 + $0x1f4] sm:$0xf]  ;;  %v242_v26 = vld [vmem:[%s1796_s6 + $0x208] sm:$0xf] }
  0x29   : > { %239 = vst [vmem:[%s1801_s7 + $0x60] sm:$0xf] %v238_v24  ;;  %241 = vst [vmem:[%s1801_s7 + $0x64] sm:$0xf] %v240_v25  ;;  %v244_v27 = vld [vmem:[%s1796_s6 + $0x21c] sm:$0xf] }
  0x2a   : > { %243 = vst [vmem:[%s1801_s7 + $0x68] sm:$0xf] %v242_v26  ;;  %v246_v28 = vld [vmem:[%s1796_s6 + $0x230] sm:$0xf]  ;;  %v248_v29 = vld [vmem:[%s1796_s6 + $0x244] sm:$0xf] }
  0x2b   : > { %245 = vst [vmem:[%s1801_s7 + $0x6c] sm:$0xf] %v244_v27  ;;  %247 = vst [vmem:[%s1801_s7 + $0x70] sm:$0xf] %v246_v28  ;;  %v250_v30 = vld [vmem:[%s1796_s6 + $0x258] sm:$0xf] }
  0x2c   : > { %249 = vst [vmem:[%s1801_s7 + $0x74] sm:$0xf] %v248_v29  ;;  %v252_v31 = vld [vmem:[%s1796_s6 + $0x26c] sm:$0xf]  ;;  %251 = vst [vmem:[%s1801_s7 + $0x78] sm:$0xf] %v250_v30 }
  0x2d   : > { %253 = vst [vmem:[%s1801_s7 + $0x7c] sm:$0xf] %v252_v31 }
  0x2e PF: > { %p1295_p7 = scmp.ge.s32.totalorder %s1713_s18, 1  ;;  %p351_p8 = scmp.lt.s32.totalorder %s1713_s18, 11 }
  0x30   : > { %p352_p9 = pnand %p1295_p7, %p351_p8 }
  0x31   : > { %s358_s8 = sand.u32 (!%p352_p9), 1, %s1689_s12   ;;  %s1297_s9 = sshll.u32 (!%p352_p9), %s1697_s14, 4 }
  0x32   : > { %355 = sbr.rel (%p352_p9) target bundleno = 366 (0x16e), region = 69  ;;  %s1296_s10 = sshll.u32 (!%p352_p9), %s358_s8, 7 }
  0x33   : > { %p397_p10 = scmp.lt.s32.totalorder (!%p352_p9), %s1297_s9, 79  ;;  %s1299_s11 = sshll.u32 (!%p352_p9), %s1701_s15, 5 }
  0x34   : > { %p409_p11 = scmp.lt.s32.totalorder (!%p352_p9), %s1299_s11, 63  ;;  %s1879_s12 = scalar_lea.vmem (!%p352_p9), [#allocation3], %s1296_s10 }
  0x35   : > { %p1301_p12 = scmp.ne.s32.totalorder (!%p352_p9), %s1697_s14, 0 }
  0x39   : > { %s1998_s9 = smov (!%p397_p10, %s1297_s9), 79  ;;  %s2000_s11 = smov (!%p409_p11, %s1299_s11), 63 }
  0x3a   : > { %s1298_s21 = sshll.u32 %s1998_s9, 2  ;;  %s1300_s26 = sshll.u32 %s2000_s11, 2  ;;  %v1715_v32 = vmov (!%p1301_p12), 0.0  }
  0x3b   : > { %s1872_s24 = scalar_lea.vmem %s1982_s1, %s1298_s21  ;;  %s1877_s29 = scalar_lea.vmem %s1984_s3, %s1300_s26  ;;  %422 = vst [vmem:[#allocation2] sm:$0xff] (!%p1301_p12), %v1715_v32  ;;  %423 = vst [vmem:[#allocation2 + $0x8] sm:$0xff] (!%p1301_p12), %v1715_v32 }
  0x3c   : > { %421 = sbr.rel (%p1301_p12) target bundleno = 75 (0x4b), region = 77  ;;  %424 = vst [vmem:[#allocation2 + $0x10] sm:$0xff] (!%p1301_p12), %v1715_v32  ;;  %425 = vst [vmem:[#allocation2 + $0x18] sm:$0xff] (!%p1301_p12), %v1715_v32 }
  0x3d   : > { %426 = vst [vmem:[#allocation2 + $0x20] sm:$0xff] (!%p1301_p12), %v1715_v32  ;;  %427 = vst [vmem:[#allocation2 + $0x28] sm:$0xff] (!%p1301_p12), %v1715_v32 }
  0x3e   : > { %428 = vst [vmem:[#allocation2 + $0x30] sm:$0xff] (!%p1301_p12), %v1715_v32  ;;  %429 = vst [vmem:[#allocation2 + $0x38] sm:$0xff] (!%p1301_p12), %v1715_v32 }
  0x3f   : > { %430 = vst [vmem:[#allocation2 + $0x40] sm:$0xff] (!%p1301_p12), %v1715_v32  ;;  %431 = vst [vmem:[#allocation2 + $0x48] sm:$0xff] (!%p1301_p12), %v1715_v32 }
  0x40   : > { %432 = vst [vmem:[#allocation2 + $0x50] sm:$0xff] (!%p1301_p12), %v1715_v32  ;;  %433 = vst [vmem:[#allocation2 + $0x58] sm:$0xff] (!%p1301_p12), %v1715_v32 }
  0x41   : > { %434 = vst [vmem:[#allocation2 + $0x60] sm:$0xff] (!%p1301_p12), %v1715_v32  ;;  %435 = vst [vmem:[#allocation2 + $0x68] sm:$0xff] (!%p1301_p12), %v1715_v32 }
  0x42   : > { %436 = vst [vmem:[#allocation2 + $0x70] sm:$0xff] (!%p1301_p12), %v1715_v32  ;;  %437 = vst [vmem:[#allocation2 + $0x78] sm:$0xff] (!%p1301_p12), %v1715_v32 }
  0x43   : > { %438 = vst [vmem:[#allocation2 + $0x80] sm:$0xff] %v1715_v32  ;;  %439 = vst [vmem:[#allocation2 + $0x88] sm:$0xff] %v1715_v32 }
  0x44   : > { %440 = vst [vmem:[#allocation2 + $0x90] sm:$0xff] %v1715_v32  ;;  %441 = vst [vmem:[#allocation2 + $0x98] sm:$0xff] %v1715_v32 }
  0x45   : > { %442 = vst [vmem:[#allocation2 + $0xa0] sm:$0xff] %v1715_v32  ;;  %443 = vst [vmem:[#allocation2 + $0xa8] sm:$0xff] %v1715_v32 }
  0x46   : > { %444 = vst [vmem:[#allocation2 + $0xb0] sm:$0xff] %v1715_v32  ;;  %445 = vst [vmem:[#allocation2 + $0xb8] sm:$0xff] %v1715_v32 }
  0x47   : > { %446 = vst [vmem:[#allocation2 + $0xc0] sm:$0xff] %v1715_v32  ;;  %447 = vst [vmem:[#allocation2 + $0xc8] sm:$0xff] %v1715_v32 }
  0x48   : > { %448 = vst [vmem:[#allocation2 + $0xd0] sm:$0xff] %v1715_v32  ;;  %449 = vst [vmem:[#allocation2 + $0xd8] sm:$0xff] %v1715_v32 }
  0x49   : > { %450 = vst [vmem:[#allocation2 + $0xe0] sm:$0xff] %v1715_v32  ;;  %451 = vst [vmem:[#allocation2 + $0xe8] sm:$0xff] %v1715_v32 }
  0x4a   : > { %452 = vst [vmem:[#allocation2 + $0xf0] sm:$0xff] %v1715_v32  ;;  %453 = vst [vmem:[#allocation2 + $0xf8] sm:$0xff] %v1715_v32 }
  0x4b PF: > { %v1635_v33 = vld [vmem:[%s1872_s24] sm:$0xff]   ;;  %v1636_v34 = vld [vmem:[%s1872_s24 + $0x8] sm:$0xff]   ;;  %v1637_v35 = vld [vmem:[%s1872_s24 + $0x10] sm:$0xff]   ;;  %p1326_p13 = scmp.ne.s32.totalorder %s1697_s14, 4 }
  0x4c   : > { %1513 = vmatprep.subr.bf16.mxu0 %v1635_v33  ;;  %1561 = vmatprep.subr.bf16.mxu1 %v1635_v33  ;;  %v1638_v36 = vld [vmem:[%s1872_s24 + $0x18] sm:$0xff]   ;;  %v1643_v37 = vld [vmem:[%s1879_s12] sm:$0xff]   ;;  %v1640_v40 = vld [vmem:[%s1872_s24 + $0x28] sm:$0xff]  }
  0x4d   : > { %1514 = vmatpush3.bf16.msra.mxu0 %v1635_v33  ;;  %1569 = vmatpush3.bf16.msra.mxu1 %v1635_v33  ;;  %v1644_v38 = vld [vmem:[%s1879_s12 + $0x40] sm:$0xff]   ;;  %v1641_v41 = vld [vmem:[%s1872_s24 + $0x30] sm:$0xff]   ;;  %v1642_v42 = vld [vmem:[%s1872_s24 + $0x38] sm:$0xff]  }
  0x4e   : > { %1515 = vmatprep.subr.bf16.mxu0 %v1636_v34  ;;  %1562 = vmatprep.subr.bf16.mxu1 %v1636_v34  ;;  %v1639_v39 = vld [vmem:[%s1872_s24 + $0x20] sm:$0xff]   ;;  %v1645_v43 = vld [vmem:[%s1879_s12 + $0x8] sm:$0xff]   ;;  %v1647_v45 = vld [vmem:[%s1879_s12 + $0x10] sm:$0xff]  }
  0x4f   : > { %1529 = vmatprep.mubr.bf16.mxu0 %v1643_v37  ;;  %1545 = vmatprep.mubr.bf16.mxu1 %v1644_v38  ;;  %v1646_v44 = vld [vmem:[%s1879_s12 + $0x48] sm:$0xff]   ;;  %v1648_v46 = vld [vmem:[%s1879_s12 + $0x50] sm:$0xff]   ;;  %v1649_v47 = vld [vmem:[%s1879_s12 + $0x18] sm:$0xff]  }
  0x50   : > { %v1650_v48 = vld [vmem:[%s1879_s12 + $0x58] sm:$0xff]   ;;  %v1651_v49 = vld [vmem:[%s1879_s12 + $0x20] sm:$0xff]   ;;  %v1653_v51 = vld [vmem:[%s1879_s12 + $0x28] sm:$0xff]  }
  0x51   : > { %1516 = vmatpush3.bf16.msra.mxu0 %v1636_v34  ;;  %1570 = vmatpush3.bf16.msra.mxu1 %v1636_v34  ;;  %v1652_v50 = vld [vmem:[%s1879_s12 + $0x60] sm:$0xff]   ;;  %v1654_v52 = vld [vmem:[%s1879_s12 + $0x68] sm:$0xff]   ;;  %v1655_v53 = vld [vmem:[%s1879_s12 + $0x30] sm:$0xff]  }
  0x52   : > { %1517 = vmatprep.subr.bf16.mxu0 %v1637_v35  ;;  %1563 = vmatprep.subr.bf16.mxu1 %v1637_v35  ;;  %v1656_v54 = vld [vmem:[%s1879_s12 + $0x70] sm:$0xff]   ;;  %v1657_v55 = vld [vmem:[%s1879_s12 + $0x38] sm:$0xff]   ;;  %v454_v59 = vld [vmem:[#allocation2] sm:$0xff] }
  0x53   : > { %v1658_v56 = vld [vmem:[%s1879_s12 + $0x78] sm:$0xff]   ;;  %v456_v57 = vld [vmem:[#allocation2 + $0x10] sm:$0xff]  ;;  %v470_v60 = vld [vmem:[#allocation2 + $0x80] sm:$0xff] }
  0x54   : > { %v472_v58 = vld [vmem:[#allocation2 + $0x90] sm:$0xff]  ;;  %v457_v63 = vld [vmem:[#allocation2 + $0x18] sm:$0xff]  ;;  %v455_v5 = vld [vmem:[#allocation2 + $0x8] sm:$0xff] }
  0x55   : > { %1518 = vmatpush3.bf16.msra.mxu0 %v1637_v35  ;;  %1571 = vmatpush3.bf16.msra.mxu1 %v1637_v35  ;;  %v473_v0 = vld [vmem:[#allocation2 + $0x98] sm:$0xff]  ;;  %v471_v6 = vld [vmem:[#allocation2 + $0x88] sm:$0xff]  ;;  %v460_v17 = vld [vmem:[#allocation2 + $0x30] sm:$0xff] }
  0x56   : > { %1519 = vmatprep.subr.bf16.mxu0 %v1638_v36  ;;  %1564 = vmatprep.subr.bf16.mxu1 %v1638_v36  ;;  %v476_v18 = vld [vmem:[#allocation2 + $0xb0] sm:$0xff]  ;;  %v458_v19 = vld [vmem:[#allocation2 + $0x20] sm:$0xff]  ;;  %v461_v23 = vld [vmem:[#allocation2 + $0x38] sm:$0xff] }
  0x57   : > { %v474_v20 = vld [vmem:[#allocation2 + $0xa0] sm:$0xff]  ;;  %v477_v24 = vld [vmem:[#allocation2 + $0xb8] sm:$0xff]  ;;  %v459_v29 = vld [vmem:[#allocation2 + $0x28] sm:$0xff] }
  0x58   : > { %v475_v30 = vld [vmem:[#allocation2 + $0xa8] sm:$0xff] }
  0x59   : > { %1520 = vmatpush3.bf16.msra.mxu0 %v1638_v36  ;;  %1572 = vmatpush3.bf16.msra.mxu1 %v1638_v36 }
  0x5a   : > { %1521 = vmatprep.subr.bf16.mxu0 %v1639_v39  ;;  %1565 = vmatprep.subr.bf16.mxu1 %v1639_v39 }
  0x5d   : > { %1522 = vmatpush3.bf16.msra.mxu0 %v1639_v39  ;;  %1573 = vmatpush3.bf16.msra.mxu1 %v1639_v39 }
  0x5e   : > { %1523 = vmatprep.subr.bf16.mxu0 %v1640_v40  ;;  %1566 = vmatprep.subr.bf16.mxu1 %v1640_v40 }
  0x61   : > { %1524 = vmatpush3.bf16.msra.mxu0 %v1640_v40  ;;  %1574 = vmatpush3.bf16.msra.mxu1 %v1640_v40 }
  0x62   : > { %1525 = vmatprep.subr.bf16.mxu0 %v1641_v41  ;;  %1567 = vmatprep.subr.bf16.mxu1 %v1641_v41 }
  0x65   : > { %1526 = vmatpush3.bf16.msra.mxu0 %v1641_v41  ;;  %1575 = vmatpush3.bf16.msra.mxu1 %v1641_v41  ;;  %v464_v41 = vld [vmem:[#allocation2 + $0x50] sm:$0xff] }
  0x66   : > { %1527 = vmatprep.subr.bf16.mxu0 %v1642_v42  ;;  %1568 = vmatprep.subr.bf16.mxu1 %v1642_v42 }
  0x69   : > { %1528 = vmatpush3.bf16.msra.mxu0 %v1642_v42  ;;  %1576 = vmatpush3.bf16.msra.mxu1 %v1642_v42  ;;  %v480_v42 = vld [vmem:[#allocation2 + $0xd0] sm:$0xff] }
  0x6c   : > { %1530 = vmatmul.mubr.bf16.vlgmr.msra.gmra.mrb[0].mxu0 %v1645_v43  ;;  %1546 = vmatmul.mubr.bf16.vlgmr.msra.gmra.mrb[0].mxu1 %v1646_v44  ;;  %v462_v43 = vld [vmem:[#allocation2 + $0x40] sm:$0xff] }
  0x6d   : > { %1533 = vmatprep.mubr.bf16.mxu0 %v1647_v45  ;;  %1549 = vmatprep.mubr.bf16.mxu1 %v1648_v46  ;;  %v478_v44 = vld [vmem:[#allocation2 + $0xc0] sm:$0xff] }
  0x74   : > { %1534 = vmatmul.mubr.bf16.gmra.mrb[4].mxu0 %v1649_v47  ;;  %1550 = vmatmul.mubr.bf16.gmra.mrb[4].mxu1 %v1650_v48  ;;  %v465_v47 = vld [vmem:[#allocation2 + $0x58] sm:$0xff] }
  0x75   : > { %1537 = vmatprep.mubr.bf16.mxu0 %v1651_v49  ;;  %1553 = vmatprep.mubr.bf16.mxu1 %v1652_v50  ;;  %v481_v48 = vld [vmem:[#allocation2 + $0xd8] sm:$0xff] }
  0x7c   : > { %1538 = vmatmul.mubr.bf16.gmra.mrb[8].mxu0 %v1653_v51  ;;  %1554 = vmatmul.mubr.bf16.gmra.mrb[8].mxu1 %v1654_v52 }
  0x7d   : > { %1541 = vmatprep.mubr.bf16.mxu0 %v1655_v53  ;;  %1557 = vmatprep.mubr.bf16.mxu1 %v1656_v54  ;;  %v463_v53 = vld [vmem:[#allocation2 + $0x48] sm:$0xff] }
  0x7e   : > { %v479_v54 = vld [vmem:[#allocation2 + $0xc8] sm:$0xff] }
  0x84   : > { %1542 = vmatmul.mubr.bf16.gmra.mrb[12].mxu0 %v1657_v55  ;;  %1558 = vmatmul.mubr.bf16.gmra.mrb[12].mxu1 %v1658_v56 }
 0x13f   : > { %v1531_v61 = vpop.f32.mrb[0].mxu0  ;;  %v1547_v62 = vpop.f32.mrb[0].mxu1 }
 0x140   : > { %v841_v1 = vadd.f32 %v1531_v61, %v456_v57  ;;  %v857_v2 = vadd.f32 %v1547_v62, %v472_v58  ;;  %v712_v3 = vpop.f32.mrb[1].mxu0  ;;  %v776_v4 = vpop.f32.mrb[1].mxu1 }
 0x141   : > { %v839_v7 = vadd.f32 %v712_v3, %v454_v59  ;;  %v855_v8 = vadd.f32 %v776_v4, %v470_v60  ;;  %v1532_v9 = vpop.f32.mrb[2].mxu0  ;;  %v1548_v10 = vpop.f32.mrb[2].mxu1  ;;  %v466_v3 = vld [vmem:[#allocation2 + $0x60] sm:$0xff] }
 0x142   : > { %873 = vst [vmem:[#allocation2 + $0x10] sm:$0xff] %v841_v1  ;;  %889 = vst [vmem:[#allocation2 + $0x90] sm:$0xff] %v857_v2  ;;  %v842_v11 = vadd.f32 %v1532_v9, %v457_v63  ;;  %v858_v12 = vadd.f32 %v1548_v10, %v473_v0  ;;  %v715_v13 = vpop.f32.mrb[3].mxu0  ;;  %v779_v14 = vpop.f32.mrb[3].mxu1  ;;  %v468_v1 = vld [vmem:[#allocation2 + $0x70] sm:$0xff]  ;;  %v482_v4 = vld [vmem:[#allocation2 + $0xe0] sm:$0xff] }
 0x143   : > { %871 = vst [vmem:[#allocation2] sm:$0xff] %v839_v7  ;;  %887 = vst [vmem:[#allocation2 + $0x80] sm:$0xff] %v855_v8  ;;  %v840_v15 = vadd.f32 %v715_v13, %v455_v5  ;;  %v856_v16 = vadd.f32 %v779_v14, %v471_v6  ;;  %v484_v2 = vld [vmem:[#allocation2 + $0xf0] sm:$0xff]  ;;  %v469_v7 = vld [vmem:[#allocation2 + $0x78] sm:$0xff] }
 0x144   : > { %874 = vst [vmem:[#allocation2 + $0x18] sm:$0xff] %v842_v11  ;;  %890 = vst [vmem:[#allocation2 + $0x98] sm:$0xff] %v858_v12  ;;  %v485_v8 = vld [vmem:[#allocation2 + $0xf8] sm:$0xff]  ;;  %v467_v13 = vld [vmem:[#allocation2 + $0x68] sm:$0xff] }
 0x145   : > { %872 = vst [vmem:[#allocation2 + $0x8] sm:$0xff] %v840_v15  ;;  %888 = vst [vmem:[#allocation2 + $0x88] sm:$0xff] %v856_v16  ;;  %v483_v14 = vld [vmem:[#allocation2 + $0xe8] sm:$0xff] }
 0x147   : > { %v1535_v21 = vpop.f32.mrb[4].mxu0  ;;  %v1551_v22 = vpop.f32.mrb[4].mxu1 }
 0x148   : > { %v845_v25 = vadd.f32 %v1535_v21, %v460_v17  ;;  %v861_v26 = vadd.f32 %v1551_v22, %v476_v18  ;;  %v728_v27 = vpop.f32.mrb[5].mxu0  ;;  %v792_v28 = vpop.f32.mrb[5].mxu1 }
 0x149   : > { %v843_v31 = vadd.f32 %v728_v27, %v458_v19  ;;  %v859_v32 = vadd.f32 %v792_v28, %v474_v20  ;;  %v1536_v33 = vpop.f32.mrb[6].mxu0  ;;  %v1552_v34 = vpop.f32.mrb[6].mxu1  ;;  %v1910_v27 = vld [vmem:[%s1983_s2] ss:$0 sm:$0xff] (!%p1326_p13) }
 0x14a   : > { %877 = vst [vmem:[#allocation2 + $0x30] sm:$0xff] %v845_v25  ;;  %893 = vst [vmem:[#allocation2 + $0xb0] sm:$0xff] %v861_v26  ;;  %v846_v35 = vadd.f32 %v1536_v33, %v461_v23  ;;  %v862_v36 = vadd.f32 %v1552_v34, %v477_v24  ;;  %v731_v37 = vpop.f32.mrb[7].mxu0  ;;  %v795_v38 = vpop.f32.mrb[7].mxu1  ;;  %v907_v25 = vld [vmem:[#allocation2] sm:$0xff] (!%p1326_p13) }
 0x14b   : > { %875 = vst [vmem:[#allocation2 + $0x20] sm:$0xff] %v843_v31  ;;  %891 = vst [vmem:[#allocation2 + $0xa0] sm:$0xff] %v859_v32  ;;  %v844_v39 = vadd.f32 %v731_v37, %v459_v29  ;;  %v860_v40 = vadd.f32 %v795_v38, %v475_v30  ;;  %v946_v28 = vadd.f32 (!%p1326_p13), %v1910_v27, %v907_v25  ;;  %v909_v30 = vld [vmem:[#allocation2 + $0x10] sm:$0xff] (!%p1326_p13)  ;;  %v910_v31 = vld [vmem:[#allocation2 + $0x18] sm:$0xff] (!%p1326_p13) }
 0x14c   : > { %878 = vst [vmem:[#allocation2 + $0x38] sm:$0xff] %v846_v35  ;;  %894 = vst [vmem:[#allocation2 + $0xb8] sm:$0xff] %v862_v36  ;;  %v908_v26 = vld [vmem:[#allocation2 + $0x8] sm:$0xff] (!%p1326_p13)  ;;  %v948_v33 = vadd.f32 (!%p1326_p13), %v1910_v27, %v909_v30  ;;  %v949_v34 = vadd.f32 (!%p1326_p13), %v1910_v27, %v910_v31 }
 0x14d   : > { %876 = vst [vmem:[#allocation2 + $0x28] sm:$0xff] %v844_v39  ;;  %892 = vst [vmem:[#allocation2 + $0xa8] sm:$0xff] %v860_v40  ;;  %v947_v29 = vadd.f32 (!%p1326_p13), %v1910_v27, %v908_v26  ;;  %v978_v39 = vmax.f32 (!%p1326_p13), %v946_v28, 0.0 }
 0x14f   : > { %v1539_v45 = vpop.f32.mrb[8].mxu0  ;;  %v1555_v46 = vpop.f32.mrb[8].mxu1  ;;  %v979_v40 = vmax.f32 (!%p1326_p13), %v947_v29, 0.0 }
 0x150   : > { %v849_v49 = vadd.f32 %v1539_v45, %v464_v41  ;;  %v865_v50 = vadd.f32 %v1555_v46, %v480_v42  ;;  %v744_v51 = vpop.f32.mrb[9].mxu0  ;;  %v808_v52 = vpop.f32.mrb[9].mxu1  ;;  %v980_v46 = vmax.f32 (!%p1326_p13), %v948_v33, 0.0 }
 0x151   : > { %v847_v55 = vadd.f32 %v744_v51, %v462_v43  ;;  %v863_v56 = vadd.f32 %v808_v52, %v478_v44  ;;  %v1540_v57 = vpop.f32.mrb[10].mxu0  ;;  %v1556_v58 = vpop.f32.mrb[10].mxu1  ;;  %v913_v37 = vld [vmem:[#allocation2 + $0x30] sm:$0xff] (!%p1326_p13)  ;;  %v1397_v52 = vpack.c.bf16 (!%p1326_p13), %v979_v40, %v978_v39 }
 0x152   : > { %881 = vst [vmem:[#allocation2 + $0x50] sm:$0xff] %v849_v49  ;;  %897 = vst [vmem:[#allocation2 + $0xd0] sm:$0xff] %v865_v50  ;;  %v850_v59 = vadd.f32 %v1540_v57, %v465_v47  ;;  %v866_v60 = vadd.f32 %v1556_v58, %v481_v48  ;;  %v747_v61 = vpop.f32.mrb[11].mxu0  ;;  %v811_v62 = vpop.f32.mrb[11].mxu1  ;;  %v911_v32 = vld [vmem:[#allocation2 + $0x20] sm:$0xff] (!%p1326_p13)  ;;  %v952_v42 = vadd.f32 (!%p1326_p13), %v1910_v27, %v913_v37  ;;  %v981_v47 = vmax.f32 (!%p1326_p13), %v949_v34, 0.0 }
 0x153   : > { %879 = vst [vmem:[#allocation2 + $0x40] sm:$0xff] %v847_v55  ;;  %895 = vst [vmem:[#allocation2 + $0xc0] sm:$0xff] %v863_v56  ;;  %v848_v63 = vadd.f32 %v747_v61, %v463_v53  ;;  %v864_v0 = vadd.f32 %v811_v62, %v479_v54  ;;  %v950_v36 = vadd.f32 (!%p1326_p13), %v1910_v27, %v911_v32  ;;  %v914_v38 = vld [vmem:[#allocation2 + $0x38] sm:$0xff] (!%p1326_p13)  ;;  %v929_v25 = vld [vmem:[#allocation2 + $0xb0] sm:$0xff] (!%p1326_p13) }
 0x154   : > { %882 = vst [vmem:[#allocation2 + $0x58] sm:$0xff] %v850_v59  ;;  %898 = vst [vmem:[#allocation2 + $0xd8] sm:$0xff] %v866_v60  ;;  %v912_v35 = vld [vmem:[#allocation2 + $0x28] sm:$0xff] (!%p1326_p13)  ;;  %v953_v49 = vadd.f32 (!%p1326_p13), %v1910_v27, %v914_v38  ;;  %v984_v54 = vmax.f32 (!%p1326_p13), %v952_v42, 0.0  ;;  %v1402_v57 = vpack.c.bf16 (!%p1326_p13), %v981_v47, %v980_v46  ;;  %v930_v26 = vld [vmem:[#allocation2 + $0xb8] sm:$0xff] (!%p1326_p13) }
 0x155   : > { %880 = vst [vmem:[#allocation2 + $0x48] sm:$0xff] %v848_v63  ;;  %896 = vst [vmem:[#allocation2 + $0xc8] sm:$0xff] %v864_v0  ;;  %v951_v41 = vadd.f32 (!%p1326_p13), %v1910_v27, %v912_v35  ;;  %v982_v48 = vmax.f32 (!%p1326_p13), %v950_v36, 0.0  ;;  %v969_v42 = vadd.f32 (!%p1326_p13), %v1910_v27, %v930_v26 }
 0x156   : > { %v985_v58 = vmax.f32 (!%p1326_p13), %v953_v49, 0.0  ;;  %1398 = vst [vmem:[%s1877_s29] sm:$0xff] (!%p1326_p13), %v1397_v52   ;;  %1474 = vst [vmem:[%s1877_s29 + $0x8] sm:$0xff] (!%p1326_p13), %v1402_v57  }
 0x157   : > { %v1543_v5 = vpop.f32.mrb[12].mxu0  ;;  %v1559_v6 = vpop.f32.mrb[12].mxu1  ;;  %906 = sbr.rel (%p1326_p13) target bundleno = 366 (0x16e), region = 81  ;;  %v983_v53 = vmax.f32 (!%p1326_p13), %v951_v41, 0.0  ;;  %v968_v41 = vadd.f32 (!%p1326_p13), %v1910_v27, %v929_v25  ;;  %v1001_v52 = vmax.f32 (!%p1326_p13), %v969_v42, 0.0 }
 0x158   : > { %v853_v9 = vadd.f32 %v1543_v5, %v468_v1  ;;  %v869_v10 = vadd.f32 %v1559_v6, %v484_v2  ;;  %v760_v11 = vpop.f32.mrb[13].mxu0  ;;  %v824_v12 = vpop.f32.mrb[13].mxu1  ;;  %v1412_v5 = vpack.c.bf16 (!%p1326_p13), %v985_v58, %v984_v54 }
 0x159   : > { %v851_v15 = vadd.f32 %v760_v11, %v466_v3  ;;  %v867_v16 = vadd.f32 %v824_v12, %v482_v4  ;;  %v1544_v17 = vpop.f32.mrb[14].mxu0  ;;  %v1560_v18 = vpop.f32.mrb[14].mxu1  ;;  %v917_v45 = vld [vmem:[#allocation2 + $0x50] sm:$0xff] (!%p1326_p13)  ;;  %v1407_v63 = vpack.c.bf16 (!%p1326_p13), %v983_v53, %v982_v48  ;;  %v923_v3 = vld [vmem:[#allocation2 + $0x80] sm:$0xff] (!%p1326_p13)  ;;  %v924_v4 = vld [vmem:[#allocation2 + $0x88] sm:$0xff] (!%p1326_p13) }
 0x15a   : > { %885 = vst [vmem:[#allocation2 + $0x70] sm:$0xff] %v853_v9  ;;  %901 = vst [vmem:[#allocation2 + $0xf0] sm:$0xff] %v869_v10  ;;  %v854_v19 = vadd.f32 %v1544_v17, %v469_v7  ;;  %v870_v20 = vadd.f32 %v1560_v18, %v485_v8  ;;  %v763_v21 = vpop.f32.mrb[15].mxu0  ;;  %v827_v22 = vpop.f32.mrb[15].mxu1  ;;  %v915_v43 = vld [vmem:[#allocation2 + $0x40] sm:$0xff] (!%p1326_p13)  ;;  %v956_v60 = vadd.f32 (!%p1326_p13), %v1910_v27, %v917_v45  ;;  %v925_v9 = vld [vmem:[#allocation2 + $0x90] sm:$0xff] (!%p1326_p13) }
 0x15b   : > { %883 = vst [vmem:[#allocation2 + $0x60] sm:$0xff] %v851_v15  ;;  %899 = vst [vmem:[#allocation2 + $0xe0] sm:$0xff] %v867_v16  ;;  %v852_v23 = vadd.f32 %v763_v21, %v467_v13  ;;  %v868_v24 = vadd.f32 %v827_v22, %v483_v14  ;;  %v918_v50 = vld [vmem:[#allocation2 + $0x58] sm:$0xff] (!%p1326_p13)  ;;  %v954_v55 = vadd.f32 (!%p1326_p13), %v1910_v27, %v915_v43  ;;  %v931_v32 = vld [vmem:[#allocation2 + $0xc0] sm:$0xff] (!%p1326_p13) }
 0x15c   : > { %886 = vst [vmem:[#allocation2 + $0x78] sm:$0xff] %v854_v19  ;;  %902 = vst [vmem:[#allocation2 + $0xf8] sm:$0xff] %v870_v20  ;;  %v916_v44 = vld [vmem:[#allocation2 + $0x48] sm:$0xff] (!%p1326_p13)  ;;  %v957_v1 = vadd.f32 (!%p1326_p13), %v1910_v27, %v918_v50  ;;  %v988_v7 = vmax.f32 (!%p1326_p13), %v956_v60, 0.0  ;;  %v926_v14 = vld [vmem:[#allocation2 + $0x98] sm:$0xff] (!%p1326_p13)  ;;  %v962_v17 = vadd.f32 (!%p1326_p13), %v1910_v27, %v923_v3  ;;  %v963_v18 = vadd.f32 (!%p1326_p13), %v1910_v27, %v924_v4 }
 0x15d   : > { %884 = vst [vmem:[#allocation2 + $0x68] sm:$0xff] %v852_v23  ;;  %900 = vst [vmem:[#allocation2 + $0xe8] sm:$0xff] %v868_v24  ;;  %v955_v59 = vadd.f32 (!%p1326_p13), %v1910_v27, %v916_v44  ;;  %v986_v0 = vmax.f32 (!%p1326_p13), %v954_v55, 0.0  ;;  %v927_v19 = vld [vmem:[#allocation2 + $0xa0] sm:$0xff] (!%p1326_p13)  ;;  %v928_v20 = vld [vmem:[#allocation2 + $0xa8] sm:$0xff] (!%p1326_p13)  ;;  %v964_v24 = vadd.f32 (!%p1326_p13), %v1910_v27, %v925_v9  ;;  %v965_v31 = vadd.f32 (!%p1326_p13), %v1910_v27, %v926_v14 }
 0x15e   : > { %1475 = vst [vmem:[%s1877_s29 + $0x10] sm:$0xff] %v1407_v63   ;;  %v989_v10 = vmax.f32 %v957_v1, 0.0  ;;  %1476 = vst [vmem:[%s1877_s29 + $0x18] sm:$0xff] %v1412_v5   ;;  %v994_v29 = vmax.f32 %v962_v17, 0.0  ;;  %v995_v30 = vmax.f32 %v963_v18, 0.0  ;;  %v932_v33 = vld [vmem:[#allocation2 + $0xc8] sm:$0xff]  ;;  %v966_v36 = vadd.f32 %v1910_v27, %v927_v19 }
 0x15f   : > { %v987_v6 = vmax.f32 %v955_v59, 0.0  ;;  %v996_v35 = vmax.f32 %v964_v24, 0.0  ;;  %v967_v37 = vadd.f32 %v1910_v27, %v928_v20  ;;  %v933_v38 = vld [vmem:[#allocation2 + $0xd0] sm:$0xff]  ;;  %v997_v40 = vmax.f32 %v965_v31, 0.0  ;;  %v934_v43 = vld [vmem:[#allocation2 + $0xd8] sm:$0xff] }
 0x160   : > { %v1422_v21 = vpack.c.bf16 %v989_v10, %v988_v7  ;;  %v1437_v39 = vpack.c.bf16 %v995_v30, %v994_v29  ;;  %v998_v44 = vmax.f32 %v966_v36, 0.0  ;;  %v970_v46 = vadd.f32 %v1910_v27, %v931_v32 }
 0x161   : > { %v921_v61 = vld [vmem:[#allocation2 + $0x70] sm:$0xff]  ;;  %v1417_v15 = vpack.c.bf16 %v987_v6, %v986_v0  ;;  %v999_v45 = vmax.f32 %v967_v37, 0.0  ;;  %v971_v47 = vadd.f32 %v1910_v27, %v932_v33  ;;  %v1442_v50 = vpack.c.bf16 %v997_v40, %v996_v35 }
 0x162   : > { %v919_v51 = vld [vmem:[#allocation2 + $0x60] sm:$0xff]  ;;  %v960_v12 = vadd.f32 %v1910_v27, %v921_v61  ;;  %1478 = vst [vmem:[%s1877_s29 + $0x28] sm:$0xff] %v1422_v21   ;;  %1481 = vst [vmem:[%s1877_s29 + $0x40] sm:$0xff] %v1437_v39   ;;  %v972_v53 = vadd.f32 %v1910_v27, %v933_v38  ;;  %v937_v54 = vld [vmem:[#allocation2 + $0xf0] sm:$0xff]  ;;  %v1002_v57 = vmax.f32 %v970_v46, 0.0  ;;  %v973_v59 = vadd.f32 %v1910_v27, %v934_v43 }
 0x163   : > { %v922_v62 = vld [vmem:[#allocation2 + $0x78] sm:$0xff]  ;;  %v958_v2 = vadd.f32 %v1910_v27, %v919_v51  ;;  %1477 = vst [vmem:[%s1877_s29 + $0x20] sm:$0xff] %v1417_v15   ;;  %v935_v48 = vld [vmem:[#allocation2 + $0xe0] sm:$0xff]  ;;  %v1000_v51 = vmax.f32 %v968_v41, 0.0  ;;  %v1003_v58 = vmax.f32 %v971_v47, 0.0  ;;  %1482 = vst [vmem:[%s1877_s29 + $0x48] sm:$0xff] %v1442_v50  }
 0x164   : > { %v920_v56 = vld [vmem:[#allocation2 + $0x68] sm:$0xff]  ;;  %v961_v13 = vadd.f32 %v1910_v27, %v922_v62  ;;  %v992_v22 = vmax.f32 %v960_v12, 0.0  ;;  %v938_v55 = vld [vmem:[#allocation2 + $0xf8] sm:$0xff]  ;;  %v1004_v61 = vmax.f32 %v972_v53, 0.0  ;;  %v974_v62 = vadd.f32 %v1910_v27, %v935_v48 }
 0x165   : > { %v959_v8 = vadd.f32 %v1910_v27, %v920_v56  ;;  %v990_v11 = vmax.f32 %v958_v2, 0.0  ;;  %v936_v49 = vld [vmem:[#allocation2 + $0xe8] sm:$0xff]  ;;  %v1447_v56 = vpack.c.bf16 %v999_v45, %v998_v44  ;;  %v1452_v60 = vpack.c.bf16 %v1001_v52, %v1000_v51 }
 0x166   : > { %v993_v23 = vmax.f32 %v961_v13, 0.0  ;;  %v975_v63 = vadd.f32 %v1910_v27, %v936_v49  ;;  %v1457_v0 = vpack.c.bf16 %v1003_v58, %v1002_v57  ;;  %v1005_v1 = vmax.f32 %v973_v59, 0.0 }
 0x167   : > { %v991_v16 = vmax.f32 %v959_v8, 0.0  ;;  %1483 = vst [vmem:[%s1877_s29 + $0x50] sm:$0xff] %v1447_v56   ;;  %v976_v2 = vadd.f32 %v1910_v27, %v937_v54  ;;  %v977_v3 = vadd.f32 %v1910_v27, %v938_v55  ;;  %1484 = vst [vmem:[%s1877_s29 + $0x58] sm:$0xff] %v1452_v60   ;;  %v1006_v4 = vmax.f32 %v974_v62, 0.0 }
 0x168   : > { %v1432_v34 = vpack.c.bf16 %v993_v23, %v992_v22  ;;  %v1007_v5 = vmax.f32 %v975_v63, 0.0  ;;  %1485 = vst [vmem:[%s1877_s29 + $0x60] sm:$0xff] %v1457_v0   ;;  %v1462_v6 = vpack.c.bf16 %v1005_v1, %v1004_v61 }
 0x169   : > { %v1427_v28 = vpack.c.bf16 %v991_v16, %v990_v11  ;;  %v1008_v7 = vmax.f32 %v976_v2, 0.0  ;;  %v1009_v8 = vmax.f32 %v977_v3, 0.0 }
 0x16a   : > { %1480 = vst [vmem:[%s1877_s29 + $0x38] sm:$0xff] %v1432_v34   ;;  %v1467_v9 = vpack.c.bf16 %v1007_v5, %v1006_v4  ;;  %1486 = vst [vmem:[%s1877_s29 + $0x68] sm:$0xff] %v1462_v6  }
 0x16b   : > { %1479 = vst [vmem:[%s1877_s29 + $0x30] sm:$0xff] %v1427_v28   ;;  %v1472_v10 = vpack.c.bf16 %v1009_v8, %v1008_v7 }
 0x16c   : > { %1487 = vst [vmem:[%s1877_s29 + $0x70] sm:$0xff] %v1467_v9  }
 0x16d   : > { %1488 = vst [vmem:[%s1877_s29 + $0x78] sm:$0xff] %v1472_v10  }
 0x16e PF: > { %s13_s18 = sadd.s32 1, %s1713_s18   ;;  %s1985_s12 = smov %s1693_s13 }
 0x16f   : > { %p10_p0 = scmp.ge.s32.totalorder %s13_s18, 12   ;;  %s1986_s13 = smov %s1787_s25 }
 0x170   : > { %s1987_s14 = smov %s1705_s16  ;;  %s1988_s15 = smov %s1709_s17 }
 0x171   : > { %s1989_s16 = smov %s1992_s19  ;;  %s1990_s17 = smov %s1996_s20 }
 0x172   :  { %12 = sbr.rel (!%p10_p0) target bundleno = 4 (0x4), region = 122 }

// kernel: color_model_forward.23
= control target key start
LH: loop header
LB: loop body
LE: loop exit
PB: predicated region body
PF: predicated region fallthrough
CT: control target
= control target key end

     0   :  { %s1993_s15 = smov 0   ;;  %s1995_s16 = smov 0   ;;  %s2259_s0 = inlined_call_operand.vmem [shape: bf16[512,640], index: 0, kind: input, shape index: {}]   ;;  %s2260_s1 = inlined_call_operand.vmem [shape: bf16[640,128], index: 1, kind: input, shape index: {}]   ;;  %s2261_s2 = inlined_call_operand.vmem [shape: f32[1,128], index: 2, kind: input, shape index: {}]   ;;  %s2262_s3 = inlined_call_operand.vmem [shape: bf16[512,128], index: 3, kind: input, shape index: {}]   ;;  %s2263_s4 = inlined_call_operand.vmem [shape: bf16[512,128], index: 4, kind: output, shape index: {}]  }
   0x1   :  { %s1997_s17 = smov 0   ;;  %s1999_s18 = smov 0  }
   0x2   :  { %s2001_s19 = smov 0   ;;  %s2003_s20 = smov 0  }
   0x3   :  { %s2005_s21 = smov 0  }
   0x4 LB: > { %s26_s22 = sadd.s32 1, %s1957_s19  ;;  %s33_s23 = sadd.s32 1, %s1961_s20  ;;  %s1965_s21 = sphi %s2005_s21, %s14_s21   ;;  %s1961_s20 = sphi %s2003_s20, %s2269_s20   ;;  %s1957_s19 = sphi %s2001_s19, %s2268_s19   ;;  %s1953_s18 = sphi %s1999_s18, %s2267_s18   ;;  %s1949_s17 = sphi %s1997_s17, %s2266_s17   ;;  %s1945_s16 = sphi %s1995_s16, %s2265_s16   ;;  %s1941_s15 = sphi %s1993_s15, %s2264_s15  }
   0x5   : > { %p27_p0 = scmp.ge.s32.totalorder %s26_s22, 5  ;;  %p49_p1 = scmp.ne.s32.totalorder %s1945_s16, %s1941_s15 }
   0x6   : > { %p50_p2 = scmp.eq.s32.totalorder %s1965_s21, 0  ;;  %s42_s27 = sadd.s32 1, %s1945_s16 }
   0x7   : > { %s2271_s22 = smov (%p27_p0, %s26_s22), 0  ;;  %s2273_s23 = smov (!%p27_p0, %s33_s23), %s1961_s20 }
   0x8   : > { %p51_p3 = por %p50_p2, %p49_p1  ;;  %p35_p4 = scmp.ge.s32.totalorder %s2273_s23, 2 }
   0x9   : > { %s38_s24 = ssub.s32 %s1957_s19, %s2271_s22  ;;  %p1461_p6 = scmp.ge.s32.totalorder %s1965_s21, 10 }
   0xa   : > { %s2275_s23 = smov (%p35_p4, %s2273_s23), 0 }
   0xb   : > { %s37_s25 = ssub.s32 %s1961_s20, %s2275_s23  ;;  %191 = sbr.rel (%p1461_p6) target bundleno = 46 (0x2e), region = 20 }
   0xc   : > { %s39_s26 = sor.u32 %s38_s24, %s37_s25 }
   0xd   : > { %p40_p5 = scmp.eq.s32.totalorder %s39_s26, 0 }
   0xf   : > { %s2044_s28 = scalar_select %p40_p5, %s1945_s16, %s42_s27  }
  0x12   : > { %194 = sbr.rel (!%p51_p3) target bundleno = 46 (0x2e), region = 24  ;;  %s196_s29 = sand.u32 (%p51_p3), 1, %s1945_s16  }
  0x13   : > { %s1829_s30 = smul.u32 (%p51_p3), 160, %s1961_s20  ;;  %s1462_s5 = sshll.u32 (%p51_p3), %s196_s29, 7 }
  0x14   : > { %s2058_s11 = scalar_lea.vmem (%p51_p3), [#allocation3], %s1462_s5 }
  0x15   : > { %s201_s6 = sadd.s32 (%p51_p3), %s1957_s19, %s1829_s30 }
  0x16   : > { %s1465_s7 = sshll.u32 (%p51_p3), %s201_s6, 2 }
  0x17   : > { %s2053_s10 = scalar_lea.vmem (%p51_p3), %s2259_s0, %s1465_s7 }
  0x18   : > { %v219_v0 = vld [vmem:[%s2053_s10] sm:$0xf] (%p51_p3)  ;;  %v221_v1 = vld [vmem:[%s2053_s10 + $0x14] sm:$0xf] (%p51_p3)  ;;  %v223_v2 = vld [vmem:[%s2053_s10 + $0x28] sm:$0xf] (%p51_p3) }
  0x19   : > { %220 = vst [vmem:[%s2058_s11] sm:$0xf] %v219_v0  ;;  %222 = vst [vmem:[%s2058_s11 + $0x4] sm:$0xf] %v221_v1  ;;  %v225_v3 = vld [vmem:[%s2053_s10 + $0x3c] sm:$0xf] }
  0x1a   : > { %224 = vst [vmem:[%s2058_s11 + $0x8] sm:$0xf] %v223_v2  ;;  %v227_v4 = vld [vmem:[%s2053_s10 + $0x50] sm:$0xf]  ;;  %v229_v5 = vld [vmem:[%s2053_s10 + $0x64] sm:$0xf] }
  0x1b   : > { %226 = vst [vmem:[%s2058_s11 + $0xc] sm:$0xf] %v225_v3  ;;  %228 = vst [vmem:[%s2058_s11 + $0x10] sm:$0xf] %v227_v4  ;;  %v231_v6 = vld [vmem:[%s2053_s10 + $0x78] sm:$0xf] }
  0x1c   : > { %230 = vst [vmem:[%s2058_s11 + $0x14] sm:$0xf] %v229_v5  ;;  %v233_v7 = vld [vmem:[%s2053_s10 + $0x8c] sm:$0xf]  ;;  %v235_v8 = vld [vmem:[%s2053_s10 + $0xa0] sm:$0xf] }
  0x1d   : > { %232 = vst [vmem:[%s2058_s11 + $0x18] sm:$0xf] %v231_v6  ;;  %234 = vst [vmem:[%s2058_s11 + $0x1c] sm:$0xf] %v233_v7  ;;  %v237_v9 = vld [vmem:[%s2053_s10 + $0xb4] sm:$0xf] }
  0x1e   : > { %236 = vst [vmem:[%s2058_s11 + $0x20] sm:$0xf] %v235_v8  ;;  %v239_v10 = vld [vmem:[%s2053_s10 + $0xc8] sm:$0xf]  ;;  %v241_v11 = vld [vmem:[%s2053_s10 + $0xdc] sm:$0xf] }
  0x1f   : > { %238 = vst [vmem:[%s2058_s11 + $0x24] sm:$0xf] %v237_v9  ;;  %240 = vst [vmem:[%s2058_s11 + $0x28] sm:$0xf] %v239_v10  ;;  %v243_v12 = vld [vmem:[%s2053_s10 + $0xf0] sm:$0xf] }
  0x20   : > { %242 = vst [vmem:[%s2058_s11 + $0x2c] sm:$0xf] %v241_v11  ;;  %v245_v13 = vld [vmem:[%s2053_s10 + $0x104] sm:$0xf]  ;;  %v247_v14 = vld [vmem:[%s2053_s10 + $0x118] sm:$0xf] }
  0x21   : > { %244 = vst [vmem:[%s2058_s11 + $0x30] sm:$0xf] %v243_v12  ;;  %246 = vst [vmem:[%s2058_s11 + $0x34] sm:$0xf] %v245_v13  ;;  %v249_v15 = vld [vmem:[%s2053_s10 + $0x12c] sm:$0xf] }
  0x22   : > { %248 = vst [vmem:[%s2058_s11 + $0x38] sm:$0xf] %v247_v14  ;;  %v251_v16 = vld [vmem:[%s2053_s10 + $0x140] sm:$0xf]  ;;  %v253_v17 = vld [vmem:[%s2053_s10 + $0x154] sm:$0xf] }
  0x23   : > { %250 = vst [vmem:[%s2058_s11 + $0x3c] sm:$0xf] %v249_v15  ;;  %252 = vst [vmem:[%s2058_s11 + $0x40] sm:$0xf] %v251_v16  ;;  %v255_v18 = vld [vmem:[%s2053_s10 + $0x168] sm:$0xf] }
  0x24   : > { %254 = vst [vmem:[%s2058_s11 + $0x44] sm:$0xf] %v253_v17  ;;  %v257_v19 = vld [vmem:[%s2053_s10 + $0x17c] sm:$0xf]  ;;  %v259_v20 = vld [vmem:[%s2053_s10 + $0x190] sm:$0xf] }
  0x25   : > { %256 = vst [vmem:[%s2058_s11 + $0x48] sm:$0xf] %v255_v18  ;;  %258 = vst [vmem:[%s2058_s11 + $0x4c] sm:$0xf] %v257_v19  ;;  %v261_v21 = vld [vmem:[%s2053_s10 + $0x1a4] sm:$0xf] }
  0x26   : > { %260 = vst [vmem:[%s2058_s11 + $0x50] sm:$0xf] %v259_v20  ;;  %v263_v22 = vld [vmem:[%s2053_s10 + $0x1b8] sm:$0xf]  ;;  %v265_v23 = vld [vmem:[%s2053_s10 + $0x1cc] sm:$0xf] }
  0x27   : > { %262 = vst [vmem:[%s2058_s11 + $0x54] sm:$0xf] %v261_v21  ;;  %264 = vst [vmem:[%s2058_s11 + $0x58] sm:$0xf] %v263_v22  ;;  %v267_v24 = vld [vmem:[%s2053_s10 + $0x1e0] sm:$0xf] }
  0x28   : > { %266 = vst [vmem:[%s2058_s11 + $0x5c] sm:$0xf] %v265_v23  ;;  %v269_v25 = vld [vmem:[%s2053_s10 + $0x1f4] sm:$0xf]  ;;  %v271_v26 = vld [vmem:[%s2053_s10 + $0x208] sm:$0xf] }
  0x29   : > { %268 = vst [vmem:[%s2058_s11 + $0x60] sm:$0xf] %v267_v24  ;;  %270 = vst [vmem:[%s2058_s11 + $0x64] sm:$0xf] %v269_v25  ;;  %v273_v27 = vld [vmem:[%s2053_s10 + $0x21c] sm:$0xf] }
  0x2a   : > { %272 = vst [vmem:[%s2058_s11 + $0x68] sm:$0xf] %v271_v26  ;;  %v275_v28 = vld [vmem:[%s2053_s10 + $0x230] sm:$0xf]  ;;  %v277_v29 = vld [vmem:[%s2053_s10 + $0x244] sm:$0xf] }
  0x2b   : > { %274 = vst [vmem:[%s2058_s11 + $0x6c] sm:$0xf] %v273_v27  ;;  %276 = vst [vmem:[%s2058_s11 + $0x70] sm:$0xf] %v275_v28  ;;  %v279_v30 = vld [vmem:[%s2053_s10 + $0x258] sm:$0xf] }
  0x2c   : > { %278 = vst [vmem:[%s2058_s11 + $0x74] sm:$0xf] %v277_v29  ;;  %v281_v31 = vld [vmem:[%s2053_s10 + $0x26c] sm:$0xf]  ;;  %280 = vst [vmem:[%s2058_s11 + $0x78] sm:$0xf] %v279_v30 }
  0x2d   : > { %282 = vst [vmem:[%s2058_s11 + $0x7c] sm:$0xf] %v281_v31 }
  0x2e PF: > { %p1466_p7 = scmp.ge.s32.totalorder %s1965_s21, 1  ;;  %p392_p8 = scmp.lt.s32.totalorder %s1965_s21, 11 }
  0x30   : > { %p393_p9 = pnand %p1466_p7, %p392_p8 }
  0x31   : > { %s399_s12 = sand.u32 (!%p393_p9), 1, %s1941_s15   ;;  %s1468_s13 = sshll.u32 (!%p393_p9), %s1949_s17, 4 }
  0x32   : > { %396 = sbr.rel (%p393_p9) target bundleno = 382 (0x17e), region = 73  ;;  %s1467_s14 = sshll.u32 (!%p393_p9), %s399_s12, 7 }
  0x33   : > { %p448_p10 = scmp.lt.s32.totalorder (!%p393_p9), %s1468_s13, 79  ;;  %s1470_s24 = sshll.u32 (!%p393_p9), %s1953_s18, 5 }
  0x34   : > { %p460_p11 = scmp.lt.s32.totalorder (!%p393_p9), %s1470_s24, 63  ;;  %s2141_s18 = scalar_lea.vmem (!%p393_p9), [#allocation3], %s1467_s14 }
  0x35   : > { %p1474_p12 = scmp.ne.s32.totalorder (!%p393_p9), %s1949_s17, 0 }
  0x39   : > { %s2277_s13 = smov (!%p448_p10, %s1468_s13), 79  ;;  %s2279_s24 = smov (!%p460_p11, %s1470_s24), 63 }
  0x3a   : > { %s1469_s25 = sshll.u32 %s2277_s13, 2  ;;  %s1471_s30 = sshll.u32 %s2279_s24, 2  ;;  %v1967_v32 = vmov (!%p1474_p12), 0.0  }
  0x3b   : > { %s2129_s29 = scalar_lea.vmem %s2260_s1, %s1469_s25  ;;  %s2134_s7 = scalar_lea.vmem %s2262_s3, %s1471_s30  ;;  %482 = vst [vmem:[#allocation2] sm:$0xff] (!%p1474_p12), %v1967_v32  ;;  %483 = vst [vmem:[#allocation2 + $0x8] sm:$0xff] (!%p1474_p12), %v1967_v32 }
  0x3c   : > { %s2139_s9 = scalar_lea.vmem %s2263_s4, %s1471_s30  ;;  %481 = sbr.rel (%p1474_p12) target bundleno = 75 (0x4b), region = 81  ;;  %484 = vst [vmem:[#allocation2 + $0x10] sm:$0xff] (!%p1474_p12), %v1967_v32  ;;  %485 = vst [vmem:[#allocation2 + $0x18] sm:$0xff] (!%p1474_p12), %v1967_v32 }
  0x3d   : > { %486 = vst [vmem:[#allocation2 + $0x20] sm:$0xff] (!%p1474_p12), %v1967_v32  ;;  %487 = vst [vmem:[#allocation2 + $0x28] sm:$0xff] (!%p1474_p12), %v1967_v32 }
  0x3e   : > { %488 = vst [vmem:[#allocation2 + $0x30] sm:$0xff] (!%p1474_p12), %v1967_v32  ;;  %489 = vst [vmem:[#allocation2 + $0x38] sm:$0xff] (!%p1474_p12), %v1967_v32 }
  0x3f   : > { %490 = vst [vmem:[#allocation2 + $0x40] sm:$0xff] (!%p1474_p12), %v1967_v32  ;;  %491 = vst [vmem:[#allocation2 + $0x48] sm:$0xff] (!%p1474_p12), %v1967_v32 }
  0x40   : > { %492 = vst [vmem:[#allocation2 + $0x50] sm:$0xff] (!%p1474_p12), %v1967_v32  ;;  %493 = vst [vmem:[#allocation2 + $0x58] sm:$0xff] (!%p1474_p12), %v1967_v32 }
  0x41   : > { %494 = vst [vmem:[#allocation2 + $0x60] sm:$0xff] (!%p1474_p12), %v1967_v32  ;;  %495 = vst [vmem:[#allocation2 + $0x68] sm:$0xff] (!%p1474_p12), %v1967_v32 }
  0x42   : > { %496 = vst [vmem:[#allocation2 + $0x70] sm:$0xff] (!%p1474_p12), %v1967_v32  ;;  %497 = vst [vmem:[#allocation2 + $0x78] sm:$0xff] (!%p1474_p12), %v1967_v32 }
  0x43   : > { %498 = vst [vmem:[#allocation2 + $0x80] sm:$0xff] %v1967_v32  ;;  %499 = vst [vmem:[#allocation2 + $0x88] sm:$0xff] %v1967_v32 }
  0x44   : > { %500 = vst [vmem:[#allocation2 + $0x90] sm:$0xff] %v1967_v32  ;;  %501 = vst [vmem:[#allocation2 + $0x98] sm:$0xff] %v1967_v32 }
  0x45   : > { %502 = vst [vmem:[#allocation2 + $0xa0] sm:$0xff] %v1967_v32  ;;  %503 = vst [vmem:[#allocation2 + $0xa8] sm:$0xff] %v1967_v32 }
  0x46   : > { %504 = vst [vmem:[#allocation2 + $0xb0] sm:$0xff] %v1967_v32  ;;  %505 = vst [vmem:[#allocation2 + $0xb8] sm:$0xff] %v1967_v32 }
  0x47   : > { %506 = vst [vmem:[#allocation2 + $0xc0] sm:$0xff] %v1967_v32  ;;  %507 = vst [vmem:[#allocation2 + $0xc8] sm:$0xff] %v1967_v32 }
  0x48   : > { %508 = vst [vmem:[#allocation2 + $0xd0] sm:$0xff] %v1967_v32  ;;  %509 = vst [vmem:[#allocation2 + $0xd8] sm:$0xff] %v1967_v32 }
  0x49   : > { %510 = vst [vmem:[#allocation2 + $0xe0] sm:$0xff] %v1967_v32  ;;  %511 = vst [vmem:[#allocation2 + $0xe8] sm:$0xff] %v1967_v32 }
  0x4a   : > { %512 = vst [vmem:[#allocation2 + $0xf0] sm:$0xff] %v1967_v32  ;;  %513 = vst [vmem:[#allocation2 + $0xf8] sm:$0xff] %v1967_v32 }
  0x4b PF: > { %v1887_v33 = vld [vmem:[%s2129_s29] sm:$0xff]   ;;  %v1888_v34 = vld [vmem:[%s2129_s29 + $0x8] sm:$0xff]   ;;  %v1889_v35 = vld [vmem:[%s2129_s29 + $0x10] sm:$0xff]   ;;  %p1499_p13 = scmp.ne.s32.totalorder %s1949_s17, 4 }
  0x4c   : > { %1765 = vmatprep.subr.bf16.mxu0 %v1887_v33  ;;  %1813 = vmatprep.subr.bf16.mxu1 %v1887_v33  ;;  %v1890_v36 = vld [vmem:[%s2129_s29 + $0x18] sm:$0xff]   ;;  %v1895_v37 = vld [vmem:[%s2141_s18] sm:$0xff]   ;;  %v1892_v40 = vld [vmem:[%s2129_s29 + $0x28] sm:$0xff]  }
  0x4d   : > { %1766 = vmatpush3.bf16.msra.mxu0 %v1887_v33  ;;  %1821 = vmatpush3.bf16.msra.mxu1 %v1887_v33  ;;  %v1896_v38 = vld [vmem:[%s2141_s18 + $0x40] sm:$0xff]   ;;  %v1893_v41 = vld [vmem:[%s2129_s29 + $0x30] sm:$0xff]   ;;  %v1894_v42 = vld [vmem:[%s2129_s29 + $0x38] sm:$0xff]  }
  0x4e   : > { %1767 = vmatprep.subr.bf16.mxu0 %v1888_v34  ;;  %1814 = vmatprep.subr.bf16.mxu1 %v1888_v34  ;;  %v1891_v39 = vld [vmem:[%s2129_s29 + $0x20] sm:$0xff]   ;;  %v1897_v43 = vld [vmem:[%s2141_s18 + $0x8] sm:$0xff]   ;;  %v1899_v45 = vld [vmem:[%s2141_s18 + $0x10] sm:$0xff]  }
  0x4f   : > { %1781 = vmatprep.mubr.bf16.mxu0 %v1895_v37  ;;  %1797 = vmatprep.mubr.bf16.mxu1 %v1896_v38  ;;  %v1898_v44 = vld [vmem:[%s2141_s18 + $0x48] sm:$0xff]   ;;  %v1900_v46 = vld [vmem:[%s2141_s18 + $0x50] sm:$0xff]   ;;  %v1901_v47 = vld [vmem:[%s2141_s18 + $0x18] sm:$0xff]  }
  0x50   : > { %v1902_v48 = vld [vmem:[%s2141_s18 + $0x58] sm:$0xff]   ;;  %v1903_v49 = vld [vmem:[%s2141_s18 + $0x20] sm:$0xff]   ;;  %v1905_v51 = vld [vmem:[%s2141_s18 + $0x28] sm:$0xff]  }
  0x51   : > { %1768 = vmatpush3.bf16.msra.mxu0 %v1888_v34  ;;  %1822 = vmatpush3.bf16.msra.mxu1 %v1888_v34  ;;  %v1904_v50 = vld [vmem:[%s2141_s18 + $0x60] sm:$0xff]   ;;  %v1906_v52 = vld [vmem:[%s2141_s18 + $0x68] sm:$0xff]   ;;  %v1907_v53 = vld [vmem:[%s2141_s18 + $0x30] sm:$0xff]  }
  0x52   : > { %1769 = vmatprep.subr.bf16.mxu0 %v1889_v35  ;;  %1815 = vmatprep.subr.bf16.mxu1 %v1889_v35  ;;  %v1908_v54 = vld [vmem:[%s2141_s18 + $0x70] sm:$0xff]   ;;  %v1909_v55 = vld [vmem:[%s2141_s18 + $0x38] sm:$0xff]   ;;  %v514_v59 = vld [vmem:[#allocation2] sm:$0xff] }
  0x53   : > { %v1910_v56 = vld [vmem:[%s2141_s18 + $0x78] sm:$0xff]   ;;  %v516_v57 = vld [vmem:[#allocation2 + $0x10] sm:$0xff]  ;;  %v530_v60 = vld [vmem:[#allocation2 + $0x80] sm:$0xff] }
  0x54   : > { %v532_v58 = vld [vmem:[#allocation2 + $0x90] sm:$0xff]  ;;  %v517_v63 = vld [vmem:[#allocation2 + $0x18] sm:$0xff]  ;;  %v515_v5 = vld [vmem:[#allocation2 + $0x8] sm:$0xff] }
  0x55   : > { %1770 = vmatpush3.bf16.msra.mxu0 %v1889_v35  ;;  %1823 = vmatpush3.bf16.msra.mxu1 %v1889_v35  ;;  %v533_v0 = vld [vmem:[#allocation2 + $0x98] sm:$0xff]  ;;  %v531_v6 = vld [vmem:[#allocation2 + $0x88] sm:$0xff]  ;;  %v520_v17 = vld [vmem:[#allocation2 + $0x30] sm:$0xff] }
  0x56   : > { %1771 = vmatprep.subr.bf16.mxu0 %v1890_v36  ;;  %1816 = vmatprep.subr.bf16.mxu1 %v1890_v36  ;;  %v536_v18 = vld [vmem:[#allocation2 + $0xb0] sm:$0xff]  ;;  %v518_v19 = vld [vmem:[#allocation2 + $0x20] sm:$0xff]  ;;  %v521_v23 = vld [vmem:[#allocation2 + $0x38] sm:$0xff] }
  0x57   : > { %v534_v20 = vld [vmem:[#allocation2 + $0xa0] sm:$0xff]  ;;  %v537_v24 = vld [vmem:[#allocation2 + $0xb8] sm:$0xff]  ;;  %v519_v29 = vld [vmem:[#allocation2 + $0x28] sm:$0xff] }
  0x58   : > { %v535_v30 = vld [vmem:[#allocation2 + $0xa8] sm:$0xff] }
  0x59   : > { %1772 = vmatpush3.bf16.msra.mxu0 %v1890_v36  ;;  %1824 = vmatpush3.bf16.msra.mxu1 %v1890_v36 }
  0x5a   : > { %1773 = vmatprep.subr.bf16.mxu0 %v1891_v39  ;;  %1817 = vmatprep.subr.bf16.mxu1 %v1891_v39 }
  0x5d   : > { %1774 = vmatpush3.bf16.msra.mxu0 %v1891_v39  ;;  %1825 = vmatpush3.bf16.msra.mxu1 %v1891_v39 }
  0x5e   : > { %1775 = vmatprep.subr.bf16.mxu0 %v1892_v40  ;;  %1818 = vmatprep.subr.bf16.mxu1 %v1892_v40 }
  0x61   : > { %1776 = vmatpush3.bf16.msra.mxu0 %v1892_v40  ;;  %1826 = vmatpush3.bf16.msra.mxu1 %v1892_v40 }
  0x62   : > { %1777 = vmatprep.subr.bf16.mxu0 %v1893_v41  ;;  %1819 = vmatprep.subr.bf16.mxu1 %v1893_v41 }
  0x65   : > { %1778 = vmatpush3.bf16.msra.mxu0 %v1893_v41  ;;  %1827 = vmatpush3.bf16.msra.mxu1 %v1893_v41  ;;  %v524_v41 = vld [vmem:[#allocation2 + $0x50] sm:$0xff] }
  0x66   : > { %1779 = vmatprep.subr.bf16.mxu0 %v1894_v42  ;;  %1820 = vmatprep.subr.bf16.mxu1 %v1894_v42 }
  0x69   : > { %1780 = vmatpush3.bf16.msra.mxu0 %v1894_v42  ;;  %1828 = vmatpush3.bf16.msra.mxu1 %v1894_v42  ;;  %v540_v42 = vld [vmem:[#allocation2 + $0xd0] sm:$0xff] }
  0x6c   : > { %1782 = vmatmul.mubr.bf16.vlgmr.msra.gmra.mrb[0].mxu0 %v1897_v43  ;;  %1798 = vmatmul.mubr.bf16.vlgmr.msra.gmra.mrb[0].mxu1 %v1898_v44  ;;  %v522_v43 = vld [vmem:[#allocation2 + $0x40] sm:$0xff] }
  0x6d   : > { %1785 = vmatprep.mubr.bf16.mxu0 %v1899_v45  ;;  %1801 = vmatprep.mubr.bf16.mxu1 %v1900_v46  ;;  %v538_v44 = vld [vmem:[#allocation2 + $0xc0] sm:$0xff] }
  0x74   : > { %1786 = vmatmul.mubr.bf16.gmra.mrb[4].mxu0 %v1901_v47  ;;  %1802 = vmatmul.mubr.bf16.gmra.mrb[4].mxu1 %v1902_v48  ;;  %v525_v47 = vld [vmem:[#allocation2 + $0x58] sm:$0xff] }
  0x75   : > { %1789 = vmatprep.mubr.bf16.mxu0 %v1903_v49  ;;  %1805 = vmatprep.mubr.bf16.mxu1 %v1904_v50  ;;  %v541_v48 = vld [vmem:[#allocation2 + $0xd8] sm:$0xff] }
  0x7c   : > { %1790 = vmatmul.mubr.bf16.gmra.mrb[8].mxu0 %v1905_v51  ;;  %1806 = vmatmul.mubr.bf16.gmra.mrb[8].mxu1 %v1906_v52 }
  0x7d   : > { %1793 = vmatprep.mubr.bf16.mxu0 %v1907_v53  ;;  %1809 = vmatprep.mubr.bf16.mxu1 %v1908_v54  ;;  %v523_v53 = vld [vmem:[#allocation2 + $0x48] sm:$0xff] }
  0x7e   : > { %v539_v54 = vld [vmem:[#allocation2 + $0xc8] sm:$0xff] }
  0x84   : > { %1794 = vmatmul.mubr.bf16.gmra.mrb[12].mxu0 %v1909_v55  ;;  %1810 = vmatmul.mubr.bf16.gmra.mrb[12].mxu1 %v1910_v56 }
 0x13f   : > { %v1783_v61 = vpop.f32.mrb[0].mxu0  ;;  %v1799_v62 = vpop.f32.mrb[0].mxu1 }
 0x140   : > { %v901_v1 = vadd.f32 %v1783_v61, %v516_v57  ;;  %v917_v2 = vadd.f32 %v1799_v62, %v532_v58  ;;  %v772_v3 = vpop.f32.mrb[1].mxu0  ;;  %v836_v4 = vpop.f32.mrb[1].mxu1 }
 0x141   : > { %v899_v7 = vadd.f32 %v772_v3, %v514_v59  ;;  %v915_v8 = vadd.f32 %v836_v4, %v530_v60  ;;  %v1784_v9 = vpop.f32.mrb[2].mxu0  ;;  %v1800_v10 = vpop.f32.mrb[2].mxu1  ;;  %v526_v3 = vld [vmem:[#allocation2 + $0x60] sm:$0xff] }
 0x142   : > { %933 = vst [vmem:[#allocation2 + $0x10] sm:$0xff] %v901_v1  ;;  %949 = vst [vmem:[#allocation2 + $0x90] sm:$0xff] %v917_v2  ;;  %v902_v11 = vadd.f32 %v1784_v9, %v517_v63  ;;  %v918_v12 = vadd.f32 %v1800_v10, %v533_v0  ;;  %v775_v13 = vpop.f32.mrb[3].mxu0  ;;  %v839_v14 = vpop.f32.mrb[3].mxu1  ;;  %v528_v1 = vld [vmem:[#allocation2 + $0x70] sm:$0xff]  ;;  %v542_v4 = vld [vmem:[#allocation2 + $0xe0] sm:$0xff] }
 0x143   : > { %931 = vst [vmem:[#allocation2] sm:$0xff] %v899_v7  ;;  %947 = vst [vmem:[#allocation2 + $0x80] sm:$0xff] %v915_v8  ;;  %v900_v15 = vadd.f32 %v775_v13, %v515_v5  ;;  %v916_v16 = vadd.f32 %v839_v14, %v531_v6  ;;  %v544_v2 = vld [vmem:[#allocation2 + $0xf0] sm:$0xff]  ;;  %v529_v7 = vld [vmem:[#allocation2 + $0x78] sm:$0xff] }
 0x144   : > { %934 = vst [vmem:[#allocation2 + $0x18] sm:$0xff] %v902_v11  ;;  %950 = vst [vmem:[#allocation2 + $0x98] sm:$0xff] %v918_v12  ;;  %v545_v8 = vld [vmem:[#allocation2 + $0xf8] sm:$0xff]  ;;  %v527_v13 = vld [vmem:[#allocation2 + $0x68] sm:$0xff] }
 0x145   : > { %932 = vst [vmem:[#allocation2 + $0x8] sm:$0xff] %v900_v15  ;;  %948 = vst [vmem:[#allocation2 + $0x88] sm:$0xff] %v916_v16  ;;  %v543_v14 = vld [vmem:[#allocation2 + $0xe8] sm:$0xff] }
 0x147   : > { %v1787_v21 = vpop.f32.mrb[4].mxu0  ;;  %v1803_v22 = vpop.f32.mrb[4].mxu1 }
 0x148   : > { %v905_v25 = vadd.f32 %v1787_v21, %v520_v17  ;;  %v921_v26 = vadd.f32 %v1803_v22, %v536_v18  ;;  %v788_v27 = vpop.f32.mrb[5].mxu0  ;;  %v852_v28 = vpop.f32.mrb[5].mxu1 }
 0x149   : > { %v903_v31 = vadd.f32 %v788_v27, %v518_v19  ;;  %v919_v32 = vadd.f32 %v852_v28, %v534_v20  ;;  %v1788_v33 = vpop.f32.mrb[6].mxu0  ;;  %v1804_v34 = vpop.f32.mrb[6].mxu1  ;;  %v2172_v27 = vld [vmem:[%s2261_s2] ss:$0 sm:$0xff] (!%p1499_p13) }
 0x14a   : > { %937 = vst [vmem:[#allocation2 + $0x30] sm:$0xff] %v905_v25  ;;  %953 = vst [vmem:[#allocation2 + $0xb0] sm:$0xff] %v921_v26  ;;  %v906_v35 = vadd.f32 %v1788_v33, %v521_v23  ;;  %v922_v36 = vadd.f32 %v1804_v34, %v537_v24  ;;  %v791_v37 = vpop.f32.mrb[7].mxu0  ;;  %v855_v38 = vpop.f32.mrb[7].mxu1  ;;  %v967_v25 = vld [vmem:[#allocation2] sm:$0xff] (!%p1499_p13) }
 0x14b   : > { %935 = vst [vmem:[#allocation2 + $0x20] sm:$0xff] %v903_v31  ;;  %951 = vst [vmem:[#allocation2 + $0xa0] sm:$0xff] %v919_v32  ;;  %v904_v39 = vadd.f32 %v791_v37, %v519_v29  ;;  %v920_v40 = vadd.f32 %v855_v38, %v535_v30  ;;  %v1006_v28 = vadd.f32 (!%p1499_p13), %v2172_v27, %v967_v25  ;;  %v1568_v30 = vld [vmem:[%s2134_s7] sm:$0xff] (!%p1499_p13)   ;;  %v969_v31 = vld [vmem:[#allocation2 + $0x10] sm:$0xff] (!%p1499_p13) }
 0x14c   : > { %938 = vst [vmem:[#allocation2 + $0x38] sm:$0xff] %v906_v35  ;;  %954 = vst [vmem:[#allocation2 + $0xb8] sm:$0xff] %v922_v36  ;;  %v968_v26 = vld [vmem:[#allocation2 + $0x8] sm:$0xff] (!%p1499_p13)  ;;  %v970_v32 = vld [vmem:[#allocation2 + $0x18] sm:$0xff] (!%p1499_p13)  ;;  %v1569_v33 = vunpack.c.l.bf16 (!%p1499_p13), %v1568_v30  ;;  %v1570_v34 = vunpack.c.h.bf16 (!%p1499_p13), %v1568_v30  ;;  %v1008_v35 = vadd.f32 (!%p1499_p13), %v2172_v27, %v969_v31 }
 0x14d   : > { %936 = vst [vmem:[#allocation2 + $0x28] sm:$0xff] %v904_v39  ;;  %952 = vst [vmem:[#allocation2 + $0xa8] sm:$0xff] %v920_v40  ;;  %v1007_v29 = vadd.f32 (!%p1499_p13), %v2172_v27, %v968_v26  ;;  %v1009_v36 = vadd.f32 (!%p1499_p13), %v2172_v27, %v970_v32  ;;  %v1711_v37 = vld [vmem:[%s2134_s7 + $0x8] sm:$0xff] (!%p1499_p13)  }
 0x14e   : > { %v1573_v40 = vunpack.c.l.bf16 (!%p1499_p13), %v1711_v37 }
 0x14f   : > { %v1791_v45 = vpop.f32.mrb[8].mxu0  ;;  %v1807_v46 = vpop.f32.mrb[8].mxu1 }
 0x150   : > { %v909_v49 = vadd.f32 %v1791_v45, %v524_v41  ;;  %v925_v50 = vadd.f32 %v1807_v46, %v540_v42  ;;  %v804_v51 = vpop.f32.mrb[9].mxu0  ;;  %v868_v52 = vpop.f32.mrb[9].mxu1  ;;  %v1574_v41 = vunpack.c.h.bf16 (!%p1499_p13), %v1711_v37 }
 0x151   : > { %v907_v55 = vadd.f32 %v804_v51, %v522_v43  ;;  %v923_v56 = vadd.f32 %v868_v52, %v538_v44  ;;  %v1792_v57 = vpop.f32.mrb[10].mxu0  ;;  %v1808_v58 = vpop.f32.mrb[10].mxu1  ;;  %v1712_v44 = vld [vmem:[%s2134_s7 + $0x10] sm:$0xff] (!%p1499_p13)   ;;  %v1713_v51 = vld [vmem:[%s2134_s7 + $0x18] sm:$0xff] (!%p1499_p13)   ;;  %v1104_v52 = vadd.f32 (!%p1499_p13), %v1573_v40, %v1008_v35 }
 0x152   : > { %941 = vst [vmem:[#allocation2 + $0x50] sm:$0xff] %v909_v49  ;;  %957 = vst [vmem:[#allocation2 + $0xd0] sm:$0xff] %v925_v50  ;;  %v910_v59 = vadd.f32 %v1792_v57, %v525_v47  ;;  %v926_v60 = vadd.f32 %v1808_v58, %v541_v48  ;;  %v807_v61 = vpop.f32.mrb[11].mxu0  ;;  %v871_v62 = vpop.f32.mrb[11].mxu1  ;;  %v971_v38 = vld [vmem:[#allocation2 + $0x20] sm:$0xff] (!%p1499_p13)  ;;  %v973_v45 = vld [vmem:[#allocation2 + $0x30] sm:$0xff] (!%p1499_p13)  ;;  %v1102_v47 = vadd.f32 (!%p1499_p13), %v1569_v33, %v1006_v28  ;;  %v1577_v49 = vunpack.c.l.bf16 (!%p1499_p13), %v1712_v44 }
 0x153   : > { %939 = vst [vmem:[#allocation2 + $0x40] sm:$0xff] %v907_v55  ;;  %955 = vst [vmem:[#allocation2 + $0xc0] sm:$0xff] %v923_v56  ;;  %v908_v63 = vadd.f32 %v807_v61, %v523_v53  ;;  %v924_v0 = vadd.f32 %v871_v62, %v539_v54  ;;  %v1010_v42 = vadd.f32 (!%p1499_p13), %v2172_v27, %v971_v38  ;;  %v974_v46 = vld [vmem:[#allocation2 + $0x38] sm:$0xff] (!%p1499_p13)  ;;  %v1578_v50 = vunpack.c.h.bf16 (!%p1499_p13), %v1712_v44 }
 0x154   : > { %942 = vst [vmem:[#allocation2 + $0x58] sm:$0xff] %v910_v59  ;;  %958 = vst [vmem:[#allocation2 + $0xd8] sm:$0xff] %v926_v60  ;;  %v972_v39 = vld [vmem:[#allocation2 + $0x28] sm:$0xff] (!%p1499_p13)  ;;  %v1103_v48 = vadd.f32 (!%p1499_p13), %v1570_v34, %v1007_v29  ;;  %v1105_v53 = vadd.f32 (!%p1499_p13), %v1574_v41, %v1009_v36  ;;  %v1012_v54 = vadd.f32 (!%p1499_p13), %v2172_v27, %v973_v45  ;;  %v1134_v57 = vmax.f32 (!%p1499_p13), %v1102_v47, 0.0  ;;  %v1717_v36 = vld [vmem:[%s2134_s7 + $0x38] sm:$0xff] (!%p1499_p13)  }
 0x155   : > { %940 = vst [vmem:[#allocation2 + $0x48] sm:$0xff] %v908_v63  ;;  %956 = vst [vmem:[#allocation2 + $0xc8] sm:$0xff] %v924_v0  ;;  %v1011_v43 = vadd.f32 (!%p1499_p13), %v2172_v27, %v972_v39  ;;  %v1013_v55 = vadd.f32 (!%p1499_p13), %v2172_v27, %v974_v46  ;;  %v1106_v59 = vadd.f32 (!%p1499_p13), %v1577_v49, %v1010_v42  ;;  %v1136_v62 = vmax.f32 (!%p1499_p13), %v1104_v52, 0.0  ;;  %v983_v41 = vld [vmem:[#allocation2 + $0x80] sm:$0xff] (!%p1499_p13)  ;;  %v984_v42 = vld [vmem:[#allocation2 + $0x88] sm:$0xff] (!%p1499_p13) }
 0x156   : > { %v1135_v58 = vmax.f32 (!%p1499_p13), %v1103_v48, 0.0  ;;  %v1137_v63 = vmax.f32 (!%p1499_p13), %v1105_v53, 0.0  ;;  %v1581_v0 = vunpack.c.l.bf16 (!%p1499_p13), %v1713_v51  ;;  %v1718_v47 = vld [vmem:[%s2134_s7 + $0x40] sm:$0xff] (!%p1499_p13)   ;;  %v985_v52 = vld [vmem:[#allocation2 + $0x90] sm:$0xff] (!%p1499_p13)  ;;  %v986_v53 = vld [vmem:[#allocation2 + $0x98] sm:$0xff] (!%p1499_p13) }
 0x157   : > { %v1795_v5 = vpop.f32.mrb[12].mxu0  ;;  %v1811_v6 = vpop.f32.mrb[12].mxu1  ;;  %966 = sbr.rel (%p1499_p13) target bundleno = 382 (0x17e), region = 85  ;;  %v1107_v60 = vadd.f32 (!%p1499_p13), %v1578_v50, %v1011_v43 }
 0x158   : > { %v913_v9 = vadd.f32 %v1795_v5, %v528_v1  ;;  %v929_v10 = vadd.f32 %v1811_v6, %v544_v2  ;;  %v820_v11 = vpop.f32.mrb[13].mxu0  ;;  %v884_v12 = vpop.f32.mrb[13].mxu1  ;;  %v1582_v1 = vunpack.c.h.bf16 (!%p1499_p13), %v1713_v51  ;;  %v1714_v2 = vld [vmem:[%s2134_s7 + $0x20] sm:$0xff] (!%p1499_p13)   ;;  %v1138_v5 = vmax.f32 (!%p1499_p13), %v1106_v59, 0.0 }
 0x159   : > { %v911_v15 = vadd.f32 %v820_v11, %v526_v3  ;;  %v927_v16 = vadd.f32 %v884_v12, %v542_v4  ;;  %v1796_v17 = vpop.f32.mrb[14].mxu0  ;;  %v1812_v18 = vpop.f32.mrb[14].mxu1  ;;  %v977_v3 = vld [vmem:[#allocation2 + $0x50] sm:$0xff] (!%p1499_p13)  ;;  %v1634_v4 = vpack.c.bf16 (!%p1499_p13), %v1135_v58, %v1134_v57  ;;  %v1139_v6 = vmax.f32 (!%p1499_p13), %v1107_v60, 0.0  ;;  %v1719_v58 = vld [vmem:[%s2134_s7 + $0x48] sm:$0xff] (!%p1499_p13)  }
 0x15a   : > { %945 = vst [vmem:[#allocation2 + $0x70] sm:$0xff] %v913_v9  ;;  %961 = vst [vmem:[#allocation2 + $0xf0] sm:$0xff] %v929_v10  ;;  %v914_v19 = vadd.f32 %v1796_v17, %v529_v7  ;;  %v930_v20 = vadd.f32 %v1812_v18, %v545_v8  ;;  %v823_v21 = vpop.f32.mrb[15].mxu0  ;;  %v887_v22 = vpop.f32.mrb[15].mxu1  ;;  %v975_v56 = vld [vmem:[#allocation2 + $0x40] sm:$0xff] (!%p1499_p13)  ;;  %v1715_v9 = vld [vmem:[%s2134_s7 + $0x28] sm:$0xff] (!%p1499_p13)   ;;  %v1639_v10 = vpack.c.bf16 (!%p1499_p13), %v1137_v63, %v1136_v62  ;;  %v1586_v17 = vunpack.c.h.bf16 (!%p1499_p13), %v1714_v2 }
 0x15b   : > { %943 = vst [vmem:[#allocation2 + $0x60] sm:$0xff] %v911_v15  ;;  %959 = vst [vmem:[#allocation2 + $0xe0] sm:$0xff] %v927_v16  ;;  %v912_v23 = vadd.f32 %v823_v21, %v527_v13  ;;  %v928_v24 = vadd.f32 %v887_v22, %v543_v14  ;;  %v1014_v7 = vadd.f32 (!%p1499_p13), %v2172_v27, %v975_v56  ;;  %v978_v8 = vld [vmem:[#allocation2 + $0x58] sm:$0xff] (!%p1499_p13)  ;;  %v1585_v16 = vunpack.c.l.bf16 (!%p1499_p13), %v1714_v2  ;;  %v987_v63 = vld [vmem:[#allocation2 + $0xa0] sm:$0xff] (!%p1499_p13) }
 0x15c   : > { %946 = vst [vmem:[#allocation2 + $0x78] sm:$0xff] %v914_v19  ;;  %962 = vst [vmem:[#allocation2 + $0xf8] sm:$0xff] %v930_v20  ;;  %v976_v61 = vld [vmem:[#allocation2 + $0x48] sm:$0xff] (!%p1499_p13)  ;;  %v1108_v11 = vadd.f32 (!%p1499_p13), %v1581_v0, %v1012_v54  ;;  %v1109_v12 = vadd.f32 (!%p1499_p13), %v1582_v1, %v1013_v55  ;;  %v1644_v15 = vpack.c.bf16 (!%p1499_p13), %v1139_v6, %v1138_v5  ;;  %v1716_v20 = vld [vmem:[%s2134_s7 + $0x30] sm:$0xff] (!%p1499_p13)   ;;  %v1590_v28 = vunpack.c.h.bf16 (!%p1499_p13), %v1715_v9 }
 0x15d   : > { %944 = vst [vmem:[#allocation2 + $0x68] sm:$0xff] %v912_v23  ;;  %960 = vst [vmem:[#allocation2 + $0xe8] sm:$0xff] %v928_v24  ;;  %v1015_v13 = vadd.f32 (!%p1499_p13), %v2172_v27, %v976_v61  ;;  %v1016_v18 = vadd.f32 (!%p1499_p13), %v2172_v27, %v977_v3  ;;  %v1017_v23 = vadd.f32 (!%p1499_p13), %v2172_v27, %v978_v8  ;;  %v1589_v24 = vunpack.c.l.bf16 (!%p1499_p13), %v1715_v9  ;;  %v1720_v5 = vld [vmem:[%s2134_s7 + $0x50] sm:$0xff] (!%p1499_p13)  }
 0x15e   : > { %1635 = vst [vmem:[%s2139_s9] sm:$0xff] %v1634_v4   ;;  %1726 = vst [vmem:[%s2139_s9 + $0x8] sm:$0xff] %v1639_v10   ;;  %v1140_v21 = vmax.f32 %v1108_v11, 0.0  ;;  %v1141_v22 = vmax.f32 %v1109_v12, 0.0  ;;  %v1110_v25 = vadd.f32 %v1585_v16, %v1014_v7  ;;  %v1593_v35 = vunpack.c.l.bf16 %v1716_v20  ;;  %v988_v4 = vld [vmem:[#allocation2 + $0xa8] sm:$0xff] }
 0x15f   : > { %1727 = vst [vmem:[%s2139_s9 + $0x10] sm:$0xff] %v1644_v15   ;;  %v1111_v26 = vadd.f32 %v1586_v17, %v1015_v13  ;;  %v1112_v33 = vadd.f32 %v1589_v24, %v1016_v18  ;;  %v1113_v39 = vadd.f32 %v1590_v28, %v1017_v23  ;;  %v1594_v40 = vunpack.c.h.bf16 %v1716_v20  ;;  %v990_v15 = vld [vmem:[#allocation2 + $0xb8] sm:$0xff] }
 0x160   : > { %v1649_v32 = vpack.c.bf16 %v1141_v22, %v1140_v21  ;;  %v1142_v37 = vmax.f32 %v1110_v25, 0.0  ;;  %v1597_v51 = vunpack.c.l.bf16 %v1717_v36  ;;  %v1598_v55 = vunpack.c.h.bf16 %v1717_v36  ;;  %v1721_v20 = vld [vmem:[%s2134_s7 + $0x58] sm:$0xff]   ;;  %v991_v25 = vld [vmem:[#allocation2 + $0xc0] sm:$0xff] }
 0x161   : > { %v981_v30 = vld [vmem:[#allocation2 + $0x70] sm:$0xff]  ;;  %v1143_v38 = vmax.f32 %v1111_v26, 0.0  ;;  %v1144_v43 = vmax.f32 %v1112_v33, 0.0  ;;  %v1145_v49 = vmax.f32 %v1113_v39, 0.0  ;;  %v1022_v56 = vadd.f32 %v2172_v27, %v983_v41  ;;  %v992_v26 = vld [vmem:[#allocation2 + $0xc8] sm:$0xff] }
 0x162   : > { %v979_v14 = vld [vmem:[#allocation2 + $0x60] sm:$0xff]  ;;  %1728 = vst [vmem:[%s2139_s9 + $0x18] sm:$0xff] %v1649_v32   ;;  %v1020_v45 = vadd.f32 %v2172_v27, %v981_v30  ;;  %v1023_v57 = vadd.f32 %v2172_v27, %v984_v42  ;;  %v1601_v62 = vunpack.c.l.bf16 %v1718_v47  ;;  %v1602_v1 = vunpack.c.h.bf16 %v1718_v47 }
 0x163   : > { %v1018_v29 = vadd.f32 %v2172_v27, %v979_v14  ;;  %v982_v31 = vld [vmem:[#allocation2 + $0x78] sm:$0xff]  ;;  %v1654_v48 = vpack.c.bf16 %v1143_v38, %v1142_v37  ;;  %v1659_v59 = vpack.c.bf16 %v1145_v49, %v1144_v43  ;;  %v1024_v2 = vadd.f32 %v2172_v27, %v985_v52  ;;  %v989_v14 = vld [vmem:[#allocation2 + $0xb0] sm:$0xff]  ;;  %v1722_v32 = vld [vmem:[%s2134_s7 + $0x60] sm:$0xff]  }
 0x164   : > { %v980_v19 = vld [vmem:[#allocation2 + $0x68] sm:$0xff]  ;;  %v1021_v46 = vadd.f32 %v2172_v27, %v982_v31  ;;  %v1116_v61 = vadd.f32 %v1597_v51, %v1020_v45  ;;  %v1025_v3 = vadd.f32 %v2172_v27, %v986_v53  ;;  %v1118_v8 = vadd.f32 %v1601_v62, %v1022_v56  ;;  %v993_v37 = vld [vmem:[#allocation2 + $0xd0] sm:$0xff]  ;;  %v994_v38 = vld [vmem:[#allocation2 + $0xd8] sm:$0xff] }
 0x165   : > { %v1019_v34 = vadd.f32 %v2172_v27, %v980_v19  ;;  %v1114_v44 = vadd.f32 %v1593_v35, %v1018_v29  ;;  %1729 = vst [vmem:[%s2139_s9 + $0x20] sm:$0xff] %v1654_v48   ;;  %1730 = vst [vmem:[%s2139_s9 + $0x28] sm:$0xff] %v1659_v59   ;;  %v1605_v9 = vunpack.c.l.bf16 %v1719_v58  ;;  %v1119_v11 = vadd.f32 %v1602_v1, %v1023_v57  ;;  %v1723_v43 = vld [vmem:[%s2134_s7 + $0x68] sm:$0xff]   ;;  %v995_v48 = vld [vmem:[#allocation2 + $0xe0] sm:$0xff] }
 0x166   : > { %v1117_v0 = vadd.f32 %v1598_v55, %v1021_v46  ;;  %v1148_v7 = vmax.f32 %v1116_v61, 0.0  ;;  %v1606_v12 = vunpack.c.h.bf16 %v1719_v58  ;;  %v1026_v13 = vadd.f32 %v2172_v27, %v987_v63  ;;  %v996_v53 = vld [vmem:[#allocation2 + $0xe8] sm:$0xff]  ;;  %v997_v63 = vld [vmem:[#allocation2 + $0xf0] sm:$0xff] }
 0x167   : > { %v1115_v50 = vadd.f32 %v1594_v40, %v1019_v34  ;;  %v1146_v54 = vmax.f32 %v1114_v44, 0.0  ;;  %v1150_v16 = vmax.f32 %v1118_v8, 0.0  ;;  %v1120_v17 = vadd.f32 %v1605_v9, %v1024_v2 }
 0x168   : > { %v1149_v10 = vmax.f32 %v1117_v0, 0.0  ;;  %v1027_v18 = vadd.f32 %v2172_v27, %v988_v4  ;;  %v1609_v19 = vunpack.c.l.bf16 %v1720_v5  ;;  %v1151_v22 = vmax.f32 %v1119_v11, 0.0  ;;  %v998_v0 = vld [vmem:[#allocation2 + $0xf8] sm:$0xff] }
 0x169   : > { %v1147_v60 = vmax.f32 %v1115_v50, 0.0  ;;  %v1121_v23 = vadd.f32 %v1606_v12, %v1025_v3  ;;  %v1610_v24 = vunpack.c.h.bf16 %v1720_v5  ;;  %v1152_v28 = vmax.f32 %v1120_v17, 0.0  ;;  %v1725_v5 = vld [vmem:[%s2134_s7 + $0x78] sm:$0xff]  }
 0x16a   : > { %v1669_v21 = vpack.c.bf16 %v1149_v10, %v1148_v7  ;;  %v1122_v29 = vadd.f32 %v1609_v19, %v1026_v13  ;;  %v1028_v30 = vadd.f32 %v2172_v27, %v989_v14  ;;  %v1029_v31 = vadd.f32 %v2172_v27, %v990_v15 }
 0x16b   : > { %v1664_v6 = vpack.c.bf16 %v1147_v60, %v1146_v54  ;;  %v1674_v33 = vpack.c.bf16 %v1151_v22, %v1150_v16  ;;  %v1153_v34 = vmax.f32 %v1121_v23, 0.0  ;;  %v1123_v35 = vadd.f32 %v1610_v24, %v1027_v18  ;;  %v1724_v54 = vld [vmem:[%s2134_s7 + $0x70] sm:$0xff]  }
 0x16c   : > { %1732 = vst [vmem:[%s2139_s9 + $0x38] sm:$0xff] %v1669_v21   ;;  %v1613_v36 = vunpack.c.l.bf16 %v1721_v20  ;;  %v1154_v39 = vmax.f32 %v1122_v29, 0.0  ;;  %v1614_v40 = vunpack.c.h.bf16 %v1721_v20  ;;  %v1030_v41 = vadd.f32 %v2172_v27, %v991_v25 }
 0x16d   : > { %1731 = vst [vmem:[%s2139_s9 + $0x30] sm:$0xff] %v1664_v6   ;;  %v1031_v42 = vadd.f32 %v2172_v27, %v992_v26  ;;  %1733 = vst [vmem:[%s2139_s9 + $0x40] sm:$0xff] %v1674_v33   ;;  %v1679_v44 = vpack.c.bf16 %v1153_v34, %v1152_v28  ;;  %v1155_v45 = vmax.f32 %v1123_v35, 0.0  ;;  %v1617_v47 = vunpack.c.l.bf16 %v1722_v32 }
 0x16e   : > { %v1124_v46 = vadd.f32 %v1613_v36, %v1028_v30  ;;  %v1125_v49 = vadd.f32 %v1614_v40, %v1029_v31  ;;  %v1618_v50 = vunpack.c.h.bf16 %v1722_v32  ;;  %v1032_v51 = vadd.f32 %v2172_v27, %v993_v37 }
 0x16f   : > { %v1033_v52 = vadd.f32 %v2172_v27, %v994_v38  ;;  %1734 = vst [vmem:[%s2139_s9 + $0x48] sm:$0xff] %v1679_v44   ;;  %v1684_v55 = vpack.c.bf16 %v1155_v45, %v1154_v39  ;;  %v1126_v57 = vadd.f32 %v1617_v47, %v1030_v41  ;;  %v1621_v58 = vunpack.c.l.bf16 %v1723_v43 }
 0x170   : > { %v1156_v56 = vmax.f32 %v1124_v46, 0.0  ;;  %v1157_v59 = vmax.f32 %v1125_v49, 0.0  ;;  %v1127_v60 = vadd.f32 %v1618_v50, %v1031_v42  ;;  %v1622_v61 = vunpack.c.h.bf16 %v1723_v43 }
 0x171   : > { %v1034_v62 = vadd.f32 %v2172_v27, %v995_v48  ;;  %1735 = vst [vmem:[%s2139_s9 + $0x50] sm:$0xff] %v1684_v55   ;;  %v1158_v1 = vmax.f32 %v1126_v57, 0.0  ;;  %v1128_v2 = vadd.f32 %v1621_v58, %v1032_v51  ;;  %v1035_v3 = vadd.f32 %v2172_v27, %v996_v53 }
 0x172   : > { %v1625_v4 = vunpack.c.l.bf16 %v1724_v54  ;;  %v1689_v6 = vpack.c.bf16 %v1157_v59, %v1156_v56  ;;  %v1159_v7 = vmax.f32 %v1127_v60, 0.0  ;;  %v1129_v8 = vadd.f32 %v1622_v61, %v1033_v52 }
 0x173   : > { %v1626_v9 = vunpack.c.h.bf16 %v1724_v54  ;;  %v1160_v10 = vmax.f32 %v1128_v2, 0.0  ;;  %v1036_v12 = vadd.f32 %v2172_v27, %v997_v63  ;;  %v1037_v13 = vadd.f32 %v2172_v27, %v998_v0 }
 0x174   : > { %v1130_v11 = vadd.f32 %v1625_v4, %v1034_v62  ;;  %1736 = vst [vmem:[%s2139_s9 + $0x58] sm:$0xff] %v1689_v6   ;;  %v1694_v14 = vpack.c.bf16 %v1159_v7, %v1158_v1  ;;  %v1161_v15 = vmax.f32 %v1129_v8, 0.0  ;;  %v1629_v17 = vunpack.c.l.bf16 %v1725_v5 }
 0x175   : > { %v1131_v16 = vadd.f32 %v1626_v9, %v1035_v3  ;;  %v1630_v19 = vunpack.c.h.bf16 %v1725_v5 }
 0x176   : > { %v1162_v18 = vmax.f32 %v1130_v11, 0.0  ;;  %1737 = vst [vmem:[%s2139_s9 + $0x60] sm:$0xff] %v1694_v14   ;;  %v1699_v20 = vpack.c.bf16 %v1161_v15, %v1160_v10  ;;  %v1132_v22 = vadd.f32 %v1629_v17, %v1036_v12 }
 0x177   : > { %v1163_v21 = vmax.f32 %v1131_v16, 0.0  ;;  %v1133_v23 = vadd.f32 %v1630_v19, %v1037_v13 }
 0x178   : > { %1738 = vst [vmem:[%s2139_s9 + $0x68] sm:$0xff] %v1699_v20   ;;  %v1164_v25 = vmax.f32 %v1132_v22, 0.0 }
 0x179   : > { %v1704_v24 = vpack.c.bf16 %v1163_v21, %v1162_v18  ;;  %v1165_v26 = vmax.f32 %v1133_v23, 0.0 }
 0x17b   : > { %1739 = vst [vmem:[%s2139_s9 + $0x70] sm:$0xff] %v1704_v24   ;;  %v1709_v27 = vpack.c.bf16 %v1165_v26, %v1164_v25 }
 0x17d   : > { %1740 = vst [vmem:[%s2139_s9 + $0x78] sm:$0xff] %v1709_v27  }
 0x17e PF: > { %s14_s21 = sadd.s32 1, %s1965_s21   ;;  %s2264_s15 = smov %s1945_s16 }
 0x17f   : > { %p11_p0 = scmp.ge.s32.totalorder %s14_s21, 12   ;;  %s2265_s16 = smov %s2044_s28 }
 0x180   : > { %s2266_s17 = smov %s1957_s19  ;;  %s2267_s18 = smov %s1961_s20 }
 0x181   : > { %s2268_s19 = smov %s2271_s22  ;;  %s2269_s20 = smov %s2275_s23 }
 0x182   :  { %13 = sbr.rel (!%p11_p0) target bundleno = 4 (0x4), region = 129 }

// kernel: color_model_forward.26
= control target key start
LH: loop header
LB: loop body
LE: loop exit
PB: predicated region body
PF: predicated region fallthrough
CT: control target
= control target key end

     0   :  { %s1190_s12 = smov 0   ;;  %s1192_s13 = smov 0   ;;  %s1322_s0 = inlined_call_operand.vmem [shape: bf16[128,640], index: 0, kind: input, shape index: {}]   ;;  %s1323_s1 = inlined_call_operand.vmem [shape: bf16[640,128], index: 1, kind: input, shape index: {}]   ;;  %s1324_s2 = inlined_call_operand.vmem [shape: f32[1,128], index: 2, kind: input, shape index: {}]   ;;  %s1325_s3 = inlined_call_operand.vmem [shape: bf16[128,128], index: 3, kind: output, shape index: {}]  }
   0x1   :  { %s1194_s14 = smov 0   ;;  %s1196_s15 = smov 0  }
   0x2   :  { %s1198_s16 = smov 0  }
   0x3 LB: > { %s25_s17 = sadd.s32 1, %s1163_s15  ;;  %p48_p1 = scmp.ne.s32.totalorder %s1155_s13, %s1151_s12  ;;  %s1167_s16 = sphi %s1198_s16, %s13_s16   ;;  %s1163_s15 = sphi %s1196_s15, %s1329_s15   ;;  %s1159_s14 = sphi %s1194_s14, %s1328_s14   ;;  %s1155_s13 = sphi %s1192_s13, %s1327_s13   ;;  %s1151_s12 = sphi %s1190_s12, %s1326_s12  }
   0x4   : > { %p26_p0 = scmp.ge.s32.totalorder %s25_s17, 5  ;;  %p49_p2 = scmp.eq.s32.totalorder %s1167_s16, 0 }
   0x5   : > { %s41_s19 = sadd.s32 1, %s1155_s13  ;;  %p899_p5 = scmp.ge.s32.totalorder %s1167_s16, 5 }
   0x6   : > { %s1331_s17 = smov (%p26_p0, %s25_s17), 0  ;;  %p50_p3 = por %p49_p2, %p48_p1 }
   0x7   : > { %s37_s18 = ssub.s32 %s1163_s15, %s1331_s17  ;;  %162 = sbr.rel (%p899_p5) target bundleno = 28 (0x1c), region = 20 }
   0x8   : > { %p39_p4 = scmp.eq.s32.totalorder %s37_s18, 0 }
   0xa   : > { %s1225_s20 = scalar_select %p39_p4, %s1155_s13, %s41_s19  }
   0xe   : > { %165 = sbr.rel (!%p50_p3) target bundleno = 28 (0x1c), region = 24  ;;  %s167_s21 = sand.u32 (%p50_p3), 1, %s1155_s13  }
   0xf   : > { %s901_s22 = sshll.u32 (%p50_p3), %s1163_s15, 2  ;;  %s900_s23 = sshll.u32 (%p50_p3), %s167_s21, 6 }
  0x10   : > { %s1233_s26 = scalar_lea.vmem (%p50_p3), %s1322_s0, %s901_s22  ;;  %s169_s27 = scalar_lea.vmem (%p50_p3), [#allocation3], %s900_s23 }
  0x11   : > { %v190_v0 = vld [vmem:[%s1233_s26] sm:$0xf] (%p50_p3)  ;;  %v192_v1 = vld [vmem:[%s1233_s26 + $0x14] sm:$0xf] (%p50_p3)  ;;  %v194_v2 = vld [vmem:[%s1233_s26 + $0x28] sm:$0xf] (%p50_p3) }
  0x12   : > { %191 = vst [vmem:[%s169_s27] sm:$0xf] (%p50_p3), %v190_v0  ;;  %193 = vst [vmem:[%s169_s27 + $0x4] sm:$0xf] (%p50_p3), %v192_v1  ;;  %v196_v3 = vld [vmem:[%s1233_s26 + $0x3c] sm:$0xf] (%p50_p3) }
  0x13   : > { %v198_v4 = vld [vmem:[%s1233_s26 + $0x50] sm:$0xf] (%p50_p3)  ;;  %195 = vst [vmem:[%s169_s27 + $0x8] sm:$0xf] (%p50_p3), %v194_v2  ;;  %197 = vst [vmem:[%s169_s27 + $0xc] sm:$0xf] (%p50_p3), %v196_v3 }
  0x14   : > { %199 = vst [vmem:[%s169_s27 + $0x10] sm:$0xf] (%p50_p3), %v198_v4  ;;  %v200_v5 = vld [vmem:[%s1233_s26 + $0x64] sm:$0xf] (%p50_p3)  ;;  %v202_v6 = vld [vmem:[%s1233_s26 + $0x78] sm:$0xf] (%p50_p3) }
  0x15   : > { %v204_v7 = vld [vmem:[%s1233_s26 + $0x8c] sm:$0xf]  ;;  %201 = vst [vmem:[%s169_s27 + $0x14] sm:$0xf] %v200_v5  ;;  %203 = vst [vmem:[%s169_s27 + $0x18] sm:$0xf] %v202_v6 }
  0x16   : > { %205 = vst [vmem:[%s169_s27 + $0x1c] sm:$0xf] %v204_v7  ;;  %v206_v8 = vld [vmem:[%s1233_s26 + $0xa0] sm:$0xf]  ;;  %v208_v9 = vld [vmem:[%s1233_s26 + $0xb4] sm:$0xf] }
  0x17   : > { %v210_v10 = vld [vmem:[%s1233_s26 + $0xc8] sm:$0xf]  ;;  %207 = vst [vmem:[%s169_s27 + $0x20] sm:$0xf] %v206_v8  ;;  %209 = vst [vmem:[%s169_s27 + $0x24] sm:$0xf] %v208_v9 }
  0x18   : > { %211 = vst [vmem:[%s169_s27 + $0x28] sm:$0xf] %v210_v10  ;;  %v212_v11 = vld [vmem:[%s1233_s26 + $0xdc] sm:$0xf]  ;;  %v214_v12 = vld [vmem:[%s1233_s26 + $0xf0] sm:$0xf] }
  0x19   : > { %v216_v13 = vld [vmem:[%s1233_s26 + $0x104] sm:$0xf]  ;;  %213 = vst [vmem:[%s169_s27 + $0x2c] sm:$0xf] %v212_v11  ;;  %215 = vst [vmem:[%s169_s27 + $0x30] sm:$0xf] %v214_v12 }
  0x1a   : > { %217 = vst [vmem:[%s169_s27 + $0x34] sm:$0xf] %v216_v13  ;;  %v218_v14 = vld [vmem:[%s1233_s26 + $0x118] sm:$0xf]  ;;  %v220_v15 = vld [vmem:[%s1233_s26 + $0x12c] sm:$0xf] }
  0x1b   : > { %219 = vst [vmem:[%s169_s27 + $0x38] sm:$0xf] %v218_v14  ;;  %221 = vst [vmem:[%s169_s27 + $0x3c] sm:$0xf] %v220_v15 }
  0x1c PF: > { %p902_p6 = scmp.ge.s32.totalorder %s1167_s16, 1  ;;  %p287_p7 = scmp.lt.s32.totalorder %s1167_s16, 6 }
  0x1e   : > { %p288_p8 = pnand %p902_p6, %p287_p7 }
  0x1f   : > { %s294_s28 = sand.u32 (!%p288_p8), 1, %s1151_s12   ;;  %s904_s29 = sshll.u32 (!%p288_p8), %s1159_s14, 4 }
  0x20   : > { %291 = sbr.rel (%p288_p8) target bundleno = 323 (0x143), region = 69  ;;  %s903_s30 = sshll.u32 (!%p288_p8), %s294_s28, 6 }
  0x21   : > { %p333_p9 = scmp.lt.s32.totalorder (!%p288_p8), %s904_s29, 79  ;;  %s1260_s8 = scalar_lea.vmem (!%p288_p8), [#allocation3], %s903_s30 }
  0x22   : > { %p906_p10 = scmp.ne.s32.totalorder (!%p288_p8), %s1159_s14, 0 }
  0x27   : > { %s1333_s29 = smov (!%p333_p9, %s904_s29), 79  ;;  %357 = sbr.rel (%p906_p10) target bundleno = 49 (0x31), region = 77 }
  0x28   : > { %s905_s4 = sshll.u32 %s1333_s29, 2  ;;  %v1169_v16 = vmov (!%p906_p10), 0.0  }
  0x29   : > { %s1258_s7 = scalar_lea.vmem %s1323_s1, %s905_s4  ;;  %358 = vst [vmem:[#allocation2] sm:$0xff] (!%p906_p10), %v1169_v16  ;;  %359 = vst [vmem:[#allocation2 + $0x8] sm:$0xff] (!%p906_p10), %v1169_v16 }
  0x2a   : > { %360 = vst [vmem:[#allocation2 + $0x10] sm:$0xff] (!%p906_p10), %v1169_v16  ;;  %361 = vst [vmem:[#allocation2 + $0x18] sm:$0xff] (!%p906_p10), %v1169_v16 }
  0x2b   : > { %362 = vst [vmem:[#allocation2 + $0x20] sm:$0xff] (!%p906_p10), %v1169_v16  ;;  %363 = vst [vmem:[#allocation2 + $0x28] sm:$0xff] (!%p906_p10), %v1169_v16 }
  0x2c   : > { %364 = vst [vmem:[#allocation2 + $0x30] sm:$0xff] (!%p906_p10), %v1169_v16  ;;  %365 = vst [vmem:[#allocation2 + $0x38] sm:$0xff] (!%p906_p10), %v1169_v16 }
  0x2d   : > { %366 = vst [vmem:[#allocation2 + $0x40] sm:$0xff] (!%p906_p10), %v1169_v16  ;;  %367 = vst [vmem:[#allocation2 + $0x48] sm:$0xff] (!%p906_p10), %v1169_v16 }
  0x2e   : > { %368 = vst [vmem:[#allocation2 + $0x50] sm:$0xff] %v1169_v16  ;;  %369 = vst [vmem:[#allocation2 + $0x58] sm:$0xff] %v1169_v16 }
  0x2f   : > { %370 = vst [vmem:[#allocation2 + $0x60] sm:$0xff] %v1169_v16  ;;  %371 = vst [vmem:[#allocation2 + $0x68] sm:$0xff] %v1169_v16 }
  0x30   : > { %372 = vst [vmem:[#allocation2 + $0x70] sm:$0xff] %v1169_v16  ;;  %373 = vst [vmem:[#allocation2 + $0x78] sm:$0xff] %v1169_v16 }
  0x31 PF: > { %v1113_v17 = vld [vmem:[%s1258_s7] sm:$0xff]   ;;  %v1114_v18 = vld [vmem:[%s1258_s7 + $0x8] sm:$0xff]   ;;  %v1115_v19 = vld [vmem:[%s1258_s7 + $0x10] sm:$0xff]   ;;  %p923_p11 = scmp.ne.s32.totalorder %s1159_s14, 4 }
  0x32   : > { %1024 = vmatprep.subr.bf16.mxu0 %v1113_v17  ;;  %1056 = vmatprep.subr.bf16.mxu1 %v1113_v17  ;;  %v1116_v20 = vld [vmem:[%s1258_s7 + $0x18] sm:$0xff]   ;;  %v1121_v21 = vld [vmem:[%s1260_s8] sm:$0xff]   ;;  %v1118_v24 = vld [vmem:[%s1258_s7 + $0x28] sm:$0xff]  }
  0x33   : > { %1025 = vmatpush3.bf16.msra.mxu0 %v1113_v17  ;;  %1064 = vmatpush3.bf16.msra.mxu1 %v1113_v17  ;;  %v1122_v22 = vld [vmem:[%s1260_s8 + $0x20] sm:$0xff]   ;;  %v1119_v25 = vld [vmem:[%s1258_s7 + $0x30] sm:$0xff]   ;;  %v1120_v26 = vld [vmem:[%s1258_s7 + $0x38] sm:$0xff]  }
  0x34   : > { %1026 = vmatprep.subr.bf16.mxu0 %v1114_v18  ;;  %1057 = vmatprep.subr.bf16.mxu1 %v1114_v18  ;;  %v1117_v23 = vld [vmem:[%s1258_s7 + $0x20] sm:$0xff]   ;;  %v1123_v27 = vld [vmem:[%s1260_s8 + $0x8] sm:$0xff]   ;;  %v1125_v29 = vld [vmem:[%s1260_s8 + $0x10] sm:$0xff]  }
  0x35   : > { %1040 = vmatprep.mubr.bf16.mxu0 %v1121_v21  ;;  %1048 = vmatprep.mubr.bf16.mxu1 %v1122_v22  ;;  %v1124_v28 = vld [vmem:[%s1260_s8 + $0x28] sm:$0xff]   ;;  %v1126_v30 = vld [vmem:[%s1260_s8 + $0x30] sm:$0xff]   ;;  %v1127_v31 = vld [vmem:[%s1260_s8 + $0x18] sm:$0xff]  }
  0x36   : > { %v1128_v32 = vld [vmem:[%s1260_s8 + $0x38] sm:$0xff]   ;;  %v376_v33 = vld [vmem:[#allocation2 + $0x10] sm:$0xff]  ;;  %v374_v35 = vld [vmem:[#allocation2] sm:$0xff] }
  0x37   : > { %1027 = vmatpush3.bf16.msra.mxu0 %v1114_v18  ;;  %1065 = vmatpush3.bf16.msra.mxu1 %v1114_v18  ;;  %v384_v34 = vld [vmem:[#allocation2 + $0x50] sm:$0xff]  ;;  %v382_v36 = vld [vmem:[#allocation2 + $0x40] sm:$0xff]  ;;  %v377_v39 = vld [vmem:[#allocation2 + $0x18] sm:$0xff] }
  0x38   : > { %1028 = vmatprep.subr.bf16.mxu0 %v1115_v19  ;;  %1058 = vmatprep.subr.bf16.mxu1 %v1115_v19  ;;  %v385_v40 = vld [vmem:[#allocation2 + $0x58] sm:$0xff]  ;;  %v375_v45 = vld [vmem:[#allocation2 + $0x8] sm:$0xff]  ;;  %v380_v57 = vld [vmem:[#allocation2 + $0x30] sm:$0xff] }
  0x39   : > { %v383_v46 = vld [vmem:[#allocation2 + $0x48] sm:$0xff]  ;;  %v388_v58 = vld [vmem:[#allocation2 + $0x70] sm:$0xff]  ;;  %v378_v59 = vld [vmem:[#allocation2 + $0x20] sm:$0xff] }
  0x3a   : > { %v386_v60 = vld [vmem:[#allocation2 + $0x60] sm:$0xff]  ;;  %v381_v63 = vld [vmem:[#allocation2 + $0x38] sm:$0xff]  ;;  %v379_v5 = vld [vmem:[#allocation2 + $0x28] sm:$0xff] }
  0x3b   : > { %1029 = vmatpush3.bf16.msra.mxu0 %v1115_v19  ;;  %1066 = vmatpush3.bf16.msra.mxu1 %v1115_v19  ;;  %v389_v0 = vld [vmem:[#allocation2 + $0x78] sm:$0xff]  ;;  %v387_v6 = vld [vmem:[#allocation2 + $0x68] sm:$0xff]  ;;  %v924_v19 = vld [vmem:[%s1324_s2] ss:$0 sm:$0xff] (!%p923_p11) }
  0x3c   : > { %1030 = vmatprep.subr.bf16.mxu0 %v1116_v20  ;;  %1059 = vmatprep.subr.bf16.mxu1 %v1116_v20 }
  0x3f   : > { %1031 = vmatpush3.bf16.msra.mxu0 %v1116_v20  ;;  %1067 = vmatpush3.bf16.msra.mxu1 %v1116_v20 }
  0x40   : > { %1032 = vmatprep.subr.bf16.mxu0 %v1117_v23  ;;  %1060 = vmatprep.subr.bf16.mxu1 %v1117_v23 }
  0x43   : > { %1033 = vmatpush3.bf16.msra.mxu0 %v1117_v23  ;;  %1068 = vmatpush3.bf16.msra.mxu1 %v1117_v23 }
  0x44   : > { %1034 = vmatprep.subr.bf16.mxu0 %v1118_v24  ;;  %1061 = vmatprep.subr.bf16.mxu1 %v1118_v24 }
  0x47   : > { %1035 = vmatpush3.bf16.msra.mxu0 %v1118_v24  ;;  %1069 = vmatpush3.bf16.msra.mxu1 %v1118_v24 }
  0x48   : > { %1036 = vmatprep.subr.bf16.mxu0 %v1119_v25  ;;  %1062 = vmatprep.subr.bf16.mxu1 %v1119_v25 }
  0x4b   : > { %1037 = vmatpush3.bf16.msra.mxu0 %v1119_v25  ;;  %1070 = vmatpush3.bf16.msra.mxu1 %v1119_v25 }
  0x4c   : > { %1038 = vmatprep.subr.bf16.mxu0 %v1120_v26  ;;  %1063 = vmatprep.subr.bf16.mxu1 %v1120_v26 }
  0x4f   : > { %1039 = vmatpush3.bf16.msra.mxu0 %v1120_v26  ;;  %1071 = vmatpush3.bf16.msra.mxu1 %v1120_v26 }
  0x52   : > { %1041 = vmatmul.mubr.bf16.vlgmr.msra.gmra.mrb[0].mxu0 %v1123_v27  ;;  %1049 = vmatmul.mubr.bf16.vlgmr.msra.gmra.mrb[0].mxu1 %v1124_v28 }
  0x53   : > { %1044 = vmatprep.mubr.bf16.mxu0 %v1125_v29  ;;  %1052 = vmatprep.mubr.bf16.mxu1 %v1126_v30 }
  0x5a   : > { %1045 = vmatmul.mubr.bf16.gmra.mrb[4].mxu0 %v1127_v31  ;;  %1053 = vmatmul.mubr.bf16.gmra.mrb[4].mxu1 %v1128_v32 }
 0x125   : > { %v1042_v37 = vpop.f32.mrb[0].mxu0  ;;  %v1050_v38 = vpop.f32.mrb[0].mxu1 }
 0x126   : > { %v617_v41 = vadd.f32 %v1042_v37, %v376_v33  ;;  %v625_v42 = vadd.f32 %v1050_v38, %v384_v34  ;;  %v552_v43 = vpop.f32.mrb[1].mxu0  ;;  %v584_v44 = vpop.f32.mrb[1].mxu1 }
 0x127   : > { %v615_v47 = vadd.f32 %v552_v43, %v374_v35  ;;  %v623_v48 = vadd.f32 %v584_v44, %v382_v36  ;;  %v1043_v49 = vpop.f32.mrb[2].mxu0  ;;  %v1051_v50 = vpop.f32.mrb[2].mxu1 }
 0x128   : > { %633 = vst [vmem:[#allocation2 + $0x10] sm:$0xff] %v617_v41  ;;  %641 = vst [vmem:[#allocation2 + $0x50] sm:$0xff] %v625_v42  ;;  %v618_v51 = vadd.f32 %v1043_v49, %v377_v39  ;;  %v626_v52 = vadd.f32 %v1051_v50, %v385_v40  ;;  %v555_v53 = vpop.f32.mrb[3].mxu0  ;;  %v587_v54 = vpop.f32.mrb[3].mxu1 }
 0x129   : > { %631 = vst [vmem:[#allocation2] sm:$0xff] %v615_v47  ;;  %639 = vst [vmem:[#allocation2 + $0x40] sm:$0xff] %v623_v48  ;;  %v616_v55 = vadd.f32 %v555_v53, %v375_v45  ;;  %v624_v56 = vadd.f32 %v587_v54, %v383_v46 }
 0x12a   : > { %634 = vst [vmem:[#allocation2 + $0x18] sm:$0xff] %v618_v51  ;;  %642 = vst [vmem:[#allocation2 + $0x58] sm:$0xff] %v626_v52 }
 0x12b   : > { %632 = vst [vmem:[#allocation2 + $0x8] sm:$0xff] %v616_v55  ;;  %640 = vst [vmem:[#allocation2 + $0x48] sm:$0xff] %v624_v56 }
 0x12d   : > { %v1046_v61 = vpop.f32.mrb[4].mxu0  ;;  %v1054_v62 = vpop.f32.mrb[4].mxu1  ;;  %650 = sbr.rel (%p923_p11) target bundleno = 323 (0x143), region = 81 }
 0x12e   : > { %v621_v1 = vadd.f32 %v1046_v61, %v380_v57  ;;  %v629_v2 = vadd.f32 %v1054_v62, %v388_v58  ;;  %v568_v3 = vpop.f32.mrb[5].mxu0  ;;  %v600_v4 = vpop.f32.mrb[5].mxu1 }
 0x12f   : > { %v619_v7 = vadd.f32 %v568_v3, %v378_v59  ;;  %v627_v8 = vadd.f32 %v600_v4, %v386_v60  ;;  %v1047_v9 = vpop.f32.mrb[6].mxu0  ;;  %v1055_v10 = vpop.f32.mrb[6].mxu1  ;;  %v653_v22 = vld [vmem:[#allocation2 + $0x10] sm:$0xff] (!%p923_p11) }
 0x130   : > { %637 = vst [vmem:[#allocation2 + $0x30] sm:$0xff] %v621_v1  ;;  %645 = vst [vmem:[#allocation2 + $0x70] sm:$0xff] %v629_v2  ;;  %v622_v11 = vadd.f32 %v1047_v9, %v381_v63  ;;  %v630_v12 = vadd.f32 %v1055_v10, %v389_v0  ;;  %v571_v13 = vpop.f32.mrb[7].mxu0  ;;  %v603_v14 = vpop.f32.mrb[7].mxu1  ;;  %v651_v17 = vld [vmem:[#allocation2] sm:$0xff] (!%p923_p11)  ;;  %v676_v25 = vadd.f32 (!%p923_p11), %v924_v19, %v653_v22  ;;  %v661_v37 = vld [vmem:[#allocation2 + $0x50] sm:$0xff] (!%p923_p11) }
 0x131   : > { %635 = vst [vmem:[#allocation2 + $0x20] sm:$0xff] %v619_v7  ;;  %643 = vst [vmem:[#allocation2 + $0x60] sm:$0xff] %v627_v8  ;;  %v620_v15 = vadd.f32 %v571_v13, %v379_v5  ;;  %v628_v16 = vadd.f32 %v603_v14, %v387_v6  ;;  %v674_v20 = vadd.f32 (!%p923_p11), %v924_v19, %v651_v17  ;;  %v654_v23 = vld [vmem:[#allocation2 + $0x18] sm:$0xff] (!%p923_p11)  ;;  %v659_v35 = vld [vmem:[#allocation2 + $0x40] sm:$0xff] (!%p923_p11) }
 0x132   : > { %638 = vst [vmem:[#allocation2 + $0x38] sm:$0xff] %v622_v11  ;;  %646 = vst [vmem:[#allocation2 + $0x78] sm:$0xff] %v630_v12  ;;  %v652_v18 = vld [vmem:[#allocation2 + $0x8] sm:$0xff] (!%p923_p11)  ;;  %v677_v26 = vadd.f32 (!%p923_p11), %v924_v19, %v654_v23  ;;  %v692_v38 = vmax.f32 (!%p923_p11), %v676_v25, 0.0  ;;  %v662_v42 = vld [vmem:[#allocation2 + $0x58] sm:$0xff] (!%p923_p11)  ;;  %v682_v47 = vadd.f32 (!%p923_p11), %v924_v19, %v659_v35  ;;  %v684_v52 = vadd.f32 (!%p923_p11), %v924_v19, %v661_v37 }
 0x133   : > { %636 = vst [vmem:[#allocation2 + $0x28] sm:$0xff] %v620_v15  ;;  %644 = vst [vmem:[#allocation2 + $0x68] sm:$0xff] %v628_v16  ;;  %v675_v21 = vadd.f32 (!%p923_p11), %v924_v19, %v652_v18  ;;  %v690_v31 = vmax.f32 (!%p923_p11), %v674_v20, 0.0  ;;  %v660_v36 = vld [vmem:[#allocation2 + $0x48] sm:$0xff] (!%p923_p11)  ;;  %v685_v57 = vadd.f32 (!%p923_p11), %v924_v19, %v662_v42 }
 0x134   : > { %v693_v39 = vmax.f32 %v677_v26, 0.0  ;;  %v683_v51 = vadd.f32 %v924_v19, %v660_v36  ;;  %v698_v56 = vmax.f32 %v682_v47, 0.0  ;;  %v700_v61 = vmax.f32 %v684_v52, 0.0 }
 0x135   : > { %v691_v32 = vmax.f32 %v675_v21, 0.0  ;;  %v701_v63 = vmax.f32 %v685_v57, 0.0 }
 0x136   : > { %v969_v49 = vpack.c.bf16 %v693_v39, %v692_v38  ;;  %v699_v60 = vmax.f32 %v683_v51, 0.0 }
 0x137   : > { %v657_v29 = vld [vmem:[#allocation2 + $0x30] sm:$0xff]  ;;  %v964_v44 = vpack.c.bf16 %v691_v32, %v690_v31  ;;  %v989_v5 = vpack.c.bf16 %v701_v63, %v700_v61 }
 0x138   : > { %v655_v24 = vld [vmem:[#allocation2 + $0x20] sm:$0xff]  ;;  %v680_v34 = vadd.f32 %v924_v19, %v657_v29  ;;  %v665_v53 = vld [vmem:[#allocation2 + $0x70] sm:$0xff]  ;;  %1001 = vst [vmem:[%s1325_s3 + $0x8] sm:$0xff] %v969_v49   ;;  %v984_v3 = vpack.c.bf16 %v699_v60, %v698_v56 }
 0x139   : > { %v678_v28 = vadd.f32 %v924_v19, %v655_v24  ;;  %v658_v30 = vld [vmem:[#allocation2 + $0x38] sm:$0xff]  ;;  %v663_v43 = vld [vmem:[#allocation2 + $0x60] sm:$0xff]  ;;  %965 = vst [vmem:[%s1325_s3] sm:$0xff] %v964_v44   ;;  %v688_v1 = vadd.f32 %v924_v19, %v665_v53  ;;  %1005 = vst [vmem:[%s1325_s3 + $0x28] sm:$0xff] %v989_v5  }
 0x13a   : > { %v656_v27 = vld [vmem:[#allocation2 + $0x28] sm:$0xff]  ;;  %v681_v41 = vadd.f32 %v924_v19, %v658_v30  ;;  %v696_v46 = vmax.f32 %v680_v34, 0.0  ;;  %v666_v54 = vld [vmem:[#allocation2 + $0x78] sm:$0xff]  ;;  %v686_v58 = vadd.f32 %v924_v19, %v663_v43  ;;  %1004 = vst [vmem:[%s1325_s3 + $0x20] sm:$0xff] %v984_v3  }
 0x13b   : > { %v679_v33 = vadd.f32 %v924_v19, %v656_v27  ;;  %v694_v40 = vmax.f32 %v678_v28, 0.0  ;;  %v664_v48 = vld [vmem:[#allocation2 + $0x68] sm:$0xff]  ;;  %v689_v2 = vadd.f32 %v924_v19, %v666_v54  ;;  %v704_v6 = vmax.f32 %v688_v1, 0.0 }
 0x13c   : > { %v697_v50 = vmax.f32 %v681_v41, 0.0  ;;  %v687_v62 = vadd.f32 %v924_v19, %v664_v48  ;;  %v702_v0 = vmax.f32 %v686_v58, 0.0 }
 0x13d   : > { %v695_v45 = vmax.f32 %v679_v33, 0.0  ;;  %v705_v7 = vmax.f32 %v689_v2, 0.0 }
 0x13e   : > { %v979_v59 = vpack.c.bf16 %v697_v50, %v696_v46  ;;  %v703_v4 = vmax.f32 %v687_v62, 0.0 }
 0x13f   : > { %v974_v55 = vpack.c.bf16 %v695_v45, %v694_v40  ;;  %v999_v9 = vpack.c.bf16 %v705_v7, %v704_v6 }
 0x140   : > { %1003 = vst [vmem:[%s1325_s3 + $0x18] sm:$0xff] %v979_v59   ;;  %v994_v8 = vpack.c.bf16 %v703_v4, %v702_v0 }
 0x141   : > { %1002 = vst [vmem:[%s1325_s3 + $0x10] sm:$0xff] %v974_v55   ;;  %1007 = vst [vmem:[%s1325_s3 + $0x38] sm:$0xff] %v999_v9  }
 0x142   : > { %1006 = vst [vmem:[%s1325_s3 + $0x30] sm:$0xff] %v994_v8  }
 0x143 PF: > { %s13_s16 = sadd.s32 1, %s1167_s16   ;;  %s1326_s12 = smov %s1155_s13 }
 0x144   : > { %p10_p12 = scmp.ge.s32.totalorder %s13_s16, 7   ;;  %s1327_s13 = smov %s1225_s20 }
 0x145   : > { %s1328_s14 = smov %s1163_s15  ;;  %s1329_s15 = smov %s1331_s17 }
 0x146   :  { %12 = sbr.rel (!%p10_p12) target bundleno = 3 (0x3), region = 122 }

// kernel: color_model_forward.27
= control target key start
LH: loop header
LB: loop body
LE: loop exit
PB: predicated region body
PF: predicated region fallthrough
CT: control target
= control target key end

     0   :  { %s705_s1 = inlined_call_operand.vmem [shape: bf16[128,128], index: 1, kind: input, shape index: {}]   ;;  %s706_s0 = inlined_call_operand.vmem [shape: bf16[128,128], index: 0, kind: input, shape index: {}]   ;;  %s707_s2 = inlined_call_operand.vmem [shape: f32[1,128], index: 2, kind: input, shape index: {}]   ;;  %s708_s3 = inlined_call_operand.vmem [shape: bf16[128,128], index: 3, kind: output, shape index: {}]  }
   0x1   :  { %v594_v0 = vld [vmem:[%s705_s1] sm:$0xff]   ;;  %v595_v1 = vld [vmem:[%s705_s1 + $0x8] sm:$0xff]   ;;  %v596_v2 = vld [vmem:[%s705_s1 + $0x10] sm:$0xff]  }
   0x2   :  { %546 = vmatprep.subr.bf16.mxu0 %v594_v0  ;;  %578 = vmatprep.subr.bf16.mxu1 %v594_v0  ;;  %v597_v3 = vld [vmem:[%s705_s1 + $0x18] sm:$0xff]   ;;  %v602_v4 = vld [vmem:[%s706_s0] sm:$0xff]   ;;  %v599_v7 = vld [vmem:[%s705_s1 + $0x28] sm:$0xff]  }
   0x3   :  { %547 = vmatpush3.bf16.msra.mxu0 %v594_v0  ;;  %586 = vmatpush3.bf16.msra.mxu1 %v594_v0  ;;  %v603_v5 = vld [vmem:[%s706_s0 + $0x20] sm:$0xff]   ;;  %v600_v8 = vld [vmem:[%s705_s1 + $0x30] sm:$0xff]   ;;  %v601_v9 = vld [vmem:[%s705_s1 + $0x38] sm:$0xff]  }
   0x4   :  { %548 = vmatprep.subr.bf16.mxu0 %v595_v1  ;;  %579 = vmatprep.subr.bf16.mxu1 %v595_v1  ;;  %v598_v6 = vld [vmem:[%s705_s1 + $0x20] sm:$0xff]   ;;  %v604_v10 = vld [vmem:[%s706_s0 + $0x8] sm:$0xff]   ;;  %v606_v12 = vld [vmem:[%s706_s0 + $0x10] sm:$0xff]  }
   0x5   :  { %562 = vmatprep.mubr.bf16.mxu0 %v602_v4  ;;  %570 = vmatprep.mubr.bf16.mxu1 %v603_v5  ;;  %v605_v11 = vld [vmem:[%s706_s0 + $0x28] sm:$0xff]   ;;  %v607_v13 = vld [vmem:[%s706_s0 + $0x30] sm:$0xff]   ;;  %v608_v14 = vld [vmem:[%s706_s0 + $0x18] sm:$0xff]  }
   0x6   :  { %v609_v15 = vld [vmem:[%s706_s0 + $0x38] sm:$0xff]   ;;  %v450_v17 = vld [vmem:[%s707_s2] ss:$0 sm:$0xff] }
   0x7   :  { %549 = vmatpush3.bf16.msra.mxu0 %v595_v1  ;;  %587 = vmatpush3.bf16.msra.mxu1 %v595_v1 }
   0x8   :  { %550 = vmatprep.subr.bf16.mxu0 %v596_v2  ;;  %580 = vmatprep.subr.bf16.mxu1 %v596_v2 }
   0xb   :  { %551 = vmatpush3.bf16.msra.mxu0 %v596_v2  ;;  %588 = vmatpush3.bf16.msra.mxu1 %v596_v2 }
   0xc   :  { %552 = vmatprep.subr.bf16.mxu0 %v597_v3  ;;  %581 = vmatprep.subr.bf16.mxu1 %v597_v3 }
   0xf   :  { %553 = vmatpush3.bf16.msra.mxu0 %v597_v3  ;;  %589 = vmatpush3.bf16.msra.mxu1 %v597_v3 }
  0x10   :  { %554 = vmatprep.subr.bf16.mxu0 %v598_v6  ;;  %582 = vmatprep.subr.bf16.mxu1 %v598_v6 }
  0x13   :  { %555 = vmatpush3.bf16.msra.mxu0 %v598_v6  ;;  %590 = vmatpush3.bf16.msra.mxu1 %v598_v6 }
  0x14   :  { %556 = vmatprep.subr.bf16.mxu0 %v599_v7  ;;  %583 = vmatprep.subr.bf16.mxu1 %v599_v7 }
  0x17   :  { %557 = vmatpush3.bf16.msra.mxu0 %v599_v7  ;;  %591 = vmatpush3.bf16.msra.mxu1 %v599_v7 }
  0x18   :  { %558 = vmatprep.subr.bf16.mxu0 %v600_v8  ;;  %584 = vmatprep.subr.bf16.mxu1 %v600_v8 }
  0x1b   :  { %559 = vmatpush3.bf16.msra.mxu0 %v600_v8  ;;  %592 = vmatpush3.bf16.msra.mxu1 %v600_v8 }
  0x1c   :  { %560 = vmatprep.subr.bf16.mxu0 %v601_v9  ;;  %585 = vmatprep.subr.bf16.mxu1 %v601_v9 }
  0x1f   :  { %561 = vmatpush3.bf16.msra.mxu0 %v601_v9  ;;  %593 = vmatpush3.bf16.msra.mxu1 %v601_v9 }
  0x22   :  { %563 = vmatmul.mubr.bf16.vlgmr.msra.gmra.mrb[0].mxu0 %v604_v10  ;;  %571 = vmatmul.mubr.bf16.vlgmr.msra.gmra.mrb[0].mxu1 %v605_v11 }
  0x23   :  { %566 = vmatprep.mubr.bf16.mxu0 %v606_v12  ;;  %574 = vmatprep.mubr.bf16.mxu1 %v607_v13 }
  0x2a   :  { %567 = vmatmul.mubr.bf16.gmra.mrb[4].mxu0 %v608_v14  ;;  %575 = vmatmul.mubr.bf16.gmra.mrb[4].mxu1 %v609_v15 }
  0xf5   :  { %v564_v16 = vpop.f32.mrb[0].mxu0  ;;  %v572_v18 = vpop.f32.mrb[0].mxu1 }
  0xf6   :  { %v213_v19 = vpop.f32.mrb[1].mxu0  ;;  %v245_v20 = vpop.f32.mrb[1].mxu1  ;;  %v336_v23 = vadd.f32 %v564_v16, %v450_v17  ;;  %v344_v24 = vadd.f32 %v572_v18, %v450_v17 }
  0xf7   :  { %v565_v21 = vpop.f32.mrb[2].mxu0  ;;  %v573_v22 = vpop.f32.mrb[2].mxu1  ;;  %v334_v29 = vadd.f32 %v450_v17, %v213_v19  ;;  %v342_v30 = vadd.f32 %v450_v17, %v245_v20 }
  0xf8   :  { %v337_v25 = vadd.f32 %v565_v21, %v450_v17  ;;  %v345_v26 = vadd.f32 %v573_v22, %v450_v17  ;;  %v216_v27 = vpop.f32.mrb[3].mxu0  ;;  %v248_v28 = vpop.f32.mrb[3].mxu1 }
  0xf9   :  { %v335_v31 = vadd.f32 %v450_v17, %v216_v27  ;;  %v343_v32 = vadd.f32 %v450_v17, %v248_v28 }
  0xfa   :  { %v491_v33 = vpack.c.bf16 %v337_v25, %v336_v23  ;;  %v511_v34 = vpack.c.bf16 %v345_v26, %v344_v24 }
  0xfb   :  { %v486_v35 = vpack.c.bf16 %v335_v31, %v334_v29  ;;  %v506_v36 = vpack.c.bf16 %v343_v32, %v342_v30 }
  0xfc   :  { %523 = vst [vmem:[%s708_s3 + $0x8] sm:$0xff] %v491_v33   ;;  %527 = vst [vmem:[%s708_s3 + $0x28] sm:$0xff] %v511_v34  }
  0xfd   :  { %487 = vst [vmem:[%s708_s3] sm:$0xff] %v486_v35   ;;  %526 = vst [vmem:[%s708_s3 + $0x20] sm:$0xff] %v506_v36   ;;  %v568_v37 = vpop.f32.mrb[4].mxu0  ;;  %v576_v38 = vpop.f32.mrb[4].mxu1 }
  0xfe   :  { %v229_v39 = vpop.f32.mrb[5].mxu0  ;;  %v261_v40 = vpop.f32.mrb[5].mxu1  ;;  %v340_v43 = vadd.f32 %v568_v37, %v450_v17  ;;  %v348_v44 = vadd.f32 %v576_v38, %v450_v17 }
  0xff   :  { %v569_v41 = vpop.f32.mrb[6].mxu0  ;;  %v577_v42 = vpop.f32.mrb[6].mxu1  ;;  %v338_v49 = vadd.f32 %v450_v17, %v229_v39  ;;  %v346_v50 = vadd.f32 %v450_v17, %v261_v40 }
 0x100   :  { %v341_v45 = vadd.f32 %v569_v41, %v450_v17  ;;  %v349_v46 = vadd.f32 %v577_v42, %v450_v17  ;;  %v232_v47 = vpop.f32.mrb[7].mxu0  ;;  %v264_v48 = vpop.f32.mrb[7].mxu1 }
 0x101   :  { %v339_v51 = vadd.f32 %v450_v17, %v232_v47  ;;  %v347_v52 = vadd.f32 %v450_v17, %v264_v48 }
 0x102   :  { %v501_v53 = vpack.c.bf16 %v341_v45, %v340_v43  ;;  %v521_v54 = vpack.c.bf16 %v349_v46, %v348_v44 }
 0x103   :  { %v496_v55 = vpack.c.bf16 %v339_v51, %v338_v49  ;;  %v516_v56 = vpack.c.bf16 %v347_v52, %v346_v50 }
 0x104   :  { %525 = vst [vmem:[%s708_s3 + $0x18] sm:$0xff] %v501_v53   ;;  %529 = vst [vmem:[%s708_s3 + $0x38] sm:$0xff] %v521_v54  }
 0x105   :  { %524 = vst [vmem:[%s708_s3 + $0x10] sm:$0xff] %v496_v55   ;;  %528 = vst [vmem:[%s708_s3 + $0x30] sm:$0xff] %v516_v56  }

// kernel: color_model_forward.29
= control target key start
LH: loop header
LB: loop body
LE: loop exit
PB: predicated region body
PF: predicated region fallthrough
CT: control target
= control target key end

     0   :  { %s1659_s12 = smov 0   ;;  %s1661_s13 = smov 0   ;;  %s1873_s0 = inlined_call_operand.vmem [shape: bf16[128,1152], index: 0, kind: input, shape index: {}]   ;;  %s1874_s1 = inlined_call_operand.vmem [shape: bf16[1152,128], index: 1, kind: input, shape index: {}]   ;;  %s1875_s2 = inlined_call_operand.vmem [shape: f32[1,128], index: 2, kind: input, shape index: {}]   ;;  %s1876_s3 = inlined_call_operand.vmem [shape: bf16[128,128], index: 3, kind: output, shape index: {}]  }
   0x1   :  { %s1663_s14 = smov 0   ;;  %s1665_s15 = smov 0  }
   0x2   :  { %s1667_s16 = smov 0  }
   0x3 LB: > { %s25_s17 = sadd.s32 1, %s1632_s15  ;;  %p48_p1 = scmp.ne.s32.totalorder %s1624_s13, %s1620_s12  ;;  %s1636_s16 = sphi %s1667_s16, %s13_s16   ;;  %s1632_s15 = sphi %s1665_s15, %s1880_s15   ;;  %s1628_s14 = sphi %s1663_s14, %s1879_s14   ;;  %s1624_s13 = sphi %s1661_s13, %s1878_s13   ;;  %s1620_s12 = sphi %s1659_s12, %s1877_s12  }
   0x4   : > { %p26_p0 = scmp.ge.s32.totalorder %s25_s17, 3  ;;  %p49_p2 = scmp.eq.s32.totalorder %s1636_s16, 0 }
   0x5   : > { %s41_s19 = sadd.s32 1, %s1624_s13  ;;  %p1216_p5 = scmp.ge.s32.totalorder %s1636_s16, 3 }
   0x6   : > { %s1882_s17 = smov (%p26_p0, %s25_s17), 0  ;;  %p50_p3 = por %p49_p2, %p48_p1 }
   0x7   : > { %s37_s18 = ssub.s32 %s1632_s15, %s1882_s17  ;;  %162 = sbr.rel (%p1216_p5) target bundleno = 37 (0x25), region = 20 }
   0x8   : > { %p39_p4 = scmp.eq.s32.totalorder %s37_s18, 0 }
   0xa   : > { %s1694_s20 = scalar_select %p39_p4, %s1624_s13, %s41_s19  }
   0xe   : > { %165 = sbr.rel (!%p50_p3) target bundleno = 37 (0x25), region = 24  ;;  %s167_s21 = sand.u32 (%p50_p3), 1, %s1624_s13  }
   0xf   : > { %s1323_s22 = smul.u32 (%p50_p3), 12, %s1632_s15 }
  0x10   : > { %s1499_s23 = smul.u32 (%p50_p3), 192, %s167_s21 }
  0x11   : > { %s1702_s26 = scalar_lea.vmem (%p50_p3), %s1873_s0, %s1323_s22 }
  0x12   : > { %v190_v0 = vld [vmem:[%s1702_s26] sm:$0xff] (%p50_p3)  ;;  %v194_v2 = vld [vmem:[%s1702_s26 + $0x48] sm:$0xff] (%p50_p3)  ;;  %s1707_s27 = scalar_lea.vmem (%p50_p3), [#allocation3], %s1499_s23  ;;  %v198_v4 = vld [vmem:[%s1702_s26 + $0x90] sm:$0xff] (%p50_p3) }
  0x13   : > { %v192_v1 = vld [vmem:[%s1702_s26 + $0x24] sm:$0xff] (%p50_p3)  ;;  %191 = vst [vmem:[%s1707_s27] sm:$0xff] (%p50_p3), %v190_v0  ;;  %195 = vst [vmem:[%s1707_s27 + $0x18] sm:$0xff] (%p50_p3), %v194_v2  ;;  %v196_v3 = vld [vmem:[%s1702_s26 + $0x6c] sm:$0xff] (%p50_p3) }
  0x14   : > { %193 = vst [vmem:[%s1707_s27 + $0xc] sm:$0xff] (%p50_p3), %v192_v1  ;;  %v200_v5 = vld [vmem:[%s1702_s26 + $0xb4] sm:$0xff] (%p50_p3)  ;;  %197 = vst [vmem:[%s1707_s27 + $0x24] sm:$0xff] (%p50_p3), %v196_v3  ;;  %v204_v7 = vld [vmem:[%s1702_s26 + $0xfc] sm:$0xff] (%p50_p3) }
  0x15   : > { %199 = vst [vmem:[%s1707_s27 + $0x30] sm:$0xff] %v198_v4  ;;  %201 = vst [vmem:[%s1707_s27 + $0x3c] sm:$0xff] %v200_v5  ;;  %v202_v6 = vld [vmem:[%s1702_s26 + $0xd8] sm:$0xff]  ;;  %v206_v8 = vld [vmem:[%s1702_s26 + $0x120] sm:$0xff] }
  0x16   : > { %203 = vst [vmem:[%s1707_s27 + $0x48] sm:$0xff] %v202_v6  ;;  %205 = vst [vmem:[%s1707_s27 + $0x54] sm:$0xff] %v204_v7  ;;  %v208_v9 = vld [vmem:[%s1702_s26 + $0x144] sm:$0xff]  ;;  %v212_v11 = vld [vmem:[%s1702_s26 + $0x18c] sm:$0xff] }
  0x17   : > { %207 = vst [vmem:[%s1707_s27 + $0x60] sm:$0xff] %v206_v8  ;;  %v210_v10 = vld [vmem:[%s1702_s26 + $0x168] sm:$0xff]  ;;  %209 = vst [vmem:[%s1707_s27 + $0x6c] sm:$0xff] %v208_v9  ;;  %v214_v12 = vld [vmem:[%s1702_s26 + $0x1b0] sm:$0xff] }
  0x18   : > { %211 = vst [vmem:[%s1707_s27 + $0x78] sm:$0xff] %v210_v10  ;;  %213 = vst [vmem:[%s1707_s27 + $0x84] sm:$0xff] %v212_v11  ;;  %v216_v13 = vld [vmem:[%s1702_s26 + $0x1d4] sm:$0xff]  ;;  %v220_v15 = vld [vmem:[%s1702_s26 + $0x21c] sm:$0xff] }
  0x19   : > { %v218_v14 = vld [vmem:[%s1702_s26 + $0x1f8] sm:$0xff]  ;;  %215 = vst [vmem:[%s1707_s27 + $0x90] sm:$0xff] %v214_v12  ;;  %217 = vst [vmem:[%s1707_s27 + $0x9c] sm:$0xff] %v216_v13  ;;  %v1218_v16 = vld [vmem:[%s1702_s26 + $0x8] sm:$0xf] }
  0x1a   : > { %219 = vst [vmem:[%s1707_s27 + $0xa8] sm:$0xff] %v218_v14  ;;  %v1220_v17 = vld [vmem:[%s1702_s26 + $0x2c] sm:$0xf]  ;;  %221 = vst [vmem:[%s1707_s27 + $0xb4] sm:$0xff] %v220_v15  ;;  %v1222_v18 = vld [vmem:[%s1702_s26 + $0x50] sm:$0xf] }
  0x1b   : > { %1219 = vst [vmem:[%s1707_s27 + $0x8] sm:$0xf] %v1218_v16  ;;  %1221 = vst [vmem:[%s1707_s27 + $0x14] sm:$0xf] %v1220_v17  ;;  %v1224_v19 = vld [vmem:[%s1702_s26 + $0x74] sm:$0xf] }
  0x1c   : > { %v1226_v20 = vld [vmem:[%s1702_s26 + $0x98] sm:$0xf]  ;;  %1223 = vst [vmem:[%s1707_s27 + $0x20] sm:$0xf] %v1222_v18  ;;  %1225 = vst [vmem:[%s1707_s27 + $0x2c] sm:$0xf] %v1224_v19 }
  0x1d   : > { %1227 = vst [vmem:[%s1707_s27 + $0x38] sm:$0xf] %v1226_v20  ;;  %v1228_v21 = vld [vmem:[%s1702_s26 + $0xbc] sm:$0xf]  ;;  %v1230_v22 = vld [vmem:[%s1702_s26 + $0xe0] sm:$0xf] }
  0x1e   : > { %v1232_v23 = vld [vmem:[%s1702_s26 + $0x104] sm:$0xf]  ;;  %1229 = vst [vmem:[%s1707_s27 + $0x44] sm:$0xf] %v1228_v21  ;;  %1231 = vst [vmem:[%s1707_s27 + $0x50] sm:$0xf] %v1230_v22 }
  0x1f   : > { %1233 = vst [vmem:[%s1707_s27 + $0x5c] sm:$0xf] %v1232_v23  ;;  %v1234_v24 = vld [vmem:[%s1702_s26 + $0x128] sm:$0xf]  ;;  %v1236_v25 = vld [vmem:[%s1702_s26 + $0x14c] sm:$0xf] }
  0x20   : > { %v1238_v26 = vld [vmem:[%s1702_s26 + $0x170] sm:$0xf]  ;;  %1235 = vst [vmem:[%s1707_s27 + $0x68] sm:$0xf] %v1234_v24  ;;  %1237 = vst [vmem:[%s1707_s27 + $0x74] sm:$0xf] %v1236_v25 }
  0x21   : > { %1239 = vst [vmem:[%s1707_s27 + $0x80] sm:$0xf] %v1238_v26  ;;  %v1240_v27 = vld [vmem:[%s1702_s26 + $0x194] sm:$0xf]  ;;  %v1242_v28 = vld [vmem:[%s1702_s26 + $0x1b8] sm:$0xf] }
  0x22   : > { %v1244_v29 = vld [vmem:[%s1702_s26 + $0x1dc] sm:$0xf]  ;;  %1241 = vst [vmem:[%s1707_s27 + $0x8c] sm:$0xf] %v1240_v27  ;;  %1243 = vst [vmem:[%s1707_s27 + $0x98] sm:$0xf] %v1242_v28 }
  0x23   : > { %1245 = vst [vmem:[%s1707_s27 + $0xa4] sm:$0xf] %v1244_v29  ;;  %v1246_v30 = vld [vmem:[%s1702_s26 + $0x200] sm:$0xf]  ;;  %v1248_v31 = vld [vmem:[%s1702_s26 + $0x224] sm:$0xf] }
  0x24   : > { %1247 = vst [vmem:[%s1707_s27 + $0xb0] sm:$0xf] %v1246_v30  ;;  %1249 = vst [vmem:[%s1707_s27 + $0xbc] sm:$0xf] %v1248_v31 }
  0x25 PF: > { %p1250_p6 = scmp.ge.s32.totalorder %s1636_s16, 1  ;;  %p277_p7 = scmp.lt.s32.totalorder %s1636_s16, 4 }
  0x27   : > { %p278_p8 = pnand %p1250_p6, %p277_p7 }
  0x28   : > { %s284_s28 = sand.u32 (!%p278_p8), 1, %s1620_s12   ;;  %s323_s29 = smul.u32 (!%p278_p8), 48, %s1628_s14 }
  0x29   : > { %281 = sbr.rel (%p278_p8) target bundleno = 383 (0x17f), region = 54  ;;  %p1252_p10 = scmp.ne.s32.totalorder (!%p278_p8), %s1628_s14, 0 }
  0x2a   : > { %s1500_s30 = smul.u32 (!%p278_p8), 192, %s284_s28  ;;  %p324_p9 = scmp.lt.s32.totalorder (!%p278_p8), %s323_s29, 143 }
  0x2c   : > { %s1779_s8 = scalar_lea.vmem (!%p278_p8), [#allocation3], %s1500_s30 }
  0x30   : > { %s1884_s29 = smov (!%p324_p9, %s323_s29), 143  ;;  %348 = sbr.rel (%p1252_p10) target bundleno = 58 (0x3a), region = 62 }
  0x31   : > { %s1251_s4 = sshll.u32 %s1884_s29, 2  ;;  %v1638_v32 = vmov (!%p1252_p10), 0.0  }
  0x32   : > { %s1777_s7 = scalar_lea.vmem %s1874_s1, %s1251_s4  ;;  %349 = vst [vmem:[#allocation2] sm:$0xff] (!%p1252_p10), %v1638_v32  ;;  %350 = vst [vmem:[#allocation2 + $0x8] sm:$0xff] (!%p1252_p10), %v1638_v32 }
  0x33   : > { %351 = vst [vmem:[#allocation2 + $0x10] sm:$0xff] (!%p1252_p10), %v1638_v32  ;;  %352 = vst [vmem:[#allocation2 + $0x18] sm:$0xff] (!%p1252_p10), %v1638_v32 }
  0x34   : > { %353 = vst [vmem:[#allocation2 + $0x20] sm:$0xff] (!%p1252_p10), %v1638_v32  ;;  %354 = vst [vmem:[#allocation2 + $0x28] sm:$0xff] (!%p1252_p10), %v1638_v32 }
  0x35   : > { %355 = vst [vmem:[#allocation2 + $0x30] sm:$0xff] (!%p1252_p10), %v1638_v32  ;;  %356 = vst [vmem:[#allocation2 + $0x38] sm:$0xff] (!%p1252_p10), %v1638_v32 }
  0x36   : > { %357 = vst [vmem:[#allocation2 + $0x40] sm:$0xff] (!%p1252_p10), %v1638_v32  ;;  %358 = vst [vmem:[#allocation2 + $0x48] sm:$0xff] (!%p1252_p10), %v1638_v32 }
  0x37   : > { %359 = vst [vmem:[#allocation2 + $0x50] sm:$0xff] %v1638_v32  ;;  %360 = vst [vmem:[#allocation2 + $0x58] sm:$0xff] %v1638_v32 }
  0x38   : > { %361 = vst [vmem:[#allocation2 + $0x60] sm:$0xff] %v1638_v32  ;;  %362 = vst [vmem:[#allocation2 + $0x68] sm:$0xff] %v1638_v32 }
  0x39   : > { %363 = vst [vmem:[#allocation2 + $0x70] sm:$0xff] %v1638_v32  ;;  %364 = vst [vmem:[#allocation2 + $0x78] sm:$0xff] %v1638_v32 }
  0x3a PF: > { %v1542_v33 = vld [vmem:[%s1777_s7 + $0x40] sm:$0xff]   ;;  %v1545_v36 = vld [vmem:[%s1777_s7 + $0x48] sm:$0xff]   ;;  %v1548_v39 = vld [vmem:[%s1777_s7 + $0x50] sm:$0xff]   ;;  %p1301_p11 = scmp.ne.s32.totalorder %s1628_s14, 2 }
  0x3b   : > { %v1543_v34 = vld [vmem:[%s1777_s7] sm:$0xff]   ;;  %1387 = vmatprep.subr.bf16.mxu0 %v1542_v33  ;;  %v1546_v37 = vld [vmem:[%s1777_s7 + $0x8] sm:$0xff]   ;;  %v1549_v40 = vld [vmem:[%s1777_s7 + $0x10] sm:$0xff]  }
  0x3c   : > { %v1544_v35 = vld [vmem:[%s1777_s7 + $0x80] sm:$0xff]   ;;  %1388 = vmatpush3.bf16.msra.mxu0 %v1543_v34  ;;  %v1547_v38 = vld [vmem:[%s1777_s7 + $0x88] sm:$0xff]   ;;  %v1550_v41 = vld [vmem:[%s1777_s7 + $0x90] sm:$0xff]  }
  0x3d   : > { %1467 = vmatprep.subr.bf16.mxu1 %v1544_v35  ;;  %1389 = vmatprep.subr.bf16.mxu0 %v1545_v36  ;;  %v1551_v42 = vld [vmem:[%s1777_s7 + $0x58] sm:$0xff]   ;;  %v1554_v45 = vld [vmem:[%s1777_s7 + $0x60] sm:$0xff]   ;;  %v1557_v48 = vld [vmem:[%s1777_s7 + $0x68] sm:$0xff]  }
  0x3e   : > { %1468 = vmatpush3.bf16.msra.mxu1 %v1544_v35  ;;  %v1552_v43 = vld [vmem:[%s1777_s7 + $0x18] sm:$0xff]   ;;  %v1556_v46 = vld [vmem:[%s1777_s7 + $0xa0] sm:$0xff]   ;;  %v1559_v49 = vld [vmem:[%s1777_s7 + $0xa8] sm:$0xff]  }
  0x3f   : > { %1469 = vmatprep.subr.bf16.mxu1 %v1547_v38  ;;  %v1553_v44 = vld [vmem:[%s1777_s7 + $0x98] sm:$0xff]   ;;  %v1555_v47 = vld [vmem:[%s1777_s7 + $0x20] sm:$0xff]   ;;  %v1558_v50 = vld [vmem:[%s1777_s7 + $0x28] sm:$0xff]  }
  0x40   : > { %1390 = vmatpush3.bf16.msra.mxu0 %v1546_v37  ;;  %v1560_v51 = vld [vmem:[%s1777_s7 + $0x70] sm:$0xff]   ;;  %v1563_v54 = vld [vmem:[%s1777_s7 + $0x78] sm:$0xff]   ;;  %v1566_v59 = vld [vmem:[%s1779_s8] ss:$12 sps:$4 sm:$0xff]  }
  0x41   : > { %1391 = vmatprep.subr.bf16.mxu0 %v1548_v39  ;;  %v1561_v52 = vld [vmem:[%s1777_s7 + $0x30] sm:$0xff]   ;;  %v1565_v55 = vld [vmem:[%s1777_s7 + $0xb8] sm:$0xff]   ;;  %v1570_v61 = vld [vmem:[%s1779_s8 + $0x20] ss:$12 sps:$4 sm:$0xff]  }
  0x42   : > { %1470 = vmatpush3.bf16.msra.mxu1 %v1547_v38  ;;  %v1562_v53 = vld [vmem:[%s1777_s7 + $0xb0] sm:$0xff]   ;;  %v1564_v58 = vld [vmem:[%s1777_s7 + $0x38] sm:$0xff]   ;;  %v1586_v5 = vld [vmem:[%s1779_s8 + $0x80] ss:$12 sps:$4 sm:$0xff]  }
  0x43   : > { %1471 = vmatprep.subr.bf16.mxu1 %v1550_v41  ;;  %v1568_v56 = vld [vmem:[%s1779_s8 + $0x4] ss:$12 sps:$4 sm:$0xff]   ;;  %v1569_v57 = vld [vmem:[%s1779_s8 + $0x8] ss:$12 sps:$4 sm:$0xff]   ;;  %v1579_v4 = vld [vmem:[%s1779_s8 + $0x4c] ss:$12 sps:$4 sm:$0xff]  }
  0x44   : > { %1392 = vmatpush3.bf16.msra.mxu0 %v1549_v40  ;;  %765 = vmatprep.mubr.bf16.mxu0 %v1568_v56  ;;  %v1571_v60 = vld [vmem:[%s1779_s8 + $0x1c] ss:$12 sps:$4 sm:$0xff]   ;;  %v1577_v62 = vld [vmem:[%s1779_s8 + $0x38] ss:$12 sps:$4 sm:$0xff]   ;;  %v1574_v0 = vld [vmem:[%s1779_s8 + $0x34] ss:$12 sps:$4 sm:$0xff]  }
  0x45   : > { %1393 = vmatprep.subr.bf16.mxu0 %v1551_v42  ;;  %1483 = vmatprep.mubr.bf16.mxu1 %v1569_v57  ;;  %v1573_v63 = vld [vmem:[%s1779_s8 + $0x18] ss:$12 sps:$4 sm:$0xff]   ;;  %v1578_v1 = vld [vmem:[%s1779_s8 + $0x50] ss:$12 sps:$4 sm:$0xff]   ;;  %v1585_v2 = vld [vmem:[%s1779_s8 + $0x68] ss:$12 sps:$4 sm:$0xff]  }
  0x46   : > { %1472 = vmatpush3.bf16.msra.mxu1 %v1550_v41  ;;  %v1576_v3 = vld [vmem:[%s1779_s8 + $0x30] ss:$12 sps:$4 sm:$0xff]   ;;  %v1593_v6 = vld [vmem:[%s1779_s8 + $0x98] ss:$12 sps:$4 sm:$0xff]   ;;  %v1581_v7 = vld [vmem:[%s1779_s8 + $0x48] ss:$12 sps:$4 sm:$0xff]  }
  0x47   : > { %1473 = vmatprep.subr.bf16.mxu1 %v1553_v44  ;;  %v1582_v8 = vld [vmem:[%s1779_s8 + $0x64] ss:$12 sps:$4 sm:$0xff]   ;;  %v1584_v10 = vld [vmem:[%s1779_s8 + $0x60] ss:$12 sps:$4 sm:$0xff]   ;;  %v1587_v11 = vld [vmem:[%s1779_s8 + $0x7c] ss:$12 sps:$4 sm:$0xff]  }
  0x48   : > { %1394 = vmatpush3.bf16.msra.mxu0 %v1552_v43  ;;  %v1594_v9 = vld [vmem:[%s1779_s8 + $0xb0] ss:$12 sps:$4 sm:$0xff]   ;;  %v1589_v12 = vld [vmem:[%s1779_s8 + $0x78] ss:$12 sps:$4 sm:$0xff]   ;;  %v1590_v13 = vld [vmem:[%s1779_s8 + $0x94] ss:$12 sps:$4 sm:$0xff]  }
  0x49   : > { %1395 = vmatprep.subr.bf16.mxu0 %v1554_v45  ;;  %v1592_v14 = vld [vmem:[%s1779_s8 + $0x90] ss:$12 sps:$4 sm:$0xff]   ;;  %v1595_v15 = vld [vmem:[%s1779_s8 + $0xac] ss:$12 sps:$4 sm:$0xff]   ;;  %v1597_v16 = vld [vmem:[%s1779_s8 + $0xa8] ss:$12 sps:$4 sm:$0xff]  }
  0x4a   : > { %1474 = vmatpush3.bf16.msra.mxu1 %v1553_v44  ;;  %v365_v23 = vld [vmem:[#allocation2] sm:$0xff]  ;;  %v366_v28 = vld [vmem:[#allocation2 + $0x8] sm:$0xff]  ;;  %v367_v38 = vld [vmem:[#allocation2 + $0x10] sm:$0xff] }
  0x4b   : > { %1475 = vmatprep.subr.bf16.mxu1 %v1556_v46  ;;  %v368_v44 = vld [vmem:[#allocation2 + $0x18] sm:$0xff] }
  0x4c   : > { %1396 = vmatpush3.bf16.msra.mxu0 %v1555_v47 }
  0x4d   : > { %1397 = vmatprep.subr.bf16.mxu0 %v1557_v48 }
  0x4e   : > { %1476 = vmatpush3.bf16.msra.mxu1 %v1556_v46 }
  0x4f   : > { %1477 = vmatprep.subr.bf16.mxu1 %v1559_v49 }
  0x50   : > { %1398 = vmatpush3.bf16.msra.mxu0 %v1558_v50 }
  0x51   : > { %1399 = vmatprep.subr.bf16.mxu0 %v1560_v51 }
  0x52   : > { %1478 = vmatpush3.bf16.msra.mxu1 %v1559_v49 }
  0x53   : > { %1479 = vmatprep.subr.bf16.mxu1 %v1562_v53 }
  0x54   : > { %1400 = vmatpush3.bf16.msra.mxu0 %v1561_v52 }
  0x55   : > { %1401 = vmatprep.subr.bf16.mxu0 %v1563_v54 }
  0x56   : > { %1480 = vmatpush3.bf16.msra.mxu1 %v1562_v53 }
  0x57   : > { %1481 = vmatprep.subr.bf16.mxu1 %v1565_v55 }
  0x58   : > { %1402 = vmatpush3.bf16.msra.mxu0 %v1564_v58 }
  0x5a   : > { %1482 = vmatpush3.bf16.msra.mxu1 %v1565_v55  ;;  %v369_v55 = vld [vmem:[#allocation2 + $0x20] sm:$0xff] }
  0x5b   : > { %766 = vmatmul.mubr.bf16.vlgmr.msra.gmra.mrb[0].mxu0 %v1566_v59 }
  0x5c   : > { %773 = vmatprep.mubr.bf16.mxu0 %v1571_v60  ;;  %v370_v60 = vld [vmem:[#allocation2 + $0x28] sm:$0xff] }
  0x5d   : > { %1484 = vmatmul.mubr.bf16.vlgmr.msra.gmra.mrb[0].mxu1 %v1570_v61 }
  0x5e   : > { %1487 = vmatprep.mubr.bf16.mxu1 %v1577_v62 }
  0x63   : > { %774 = vmatmul.mubr.bf16.gmra.mrb[4].mxu0 %v1573_v63 }
  0x64   : > { %781 = vmatprep.mubr.bf16.mxu0 %v1574_v0 }
  0x65   : > { %1488 = vmatmul.mubr.bf16.gmra.mrb[4].mxu1 %v1578_v1 }
  0x66   : > { %1491 = vmatprep.mubr.bf16.mxu1 %v1585_v2 }
  0x6b   : > { %782 = vmatmul.mubr.bf16.gmra.mrb[8].mxu0 %v1576_v3 }
  0x6c   : > { %789 = vmatprep.mubr.bf16.mxu0 %v1579_v4 }
  0x6d   : > { %1492 = vmatmul.mubr.bf16.gmra.mrb[8].mxu1 %v1586_v5 }
  0x6e   : > { %1495 = vmatprep.mubr.bf16.mxu1 %v1593_v6  ;;  %v371_v6 = vld [vmem:[#allocation2 + $0x30] sm:$0xff] }
  0x73   : > { %790 = vmatmul.mubr.bf16.gmra.mrb[12].mxu0 %v1581_v7 }
  0x74   : > { %797 = vmatprep.mubr.bf16.mxu0 %v1582_v8 }
  0x75   : > { %1496 = vmatmul.mubr.bf16.gmra.mrb[12].mxu1 %v1594_v9 }
  0x7b   : > { %798 = vmatmul.mubr.bf16.gmra.mrb[16].mxu0 %v1584_v10 }
  0x7c   : > { %805 = vmatprep.mubr.bf16.mxu0 %v1587_v11 }
  0x83   : > { %806 = vmatmul.mubr.bf16.gmra.mrb[20].mxu0 %v1589_v12  ;;  %v372_v12 = vld [vmem:[#allocation2 + $0x38] sm:$0xff] }
  0x84   : > { %813 = vmatprep.mubr.bf16.mxu0 %v1590_v13 }
  0x8b   : > { %814 = vmatmul.mubr.bf16.gmra.mrb[24].mxu0 %v1592_v14 }
  0x8c   : > { %821 = vmatprep.mubr.bf16.mxu0 %v1595_v15 }
  0x93   : > { %822 = vmatmul.mubr.bf16.gmra.mrb[28].mxu0 %v1597_v16 }
 0x12e   : > { %v1403_v17 = vpop.f32.mrb[0].mxu0 }
 0x12f   : > { %v1404_v18 = vpop.f32.mrb[1].mxu0 }
 0x130   : > { %v1405_v19 = vadd.f32 %v1404_v18, %v1403_v17  ;;  %v1406_v20 = vpop.f32.mrb[2].mxu0  ;;  %v1485_v21 = vpop.f32.mrb[0].mxu1 }
 0x131   : > { %v1407_v22 = vpop.f32.mrb[3].mxu0  ;;  %v864_v24 = vpop.f32.mrb[1].mxu1 }
 0x132   : > { %v1408_v25 = vadd.f32 %v1407_v22, %v1406_v20  ;;  %v865_v26 = vadd.f32 %v1405_v19, %v864_v24  ;;  %v1486_v27 = vpop.f32.mrb[2].mxu1  ;;  %v373_v22 = vld [vmem:[#allocation2 + $0x40] sm:$0xff] }
 0x133   : > { %v867_v29 = vpop.f32.mrb[3].mxu1 }
 0x134   : > { %v927_v30 = vadd.f32 %v865_v26, %v365_v23  ;;  %v868_v31 = vadd.f32 %v1408_v25, %v867_v29  ;;  %v374_v25 = vld [vmem:[#allocation2 + $0x48] sm:$0xff] }
 0x136   : > { %943 = vst [vmem:[#allocation2] sm:$0xff] %v927_v30  ;;  %v928_v32 = vadd.f32 %v868_v31, %v366_v28  ;;  %v1409_v33 = vpop.f32.mrb[4].mxu0 }
 0x137   : > { %v1410_v34 = vpop.f32.mrb[5].mxu0 }
 0x138   : > { %944 = vst [vmem:[#allocation2 + $0x8] sm:$0xff] %v928_v32  ;;  %v1411_v35 = vadd.f32 %v1410_v34, %v1409_v33  ;;  %v1412_v36 = vpop.f32.mrb[6].mxu0  ;;  %v1489_v37 = vpop.f32.mrb[4].mxu1  ;;  %v375_v33 = vld [vmem:[#allocation2 + $0x50] sm:$0xff] }
 0x139   : > { %v1413_v39 = vpop.f32.mrb[7].mxu0  ;;  %v880_v40 = vpop.f32.mrb[5].mxu1 }
 0x13a   : > { %v873_v41 = vadd.f32 %v1485_v21, %v1411_v35  ;;  %v1414_v42 = vadd.f32 %v1413_v39, %v1412_v36  ;;  %v1490_v43 = vpop.f32.mrb[6].mxu1 }
 0x13b   : > { %v883_v45 = vpop.f32.mrb[7].mxu1 }
 0x13c   : > { %v929_v46 = vadd.f32 %v873_v41, %v367_v38  ;;  %v876_v47 = vadd.f32 %v1486_v27, %v1414_v42 }
 0x13e   : > { %945 = vst [vmem:[#allocation2 + $0x10] sm:$0xff] %v929_v46  ;;  %v930_v48 = vadd.f32 %v876_v47, %v368_v44  ;;  %v1415_v49 = vpop.f32.mrb[8].mxu0  ;;  %v377_v46 = vld [vmem:[#allocation2 + $0x60] sm:$0xff] }
 0x13f   : > { %v1416_v50 = vpop.f32.mrb[9].mxu0 }
 0x140   : > { %946 = vst [vmem:[#allocation2 + $0x18] sm:$0xff] %v930_v48  ;;  %v1417_v51 = vadd.f32 %v1416_v50, %v1415_v49  ;;  %v1418_v52 = vpop.f32.mrb[10].mxu0  ;;  %v1493_v53 = vpop.f32.mrb[8].mxu1  ;;  %v378_v49 = vld [vmem:[#allocation2 + $0x68] sm:$0xff] }
 0x141   : > { %v1419_v54 = vpop.f32.mrb[11].mxu0  ;;  %v896_v56 = vpop.f32.mrb[9].mxu1 }
 0x142   : > { %v1420_v57 = vadd.f32 %v1419_v54, %v1418_v52  ;;  %v881_v58 = vadd.f32 %v1417_v51, %v880_v40  ;;  %v1494_v59 = vpop.f32.mrb[10].mxu1 }
 0x143   : > { %v899_v61 = vpop.f32.mrb[11].mxu1 }
 0x144   : > { %v931_v62 = vadd.f32 %v881_v58, %v369_v55  ;;  %v884_v63 = vadd.f32 %v1420_v57, %v883_v45  ;;  %v379_v57 = vld [vmem:[#allocation2 + $0x70] sm:$0xff] }
 0x146   : > { %947 = vst [vmem:[#allocation2 + $0x20] sm:$0xff] %v931_v62  ;;  %v932_v0 = vadd.f32 %v884_v63, %v370_v60  ;;  %v1421_v1 = vpop.f32.mrb[12].mxu0 }
 0x147   : > { %v1422_v2 = vpop.f32.mrb[13].mxu0 }
 0x148   : > { %948 = vst [vmem:[#allocation2 + $0x28] sm:$0xff] %v932_v0  ;;  %v1423_v3 = vadd.f32 %v1422_v2, %v1421_v1  ;;  %v1424_v4 = vpop.f32.mrb[14].mxu0  ;;  %v1497_v5 = vpop.f32.mrb[12].mxu1  ;;  %v963_v1 = vld [vmem:[#allocation2] sm:$0xff] (!%p1301_p11)  ;;  %v964_v2 = vld [vmem:[#allocation2 + $0x8] sm:$0xff] (!%p1301_p11) }
 0x149   : > { %v1425_v7 = vpop.f32.mrb[15].mxu0  ;;  %v912_v8 = vpop.f32.mrb[13].mxu1 }
 0x14a   : > { %v889_v9 = vadd.f32 %v1489_v37, %v1423_v3  ;;  %v1426_v10 = vadd.f32 %v1425_v7, %v1424_v4  ;;  %v1498_v11 = vpop.f32.mrb[14].mxu1  ;;  %v376_v37 = vld [vmem:[#allocation2 + $0x58] sm:$0xff]  ;;  %v1302_v3 = vld [vmem:[%s1875_s2] ss:$0 sm:$0xff] (!%p1301_p11)  ;;  %v965_v7 = vld [vmem:[#allocation2 + $0x10] sm:$0xff] (!%p1301_p11) }
 0x14b   : > { %v915_v13 = vpop.f32.mrb[15].mxu1  ;;  %v986_v4 = vadd.f32 (!%p1301_p11), %v1302_v3, %v963_v1 }
 0x14c   : > { %v933_v14 = vadd.f32 %v889_v9, %v371_v6  ;;  %v892_v15 = vadd.f32 %v1490_v43, %v1426_v10  ;;  %v987_v6 = vadd.f32 (!%p1301_p11), %v1302_v3, %v964_v2  ;;  %v988_v9 = vadd.f32 (!%p1301_p11), %v1302_v3, %v965_v7 }
 0x14e   : > { %949 = vst [vmem:[#allocation2 + $0x30] sm:$0xff] %v933_v14  ;;  %v934_v16 = vadd.f32 %v892_v15, %v372_v12  ;;  %v1427_v17 = vpop.f32.mrb[16].mxu0  ;;  %v1002_v15 = vmax.f32 (!%p1301_p11), %v986_v4, 0.0 }
 0x14f   : > { %v1428_v18 = vpop.f32.mrb[17].mxu0 }
 0x150   : > { %950 = vst [vmem:[#allocation2 + $0x38] sm:$0xff] %v934_v16  ;;  %v1429_v19 = vadd.f32 %v1428_v18, %v1427_v17  ;;  %v1430_v20 = vpop.f32.mrb[18].mxu0  ;;  %v1003_v16 = vmax.f32 (!%p1301_p11), %v987_v6, 0.0 }
 0x151   : > { %v1431_v21 = vpop.f32.mrb[19].mxu0 }
 0x152   : > { %v1432_v23 = vadd.f32 %v1431_v21, %v1430_v20  ;;  %v897_v24 = vadd.f32 %v1429_v19, %v896_v56 }
 0x154   : > { %v935_v26 = vadd.f32 %v897_v24, %v373_v22  ;;  %v900_v27 = vadd.f32 %v1432_v23, %v899_v61  ;;  %v380_v61 = vld [vmem:[#allocation2 + $0x78] sm:$0xff]  ;;  %v1004_v22 = vmax.f32 (!%p1301_p11), %v988_v9, 0.0 }
 0x156   : > { %951 = vst [vmem:[#allocation2 + $0x40] sm:$0xff] %v935_v26  ;;  %v936_v28 = vadd.f32 %v900_v27, %v374_v25  ;;  %v1433_v29 = vpop.f32.mrb[20].mxu0 }
 0x157   : > { %v1434_v30 = vpop.f32.mrb[21].mxu0  ;;  %v970_v14 = vld [vmem:[#allocation2 + $0x38] sm:$0xff] (!%p1301_p11) }
 0x158   : > { %952 = vst [vmem:[#allocation2 + $0x48] sm:$0xff] %v936_v28  ;;  %v1435_v31 = vadd.f32 %v1434_v30, %v1433_v29  ;;  %v1436_v32 = vpop.f32.mrb[22].mxu0  ;;  %v993_v25 = vadd.f32 (!%p1301_p11), %v1302_v3, %v970_v14  ;;  %v1343_v28 = vpack.c.bf16 (!%p1301_p11), %v1003_v16, %v1002_v15 }
 0x159   : > { %v1437_v34 = vpop.f32.mrb[23].mxu0 }
 0x15a   : > { %v905_v35 = vadd.f32 %v1493_v53, %v1435_v31  ;;  %v1438_v36 = vadd.f32 %v1437_v34, %v1436_v32  ;;  %v1009_v34 = vmax.f32 (!%p1301_p11), %v993_v25, 0.0  ;;  %1344 = vst [vmem:[%s1876_s3] sm:$0xff] (!%p1301_p11), %v1343_v28  }
 0x15c   : > { %v937_v38 = vadd.f32 %v905_v35, %v375_v33  ;;  %v908_v39 = vadd.f32 %v1494_v59, %v1438_v36 }
 0x15d   : > { %v971_v19 = vld [vmem:[#allocation2 + $0x40] sm:$0xff] (!%p1301_p11) }
 0x15e   : > { %953 = vst [vmem:[#allocation2 + $0x50] sm:$0xff] %v937_v38  ;;  %v938_v40 = vadd.f32 %v908_v39, %v376_v37  ;;  %v1439_v41 = vpop.f32.mrb[24].mxu0  ;;  %v994_v31 = vadd.f32 (!%p1301_p11), %v1302_v3, %v971_v19 }
 0x15f   : > { %v1440_v42 = vpop.f32.mrb[25].mxu0  ;;  %v972_v20 = vld [vmem:[#allocation2 + $0x48] sm:$0xff] (!%p1301_p11) }
 0x160   : > { %954 = vst [vmem:[#allocation2 + $0x58] sm:$0xff] %v938_v40  ;;  %v1441_v43 = vadd.f32 %v1440_v42, %v1439_v41  ;;  %v1442_v44 = vpop.f32.mrb[26].mxu0  ;;  %v995_v35 = vadd.f32 (!%p1301_p11), %v1302_v3, %v972_v20  ;;  %v1010_v40 = vmax.f32 (!%p1301_p11), %v994_v31, 0.0 }
 0x161   : > { %v1443_v45 = vpop.f32.mrb[27].mxu0 }
 0x162   : > { %v1444_v47 = vadd.f32 %v1443_v45, %v1442_v44  ;;  %v913_v48 = vadd.f32 %v1441_v43, %v912_v8  ;;  %v967_v8 = vld [vmem:[#allocation2 + $0x20] sm:$0xff] (!%p1301_p11)  ;;  %v1011_v44 = vmax.f32 (!%p1301_p11), %v995_v35, 0.0 }
 0x163   : > { %v990_v12 = vadd.f32 (!%p1301_p11), %v1302_v3, %v967_v8 }
 0x164   : > { %v939_v50 = vadd.f32 %v913_v48, %v377_v46  ;;  %v916_v51 = vadd.f32 %v1444_v47, %v915_v13  ;;  %v969_v13 = vld [vmem:[#allocation2 + $0x30] sm:$0xff] (!%p1301_p11) }
 0x165   : > { %v992_v18 = vadd.f32 (!%p1301_p11), %v1302_v3, %v969_v13  ;;  %v973_v21 = vld [vmem:[#allocation2 + $0x50] sm:$0xff] (!%p1301_p11)  ;;  %v1006_v24 = vmax.f32 (!%p1301_p11), %v990_v12, 0.0 }
 0x166   : > { %955 = vst [vmem:[#allocation2 + $0x60] sm:$0xff] %v939_v50  ;;  %v940_v52 = vadd.f32 %v916_v51, %v378_v49  ;;  %v1445_v53 = vpop.f32.mrb[28].mxu0  ;;  %v996_v36 = vadd.f32 (!%p1301_p11), %v1302_v3, %v973_v21  ;;  %v1363_v51 = vpack.c.bf16 (!%p1301_p11), %v1011_v44, %v1010_v40 }
 0x167   : > { %v1446_v54 = vpop.f32.mrb[29].mxu0  ;;  %v974_v26 = vld [vmem:[#allocation2 + $0x58] sm:$0xff] (!%p1301_p11)  ;;  %v1008_v30 = vmax.f32 (!%p1301_p11), %v992_v18, 0.0 }
 0x168   : > { %956 = vst [vmem:[#allocation2 + $0x68] sm:$0xff] %v940_v52  ;;  %v1447_v55 = vadd.f32 %v1446_v54, %v1445_v53  ;;  %v1448_v56 = vpop.f32.mrb[30].mxu0  ;;  %v997_v41 = vadd.f32 (!%p1301_p11), %v1302_v3, %v974_v26  ;;  %v1012_v45 = vmax.f32 (!%p1301_p11), %v996_v36, 0.0  ;;  %1383 = vst [vmem:[%s1876_s3 + $0x20] sm:$0xff] (!%p1301_p11), %v1363_v51  }
 0x169   : > { %v1449_v58 = vpop.f32.mrb[31].mxu0  ;;  %v1358_v43 = vpack.c.bf16 (!%p1301_p11), %v1009_v34, %v1008_v30 }
 0x16a   : > { %v921_v59 = vadd.f32 %v1497_v5, %v1447_v55  ;;  %v1450_v60 = vadd.f32 %v1449_v58, %v1448_v56  ;;  %962 = sbr.rel (%p1301_p11) target bundleno = 383 (0x17f), region = 66  ;;  %v966_v5 = vld [vmem:[#allocation2 + $0x18] sm:$0xff] (!%p1301_p11)  ;;  %v1013_v47 = vmax.f32 (!%p1301_p11), %v997_v41, 0.0 }
 0x16b   : > { %v989_v10 = vadd.f32 (!%p1301_p11), %v1302_v3, %v966_v5  ;;  %1382 = vst [vmem:[%s1876_s3 + $0x18] sm:$0xff] (!%p1301_p11), %v1358_v43  }
 0x16c   : > { %v941_v62 = vadd.f32 %v921_v59, %v379_v57  ;;  %v924_v63 = vadd.f32 %v1498_v11, %v1450_v60  ;;  %v968_v11 = vld [vmem:[#allocation2 + $0x28] sm:$0xff] (!%p1301_p11)  ;;  %v1368_v53 = vpack.c.bf16 (!%p1301_p11), %v1013_v47, %v1012_v45 }
 0x16d   : > { %v991_v17 = vadd.f32 (!%p1301_p11), %v1302_v3, %v968_v11  ;;  %v1005_v23 = vmax.f32 (!%p1301_p11), %v989_v10, 0.0  ;;  %v975_v27 = vld [vmem:[#allocation2 + $0x60] sm:$0xff] (!%p1301_p11) }
 0x16e   : > { %957 = vst [vmem:[#allocation2 + $0x70] sm:$0xff] %v941_v62  ;;  %v942_v0 = vadd.f32 %v924_v63, %v380_v61  ;;  %v998_v42 = vadd.f32 (!%p1301_p11), %v1302_v3, %v975_v27  ;;  %1384 = vst [vmem:[%s1876_s3 + $0x28] sm:$0xff] (!%p1301_p11), %v1368_v53  }
 0x16f   : > { %v1007_v29 = vmax.f32 (!%p1301_p11), %v991_v17, 0.0  ;;  %v976_v32 = vld [vmem:[#allocation2 + $0x68] sm:$0xff] (!%p1301_p11)  ;;  %v1348_v33 = vpack.c.bf16 (!%p1301_p11), %v1005_v23, %v1004_v22 }
 0x170   : > { %958 = vst [vmem:[#allocation2 + $0x78] sm:$0xff] %v942_v0  ;;  %v999_v46 = vadd.f32 (!%p1301_p11), %v1302_v3, %v976_v32  ;;  %v1014_v48 = vmax.f32 (!%p1301_p11), %v998_v42, 0.0 }
 0x171   : > { %v1353_v39 = vpack.c.bf16 %v1007_v29, %v1006_v24  ;;  %1380 = vst [vmem:[%s1876_s3 + $0x8] sm:$0xff] %v1348_v33  }
 0x172   : > { %v1015_v52 = vmax.f32 %v999_v46, 0.0 }
 0x173   : > { %1381 = vst [vmem:[%s1876_s3 + $0x10] sm:$0xff] %v1353_v39  }
 0x174   : > { %v1373_v56 = vpack.c.bf16 %v1015_v52, %v1014_v48 }
 0x175   : > { %v977_v37 = vld [vmem:[#allocation2 + $0x70] sm:$0xff] }
 0x176   : > { %v1000_v49 = vadd.f32 %v1302_v3, %v977_v37  ;;  %1385 = vst [vmem:[%s1876_s3 + $0x30] sm:$0xff] %v1373_v56  }
 0x177   : > { %v978_v38 = vld [vmem:[#allocation2 + $0x78] sm:$0xff] }
 0x178   : > { %v1001_v50 = vadd.f32 %v1302_v3, %v978_v38  ;;  %v1016_v54 = vmax.f32 %v1000_v49, 0.0 }
 0x17a   : > { %v1017_v55 = vmax.f32 %v1001_v50, 0.0 }
 0x17c   : > { %v1378_v57 = vpack.c.bf16 %v1017_v55, %v1016_v54 }
 0x17e   : > { %1386 = vst [vmem:[%s1876_s3 + $0x38] sm:$0xff] %v1378_v57  }
 0x17f PF: > { %s13_s16 = sadd.s32 1, %s1636_s16   ;;  %s1877_s12 = smov %s1624_s13 }
 0x180   : > { %p10_p12 = scmp.ge.s32.totalorder %s13_s16, 5   ;;  %s1878_s13 = smov %s1694_s20 }
 0x181   : > { %s1879_s14 = smov %s1632_s15  ;;  %s1880_s15 = smov %s1882_s17 }
 0x182   :  { %12 = sbr.rel (!%p10_p12) target bundleno = 3 (0x3), region = 113 }

// kernel: color_model_forward.28
= control target key start
LH: loop header
LB: loop body
LE: loop exit
PB: predicated region body
PF: predicated region fallthrough
CT: control target
= control target key end

     0   :  { %s1830_s15 = smov 0   ;;  %s1832_s16 = smov 0   ;;  %s2086_s0 = inlined_call_operand.vmem [shape: bf16[128,1152], index: 0, kind: input, shape index: {}]   ;;  %s2087_s1 = inlined_call_operand.vmem [shape: bf16[1152,128], index: 1, kind: input, shape index: {}]   ;;  %s2088_s2 = inlined_call_operand.vmem [shape: f32[1,128], index: 2, kind: input, shape index: {}]   ;;  %s2089_s3 = inlined_call_operand.vmem [shape: bf16[128,128], index: 3, kind: input, shape index: {}]   ;;  %s2090_s4 = inlined_call_operand.vmem [shape: bf16[128,128], index: 4, kind: output, shape index: {}]  }
   0x1   :  { %s1834_s17 = smov 0   ;;  %s1836_s18 = smov 0  }
   0x2   :  { %s1838_s19 = smov 0  }
   0x3 LB: > { %s26_s20 = sadd.s32 1, %s1798_s18  ;;  %p49_p1 = scmp.ne.s32.totalorder %s1790_s16, %s1786_s15  ;;  %s1802_s19 = sphi %s1838_s19, %s14_s19   ;;  %s1798_s18 = sphi %s1836_s18, %s2094_s18   ;;  %s1794_s17 = sphi %s1834_s17, %s2093_s17   ;;  %s1790_s16 = sphi %s1832_s16, %s2092_s16   ;;  %s1786_s15 = sphi %s1830_s15, %s2091_s15  }
   0x4   : > { %p27_p0 = scmp.ge.s32.totalorder %s26_s20, 3  ;;  %p50_p2 = scmp.eq.s32.totalorder %s1802_s19, 0 }
   0x5   : > { %s42_s22 = sadd.s32 1, %s1790_s16  ;;  %p1343_p5 = scmp.ge.s32.totalorder %s1802_s19, 3 }
   0x6   : > { %s2096_s20 = smov (%p27_p0, %s26_s20), 0  ;;  %p51_p3 = por %p50_p2, %p49_p1 }
   0x7   : > { %s38_s21 = ssub.s32 %s1798_s18, %s2096_s20  ;;  %203 = sbr.rel (%p1343_p5) target bundleno = 37 (0x25), region = 24 }
   0x8   : > { %p40_p4 = scmp.eq.s32.totalorder %s38_s21, 0 }
   0xa   : > { %s1865_s23 = scalar_select %p40_p4, %s1790_s16, %s42_s22  }
   0xe   : > { %206 = sbr.rel (!%p51_p3) target bundleno = 37 (0x25), region = 28  ;;  %s208_s24 = sand.u32 (%p51_p3), 1, %s1790_s16  }
   0xf   : > { %s1450_s25 = smul.u32 (%p51_p3), 12, %s1798_s18 }
  0x10   : > { %s1665_s26 = smul.u32 (%p51_p3), 192, %s208_s24 }
  0x11   : > { %s1873_s29 = scalar_lea.vmem (%p51_p3), %s2086_s0, %s1450_s25 }
  0x12   : > { %v231_v0 = vld [vmem:[%s1873_s29] sm:$0xff] (%p51_p3)  ;;  %v235_v2 = vld [vmem:[%s1873_s29 + $0x48] sm:$0xff] (%p51_p3)  ;;  %s1878_s30 = scalar_lea.vmem (%p51_p3), [#allocation3], %s1665_s26  ;;  %v239_v4 = vld [vmem:[%s1873_s29 + $0x90] sm:$0xff] (%p51_p3) }
  0x13   : > { %v233_v1 = vld [vmem:[%s1873_s29 + $0x24] sm:$0xff] (%p51_p3)  ;;  %232 = vst [vmem:[%s1878_s30] sm:$0xff] (%p51_p3), %v231_v0  ;;  %236 = vst [vmem:[%s1878_s30 + $0x18] sm:$0xff] (%p51_p3), %v235_v2  ;;  %v237_v3 = vld [vmem:[%s1873_s29 + $0x6c] sm:$0xff] (%p51_p3) }
  0x14   : > { %234 = vst [vmem:[%s1878_s30 + $0xc] sm:$0xff] (%p51_p3), %v233_v1  ;;  %v241_v5 = vld [vmem:[%s1873_s29 + $0xb4] sm:$0xff] (%p51_p3)  ;;  %238 = vst [vmem:[%s1878_s30 + $0x24] sm:$0xff] (%p51_p3), %v237_v3  ;;  %v245_v7 = vld [vmem:[%s1873_s29 + $0xfc] sm:$0xff] (%p51_p3) }
  0x15   : > { %240 = vst [vmem:[%s1878_s30 + $0x30] sm:$0xff] %v239_v4  ;;  %242 = vst [vmem:[%s1878_s30 + $0x3c] sm:$0xff] %v241_v5  ;;  %v243_v6 = vld [vmem:[%s1873_s29 + $0xd8] sm:$0xff]  ;;  %v247_v8 = vld [vmem:[%s1873_s29 + $0x120] sm:$0xff] }
  0x16   : > { %244 = vst [vmem:[%s1878_s30 + $0x48] sm:$0xff] %v243_v6  ;;  %246 = vst [vmem:[%s1878_s30 + $0x54] sm:$0xff] %v245_v7  ;;  %v249_v9 = vld [vmem:[%s1873_s29 + $0x144] sm:$0xff]  ;;  %v253_v11 = vld [vmem:[%s1873_s29 + $0x18c] sm:$0xff] }
  0x17   : > { %248 = vst [vmem:[%s1878_s30 + $0x60] sm:$0xff] %v247_v8  ;;  %v251_v10 = vld [vmem:[%s1873_s29 + $0x168] sm:$0xff]  ;;  %250 = vst [vmem:[%s1878_s30 + $0x6c] sm:$0xff] %v249_v9  ;;  %v255_v12 = vld [vmem:[%s1873_s29 + $0x1b0] sm:$0xff] }
  0x18   : > { %252 = vst [vmem:[%s1878_s30 + $0x78] sm:$0xff] %v251_v10  ;;  %254 = vst [vmem:[%s1878_s30 + $0x84] sm:$0xff] %v253_v11  ;;  %v257_v13 = vld [vmem:[%s1873_s29 + $0x1d4] sm:$0xff]  ;;  %v261_v15 = vld [vmem:[%s1873_s29 + $0x21c] sm:$0xff] }
  0x19   : > { %v259_v14 = vld [vmem:[%s1873_s29 + $0x1f8] sm:$0xff]  ;;  %256 = vst [vmem:[%s1878_s30 + $0x90] sm:$0xff] %v255_v12  ;;  %258 = vst [vmem:[%s1878_s30 + $0x9c] sm:$0xff] %v257_v13  ;;  %v1345_v16 = vld [vmem:[%s1873_s29 + $0x8] sm:$0xf] }
  0x1a   : > { %260 = vst [vmem:[%s1878_s30 + $0xa8] sm:$0xff] %v259_v14  ;;  %v1347_v17 = vld [vmem:[%s1873_s29 + $0x2c] sm:$0xf]  ;;  %262 = vst [vmem:[%s1878_s30 + $0xb4] sm:$0xff] %v261_v15  ;;  %v1349_v18 = vld [vmem:[%s1873_s29 + $0x50] sm:$0xf] }
  0x1b   : > { %1346 = vst [vmem:[%s1878_s30 + $0x8] sm:$0xf] %v1345_v16  ;;  %1348 = vst [vmem:[%s1878_s30 + $0x14] sm:$0xf] %v1347_v17  ;;  %v1351_v19 = vld [vmem:[%s1873_s29 + $0x74] sm:$0xf] }
  0x1c   : > { %v1353_v20 = vld [vmem:[%s1873_s29 + $0x98] sm:$0xf]  ;;  %1350 = vst [vmem:[%s1878_s30 + $0x20] sm:$0xf] %v1349_v18  ;;  %1352 = vst [vmem:[%s1878_s30 + $0x2c] sm:$0xf] %v1351_v19 }
  0x1d   : > { %1354 = vst [vmem:[%s1878_s30 + $0x38] sm:$0xf] %v1353_v20  ;;  %v1355_v21 = vld [vmem:[%s1873_s29 + $0xbc] sm:$0xf]  ;;  %v1357_v22 = vld [vmem:[%s1873_s29 + $0xe0] sm:$0xf] }
  0x1e   : > { %v1359_v23 = vld [vmem:[%s1873_s29 + $0x104] sm:$0xf]  ;;  %1356 = vst [vmem:[%s1878_s30 + $0x44] sm:$0xf] %v1355_v21  ;;  %1358 = vst [vmem:[%s1878_s30 + $0x50] sm:$0xf] %v1357_v22 }
  0x1f   : > { %1360 = vst [vmem:[%s1878_s30 + $0x5c] sm:$0xf] %v1359_v23  ;;  %v1361_v24 = vld [vmem:[%s1873_s29 + $0x128] sm:$0xf]  ;;  %v1363_v25 = vld [vmem:[%s1873_s29 + $0x14c] sm:$0xf] }
  0x20   : > { %v1365_v26 = vld [vmem:[%s1873_s29 + $0x170] sm:$0xf]  ;;  %1362 = vst [vmem:[%s1878_s30 + $0x68] sm:$0xf] %v1361_v24  ;;  %1364 = vst [vmem:[%s1878_s30 + $0x74] sm:$0xf] %v1363_v25 }
  0x21   : > { %1366 = vst [vmem:[%s1878_s30 + $0x80] sm:$0xf] %v1365_v26  ;;  %v1367_v27 = vld [vmem:[%s1873_s29 + $0x194] sm:$0xf]  ;;  %v1369_v28 = vld [vmem:[%s1873_s29 + $0x1b8] sm:$0xf] }
  0x22   : > { %v1371_v29 = vld [vmem:[%s1873_s29 + $0x1dc] sm:$0xf]  ;;  %1368 = vst [vmem:[%s1878_s30 + $0x8c] sm:$0xf] %v1367_v27  ;;  %1370 = vst [vmem:[%s1878_s30 + $0x98] sm:$0xf] %v1369_v28 }
  0x23   : > { %1372 = vst [vmem:[%s1878_s30 + $0xa4] sm:$0xf] %v1371_v29  ;;  %v1373_v30 = vld [vmem:[%s1873_s29 + $0x200] sm:$0xf]  ;;  %v1375_v31 = vld [vmem:[%s1873_s29 + $0x224] sm:$0xf] }
  0x24   : > { %1374 = vst [vmem:[%s1878_s30 + $0xb0] sm:$0xf] %v1373_v30  ;;  %1376 = vst [vmem:[%s1878_s30 + $0xbc] sm:$0xf] %v1375_v31 }
  0x25 PF: > { %p1377_p6 = scmp.ge.s32.totalorder %s1802_s19, 1  ;;  %p318_p7 = scmp.lt.s32.totalorder %s1802_s19, 4 }
  0x27   : > { %p319_p8 = pnand %p1377_p6, %p318_p7 }
  0x28   : > { %s325_s5 = sand.u32 (!%p319_p8), 1, %s1786_s15   ;;  %s374_s6 = smul.u32 (!%p319_p8), 48, %s1794_s17 }
  0x29   : > { %322 = sbr.rel (%p319_p8) target bundleno = 385 (0x181), region = 58  ;;  %p1379_p10 = scmp.ne.s32.totalorder (!%p319_p8), %s1794_s17, 0 }
  0x2a   : > { %s1666_s7 = smul.u32 (!%p319_p8), 192, %s325_s5  ;;  %p375_p9 = scmp.lt.s32.totalorder (!%p319_p8), %s374_s6, 143 }
  0x2c   : > { %s1950_s12 = scalar_lea.vmem (!%p319_p8), [#allocation3], %s1666_s7 }
  0x30   : > { %s2098_s6 = smov (!%p375_p9, %s374_s6), 143  ;;  %408 = sbr.rel (%p1379_p10) target bundleno = 58 (0x3a), region = 66 }
  0x31   : > { %s1378_s8 = sshll.u32 %s2098_s6, 2  ;;  %v1804_v32 = vmov (!%p1379_p10), 0.0  }
  0x32   : > { %s1948_s11 = scalar_lea.vmem %s2087_s1, %s1378_s8  ;;  %409 = vst [vmem:[#allocation2] sm:$0xff] (!%p1379_p10), %v1804_v32  ;;  %410 = vst [vmem:[#allocation2 + $0x8] sm:$0xff] (!%p1379_p10), %v1804_v32 }
  0x33   : > { %411 = vst [vmem:[#allocation2 + $0x10] sm:$0xff] (!%p1379_p10), %v1804_v32  ;;  %412 = vst [vmem:[#allocation2 + $0x18] sm:$0xff] (!%p1379_p10), %v1804_v32 }
  0x34   : > { %413 = vst [vmem:[#allocation2 + $0x20] sm:$0xff] (!%p1379_p10), %v1804_v32  ;;  %414 = vst [vmem:[#allocation2 + $0x28] sm:$0xff] (!%p1379_p10), %v1804_v32 }
  0x35   : > { %415 = vst [vmem:[#allocation2 + $0x30] sm:$0xff] (!%p1379_p10), %v1804_v32  ;;  %416 = vst [vmem:[#allocation2 + $0x38] sm:$0xff] (!%p1379_p10), %v1804_v32 }
  0x36   : > { %417 = vst [vmem:[#allocation2 + $0x40] sm:$0xff] (!%p1379_p10), %v1804_v32  ;;  %418 = vst [vmem:[#allocation2 + $0x48] sm:$0xff] (!%p1379_p10), %v1804_v32 }
  0x37   : > { %419 = vst [vmem:[#allocation2 + $0x50] sm:$0xff] %v1804_v32  ;;  %420 = vst [vmem:[#allocation2 + $0x58] sm:$0xff] %v1804_v32 }
  0x38   : > { %421 = vst [vmem:[#allocation2 + $0x60] sm:$0xff] %v1804_v32  ;;  %422 = vst [vmem:[#allocation2 + $0x68] sm:$0xff] %v1804_v32 }
  0x39   : > { %423 = vst [vmem:[#allocation2 + $0x70] sm:$0xff] %v1804_v32  ;;  %424 = vst [vmem:[#allocation2 + $0x78] sm:$0xff] %v1804_v32 }
  0x3a PF: > { %v1708_v33 = vld [vmem:[%s1948_s11 + $0x40] sm:$0xff]   ;;  %v1711_v36 = vld [vmem:[%s1948_s11 + $0x48] sm:$0xff]   ;;  %v1714_v39 = vld [vmem:[%s1948_s11 + $0x50] sm:$0xff]   ;;  %p1428_p11 = scmp.ne.s32.totalorder %s1794_s17, 2 }
  0x3b   : > { %v1709_v34 = vld [vmem:[%s1948_s11] sm:$0xff]   ;;  %1553 = vmatprep.subr.bf16.mxu0 %v1708_v33  ;;  %v1712_v37 = vld [vmem:[%s1948_s11 + $0x8] sm:$0xff]   ;;  %v1715_v40 = vld [vmem:[%s1948_s11 + $0x10] sm:$0xff]  }
  0x3c   : > { %v1710_v35 = vld [vmem:[%s1948_s11 + $0x80] sm:$0xff]   ;;  %1554 = vmatpush3.bf16.msra.mxu0 %v1709_v34  ;;  %v1713_v38 = vld [vmem:[%s1948_s11 + $0x88] sm:$0xff]   ;;  %v1716_v41 = vld [vmem:[%s1948_s11 + $0x90] sm:$0xff]  }
  0x3d   : > { %1633 = vmatprep.subr.bf16.mxu1 %v1710_v35  ;;  %1555 = vmatprep.subr.bf16.mxu0 %v1711_v36  ;;  %v1717_v42 = vld [vmem:[%s1948_s11 + $0x58] sm:$0xff]   ;;  %v1720_v45 = vld [vmem:[%s1948_s11 + $0x60] sm:$0xff]   ;;  %v1723_v48 = vld [vmem:[%s1948_s11 + $0x68] sm:$0xff]  }
  0x3e   : > { %1634 = vmatpush3.bf16.msra.mxu1 %v1710_v35  ;;  %v1718_v43 = vld [vmem:[%s1948_s11 + $0x18] sm:$0xff]   ;;  %v1722_v46 = vld [vmem:[%s1948_s11 + $0xa0] sm:$0xff]   ;;  %v1725_v49 = vld [vmem:[%s1948_s11 + $0xa8] sm:$0xff]  }
  0x3f   : > { %1635 = vmatprep.subr.bf16.mxu1 %v1713_v38  ;;  %v1719_v44 = vld [vmem:[%s1948_s11 + $0x98] sm:$0xff]   ;;  %v1721_v47 = vld [vmem:[%s1948_s11 + $0x20] sm:$0xff]   ;;  %v1724_v50 = vld [vmem:[%s1948_s11 + $0x28] sm:$0xff]  }
  0x40   : > { %1556 = vmatpush3.bf16.msra.mxu0 %v1712_v37  ;;  %v1726_v51 = vld [vmem:[%s1948_s11 + $0x70] sm:$0xff]   ;;  %v1729_v54 = vld [vmem:[%s1948_s11 + $0x78] sm:$0xff]   ;;  %v1732_v59 = vld [vmem:[%s1950_s12] ss:$12 sps:$4 sm:$0xff]  }
  0x41   : > { %1557 = vmatprep.subr.bf16.mxu0 %v1714_v39  ;;  %v1727_v52 = vld [vmem:[%s1948_s11 + $0x30] sm:$0xff]   ;;  %v1731_v55 = vld [vmem:[%s1948_s11 + $0xb8] sm:$0xff]   ;;  %v1736_v61 = vld [vmem:[%s1950_s12 + $0x20] ss:$12 sps:$4 sm:$0xff]  }
  0x42   : > { %1636 = vmatpush3.bf16.msra.mxu1 %v1713_v38  ;;  %v1728_v53 = vld [vmem:[%s1948_s11 + $0xb0] sm:$0xff]   ;;  %v1730_v58 = vld [vmem:[%s1948_s11 + $0x38] sm:$0xff]   ;;  %v1752_v5 = vld [vmem:[%s1950_s12 + $0x80] ss:$12 sps:$4 sm:$0xff]  }
  0x43   : > { %1637 = vmatprep.subr.bf16.mxu1 %v1716_v41  ;;  %v1734_v56 = vld [vmem:[%s1950_s12 + $0x4] ss:$12 sps:$4 sm:$0xff]   ;;  %v1735_v57 = vld [vmem:[%s1950_s12 + $0x8] ss:$12 sps:$4 sm:$0xff]   ;;  %v1745_v4 = vld [vmem:[%s1950_s12 + $0x4c] ss:$12 sps:$4 sm:$0xff]  }
  0x44   : > { %1558 = vmatpush3.bf16.msra.mxu0 %v1715_v40  ;;  %825 = vmatprep.mubr.bf16.mxu0 %v1734_v56  ;;  %v1737_v60 = vld [vmem:[%s1950_s12 + $0x1c] ss:$12 sps:$4 sm:$0xff]   ;;  %v1743_v62 = vld [vmem:[%s1950_s12 + $0x38] ss:$12 sps:$4 sm:$0xff]   ;;  %v1740_v0 = vld [vmem:[%s1950_s12 + $0x34] ss:$12 sps:$4 sm:$0xff]  }
  0x45   : > { %1559 = vmatprep.subr.bf16.mxu0 %v1717_v42  ;;  %1649 = vmatprep.mubr.bf16.mxu1 %v1735_v57  ;;  %v1739_v63 = vld [vmem:[%s1950_s12 + $0x18] ss:$12 sps:$4 sm:$0xff]   ;;  %v1744_v1 = vld [vmem:[%s1950_s12 + $0x50] ss:$12 sps:$4 sm:$0xff]   ;;  %v1751_v2 = vld [vmem:[%s1950_s12 + $0x68] ss:$12 sps:$4 sm:$0xff]  }
  0x46   : > { %1638 = vmatpush3.bf16.msra.mxu1 %v1716_v41  ;;  %v1742_v3 = vld [vmem:[%s1950_s12 + $0x30] ss:$12 sps:$4 sm:$0xff]   ;;  %v1759_v6 = vld [vmem:[%s1950_s12 + $0x98] ss:$12 sps:$4 sm:$0xff]   ;;  %v1747_v7 = vld [vmem:[%s1950_s12 + $0x48] ss:$12 sps:$4 sm:$0xff]  }
  0x47   : > { %1639 = vmatprep.subr.bf16.mxu1 %v1719_v44  ;;  %v1748_v8 = vld [vmem:[%s1950_s12 + $0x64] ss:$12 sps:$4 sm:$0xff]   ;;  %v1750_v10 = vld [vmem:[%s1950_s12 + $0x60] ss:$12 sps:$4 sm:$0xff]   ;;  %v1753_v11 = vld [vmem:[%s1950_s12 + $0x7c] ss:$12 sps:$4 sm:$0xff]  }
  0x48   : > { %1560 = vmatpush3.bf16.msra.mxu0 %v1718_v43  ;;  %v1760_v9 = vld [vmem:[%s1950_s12 + $0xb0] ss:$12 sps:$4 sm:$0xff]   ;;  %v1755_v12 = vld [vmem:[%s1950_s12 + $0x78] ss:$12 sps:$4 sm:$0xff]   ;;  %v1756_v13 = vld [vmem:[%s1950_s12 + $0x94] ss:$12 sps:$4 sm:$0xff]  }
  0x49   : > { %1561 = vmatprep.subr.bf16.mxu0 %v1720_v45  ;;  %v1758_v14 = vld [vmem:[%s1950_s12 + $0x90] ss:$12 sps:$4 sm:$0xff]   ;;  %v1761_v15 = vld [vmem:[%s1950_s12 + $0xac] ss:$12 sps:$4 sm:$0xff]   ;;  %v1763_v16 = vld [vmem:[%s1950_s12 + $0xa8] ss:$12 sps:$4 sm:$0xff]  }
  0x4a   : > { %1640 = vmatpush3.bf16.msra.mxu1 %v1719_v44  ;;  %v425_v23 = vld [vmem:[#allocation2] sm:$0xff]  ;;  %v426_v28 = vld [vmem:[#allocation2 + $0x8] sm:$0xff]  ;;  %v427_v38 = vld [vmem:[#allocation2 + $0x10] sm:$0xff] }
  0x4b   : > { %1641 = vmatprep.subr.bf16.mxu1 %v1722_v46  ;;  %v428_v44 = vld [vmem:[#allocation2 + $0x18] sm:$0xff] }
  0x4c   : > { %1562 = vmatpush3.bf16.msra.mxu0 %v1721_v47 }
  0x4d   : > { %1563 = vmatprep.subr.bf16.mxu0 %v1723_v48 }
  0x4e   : > { %1642 = vmatpush3.bf16.msra.mxu1 %v1722_v46 }
  0x4f   : > { %1643 = vmatprep.subr.bf16.mxu1 %v1725_v49 }
  0x50   : > { %1564 = vmatpush3.bf16.msra.mxu0 %v1724_v50 }
  0x51   : > { %1565 = vmatprep.subr.bf16.mxu0 %v1726_v51 }
  0x52   : > { %1644 = vmatpush3.bf16.msra.mxu1 %v1725_v49 }
  0x53   : > { %1645 = vmatprep.subr.bf16.mxu1 %v1728_v53 }
  0x54   : > { %1566 = vmatpush3.bf16.msra.mxu0 %v1727_v52 }
  0x55   : > { %1567 = vmatprep.subr.bf16.mxu0 %v1729_v54 }
  0x56   : > { %1646 = vmatpush3.bf16.msra.mxu1 %v1728_v53 }
  0x57   : > { %1647 = vmatprep.subr.bf16.mxu1 %v1731_v55 }
  0x58   : > { %1568 = vmatpush3.bf16.msra.mxu0 %v1730_v58 }
  0x5a   : > { %1648 = vmatpush3.bf16.msra.mxu1 %v1731_v55  ;;  %v429_v55 = vld [vmem:[#allocation2 + $0x20] sm:$0xff] }
  0x5b   : > { %826 = vmatmul.mubr.bf16.vlgmr.msra.gmra.mrb[0].mxu0 %v1732_v59 }
  0x5c   : > { %833 = vmatprep.mubr.bf16.mxu0 %v1737_v60  ;;  %v430_v60 = vld [vmem:[#allocation2 + $0x28] sm:$0xff] }
  0x5d   : > { %1650 = vmatmul.mubr.bf16.vlgmr.msra.gmra.mrb[0].mxu1 %v1736_v61 }
  0x5e   : > { %1653 = vmatprep.mubr.bf16.mxu1 %v1743_v62 }
  0x63   : > { %834 = vmatmul.mubr.bf16.gmra.mrb[4].mxu0 %v1739_v63 }
  0x64   : > { %841 = vmatprep.mubr.bf16.mxu0 %v1740_v0 }
  0x65   : > { %1654 = vmatmul.mubr.bf16.gmra.mrb[4].mxu1 %v1744_v1 }
  0x66   : > { %1657 = vmatprep.mubr.bf16.mxu1 %v1751_v2 }
  0x6b   : > { %842 = vmatmul.mubr.bf16.gmra.mrb[8].mxu0 %v1742_v3 }
  0x6c   : > { %849 = vmatprep.mubr.bf16.mxu0 %v1745_v4 }
  0x6d   : > { %1658 = vmatmul.mubr.bf16.gmra.mrb[8].mxu1 %v1752_v5 }
  0x6e   : > { %1661 = vmatprep.mubr.bf16.mxu1 %v1759_v6  ;;  %v431_v6 = vld [vmem:[#allocation2 + $0x30] sm:$0xff] }
  0x73   : > { %850 = vmatmul.mubr.bf16.gmra.mrb[12].mxu0 %v1747_v7 }
  0x74   : > { %857 = vmatprep.mubr.bf16.mxu0 %v1748_v8 }
  0x75   : > { %1662 = vmatmul.mubr.bf16.gmra.mrb[12].mxu1 %v1760_v9 }
  0x7b   : > { %858 = vmatmul.mubr.bf16.gmra.mrb[16].mxu0 %v1750_v10 }
  0x7c   : > { %865 = vmatprep.mubr.bf16.mxu0 %v1753_v11 }
  0x83   : > { %866 = vmatmul.mubr.bf16.gmra.mrb[20].mxu0 %v1755_v12  ;;  %v432_v12 = vld [vmem:[#allocation2 + $0x38] sm:$0xff] }
  0x84   : > { %873 = vmatprep.mubr.bf16.mxu0 %v1756_v13 }
  0x8b   : > { %874 = vmatmul.mubr.bf16.gmra.mrb[24].mxu0 %v1758_v14 }
  0x8c   : > { %881 = vmatprep.mubr.bf16.mxu0 %v1761_v15 }
  0x93   : > { %882 = vmatmul.mubr.bf16.gmra.mrb[28].mxu0 %v1763_v16 }
 0x12e   : > { %v1569_v17 = vpop.f32.mrb[0].mxu0 }
 0x12f   : > { %v1570_v18 = vpop.f32.mrb[1].mxu0 }
 0x130   : > { %v1571_v19 = vadd.f32 %v1570_v18, %v1569_v17  ;;  %v1572_v20 = vpop.f32.mrb[2].mxu0  ;;  %v1651_v21 = vpop.f32.mrb[0].mxu1 }
 0x131   : > { %v1573_v22 = vpop.f32.mrb[3].mxu0  ;;  %v924_v24 = vpop.f32.mrb[1].mxu1 }
 0x132   : > { %v1574_v25 = vadd.f32 %v1573_v22, %v1572_v20  ;;  %v925_v26 = vadd.f32 %v1571_v19, %v924_v24  ;;  %v1652_v27 = vpop.f32.mrb[2].mxu1  ;;  %v433_v22 = vld [vmem:[#allocation2 + $0x40] sm:$0xff] }
 0x133   : > { %v927_v29 = vpop.f32.mrb[3].mxu1 }
 0x134   : > { %v987_v30 = vadd.f32 %v925_v26, %v425_v23  ;;  %v928_v31 = vadd.f32 %v1574_v25, %v927_v29  ;;  %v434_v25 = vld [vmem:[#allocation2 + $0x48] sm:$0xff] }
 0x136   : > { %1003 = vst [vmem:[#allocation2] sm:$0xff] %v987_v30  ;;  %v988_v32 = vadd.f32 %v928_v31, %v426_v28  ;;  %v1575_v33 = vpop.f32.mrb[4].mxu0 }
 0x137   : > { %v1576_v34 = vpop.f32.mrb[5].mxu0 }
 0x138   : > { %1004 = vst [vmem:[#allocation2 + $0x8] sm:$0xff] %v988_v32  ;;  %v1577_v35 = vadd.f32 %v1576_v34, %v1575_v33  ;;  %v1578_v36 = vpop.f32.mrb[6].mxu0  ;;  %v1655_v37 = vpop.f32.mrb[4].mxu1  ;;  %v435_v33 = vld [vmem:[#allocation2 + $0x50] sm:$0xff] }
 0x139   : > { %v1579_v39 = vpop.f32.mrb[7].mxu0  ;;  %v940_v40 = vpop.f32.mrb[5].mxu1 }
 0x13a   : > { %v933_v41 = vadd.f32 %v1651_v21, %v1577_v35  ;;  %v1580_v42 = vadd.f32 %v1579_v39, %v1578_v36  ;;  %v1656_v43 = vpop.f32.mrb[6].mxu1 }
 0x13b   : > { %v943_v45 = vpop.f32.mrb[7].mxu1 }
 0x13c   : > { %v989_v46 = vadd.f32 %v933_v41, %v427_v38  ;;  %v936_v47 = vadd.f32 %v1652_v27, %v1580_v42 }
 0x13e   : > { %1005 = vst [vmem:[#allocation2 + $0x10] sm:$0xff] %v989_v46  ;;  %v990_v48 = vadd.f32 %v936_v47, %v428_v44  ;;  %v1581_v49 = vpop.f32.mrb[8].mxu0  ;;  %v437_v46 = vld [vmem:[#allocation2 + $0x60] sm:$0xff] }
 0x13f   : > { %v1582_v50 = vpop.f32.mrb[9].mxu0 }
 0x140   : > { %1006 = vst [vmem:[#allocation2 + $0x18] sm:$0xff] %v990_v48  ;;  %v1583_v51 = vadd.f32 %v1582_v50, %v1581_v49  ;;  %v1584_v52 = vpop.f32.mrb[10].mxu0  ;;  %v1659_v53 = vpop.f32.mrb[8].mxu1  ;;  %v438_v49 = vld [vmem:[#allocation2 + $0x68] sm:$0xff] }
 0x141   : > { %v1585_v54 = vpop.f32.mrb[11].mxu0  ;;  %v956_v56 = vpop.f32.mrb[9].mxu1 }
 0x142   : > { %v1586_v57 = vadd.f32 %v1585_v54, %v1584_v52  ;;  %v941_v58 = vadd.f32 %v1583_v51, %v940_v40  ;;  %v1660_v59 = vpop.f32.mrb[10].mxu1 }
 0x143   : > { %v959_v61 = vpop.f32.mrb[11].mxu1 }
 0x144   : > { %v991_v62 = vadd.f32 %v941_v58, %v429_v55  ;;  %v944_v63 = vadd.f32 %v1586_v57, %v943_v45  ;;  %v439_v57 = vld [vmem:[#allocation2 + $0x70] sm:$0xff] }
 0x146   : > { %1007 = vst [vmem:[#allocation2 + $0x20] sm:$0xff] %v991_v62  ;;  %v992_v0 = vadd.f32 %v944_v63, %v430_v60  ;;  %v1587_v1 = vpop.f32.mrb[12].mxu0 }
 0x147   : > { %v1588_v2 = vpop.f32.mrb[13].mxu0 }
 0x148   : > { %1008 = vst [vmem:[#allocation2 + $0x28] sm:$0xff] %v992_v0  ;;  %v1589_v3 = vadd.f32 %v1588_v2, %v1587_v1  ;;  %v1590_v4 = vpop.f32.mrb[14].mxu0  ;;  %v1663_v5 = vpop.f32.mrb[12].mxu1  ;;  %v1023_v1 = vld [vmem:[#allocation2] sm:$0xff] (!%p1428_p11)  ;;  %v1024_v2 = vld [vmem:[#allocation2 + $0x8] sm:$0xff] (!%p1428_p11) }
 0x149   : > { %v1591_v7 = vpop.f32.mrb[15].mxu0  ;;  %v972_v8 = vpop.f32.mrb[13].mxu1 }
 0x14a   : > { %v949_v9 = vadd.f32 %v1655_v37, %v1589_v3  ;;  %v1592_v10 = vadd.f32 %v1591_v7, %v1590_v4  ;;  %v1664_v11 = vpop.f32.mrb[14].mxu1  ;;  %v436_v37 = vld [vmem:[#allocation2 + $0x58] sm:$0xff]  ;;  %v2005_v3 = vld [vmem:[%s2088_s2] ss:$0 sm:$0xff] (!%p1428_p11)  ;;  %v1025_v7 = vld [vmem:[#allocation2 + $0x10] sm:$0xff] (!%p1428_p11) }
 0x14b   : > { %v975_v13 = vpop.f32.mrb[15].mxu1  ;;  %v1046_v4 = vadd.f32 (!%p1428_p11), %v2005_v3, %v1023_v1 }
 0x14c   : > { %v993_v14 = vadd.f32 %v949_v9, %v431_v6  ;;  %v952_v15 = vadd.f32 %v1656_v43, %v1592_v10  ;;  %v1468_v6 = vld [vmem:[%s2089_s3] sm:$0xff] (!%p1428_p11)  }
 0x14d   : > { %v1469_v9 = vunpack.c.l.bf16 (!%p1428_p11), %v1468_v6  ;;  %v1470_v10 = vunpack.c.h.bf16 (!%p1428_p11), %v1468_v6 }
 0x14e   : > { %1009 = vst [vmem:[#allocation2 + $0x30] sm:$0xff] %v993_v14  ;;  %v994_v16 = vadd.f32 %v952_v15, %v432_v12  ;;  %v1593_v17 = vpop.f32.mrb[16].mxu0  ;;  %v1027_v14 = vld [vmem:[#allocation2 + $0x20] sm:$0xff] (!%p1428_p11) }
 0x14f   : > { %v1594_v18 = vpop.f32.mrb[17].mxu0  ;;  %v1028_v15 = vld [vmem:[#allocation2 + $0x28] sm:$0xff] (!%p1428_p11) }
 0x150   : > { %1010 = vst [vmem:[#allocation2 + $0x38] sm:$0xff] %v994_v16  ;;  %v1595_v19 = vadd.f32 %v1594_v18, %v1593_v17  ;;  %v1596_v20 = vpop.f32.mrb[18].mxu0  ;;  %v1050_v18 = vadd.f32 (!%p1428_p11), %v2005_v3, %v1027_v14 }
 0x151   : > { %v1597_v21 = vpop.f32.mrb[19].mxu0 }
 0x152   : > { %v1598_v23 = vadd.f32 %v1597_v21, %v1596_v20  ;;  %v957_v24 = vadd.f32 %v1595_v19, %v956_v56  ;;  %v1051_v19 = vadd.f32 (!%p1428_p11), %v2005_v3, %v1028_v15  ;;  %v1540_v20 = vld [vmem:[%s2089_s3 + $0x10] sm:$0xff] (!%p1428_p11)  }
 0x154   : > { %v995_v26 = vadd.f32 %v957_v24, %v433_v22  ;;  %v960_v27 = vadd.f32 %v1598_v23, %v959_v61  ;;  %v440_v61 = vld [vmem:[#allocation2 + $0x78] sm:$0xff]  ;;  %v1094_v23 = vadd.f32 (!%p1428_p11), %v1469_v9, %v1046_v4 }
 0x155   : > { %v1029_v21 = vld [vmem:[#allocation2 + $0x30] sm:$0xff] (!%p1428_p11) }
 0x156   : > { %1011 = vst [vmem:[#allocation2 + $0x40] sm:$0xff] %v995_v26  ;;  %v996_v28 = vadd.f32 %v960_v27, %v434_v25  ;;  %v1599_v29 = vpop.f32.mrb[20].mxu0  ;;  %v1477_v25 = vunpack.c.l.bf16 (!%p1428_p11), %v1540_v20  ;;  %v1478_v26 = vunpack.c.h.bf16 (!%p1428_p11), %v1540_v20  ;;  %v1541_v27 = vld [vmem:[%s2089_s3 + $0x18] sm:$0xff] (!%p1428_p11)  }
 0x157   : > { %v1600_v30 = vpop.f32.mrb[21].mxu0  ;;  %v1030_v22 = vld [vmem:[#allocation2 + $0x38] sm:$0xff] (!%p1428_p11) }
 0x158   : > { %1012 = vst [vmem:[#allocation2 + $0x48] sm:$0xff] %v996_v28  ;;  %v1601_v31 = vadd.f32 %v1600_v30, %v1599_v29  ;;  %v1602_v32 = vpop.f32.mrb[22].mxu0  ;;  %v1052_v30 = vadd.f32 (!%p1428_p11), %v2005_v3, %v1029_v21 }
 0x159   : > { %v1603_v34 = vpop.f32.mrb[23].mxu0 }
 0x15a   : > { %v965_v35 = vadd.f32 %v1659_v53, %v1601_v31  ;;  %v1604_v36 = vadd.f32 %v1603_v34, %v1602_v32  ;;  %v1053_v31 = vadd.f32 (!%p1428_p11), %v2005_v3, %v1030_v22 }
 0x15c   : > { %v997_v38 = vadd.f32 %v965_v35, %v435_v33  ;;  %v968_v39 = vadd.f32 %v1660_v59, %v1604_v36  ;;  %v1110_v33 = vmax.f32 (!%p1428_p11), %v1094_v23, 0.0  ;;  %v1098_v35 = vadd.f32 (!%p1428_p11), %v1477_v25, %v1050_v18 }
 0x15d   : > { %v1031_v32 = vld [vmem:[#allocation2 + $0x40] sm:$0xff] (!%p1428_p11)  ;;  %v1099_v36 = vadd.f32 (!%p1428_p11), %v1478_v26, %v1051_v19 }
 0x15e   : > { %1013 = vst [vmem:[#allocation2 + $0x50] sm:$0xff] %v997_v38  ;;  %v998_v40 = vadd.f32 %v968_v39, %v436_v37  ;;  %v1605_v41 = vpop.f32.mrb[24].mxu0 }
 0x15f   : > { %v1606_v42 = vpop.f32.mrb[25].mxu0  ;;  %v1032_v37 = vld [vmem:[#allocation2 + $0x48] sm:$0xff] (!%p1428_p11) }
 0x160   : > { %1014 = vst [vmem:[#allocation2 + $0x58] sm:$0xff] %v998_v40  ;;  %v1607_v43 = vadd.f32 %v1606_v42, %v1605_v41  ;;  %v1608_v44 = vpop.f32.mrb[26].mxu0  ;;  %v1481_v40 = vunpack.c.l.bf16 (!%p1428_p11), %v1541_v27  ;;  %v1482_v41 = vunpack.c.h.bf16 (!%p1428_p11), %v1541_v27  ;;  %v1542_v42 = vld [vmem:[%s2089_s3 + $0x20] sm:$0xff] (!%p1428_p11)  }
 0x161   : > { %v1609_v45 = vpop.f32.mrb[27].mxu0 }
 0x162   : > { %v1610_v47 = vadd.f32 %v1609_v45, %v1608_v44  ;;  %v973_v48 = vadd.f32 %v1607_v43, %v972_v8  ;;  %v1026_v8 = vld [vmem:[#allocation2 + $0x18] sm:$0xff] (!%p1428_p11)  ;;  %v1114_v45 = vmax.f32 (!%p1428_p11), %v1098_v35, 0.0 }
 0x163   : > { %v1049_v12 = vadd.f32 (!%p1428_p11), %v2005_v3, %v1026_v8 }
 0x164   : > { %v999_v50 = vadd.f32 %v973_v48, %v437_v46  ;;  %v976_v51 = vadd.f32 %v1610_v47, %v975_v13  ;;  %v1539_v13 = vld [vmem:[%s2089_s3 + $0x8] sm:$0xff] (!%p1428_p11)   ;;  %v1115_v46 = vmax.f32 (!%p1428_p11), %v1099_v36, 0.0  ;;  %v1054_v47 = vadd.f32 (!%p1428_p11), %v2005_v3, %v1031_v32 }
 0x165   : > { %v1473_v16 = vunpack.c.l.bf16 (!%p1428_p11), %v1539_v13  ;;  %v1474_v17 = vunpack.c.h.bf16 (!%p1428_p11), %v1539_v13  ;;  %v1033_v43 = vld [vmem:[#allocation2 + $0x50] sm:$0xff] (!%p1428_p11) }
 0x166   : > { %1015 = vst [vmem:[#allocation2 + $0x60] sm:$0xff] %v999_v50  ;;  %v1000_v52 = vadd.f32 %v976_v51, %v438_v49  ;;  %v1611_v53 = vpop.f32.mrb[28].mxu0  ;;  %v1543_v49 = vld [vmem:[%s2089_s3 + $0x28] sm:$0xff] (!%p1428_p11)   ;;  %v1100_v51 = vadd.f32 (!%p1428_p11), %v1481_v40, %v1052_v30 }
 0x167   : > { %v1612_v54 = vpop.f32.mrb[29].mxu0  ;;  %v1097_v29 = vadd.f32 (!%p1428_p11), %v1474_v17, %v1049_v12  ;;  %v1034_v48 = vld [vmem:[#allocation2 + $0x58] sm:$0xff] (!%p1428_p11)  ;;  %v1490_v4 = vunpack.c.h.bf16 (!%p1428_p11), %v1543_v49 }
 0x168   : > { %1016 = vst [vmem:[#allocation2 + $0x68] sm:$0xff] %v1000_v52  ;;  %v1613_v55 = vadd.f32 %v1612_v54, %v1611_v53  ;;  %v1614_v56 = vpop.f32.mrb[30].mxu0  ;;  %v1101_v52 = vadd.f32 (!%p1428_p11), %v1482_v41, %v1053_v31  ;;  %v1055_v53 = vadd.f32 (!%p1428_p11), %v2005_v3, %v1032_v37  ;;  %v1545_v12 = vld [vmem:[%s2089_s3 + $0x38] sm:$0xff] (!%p1428_p11)  }
 0x169   : > { %v1615_v58 = vpop.f32.mrb[31].mxu0  ;;  %v1113_v39 = vmax.f32 (!%p1428_p11), %v1097_v29, 0.0  ;;  %v1498_v26 = vunpack.c.h.bf16 (!%p1428_p11), %v1545_v12 }
 0x16a   : > { %v981_v59 = vadd.f32 %v1663_v5, %v1613_v55  ;;  %v1616_v60 = vadd.f32 %v1615_v58, %v1614_v56  ;;  %1022 = sbr.rel (%p1428_p11) target bundleno = 385 (0x181), region = 70  ;;  %v1047_v5 = vadd.f32 (!%p1428_p11), %v2005_v3, %v1024_v2  ;;  %v1512_v55 = vpack.c.bf16 (!%p1428_p11), %v1115_v46, %v1114_v45 }
 0x16b   : > { %v1485_v56 = vunpack.c.l.bf16 (!%p1428_p11), %v1542_v42  ;;  %v1056_v58 = vadd.f32 (!%p1428_p11), %v2005_v3, %v1033_v43 }
 0x16c   : > { %v1001_v62 = vadd.f32 %v981_v59, %v439_v57  ;;  %v984_v63 = vadd.f32 %v1664_v11, %v1616_v60  ;;  %v1048_v11 = vadd.f32 (!%p1428_p11), %v2005_v3, %v1025_v7  ;;  %v1095_v24 = vadd.f32 (!%p1428_p11), %v1470_v10, %v1047_v5  ;;  %v1544_v60 = vld [vmem:[%s2089_s3 + $0x30] sm:$0xff] (!%p1428_p11)   ;;  %1547 = vst [vmem:[%s2090_s4 + $0x10] sm:$0xff] (!%p1428_p11), %v1512_v55  }
 0x16d   : > { %v1035_v54 = vld [vmem:[#allocation2 + $0x60] sm:$0xff] (!%p1428_p11)  ;;  %v1486_v57 = vunpack.c.h.bf16 (!%p1428_p11), %v1542_v42  ;;  %v1102_v1 = vadd.f32 (!%p1428_p11), %v1485_v56, %v1054_v47 }
 0x16e   : > { %1017 = vst [vmem:[#allocation2 + $0x70] sm:$0xff] %v1001_v62  ;;  %v1002_v0 = vadd.f32 %v984_v63, %v440_v61  ;;  %v1096_v28 = vadd.f32 (!%p1428_p11), %v1473_v16, %v1048_v11  ;;  %v1111_v34 = vmax.f32 (!%p1428_p11), %v1095_v24, 0.0  ;;  %v1116_v61 = vmax.f32 (!%p1428_p11), %v1100_v51, 0.0 }
 0x16f   : > { %v1036_v59 = vld [vmem:[#allocation2 + $0x68] sm:$0xff] (!%p1428_p11)  ;;  %v1117_v62 = vmax.f32 (!%p1428_p11), %v1101_v52, 0.0  ;;  %v1057_v63 = vadd.f32 (!%p1428_p11), %v2005_v3, %v1034_v48  ;;  %v1103_v2 = vadd.f32 (!%p1428_p11), %v1486_v57, %v1055_v53  ;;  %v1058_v5 = vadd.f32 (!%p1428_p11), %v2005_v3, %v1035_v54 }
 0x170   : > { %1018 = vst [vmem:[#allocation2 + $0x78] sm:$0xff] %v1002_v0  ;;  %v1112_v38 = vmax.f32 (!%p1428_p11), %v1096_v28, 0.0  ;;  %v1502_v44 = vpack.c.bf16 (!%p1428_p11), %v1111_v34, %v1110_v33  ;;  %v1489_v0 = vunpack.c.l.bf16 (!%p1428_p11), %v1543_v49  ;;  %v1059_v10 = vadd.f32 (!%p1428_p11), %v2005_v3, %v1036_v59 }
 0x171   : > { %v1517_v8 = vpack.c.bf16 %v1117_v62, %v1116_v61  ;;  %v1493_v11 = vunpack.c.l.bf16 %v1544_v60  ;;  %v1118_v13 = vmax.f32 %v1102_v1, 0.0  ;;  %v1119_v14 = vmax.f32 %v1103_v2, 0.0 }
 0x172   : > { %v1507_v50 = vpack.c.bf16 %v1113_v39, %v1112_v38  ;;  %1503 = vst [vmem:[%s2090_s4] sm:$0xff] %v1502_v44   ;;  %v1104_v9 = vadd.f32 %v1489_v0, %v1056_v58  ;;  %v1105_v15 = vadd.f32 %v1490_v4, %v1057_v63  ;;  %v1494_v16 = vunpack.c.h.bf16 %v1544_v60 }
 0x173   : > { %1548 = vst [vmem:[%s2090_s4 + $0x18] sm:$0xff] %v1517_v8   ;;  %v1106_v18 = vadd.f32 %v1493_v11, %v1058_v5  ;;  %v1522_v21 = vpack.c.bf16 %v1119_v14, %v1118_v13  ;;  %v1497_v24 = vunpack.c.l.bf16 %v1545_v12 }
 0x174   : > { %1546 = vst [vmem:[%s2090_s4 + $0x8] sm:$0xff] %v1507_v50   ;;  %v1120_v17 = vmax.f32 %v1104_v9, 0.0  ;;  %v1121_v22 = vmax.f32 %v1105_v15, 0.0  ;;  %v1107_v23 = vadd.f32 %v1494_v16, %v1059_v10 }
 0x175   : > { %v1037_v6 = vld [vmem:[#allocation2 + $0x70] sm:$0xff]  ;;  %v1122_v25 = vmax.f32 %v1106_v18, 0.0  ;;  %1549 = vst [vmem:[%s2090_s4 + $0x20] sm:$0xff] %v1522_v21  }
 0x176   : > { %v1060_v19 = vadd.f32 %v2005_v3, %v1037_v6  ;;  %v1527_v27 = vpack.c.bf16 %v1121_v22, %v1120_v17  ;;  %v1123_v28 = vmax.f32 %v1107_v23, 0.0 }
 0x177   : > { %v1038_v7 = vld [vmem:[#allocation2 + $0x78] sm:$0xff] }
 0x178   : > { %v1061_v20 = vadd.f32 %v2005_v3, %v1038_v7  ;;  %v1108_v29 = vadd.f32 %v1497_v24, %v1060_v19  ;;  %1550 = vst [vmem:[%s2090_s4 + $0x28] sm:$0xff] %v1527_v27   ;;  %v1532_v31 = vpack.c.bf16 %v1123_v28, %v1122_v25 }
 0x17a   : > { %v1109_v30 = vadd.f32 %v1498_v26, %v1061_v20  ;;  %v1124_v3 = vmax.f32 %v1108_v29, 0.0  ;;  %1551 = vst [vmem:[%s2090_s4 + $0x30] sm:$0xff] %v1532_v31  }
 0x17c   : > { %v1125_v32 = vmax.f32 %v1109_v30, 0.0 }
 0x17e   : > { %v1537_v33 = vpack.c.bf16 %v1125_v32, %v1124_v3 }
 0x180   : > { %1552 = vst [vmem:[%s2090_s4 + $0x38] sm:$0xff] %v1537_v33  }
 0x181 PF: > { %s14_s19 = sadd.s32 1, %s1802_s19   ;;  %s2091_s15 = smov %s1790_s16 }
 0x182   : > { %p11_p12 = scmp.ge.s32.totalorder %s14_s19, 5   ;;  %s2092_s16 = smov %s1865_s23 }
 0x183   : > { %s2093_s17 = smov %s1798_s18  ;;  %s2094_s18 = smov %s2096_s20 }
 0x184   :  { %13 = sbr.rel (!%p11_p12) target bundleno = 3 (0x3), region = 120 }

// kernel: color_model_forward.31
= control target key start
LH: loop header
LB: loop body
LE: loop exit
PB: predicated region body
PF: predicated region fallthrough
CT: control target
= control target key end

     0   :  { %s1260_s12 = smov 0   ;;  %s1262_s13 = smov 0   ;;  %s1402_s0 = inlined_call_operand.vmem [shape: bf16[32,1152], index: 0, kind: input, shape index: {}]   ;;  %s1403_s1 = inlined_call_operand.vmem [shape: bf16[1152,256], index: 1, kind: input, shape index: {}]   ;;  %s1404_s2 = inlined_call_operand.vmem [shape: f32[1,256], index: 2, kind: input, shape index: {}]   ;;  %s1405_s3 = inlined_call_operand.vmem [shape: bf16[32,256], index: 3, kind: output, shape index: {}]  }
   0x1   :  { %s1264_s14 = smov 0   ;;  %s1266_s15 = smov 0  }
   0x2   :  { %s1268_s16 = smov 0  }
   0x3 LB: > { %s25_s17 = sadd.s32 1, %s1232_s15  ;;  %p48_p1 = scmp.ne.s32.totalorder %s1224_s13, %s1220_s12  ;;  %s1236_s16 = sphi %s1268_s16, %s13_s16   ;;  %s1232_s15 = sphi %s1266_s15, %s1409_s15   ;;  %s1228_s14 = sphi %s1264_s14, %s1408_s14   ;;  %s1224_s13 = sphi %s1262_s13, %s1407_s13   ;;  %s1220_s12 = sphi %s1260_s12, %s1406_s12  }
   0x4   : > { %p26_p0 = scmp.ge.s32.totalorder %s25_s17, 3  ;;  %p49_p2 = scmp.eq.s32.totalorder %s1236_s16, 0 }
   0x5   : > { %s41_s19 = sadd.s32 1, %s1224_s13  ;;  %p983_p5 = scmp.ge.s32.totalorder %s1236_s16, 3 }
   0x6   : > { %s1411_s17 = smov (%p26_p0, %s25_s17), 0  ;;  %p50_p3 = por %p49_p2, %p48_p1 }
   0x7   : > { %s37_s18 = ssub.s32 %s1232_s15, %s1411_s17  ;;  %164 = sbr.rel (%p983_p5) target bundleno = 23 (0x17), region = 20 }
   0x8   : > { %p39_p4 = scmp.eq.s32.totalorder %s37_s18, 0 }
   0xa   : > { %s1295_s20 = scalar_select %p39_p4, %s1224_s13, %s41_s19  }
   0xe   : > { %167 = sbr.rel (!%p50_p3) target bundleno = 23 (0x17), region = 24  ;;  %s169_s21 = sand.u32 (%p50_p3), 1, %s1224_s13  }
   0xf   : > { %s1060_s22 = smul.u32 (%p50_p3), 12, %s1232_s15 }
  0x10   : > { %s1074_s23 = smul.u32 (%p50_p3), 48, %s169_s21 }
  0x11   : > { %s177_s26 = scalar_lea.vmem (%p50_p3), %s1402_s0, %s1060_s22 }
  0x12   : > { %v192_v0 = vld [vmem:[%s177_s26] sm:$0xff] (%p50_p3)  ;;  %v196_v2 = vld [vmem:[%s177_s26 + $0x48] sm:$0xff] (%p50_p3)  ;;  %s171_s27 = scalar_lea.vmem (%p50_p3), [#allocation3], %s1074_s23  ;;  %v989_v6 = vld [vmem:[%s177_s26 + $0x50] sm:$0xf] (%p50_p3) }
  0x13   : > { %v194_v1 = vld [vmem:[%s177_s26 + $0x24] sm:$0xff] (%p50_p3)  ;;  %193 = vst [vmem:[%s171_s27] sm:$0xff] (%p50_p3), %v192_v0  ;;  %197 = vst [vmem:[%s171_s27 + $0x18] sm:$0xff] (%p50_p3), %v196_v2  ;;  %v198_v3 = vld [vmem:[%s177_s26 + $0x6c] sm:$0xff] (%p50_p3) }
  0x14   : > { %195 = vst [vmem:[%s171_s27 + $0xc] sm:$0xff] (%p50_p3), %v194_v1  ;;  %v985_v4 = vld [vmem:[%s177_s26 + $0x8] sm:$0xf] (%p50_p3)  ;;  %v987_v5 = vld [vmem:[%s177_s26 + $0x2c] sm:$0xf] (%p50_p3)  ;;  %199 = vst [vmem:[%s171_s27 + $0x24] sm:$0xff] (%p50_p3), %v198_v3 }
  0x15   : > { %986 = vst [vmem:[%s171_s27 + $0x8] sm:$0xf] %v985_v4  ;;  %988 = vst [vmem:[%s171_s27 + $0x14] sm:$0xf] %v987_v5  ;;  %v991_v7 = vld [vmem:[%s177_s26 + $0x74] sm:$0xf] }
  0x16   : > { %990 = vst [vmem:[%s171_s27 + $0x20] sm:$0xf] %v989_v6  ;;  %992 = vst [vmem:[%s171_s27 + $0x2c] sm:$0xf] %v991_v7 }
  0x17 PF: > { %p993_p6 = scmp.ge.s32.totalorder %s1236_s16, 1  ;;  %p234_p7 = scmp.lt.s32.totalorder %s1236_s16, 4 }
  0x19   : > { %p235_p8 = pnand %p993_p6, %p234_p7 }
  0x1a   : > { %s241_s28 = sand.u32 (!%p235_p8), 1, %s1220_s12   ;;  %s285_s29 = smul.u32 (!%p235_p8), 48, %s1228_s14 }
  0x1b   : > { %238 = sbr.rel (%p235_p8) target bundleno = 348 (0x15c), region = 54  ;;  %p996_p10 = scmp.ne.s32.totalorder (!%p235_p8), %s1228_s14, 0 }
  0x1c   : > { %s1075_s30 = smul.u32 (!%p235_p8), 48, %s241_s28  ;;  %p287_p9 = scmp.lt.s32.totalorder (!%p235_p8), %s285_s29, 143 }
  0x1e   : > { %s1312_s8 = scalar_lea.vmem (!%p235_p8), [#allocation3], %s1075_s30 }
  0x22   : > { %s1413_s29 = smov (!%p287_p9, %s285_s29), 143  ;;  %318 = sbr.rel (%p996_p10) target bundleno = 41 (0x29), region = 62 }
  0x23   : > { %s1061_s4 = sshll.u32 %s1413_s29, 3  ;;  %v1238_v8 = vmov (!%p996_p10), 0.0  }
  0x24   : > { %s1310_s7 = scalar_lea.vmem %s1403_s1, %s1061_s4  ;;  %319 = vst [vmem:[#allocation2] sm:$0xff] (!%p996_p10), %v1238_v8  ;;  %320 = vst [vmem:[#allocation2 + $0x8] sm:$0xff] (!%p996_p10), %v1238_v8 }
  0x25   : > { %321 = vst [vmem:[#allocation2 + $0x10] sm:$0xff] (!%p996_p10), %v1238_v8  ;;  %322 = vst [vmem:[#allocation2 + $0x18] sm:$0xff] (!%p996_p10), %v1238_v8 }
  0x26   : > { %323 = vst [vmem:[#allocation2 + $0x20] sm:$0xff] (!%p996_p10), %v1238_v8  ;;  %324 = vst [vmem:[#allocation2 + $0x28] sm:$0xff] (!%p996_p10), %v1238_v8 }
  0x27   : > { %325 = vst [vmem:[#allocation2 + $0x30] sm:$0xff] (!%p996_p10), %v1238_v8  ;;  %326 = vst [vmem:[#allocation2 + $0x38] sm:$0xff] (!%p996_p10), %v1238_v8 }
  0x29 PF: > { %v1118_v9 = vld [vmem:[%s1310_s7 + $0x4] ss:$8 sps:$4 sm:$0xff]   ;;  %v1120_v10 = vld [vmem:[%s1310_s7] ss:$8 sps:$4 sm:$0xff]   ;;  %v1239_v11 = vmov 0   ;;  %p1051_p11 = scmp.ne.s32.totalorder %s1228_s14, 2 }
  0x2a   : > { %748 = vmatprep.mubr.bf16.mxu0 %v1239_v11  ;;  %663 = vmatprep.subr.bf16.mxu1 %v1118_v9  ;;  %v1121_v12 = vld [vmem:[%s1310_s7 + $0x14] ss:$8 sps:$4 sm:$0xff]   ;;  %v1123_v13 = vld [vmem:[%s1310_s7 + $0x10] ss:$8 sps:$4 sm:$0xff]   ;;  %v1124_v14 = vld [vmem:[%s1310_s7 + $0x24] ss:$8 sps:$4 sm:$0xff]  }
  0x2b   : > { %664 = vmatpush1.bf16.msra.mxu1 %v1120_v10  ;;  %v1126_v15 = vld [vmem:[%s1310_s7 + $0x20] ss:$8 sps:$4 sm:$0xff]   ;;  %v1127_v16 = vld [vmem:[%s1310_s7 + $0x34] ss:$8 sps:$4 sm:$0xff]   ;;  %v1129_v17 = vld [vmem:[%s1310_s7 + $0x30] ss:$8 sps:$4 sm:$0xff]  }
  0x2c   : > { %665 = vmatprep.subr.bf16.mxu1 %v1121_v12  ;;  %v1142_v18 = vld [vmem:[%s1310_s7 + $0x104] ss:$8 sps:$4 sm:$0xff]   ;;  %v1144_v19 = vld [vmem:[%s1310_s7 + $0x100] ss:$8 sps:$4 sm:$0xff]   ;;  %v1148_v21 = vld [vmem:[%s1310_s7 + $0x114] ss:$8 sps:$4 sm:$0xff]  }
  0x2d   : > { %v1130_v20 = vld [vmem:[%s1310_s7 + $0x44] ss:$8 sps:$4 sm:$0xff]   ;;  %716 = vmatprep.subr.bf16.mxu0 %v1142_v18  ;;  %v1150_v22 = vld [vmem:[%s1310_s7 + $0x110] ss:$8 sps:$4 sm:$0xff]   ;;  %v1132_v23 = vld [vmem:[%s1310_s7 + $0x40] ss:$8 sps:$4 sm:$0xff]  }
  0x2e   : > { %717 = vmatpush1.bf16.msra.mxu0 %v1144_v19  ;;  %v1133_v24 = vld [vmem:[%s1310_s7 + $0x54] ss:$8 sps:$4 sm:$0xff]   ;;  %v1154_v25 = vld [vmem:[%s1310_s7 + $0x124] ss:$8 sps:$4 sm:$0xff]   ;;  %v1156_v26 = vld [vmem:[%s1310_s7 + $0x120] ss:$8 sps:$4 sm:$0xff]  }
  0x2f   : > { %666 = vmatpush1.bf16.msra.mxu1 %v1123_v13  ;;  %718 = vmatprep.subr.bf16.mxu0 %v1148_v21  ;;  %v1135_v27 = vld [vmem:[%s1310_s7 + $0x50] ss:$8 sps:$4 sm:$0xff]   ;;  %v1160_v28 = vld [vmem:[%s1310_s7 + $0x134] ss:$8 sps:$4 sm:$0xff]   ;;  %v1136_v29 = vld [vmem:[%s1310_s7 + $0x64] ss:$8 sps:$4 sm:$0xff]  }
  0x30   : > { %667 = vmatprep.subr.bf16.mxu1 %v1124_v14  ;;  %v1162_v30 = vld [vmem:[%s1310_s7 + $0x130] ss:$8 sps:$4 sm:$0xff]   ;;  %v1138_v31 = vld [vmem:[%s1310_s7 + $0x60] ss:$8 sps:$4 sm:$0xff]   ;;  %v1166_v32 = vld [vmem:[%s1310_s7 + $0x144] ss:$8 sps:$4 sm:$0xff]  }
  0x31   : > { %v1139_v33 = vld [vmem:[%s1310_s7 + $0x74] ss:$8 sps:$4 sm:$0xff]   ;;  %v1168_v34 = vld [vmem:[%s1310_s7 + $0x140] ss:$8 sps:$4 sm:$0xff]   ;;  %v1141_v35 = vld [vmem:[%s1310_s7 + $0x70] ss:$8 sps:$4 sm:$0xff]  }
  0x32   : > { %719 = vmatpush1.bf16.msra.mxu0 %v1150_v22  ;;  %v1172_v36 = vld [vmem:[%s1310_s7 + $0x154] ss:$8 sps:$4 sm:$0xff]   ;;  %v1145_v37 = vld [vmem:[%s1310_s7 + $0x84] ss:$8 sps:$4 sm:$0xff]   ;;  %v1174_v38 = vld [vmem:[%s1310_s7 + $0x150] ss:$8 sps:$4 sm:$0xff]  }
  0x33   : > { %668 = vmatpush1.bf16.msra.mxu1 %v1126_v15  ;;  %720 = vmatprep.subr.bf16.mxu0 %v1154_v25  ;;  %v1147_v39 = vld [vmem:[%s1310_s7 + $0x80] ss:$8 sps:$4 sm:$0xff]   ;;  %v1178_v40 = vld [vmem:[%s1310_s7 + $0x164] ss:$8 sps:$4 sm:$0xff]   ;;  %v1151_v41 = vld [vmem:[%s1310_s7 + $0x94] ss:$8 sps:$4 sm:$0xff]  }
  0x34   : > { %669 = vmatprep.subr.bf16.mxu1 %v1127_v16  ;;  %v1153_v42 = vld [vmem:[%s1310_s7 + $0x90] ss:$8 sps:$4 sm:$0xff]   ;;  %v1180_v43 = vld [vmem:[%s1310_s7 + $0x160] ss:$8 sps:$4 sm:$0xff]   ;;  %v1184_v45 = vld [vmem:[%s1310_s7 + $0x174] ss:$8 sps:$4 sm:$0xff]  }
  0x35   : > { %v1193_v44 = vld [vmem:[%s1312_s8 + $0x4] ss:$12 sps:$4 sm:$0xff]   ;;  %v1190_v50 = vld [vmem:[%s1312_s8 + $0x8] ss:$12 sps:$4 sm:$0xff]   ;;  %v1194_v55 = vld [vmem:[%s1312_s8 + $0x20] ss:$12 sps:$4 sm:$0xff]  }
  0x36   : > { %721 = vmatpush1.bf16.msra.mxu0 %v1156_v26  ;;  %v1157_v46 = vld [vmem:[%s1310_s7 + $0xa4] ss:$8 sps:$4 sm:$0xff]   ;;  %695 = vmatprep.mubr.bf16.mxu1 %v1193_v44  ;;  %v1186_v47 = vld [vmem:[%s1310_s7 + $0x170] ss:$8 sps:$4 sm:$0xff]   ;;  %v1159_v48 = vld [vmem:[%s1310_s7 + $0xa0] ss:$8 sps:$4 sm:$0xff]  }
  0x37   : > { %670 = vmatpush1.bf16.msra.mxu1 %v1129_v17  ;;  %722 = vmatprep.subr.bf16.mxu0 %v1160_v28  ;;  %v1163_v49 = vld [vmem:[%s1310_s7 + $0xb4] ss:$8 sps:$4 sm:$0xff]   ;;  %v1165_v51 = vld [vmem:[%s1310_s7 + $0xb0] ss:$8 sps:$4 sm:$0xff]   ;;  %v1169_v52 = vld [vmem:[%s1310_s7 + $0xc4] ss:$8 sps:$4 sm:$0xff]  }
  0x38   : > { %671 = vmatprep.subr.bf16.mxu1 %v1130_v20  ;;  %v1171_v53 = vld [vmem:[%s1310_s7 + $0xc0] ss:$8 sps:$4 sm:$0xff]   ;;  %v1175_v54 = vld [vmem:[%s1310_s7 + $0xd4] ss:$8 sps:$4 sm:$0xff]   ;;  %v1177_v56 = vld [vmem:[%s1310_s7 + $0xd0] ss:$8 sps:$4 sm:$0xff]  }
  0x39   : > { %v1181_v57 = vld [vmem:[%s1310_s7 + $0xe4] ss:$8 sps:$4 sm:$0xff]   ;;  %v1183_v58 = vld [vmem:[%s1310_s7 + $0xe0] ss:$8 sps:$4 sm:$0xff]   ;;  %v1187_v59 = vld [vmem:[%s1310_s7 + $0xf4] ss:$8 sps:$4 sm:$0xff]  }
  0x3a   : > { %723 = vmatpush1.bf16.msra.mxu0 %v1162_v30  ;;  %v1189_v60 = vld [vmem:[%s1310_s7 + $0xf0] ss:$8 sps:$4 sm:$0xff]   ;;  %v327_v8 = vld [vmem:[#allocation2] sm:$0xff] }
  0x3b   : > { %672 = vmatpush1.bf16.msra.mxu1 %v1132_v23  ;;  %724 = vmatprep.subr.bf16.mxu0 %v1166_v32  ;;  %v1191_v61 = vld [vmem:[%s1312_s8] ss:$12 sps:$4 sm:$0xff]   ;;  %v1195_v62 = vld [vmem:[%s1312_s8 + $0x1c] ss:$12 sps:$4 sm:$0xff]   ;;  %v1197_v63 = vld [vmem:[%s1312_s8 + $0x18] ss:$12 sps:$4 sm:$0xff]  }
  0x3c   : > { %673 = vmatprep.subr.bf16.mxu1 %v1133_v24  ;;  %v329_v14 = vld [vmem:[#allocation2 + $0x10] sm:$0xff]  ;;  %v330_v18 = vld [vmem:[#allocation2 + $0x18] sm:$0xff]  ;;  %v331_v24 = vld [vmem:[#allocation2 + $0x20] sm:$0xff] }
  0x3d   : > { %v333_v30 = vld [vmem:[#allocation2 + $0x30] sm:$0xff] }
  0x3e   : > { %725 = vmatpush1.bf16.msra.mxu0 %v1168_v34  ;;  %v334_v34 = vld [vmem:[#allocation2 + $0x38] sm:$0xff] }
  0x3f   : > { %674 = vmatpush1.bf16.msra.mxu1 %v1135_v27  ;;  %726 = vmatprep.subr.bf16.mxu0 %v1172_v36  ;;  %v332_v27 = vld [vmem:[#allocation2 + $0x28] sm:$0xff] }
  0x40   : > { %675 = vmatprep.subr.bf16.mxu1 %v1136_v29 }
  0x42   : > { %727 = vmatpush1.bf16.msra.mxu0 %v1174_v38 }
  0x43   : > { %676 = vmatpush1.bf16.msra.mxu1 %v1138_v31  ;;  %728 = vmatprep.subr.bf16.mxu0 %v1178_v40  ;;  %v799_v40 = vlaneseq (!%p1051_p11) }
  0x44   : > { %677 = vmatprep.subr.bf16.mxu1 %v1139_v33 }
  0x46   : > { %729 = vmatpush1.bf16.msra.mxu0 %v1180_v43 }
  0x47   : > { %678 = vmatpush1.bf16.msra.mxu1 %v1141_v35  ;;  %730 = vmatprep.subr.bf16.mxu0 %v1184_v45 }
  0x48   : > { %679 = vmatprep.subr.bf16.mxu1 %v1145_v37 }
  0x4a   : > { %731 = vmatpush1.bf16.msra.mxu0 %v1186_v47 }
  0x4b   : > { %680 = vmatpush1.bf16.msra.mxu1 %v1147_v39 }
  0x4c   : > { %681 = vmatprep.subr.bf16.mxu1 %v1151_v41  ;;  %v800_v41 = vshrl.u32 (!%p1051_p11), %v799_v40, 7 }
  0x4d   : > { %749 = vmatmul.mubr.bf16.vlgmr.msra.gmra.mrb[0].mxu0 %v1190_v50 }
  0x4e   : > { %758 = vmatprep.mubr.bf16.mxu0 %v1239_v11  ;;  %v328_v11 = vld [vmem:[#allocation2 + $0x8] sm:$0xff]  ;;  %v801_v45 = vsub.s32 (!%p1051_p11), 0, %v800_v41 }
  0x4f   : > { %682 = vmatpush1.bf16.msra.mxu1 %v1153_v42  ;;  %v797_v42 = vld [vmem:[%s1404_s2] sm:$0x3] (!%p1051_p11) }
  0x50   : > { %683 = vmatprep.subr.bf16.mxu1 %v1157_v46  ;;  %v805_v46 = vsub.s32 (!%p1051_p11), 1, %v800_v41  ;;  %v802_v50 = vrot.slane (!%p1051_p11), %v797_v42, %v801_v45 }
  0x53   : > { %684 = vmatpush1.bf16.msra.mxu1 %v1159_v48 }
  0x54   : > { %685 = vmatprep.subr.bf16.mxu1 %v1163_v49 }
  0x55   : > { %759 = vmatmul.mubr.bf16.gmra.mrb[4].mxu0 %v1194_v55 }
  0x57   : > { %686 = vmatpush1.bf16.msra.mxu1 %v1165_v51  ;;  %v806_v51 = vrot.slane (!%p1051_p11), %v797_v42, %v805_v46 }
  0x58   : > { %687 = vmatprep.subr.bf16.mxu1 %v1169_v52 }
  0x5b   : > { %688 = vmatpush1.bf16.msra.mxu1 %v1171_v53 }
  0x5c   : > { %689 = vmatprep.subr.bf16.mxu1 %v1175_v54 }
  0x5f   : > { %690 = vmatpush1.bf16.msra.mxu1 %v1177_v56 }
  0x60   : > { %691 = vmatprep.subr.bf16.mxu1 %v1181_v57 }
  0x63   : > { %692 = vmatpush1.bf16.msra.mxu1 %v1183_v58 }
  0x64   : > { %693 = vmatprep.subr.bf16.mxu1 %v1187_v59 }
  0x67   : > { %694 = vmatpush1.bf16.msra.mxu1 %v1189_v60 }
  0x6a   : > { %696 = vmatmul.mubr.bf16.vlgmr.msra.gmra.mrb[0].mxu1 %v1191_v61 }
  0x6b   : > { %705 = vmatprep.mubr.bf16.mxu1 %v1195_v62 }
  0x72   : > { %706 = vmatmul.mubr.bf16.gmra.mrb[4].mxu1 %v1197_v63 }
 0x120   : > { %v750_v0 = vpop.f32.mrb[0].mxu0 }
 0x121   : > { %v752_v1 = vpop.f32.mrb[1].mxu0 }
 0x122   : > { %v754_v2 = vpop.f32.mrb[2].mxu0 }
 0x123   : > { %v756_v3 = vpop.f32.mrb[3].mxu0 }
 0x128   : > { %v760_v4 = vpop.f32.mrb[4].mxu0 }
 0x129   : > { %v762_v5 = vpop.f32.mrb[5].mxu0 }
 0x12a   : > { %v764_v6 = vpop.f32.mrb[6].mxu0 }
 0x12b   : > { %v766_v7 = vpop.f32.mrb[7].mxu0 }
 0x13d   : > { %v697_v9 = vpop.f32.mrb[0].mxu1 }
 0x13e   : > { %v751_v10 = vadd.f32 %v750_v0, %v697_v9  ;;  %v699_v12 = vpop.f32.mrb[1].mxu1 }
 0x13f   : > { %v753_v13 = vadd.f32 %v752_v1, %v699_v12  ;;  %v701_v15 = vpop.f32.mrb[2].mxu1 }
 0x140   : > { %v769_v16 = vadd.f32 %v751_v10, %v327_v8  ;;  %v755_v17 = vadd.f32 %v754_v2, %v701_v15  ;;  %v703_v19 = vpop.f32.mrb[3].mxu1 }
 0x141   : > { %v770_v20 = vadd.f32 %v753_v13, %v328_v11  ;;  %v757_v21 = vadd.f32 %v756_v3, %v703_v19 }
 0x142   : > { %777 = vst [vmem:[#allocation2] sm:$0xff] %v769_v16  ;;  %v771_v22 = vadd.f32 %v755_v17, %v329_v14 }
 0x143   : > { %778 = vst [vmem:[#allocation2 + $0x8] sm:$0xff] %v770_v20  ;;  %v772_v23 = vadd.f32 %v757_v21, %v330_v18 }
 0x144   : > { %779 = vst [vmem:[#allocation2 + $0x10] sm:$0xff] %v771_v22 }
 0x145   : > { %780 = vst [vmem:[#allocation2 + $0x18] sm:$0xff] %v772_v23  ;;  %v707_v25 = vpop.f32.mrb[4].mxu1 }
 0x146   : > { %v761_v26 = vadd.f32 %v760_v4, %v707_v25  ;;  %v709_v28 = vpop.f32.mrb[5].mxu1 }
 0x147   : > { %v763_v29 = vadd.f32 %v762_v5, %v709_v28  ;;  %v711_v31 = vpop.f32.mrb[6].mxu1  ;;  %788 = sbr.rel (%p1051_p11) target bundleno = 348 (0x15c), region = 66 }
 0x148   : > { %v773_v32 = vadd.f32 %v761_v26, %v331_v24  ;;  %v765_v33 = vadd.f32 %v764_v6, %v711_v31  ;;  %v713_v35 = vpop.f32.mrb[7].mxu1 }
 0x149   : > { %v774_v36 = vadd.f32 %v763_v29, %v332_v27  ;;  %v767_v37 = vadd.f32 %v766_v7, %v713_v35  ;;  %v789_v43 = vld [vmem:[#allocation2] sm:$0xff] (!%p1051_p11) }
 0x14a   : > { %781 = vst [vmem:[#allocation2 + $0x20] sm:$0xff] %v773_v32  ;;  %v775_v38 = vadd.f32 %v765_v33, %v333_v30  ;;  %v790_v44 = vld [vmem:[#allocation2 + $0x8] sm:$0xff] (!%p1051_p11)  ;;  %v809_v55 = vadd.f32 (!%p1051_p11), %v802_v50, %v789_v43 }
 0x14b   : > { %782 = vst [vmem:[#allocation2 + $0x28] sm:$0xff] %v774_v36  ;;  %v776_v39 = vadd.f32 %v767_v37, %v334_v34  ;;  %v791_v47 = vld [vmem:[#allocation2 + $0x10] sm:$0xff] (!%p1051_p11)  ;;  %v810_v56 = vadd.f32 (!%p1051_p11), %v806_v51, %v790_v44 }
 0x14c   : > { %783 = vst [vmem:[#allocation2 + $0x30] sm:$0xff] %v775_v38  ;;  %v792_v48 = vld [vmem:[#allocation2 + $0x18] sm:$0xff] (!%p1051_p11)  ;;  %v811_v57 = vadd.f32 (!%p1051_p11), %v802_v50, %v791_v47  ;;  %v817_v63 = vmax.f32 (!%p1051_p11), %v809_v55, 0.0 }
 0x14d   : > { %784 = vst [vmem:[#allocation2 + $0x38] sm:$0xff] %v776_v39  ;;  %v812_v58 = vadd.f32 (!%p1051_p11), %v806_v51, %v792_v48  ;;  %v818_v0 = vmax.f32 (!%p1051_p11), %v810_v56, 0.0 }
 0x14e   : > { %v819_v1 = vmax.f32 %v811_v57, 0.0 }
 0x14f   : > { %v820_v2 = vmax.f32 %v812_v58, 0.0  ;;  %v1062_v7 = vpack.c.bf16 %v818_v0, %v817_v63 }
 0x151   : > { %v793_v49 = vld [vmem:[#allocation2 + $0x20] sm:$0xff]  ;;  %v1063_v8 = vpack.c.bf16 %v820_v2, %v819_v1  ;;  %849 = vst [vmem:[%s1405_s3] sm:$0xff] %v1062_v7 }
 0x152   : > { %v794_v52 = vld [vmem:[#allocation2 + $0x28] sm:$0xff]  ;;  %v813_v59 = vadd.f32 %v802_v50, %v793_v49 }
 0x153   : > { %v795_v53 = vld [vmem:[#allocation2 + $0x30] sm:$0xff]  ;;  %v814_v60 = vadd.f32 %v806_v51, %v794_v52  ;;  %850 = vst [vmem:[%s1405_s3 + $0x8] sm:$0xff] %v1063_v8 }
 0x154   : > { %v796_v54 = vld [vmem:[#allocation2 + $0x38] sm:$0xff]  ;;  %v815_v61 = vadd.f32 %v802_v50, %v795_v53  ;;  %v821_v3 = vmax.f32 %v813_v59, 0.0 }
 0x155   : > { %v816_v62 = vadd.f32 %v806_v51, %v796_v54  ;;  %v822_v4 = vmax.f32 %v814_v60, 0.0 }
 0x156   : > { %v823_v5 = vmax.f32 %v815_v61, 0.0 }
 0x157   : > { %v824_v6 = vmax.f32 %v816_v62, 0.0  ;;  %v1064_v9 = vpack.c.bf16 %v822_v4, %v821_v3 }
 0x159   : > { %v1065_v10 = vpack.c.bf16 %v824_v6, %v823_v5  ;;  %851 = vst [vmem:[%s1405_s3 + $0x10] sm:$0xff] %v1064_v9 }
 0x15b   : > { %852 = vst [vmem:[%s1405_s3 + $0x18] sm:$0xff] %v1065_v10 }
 0x15c PF: > { %s13_s16 = sadd.s32 1, %s1236_s16   ;;  %s1406_s12 = smov %s1224_s13 }
 0x15d   : > { %p10_p12 = scmp.ge.s32.totalorder %s13_s16, 5   ;;  %s1407_s13 = smov %s1295_s20 }
 0x15e   : > { %s1408_s14 = smov %s1232_s15  ;;  %s1409_s15 = smov %s1411_s17 }
 0x15f   :  { %12 = sbr.rel (!%p10_p12) target bundleno = 3 (0x3), region = 113 }

// kernel: color_model_forward.32
= control target key start
LH: loop header
LB: loop body
LE: loop exit
PB: predicated region body
PF: predicated region fallthrough
CT: control target
= control target key end

     0   :  { %v348_v1 = vmov 0   ;;  %v229_v19 = vlaneseq  ;;  %s438_s1 = inlined_call_operand.vmem [shape: bf16[128,256], index: 1, kind: input, shape index: {}]   ;;  %s439_s0 = inlined_call_operand.vmem [shape: bf16[32,128], index: 0, kind: input, shape index: {}]   ;;  %s440_s2 = inlined_call_operand.vmem [shape: f32[1,256], index: 2, kind: input, shape index: {}]   ;;  %s441_s3 = inlined_call_operand.vmem [shape: bf16[32,256], index: 3, kind: output, shape index: {}]  }
   0x1   :  { %v322_v0 = vld [vmem:[%s438_s1 + $0x4] ss:$8 sps:$4 sm:$0xff]   ;;  %179 = vmatprep.mubr.bf16.mxu0 %v348_v1  ;;  %189 = vmatprep.mubr.bf16.mxu1 %v348_v1  ;;  %v324_v2 = vld [vmem:[%s438_s1] ss:$8 sps:$4 sm:$0xff]   ;;  %v325_v3 = vld [vmem:[%s438_s1 + $0x14] ss:$8 sps:$4 sm:$0xff]  }
   0x2   :  { %147 = vmatprep.subr.bf16.mxu0 %v322_v0  ;;  %305 = vmatprep.subr.bf16.mxu1 %v322_v0  ;;  %v327_v4 = vld [vmem:[%s438_s1 + $0x10] ss:$8 sps:$4 sm:$0xff]   ;;  %v328_v5 = vld [vmem:[%s438_s1 + $0x24] ss:$8 sps:$4 sm:$0xff]   ;;  %v330_v6 = vld [vmem:[%s438_s1 + $0x20] ss:$8 sps:$4 sm:$0xff]  }
   0x3   :  { %148 = vmatpush1.bf16.msra.mxu0 %v324_v2  ;;  %313 = vmatpush1.bf16.msra.mxu1 %v324_v2  ;;  %v331_v7 = vld [vmem:[%s438_s1 + $0x34] ss:$8 sps:$4 sm:$0xff]   ;;  %v333_v8 = vld [vmem:[%s438_s1 + $0x30] ss:$8 sps:$4 sm:$0xff]   ;;  %v334_v9 = vld [vmem:[%s438_s1 + $0x44] ss:$8 sps:$4 sm:$0xff]  }
   0x4   :  { %149 = vmatprep.subr.bf16.mxu0 %v325_v3  ;;  %306 = vmatprep.subr.bf16.mxu1 %v325_v3  ;;  %v336_v10 = vld [vmem:[%s438_s1 + $0x40] ss:$8 sps:$4 sm:$0xff]   ;;  %v337_v11 = vld [vmem:[%s438_s1 + $0x54] ss:$8 sps:$4 sm:$0xff]   ;;  %v339_v12 = vld [vmem:[%s438_s1 + $0x50] ss:$8 sps:$4 sm:$0xff]  }
   0x5   :  { %v340_v13 = vld [vmem:[%s438_s1 + $0x64] ss:$8 sps:$4 sm:$0xff]   ;;  %v342_v14 = vld [vmem:[%s438_s1 + $0x60] ss:$8 sps:$4 sm:$0xff]   ;;  %v343_v15 = vld [vmem:[%s438_s1 + $0x74] ss:$8 sps:$4 sm:$0xff]  }
   0x6   :  { %v345_v16 = vld [vmem:[%s438_s1 + $0x70] ss:$8 sps:$4 sm:$0xff]   ;;  %v346_v17 = vld [vmem:[%s439_s0] sm:$0xff]   ;;  %v347_v18 = vld [vmem:[%s439_s0 + $0x8] sm:$0xff]   ;;  %v230_v20 = vshrl.u32 %v229_v19, 7 }
   0x7   :  { %150 = vmatpush1.bf16.msra.mxu0 %v327_v4  ;;  %314 = vmatpush1.bf16.msra.mxu1 %v327_v4  ;;  %v227_v22 = vld [vmem:[%s440_s2] sm:$0x3] }
   0x8   :  { %151 = vmatprep.subr.bf16.mxu0 %v328_v5  ;;  %307 = vmatprep.subr.bf16.mxu1 %v328_v5  ;;  %v231_v21 = vsub.s32 0, %v230_v20  ;;  %v235_v23 = vsub.s32 1, %v230_v20 }
   0xa   :  { %v232_v24 = vrot.slane %v227_v22, %v231_v21  ;;  %v236_v25 = vrot.slane %v227_v22, %v235_v23 }
   0xb   :  { %152 = vmatpush1.bf16.msra.mxu0 %v330_v6  ;;  %315 = vmatpush1.bf16.msra.mxu1 %v330_v6 }
   0xc   :  { %153 = vmatprep.subr.bf16.mxu0 %v331_v7  ;;  %308 = vmatprep.subr.bf16.mxu1 %v331_v7 }
   0xf   :  { %154 = vmatpush1.bf16.msra.mxu0 %v333_v8  ;;  %316 = vmatpush1.bf16.msra.mxu1 %v333_v8 }
  0x10   :  { %155 = vmatprep.subr.bf16.mxu0 %v334_v9  ;;  %309 = vmatprep.subr.bf16.mxu1 %v334_v9 }
  0x13   :  { %156 = vmatpush1.bf16.msra.mxu0 %v336_v10  ;;  %317 = vmatpush1.bf16.msra.mxu1 %v336_v10 }
  0x14   :  { %157 = vmatprep.subr.bf16.mxu0 %v337_v11  ;;  %310 = vmatprep.subr.bf16.mxu1 %v337_v11 }
  0x17   :  { %158 = vmatpush1.bf16.msra.mxu0 %v339_v12  ;;  %318 = vmatpush1.bf16.msra.mxu1 %v339_v12 }
  0x18   :  { %159 = vmatprep.subr.bf16.mxu0 %v340_v13  ;;  %311 = vmatprep.subr.bf16.mxu1 %v340_v13 }
  0x1b   :  { %160 = vmatpush1.bf16.msra.mxu0 %v342_v14  ;;  %319 = vmatpush1.bf16.msra.mxu1 %v342_v14 }
  0x1c   :  { %161 = vmatprep.subr.bf16.mxu0 %v343_v15  ;;  %312 = vmatprep.subr.bf16.mxu1 %v343_v15 }
  0x1f   :  { %162 = vmatpush1.bf16.msra.mxu0 %v345_v16  ;;  %320 = vmatpush1.bf16.msra.mxu1 %v345_v16 }
  0x22   :  { %180 = vmatmul.mubr.bf16.vlgmr.msra.gmra.mrb[0].mxu0 %v346_v17  ;;  %190 = vmatmul.mubr.bf16.vlgmr.msra.gmra.mrb[0].mxu1 %v347_v18 }
  0xf5   :  { %v181_v26 = vpop.f32.mrb[0].mxu0  ;;  %v191_v27 = vpop.f32.mrb[0].mxu1 }
  0xf6   :  { %v239_v28 = vadd.f32 %v232_v24, %v181_v26  ;;  %v243_v29 = vadd.f32 %v232_v24, %v191_v27  ;;  %v183_v30 = vpop.f32.mrb[1].mxu0  ;;  %v193_v31 = vpop.f32.mrb[1].mxu1 }
  0xf7   :  { %v240_v32 = vadd.f32 %v236_v25, %v183_v30  ;;  %v244_v33 = vadd.f32 %v236_v25, %v193_v31  ;;  %v185_v34 = vpop.f32.mrb[2].mxu0  ;;  %v195_v35 = vpop.f32.mrb[2].mxu1 }
  0xf8   :  { %v241_v36 = vadd.f32 %v232_v24, %v185_v34  ;;  %v245_v37 = vadd.f32 %v232_v24, %v195_v35  ;;  %v187_v38 = vpop.f32.mrb[3].mxu0  ;;  %v197_v39 = vpop.f32.mrb[3].mxu1 }
  0xf9   :  { %v301_v40 = vpack.c.bf16 %v240_v32, %v239_v28  ;;  %v303_v41 = vpack.c.bf16 %v244_v33, %v243_v29  ;;  %v242_v42 = vadd.f32 %v236_v25, %v187_v38  ;;  %v246_v43 = vadd.f32 %v236_v25, %v197_v39 }
  0xfb   :  { %271 = vst [vmem:[%s441_s3] sm:$0xff] %v301_v40  ;;  %273 = vst [vmem:[%s441_s3 + $0x10] sm:$0xff] %v303_v41  ;;  %v302_v44 = vpack.c.bf16 %v242_v42, %v241_v36  ;;  %v304_v45 = vpack.c.bf16 %v246_v43, %v245_v37 }
  0xfd   :  { %272 = vst [vmem:[%s441_s3 + $0x8] sm:$0xff] %v302_v44  ;;  %274 = vst [vmem:[%s441_s3 + $0x18] sm:$0xff] %v304_v45 }

// kernel: color_model_forward.33
= control target key start
LH: loop header
LB: loop body
LE: loop exit
PB: predicated region body
PF: predicated region fallthrough
CT: control target
= control target key end

     0   :  { %s1375_s15 = smov 0   ;;  %s1377_s16 = smov 0   ;;  %s1529_s0 = inlined_call_operand.vmem [shape: bf16[32,2304], index: 0, kind: input, shape index: {}]   ;;  %s1530_s1 = inlined_call_operand.vmem [shape: bf16[2304,256], index: 1, kind: input, shape index: {}]   ;;  %s1531_s2 = inlined_call_operand.vmem [shape: f32[1,256], index: 2, kind: input, shape index: {}]   ;;  %s1532_s3 = inlined_call_operand.vmem [shape: bf16[32,256], index: 3, kind: input, shape index: {}]   ;;  %s1533_s4 = inlined_call_operand.vmem [shape: bf16[32,256], index: 4, kind: output, shape index: {}]  }
   0x1   :  { %s1379_s17 = smov 0   ;;  %s1381_s18 = smov 0  }
   0x2   :  { %s1383_s19 = smov 0  }
   0x3 LB: > { %s26_s20 = sadd.s32 1, %s1342_s18  ;;  %p49_p1 = scmp.ne.s32.totalorder %s1334_s16, %s1330_s15  ;;  %s1346_s19 = sphi %s1383_s19, %s14_s19   ;;  %s1342_s18 = sphi %s1381_s18, %s1537_s18   ;;  %s1338_s17 = sphi %s1379_s17, %s1536_s17   ;;  %s1334_s16 = sphi %s1377_s16, %s1535_s16   ;;  %s1330_s15 = sphi %s1375_s15, %s1534_s15  }
   0x4   : > { %p27_p0 = scmp.ge.s32.totalorder %s26_s20, 6  ;;  %p50_p2 = scmp.eq.s32.totalorder %s1346_s19, 0 }
   0x5   : > { %s42_s22 = sadd.s32 1, %s1334_s16  ;;  %p1093_p5 = scmp.ge.s32.totalorder %s1346_s19, 6 }
   0x6   : > { %s1539_s20 = smov (%p27_p0, %s26_s20), 0  ;;  %p51_p3 = por %p50_p2, %p49_p1 }
   0x7   : > { %s38_s21 = ssub.s32 %s1342_s18, %s1539_s20  ;;  %208 = sbr.rel (%p1093_p5) target bundleno = 23 (0x17), region = 24 }
   0x8   : > { %p40_p4 = scmp.eq.s32.totalorder %s38_s21, 0 }
   0xa   : > { %s1410_s23 = scalar_select %p40_p4, %s1334_s16, %s42_s22  }
   0xe   : > { %211 = sbr.rel (!%p51_p3) target bundleno = 23 (0x17), region = 28  ;;  %s213_s24 = sand.u32 (%p51_p3), 1, %s1334_s16  }
   0xf   : > { %s1170_s25 = smul.u32 (%p51_p3), 12, %s1342_s18 }
  0x10   : > { %s1184_s26 = smul.u32 (%p51_p3), 48, %s213_s24 }
  0x11   : > { %s221_s29 = scalar_lea.vmem (%p51_p3), %s1529_s0, %s1170_s25 }
  0x12   : > { %v236_v0 = vld [vmem:[%s221_s29] sm:$0xff] (%p51_p3)  ;;  %v238_v1 = vld [vmem:[%s221_s29 + $0x48] sm:$0xff] (%p51_p3)  ;;  %v240_v2 = vld [vmem:[%s221_s29 + $0x90] sm:$0xff] (%p51_p3)  ;;  %s215_s30 = scalar_lea.vmem (%p51_p3), [#allocation3], %s1184_s26 }
  0x13   : > { %237 = vst [vmem:[%s215_s30] sm:$0xff] (%p51_p3), %v236_v0  ;;  %239 = vst [vmem:[%s215_s30 + $0xc] sm:$0xff] (%p51_p3), %v238_v1  ;;  %v242_v3 = vld [vmem:[%s221_s29 + $0xd8] sm:$0xff] (%p51_p3)  ;;  %v1095_v4 = vld [vmem:[%s221_s29 + $0x8] sm:$0xf] (%p51_p3) }
  0x14   : > { %241 = vst [vmem:[%s215_s30 + $0x18] sm:$0xff] (%p51_p3), %v240_v2  ;;  %v1097_v5 = vld [vmem:[%s221_s29 + $0x50] sm:$0xf] (%p51_p3)  ;;  %243 = vst [vmem:[%s215_s30 + $0x24] sm:$0xff] (%p51_p3), %v242_v3  ;;  %v1099_v6 = vld [vmem:[%s221_s29 + $0x98] sm:$0xf] (%p51_p3) }
  0x15   : > { %1096 = vst [vmem:[%s215_s30 + $0x8] sm:$0xf] %v1095_v4  ;;  %1098 = vst [vmem:[%s215_s30 + $0x14] sm:$0xf] %v1097_v5  ;;  %v1101_v7 = vld [vmem:[%s221_s29 + $0xe0] sm:$0xf] }
  0x16   : > { %1100 = vst [vmem:[%s215_s30 + $0x20] sm:$0xf] %v1099_v6  ;;  %1102 = vst [vmem:[%s215_s30 + $0x2c] sm:$0xf] %v1101_v7 }
  0x17 PF: > { %p1103_p6 = scmp.ge.s32.totalorder %s1346_s19, 1  ;;  %p278_p7 = scmp.lt.s32.totalorder %s1346_s19, 7 }
  0x19   : > { %p279_p8 = pnand %p1103_p6, %p278_p7 }
  0x1a   : > { %s285_s5 = sand.u32 (!%p279_p8), 1, %s1330_s15   ;;  %s341_s6 = smul.u32 (!%p279_p8), 48, %s1338_s17 }
  0x1b   : > { %282 = sbr.rel (%p279_p8) target bundleno = 350 (0x15e), region = 58  ;;  %p1106_p10 = scmp.ne.s32.totalorder (!%p279_p8), %s1338_s17, 0 }
  0x1c   : > { %s1185_s7 = smul.u32 (!%p279_p8), 48, %s285_s5  ;;  %p343_p9 = scmp.lt.s32.totalorder (!%p279_p8), %s341_s6, 287 }
  0x1e   : > { %s1427_s12 = scalar_lea.vmem (!%p279_p8), [#allocation3], %s1185_s7 }
  0x22   : > { %s1541_s6 = smov (!%p343_p9, %s341_s6), 287  ;;  %386 = sbr.rel (%p1106_p10) target bundleno = 41 (0x29), region = 66 }
  0x23   : > { %s1171_s8 = sshll.u32 %s1541_s6, 3  ;;  %v1348_v8 = vmov (!%p1106_p10), 0.0  }
  0x24   : > { %s1425_s11 = scalar_lea.vmem %s1530_s1, %s1171_s8  ;;  %387 = vst [vmem:[#allocation2] sm:$0xff] (!%p1106_p10), %v1348_v8  ;;  %388 = vst [vmem:[#allocation2 + $0x8] sm:$0xff] (!%p1106_p10), %v1348_v8 }
  0x25   : > { %389 = vst [vmem:[#allocation2 + $0x10] sm:$0xff] (!%p1106_p10), %v1348_v8  ;;  %390 = vst [vmem:[#allocation2 + $0x18] sm:$0xff] (!%p1106_p10), %v1348_v8 }
  0x26   : > { %391 = vst [vmem:[#allocation2 + $0x20] sm:$0xff] (!%p1106_p10), %v1348_v8  ;;  %392 = vst [vmem:[#allocation2 + $0x28] sm:$0xff] (!%p1106_p10), %v1348_v8 }
  0x27   : > { %393 = vst [vmem:[#allocation2 + $0x30] sm:$0xff] (!%p1106_p10), %v1348_v8  ;;  %394 = vst [vmem:[#allocation2 + $0x38] sm:$0xff] (!%p1106_p10), %v1348_v8 }
  0x29 PF: > { %v1228_v9 = vld [vmem:[%s1425_s11 + $0x4] ss:$8 sps:$4 sm:$0xff]   ;;  %v1230_v10 = vld [vmem:[%s1425_s11] ss:$8 sps:$4 sm:$0xff]   ;;  %v1349_v11 = vmov 0   ;;  %p1161_p11 = scmp.ne.s32.totalorder %s1338_s17, 5 }
  0x2a   : > { %816 = vmatprep.mubr.bf16.mxu0 %v1349_v11  ;;  %731 = vmatprep.subr.bf16.mxu1 %v1228_v9  ;;  %v1231_v12 = vld [vmem:[%s1425_s11 + $0x14] ss:$8 sps:$4 sm:$0xff]   ;;  %v1233_v13 = vld [vmem:[%s1425_s11 + $0x10] ss:$8 sps:$4 sm:$0xff]   ;;  %v1234_v14 = vld [vmem:[%s1425_s11 + $0x24] ss:$8 sps:$4 sm:$0xff]  }
  0x2b   : > { %732 = vmatpush1.bf16.msra.mxu1 %v1230_v10  ;;  %v1236_v15 = vld [vmem:[%s1425_s11 + $0x20] ss:$8 sps:$4 sm:$0xff]   ;;  %v1237_v16 = vld [vmem:[%s1425_s11 + $0x34] ss:$8 sps:$4 sm:$0xff]   ;;  %v1239_v17 = vld [vmem:[%s1425_s11 + $0x30] ss:$8 sps:$4 sm:$0xff]  }
  0x2c   : > { %733 = vmatprep.subr.bf16.mxu1 %v1231_v12  ;;  %v1252_v18 = vld [vmem:[%s1425_s11 + $0x104] ss:$8 sps:$4 sm:$0xff]   ;;  %v1254_v19 = vld [vmem:[%s1425_s11 + $0x100] ss:$8 sps:$4 sm:$0xff]   ;;  %v1258_v21 = vld [vmem:[%s1425_s11 + $0x114] ss:$8 sps:$4 sm:$0xff]  }
  0x2d   : > { %v1240_v20 = vld [vmem:[%s1425_s11 + $0x44] ss:$8 sps:$4 sm:$0xff]   ;;  %784 = vmatprep.subr.bf16.mxu0 %v1252_v18  ;;  %v1260_v22 = vld [vmem:[%s1425_s11 + $0x110] ss:$8 sps:$4 sm:$0xff]   ;;  %v1242_v23 = vld [vmem:[%s1425_s11 + $0x40] ss:$8 sps:$4 sm:$0xff]  }
  0x2e   : > { %785 = vmatpush1.bf16.msra.mxu0 %v1254_v19  ;;  %v1243_v24 = vld [vmem:[%s1425_s11 + $0x54] ss:$8 sps:$4 sm:$0xff]   ;;  %v1264_v25 = vld [vmem:[%s1425_s11 + $0x124] ss:$8 sps:$4 sm:$0xff]   ;;  %v1266_v26 = vld [vmem:[%s1425_s11 + $0x120] ss:$8 sps:$4 sm:$0xff]  }
  0x2f   : > { %734 = vmatpush1.bf16.msra.mxu1 %v1233_v13  ;;  %786 = vmatprep.subr.bf16.mxu0 %v1258_v21  ;;  %v1245_v27 = vld [vmem:[%s1425_s11 + $0x50] ss:$8 sps:$4 sm:$0xff]   ;;  %v1270_v28 = vld [vmem:[%s1425_s11 + $0x134] ss:$8 sps:$4 sm:$0xff]   ;;  %v1246_v29 = vld [vmem:[%s1425_s11 + $0x64] ss:$8 sps:$4 sm:$0xff]  }
  0x30   : > { %735 = vmatprep.subr.bf16.mxu1 %v1234_v14  ;;  %v1272_v30 = vld [vmem:[%s1425_s11 + $0x130] ss:$8 sps:$4 sm:$0xff]   ;;  %v1248_v31 = vld [vmem:[%s1425_s11 + $0x60] ss:$8 sps:$4 sm:$0xff]   ;;  %v1276_v32 = vld [vmem:[%s1425_s11 + $0x144] ss:$8 sps:$4 sm:$0xff]  }
  0x31   : > { %v1249_v33 = vld [vmem:[%s1425_s11 + $0x74] ss:$8 sps:$4 sm:$0xff]   ;;  %v1278_v34 = vld [vmem:[%s1425_s11 + $0x140] ss:$8 sps:$4 sm:$0xff]   ;;  %v1251_v35 = vld [vmem:[%s1425_s11 + $0x70] ss:$8 sps:$4 sm:$0xff]  }
  0x32   : > { %787 = vmatpush1.bf16.msra.mxu0 %v1260_v22  ;;  %v1282_v36 = vld [vmem:[%s1425_s11 + $0x154] ss:$8 sps:$4 sm:$0xff]   ;;  %v1255_v37 = vld [vmem:[%s1425_s11 + $0x84] ss:$8 sps:$4 sm:$0xff]   ;;  %v1284_v38 = vld [vmem:[%s1425_s11 + $0x150] ss:$8 sps:$4 sm:$0xff]  }
  0x33   : > { %736 = vmatpush1.bf16.msra.mxu1 %v1236_v15  ;;  %788 = vmatprep.subr.bf16.mxu0 %v1264_v25  ;;  %v1257_v39 = vld [vmem:[%s1425_s11 + $0x80] ss:$8 sps:$4 sm:$0xff]   ;;  %v1288_v40 = vld [vmem:[%s1425_s11 + $0x164] ss:$8 sps:$4 sm:$0xff]   ;;  %v1261_v41 = vld [vmem:[%s1425_s11 + $0x94] ss:$8 sps:$4 sm:$0xff]  }
  0x34   : > { %737 = vmatprep.subr.bf16.mxu1 %v1237_v16  ;;  %v1263_v42 = vld [vmem:[%s1425_s11 + $0x90] ss:$8 sps:$4 sm:$0xff]   ;;  %v1290_v43 = vld [vmem:[%s1425_s11 + $0x160] ss:$8 sps:$4 sm:$0xff]   ;;  %v1294_v45 = vld [vmem:[%s1425_s11 + $0x174] ss:$8 sps:$4 sm:$0xff]  }
  0x35   : > { %v1303_v44 = vld [vmem:[%s1427_s12 + $0x4] ss:$12 sps:$4 sm:$0xff]   ;;  %v1300_v50 = vld [vmem:[%s1427_s12 + $0x8] ss:$12 sps:$4 sm:$0xff]   ;;  %v1304_v55 = vld [vmem:[%s1427_s12 + $0x20] ss:$12 sps:$4 sm:$0xff]  }
  0x36   : > { %789 = vmatpush1.bf16.msra.mxu0 %v1266_v26  ;;  %v1267_v46 = vld [vmem:[%s1425_s11 + $0xa4] ss:$8 sps:$4 sm:$0xff]   ;;  %763 = vmatprep.mubr.bf16.mxu1 %v1303_v44  ;;  %v1296_v47 = vld [vmem:[%s1425_s11 + $0x170] ss:$8 sps:$4 sm:$0xff]   ;;  %v1269_v48 = vld [vmem:[%s1425_s11 + $0xa0] ss:$8 sps:$4 sm:$0xff]  }
  0x37   : > { %738 = vmatpush1.bf16.msra.mxu1 %v1239_v17  ;;  %790 = vmatprep.subr.bf16.mxu0 %v1270_v28  ;;  %v1273_v49 = vld [vmem:[%s1425_s11 + $0xb4] ss:$8 sps:$4 sm:$0xff]   ;;  %v1275_v51 = vld [vmem:[%s1425_s11 + $0xb0] ss:$8 sps:$4 sm:$0xff]   ;;  %v1279_v52 = vld [vmem:[%s1425_s11 + $0xc4] ss:$8 sps:$4 sm:$0xff]  }
  0x38   : > { %739 = vmatprep.subr.bf16.mxu1 %v1240_v20  ;;  %v1281_v53 = vld [vmem:[%s1425_s11 + $0xc0] ss:$8 sps:$4 sm:$0xff]   ;;  %v1285_v54 = vld [vmem:[%s1425_s11 + $0xd4] ss:$8 sps:$4 sm:$0xff]   ;;  %v1287_v56 = vld [vmem:[%s1425_s11 + $0xd0] ss:$8 sps:$4 sm:$0xff]  }
  0x39   : > { %v1291_v57 = vld [vmem:[%s1425_s11 + $0xe4] ss:$8 sps:$4 sm:$0xff]   ;;  %v1293_v58 = vld [vmem:[%s1425_s11 + $0xe0] ss:$8 sps:$4 sm:$0xff]   ;;  %v1297_v59 = vld [vmem:[%s1425_s11 + $0xf4] ss:$8 sps:$4 sm:$0xff]  }
  0x3a   : > { %791 = vmatpush1.bf16.msra.mxu0 %v1272_v30  ;;  %v1299_v60 = vld [vmem:[%s1425_s11 + $0xf0] ss:$8 sps:$4 sm:$0xff]   ;;  %v395_v8 = vld [vmem:[#allocation2] sm:$0xff] }
  0x3b   : > { %740 = vmatpush1.bf16.msra.mxu1 %v1242_v23  ;;  %792 = vmatprep.subr.bf16.mxu0 %v1276_v32  ;;  %v1301_v61 = vld [vmem:[%s1427_s12] ss:$12 sps:$4 sm:$0xff]   ;;  %v1305_v62 = vld [vmem:[%s1427_s12 + $0x1c] ss:$12 sps:$4 sm:$0xff]   ;;  %v1307_v63 = vld [vmem:[%s1427_s12 + $0x18] ss:$12 sps:$4 sm:$0xff]  }
  0x3c   : > { %741 = vmatprep.subr.bf16.mxu1 %v1243_v24  ;;  %v397_v14 = vld [vmem:[#allocation2 + $0x10] sm:$0xff]  ;;  %v398_v18 = vld [vmem:[#allocation2 + $0x18] sm:$0xff]  ;;  %v399_v24 = vld [vmem:[#allocation2 + $0x20] sm:$0xff] }
  0x3d   : > { %v401_v30 = vld [vmem:[#allocation2 + $0x30] sm:$0xff]  ;;  %v865_v44 = vld [vmem:[%s1531_s2] sm:$0x3] (!%p1161_p11) }
  0x3e   : > { %793 = vmatpush1.bf16.msra.mxu0 %v1278_v34  ;;  %v402_v34 = vld [vmem:[#allocation2 + $0x38] sm:$0xff] }
  0x3f   : > { %742 = vmatpush1.bf16.msra.mxu1 %v1245_v27  ;;  %794 = vmatprep.subr.bf16.mxu0 %v1282_v36  ;;  %v400_v27 = vld [vmem:[#allocation2 + $0x28] sm:$0xff] }
  0x40   : > { %743 = vmatprep.subr.bf16.mxu1 %v1246_v29 }
  0x42   : > { %795 = vmatpush1.bf16.msra.mxu0 %v1284_v38 }
  0x43   : > { %744 = vmatpush1.bf16.msra.mxu1 %v1248_v31  ;;  %796 = vmatprep.subr.bf16.mxu0 %v1288_v40  ;;  %v867_v40 = vlaneseq (!%p1161_p11) }
  0x44   : > { %745 = vmatprep.subr.bf16.mxu1 %v1249_v33 }
  0x46   : > { %797 = vmatpush1.bf16.msra.mxu0 %v1290_v43 }
  0x47   : > { %746 = vmatpush1.bf16.msra.mxu1 %v1251_v35  ;;  %798 = vmatprep.subr.bf16.mxu0 %v1294_v45  ;;  %v886_v45 = vld [vmem:[%s1532_s3 + $0x8] sm:$0xff] (!%p1161_p11) }
  0x48   : > { %747 = vmatprep.subr.bf16.mxu1 %v1255_v37 }
  0x4a   : > { %799 = vmatpush1.bf16.msra.mxu0 %v1296_v47 }
  0x4b   : > { %748 = vmatpush1.bf16.msra.mxu1 %v1257_v39 }
  0x4c   : > { %749 = vmatprep.subr.bf16.mxu1 %v1261_v41  ;;  %v868_v41 = vshrl.u32 (!%p1161_p11), %v867_v40, 7 }
  0x4d   : > { %817 = vmatmul.mubr.bf16.vlgmr.msra.gmra.mrb[0].mxu0 %v1300_v50  ;;  %v888_v50 = vld [vmem:[%s1532_s3 + $0x18] sm:$0xff] (!%p1161_p11) }
  0x4e   : > { %826 = vmatprep.mubr.bf16.mxu0 %v1349_v11  ;;  %v396_v11 = vld [vmem:[#allocation2 + $0x8] sm:$0xff]  ;;  %v869_v47 = vsub.s32 (!%p1161_p11), 0, %v868_v41 }
  0x4f   : > { %750 = vmatpush1.bf16.msra.mxu1 %v1263_v42  ;;  %v885_v42 = vld [vmem:[%s1532_s3] sm:$0xff] (!%p1161_p11) }
  0x50   : > { %751 = vmatprep.subr.bf16.mxu1 %v1267_v46 }
  0x53   : > { %752 = vmatpush1.bf16.msra.mxu1 %v1269_v48  ;;  %v873_v48 = vsub.s32 (!%p1161_p11), 1, %v868_v41 }
  0x54   : > { %753 = vmatprep.subr.bf16.mxu1 %v1273_v49  ;;  %v887_v49 = vld [vmem:[%s1532_s3 + $0x10] sm:$0xff] (!%p1161_p11) }
  0x55   : > { %827 = vmatmul.mubr.bf16.gmra.mrb[4].mxu0 %v1304_v55 }
  0x57   : > { %754 = vmatpush1.bf16.msra.mxu1 %v1275_v51  ;;  %v889_v51 = vunpack.c.l.bf16 (!%p1161_p11), %v885_v42 }
  0x58   : > { %755 = vmatprep.subr.bf16.mxu1 %v1279_v52  ;;  %v890_v52 = vunpack.c.h.bf16 (!%p1161_p11), %v885_v42 }
  0x5b   : > { %756 = vmatpush1.bf16.msra.mxu1 %v1281_v53 }
  0x5c   : > { %757 = vmatprep.subr.bf16.mxu1 %v1285_v54 }
  0x5f   : > { %758 = vmatpush1.bf16.msra.mxu1 %v1287_v56  ;;  %v870_v56 = vrot.slane (!%p1161_p11), %v865_v44, %v869_v47 }
  0x60   : > { %759 = vmatprep.subr.bf16.mxu1 %v1291_v57  ;;  %v874_v57 = vrot.slane (!%p1161_p11), %v865_v44, %v873_v48 }
  0x63   : > { %760 = vmatpush1.bf16.msra.mxu1 %v1293_v58  ;;  %v891_v58 = vunpack.c.l.bf16 (!%p1161_p11), %v886_v45 }
  0x64   : > { %761 = vmatprep.subr.bf16.mxu1 %v1297_v59  ;;  %v892_v59 = vunpack.c.h.bf16 (!%p1161_p11), %v886_v45 }
  0x67   : > { %762 = vmatpush1.bf16.msra.mxu1 %v1299_v60 }
  0x6a   : > { %764 = vmatmul.mubr.bf16.vlgmr.msra.gmra.mrb[0].mxu1 %v1301_v61 }
  0x6b   : > { %773 = vmatprep.mubr.bf16.mxu1 %v1305_v62 }
  0x72   : > { %774 = vmatmul.mubr.bf16.gmra.mrb[4].mxu1 %v1307_v63  ;;  %v893_v63 = vunpack.c.l.bf16 (!%p1161_p11), %v887_v49 }
 0x120   : > { %v818_v0 = vpop.f32.mrb[0].mxu0 }
 0x121   : > { %v820_v1 = vpop.f32.mrb[1].mxu0 }
 0x122   : > { %v822_v2 = vpop.f32.mrb[2].mxu0 }
 0x123   : > { %v824_v3 = vpop.f32.mrb[3].mxu0 }
 0x128   : > { %v828_v4 = vpop.f32.mrb[4].mxu0 }
 0x129   : > { %v830_v5 = vpop.f32.mrb[5].mxu0 }
 0x12a   : > { %v832_v6 = vpop.f32.mrb[6].mxu0 }
 0x12b   : > { %v834_v7 = vpop.f32.mrb[7].mxu0 }
 0x13d   : > { %v765_v9 = vpop.f32.mrb[0].mxu1 }
 0x13e   : > { %v819_v10 = vadd.f32 %v818_v0, %v765_v9  ;;  %v767_v12 = vpop.f32.mrb[1].mxu1  ;;  %v894_v0 = vunpack.c.h.bf16 (!%p1161_p11), %v887_v49 }
 0x13f   : > { %v821_v13 = vadd.f32 %v820_v1, %v767_v12  ;;  %v769_v15 = vpop.f32.mrb[2].mxu1  ;;  %v895_v1 = vunpack.c.l.bf16 (!%p1161_p11), %v888_v50 }
 0x140   : > { %v837_v16 = vadd.f32 %v819_v10, %v395_v8  ;;  %v823_v17 = vadd.f32 %v822_v2, %v769_v15  ;;  %v771_v19 = vpop.f32.mrb[3].mxu1  ;;  %v896_v2 = vunpack.c.h.bf16 (!%p1161_p11), %v888_v50 }
 0x141   : > { %v838_v20 = vadd.f32 %v821_v13, %v396_v11  ;;  %v825_v21 = vadd.f32 %v824_v3, %v771_v19 }
 0x142   : > { %845 = vst [vmem:[#allocation2] sm:$0xff] %v837_v16  ;;  %v839_v22 = vadd.f32 %v823_v17, %v397_v14 }
 0x143   : > { %846 = vst [vmem:[#allocation2 + $0x8] sm:$0xff] %v838_v20  ;;  %v840_v23 = vadd.f32 %v825_v21, %v398_v18 }
 0x144   : > { %847 = vst [vmem:[#allocation2 + $0x10] sm:$0xff] %v839_v22 }
 0x145   : > { %848 = vst [vmem:[#allocation2 + $0x18] sm:$0xff] %v840_v23  ;;  %v775_v25 = vpop.f32.mrb[4].mxu1 }
 0x146   : > { %v829_v26 = vadd.f32 %v828_v4, %v775_v25  ;;  %v777_v28 = vpop.f32.mrb[5].mxu1 }
 0x147   : > { %v831_v29 = vadd.f32 %v830_v5, %v777_v28  ;;  %v779_v31 = vpop.f32.mrb[6].mxu1  ;;  %856 = sbr.rel (%p1161_p11) target bundleno = 350 (0x15e), region = 70 }
 0x148   : > { %v841_v32 = vadd.f32 %v829_v26, %v399_v24  ;;  %v833_v33 = vadd.f32 %v832_v6, %v779_v31  ;;  %v781_v35 = vpop.f32.mrb[7].mxu1 }
 0x149   : > { %v842_v36 = vadd.f32 %v831_v29, %v400_v27  ;;  %v835_v37 = vadd.f32 %v834_v7, %v781_v35  ;;  %v857_v43 = vld [vmem:[#allocation2] sm:$0xff] (!%p1161_p11) }
 0x14a   : > { %849 = vst [vmem:[#allocation2 + $0x20] sm:$0xff] %v841_v32  ;;  %v843_v38 = vadd.f32 %v833_v33, %v401_v30  ;;  %v858_v46 = vld [vmem:[#allocation2 + $0x8] sm:$0xff] (!%p1161_p11)  ;;  %v877_v3 = vadd.f32 (!%p1161_p11), %v870_v56, %v857_v43 }
 0x14b   : > { %850 = vst [vmem:[#allocation2 + $0x28] sm:$0xff] %v842_v36  ;;  %v844_v39 = vadd.f32 %v835_v37, %v402_v34  ;;  %v859_v53 = vld [vmem:[#allocation2 + $0x10] sm:$0xff] (!%p1161_p11)  ;;  %v878_v4 = vadd.f32 (!%p1161_p11), %v874_v57, %v858_v46 }
 0x14c   : > { %851 = vst [vmem:[#allocation2 + $0x30] sm:$0xff] %v843_v38  ;;  %v860_v54 = vld [vmem:[#allocation2 + $0x18] sm:$0xff] (!%p1161_p11)  ;;  %v879_v5 = vadd.f32 (!%p1161_p11), %v870_v56, %v859_v53  ;;  %v897_v11 = vadd.f32 (!%p1161_p11), %v889_v51, %v877_v3 }
 0x14d   : > { %852 = vst [vmem:[#allocation2 + $0x38] sm:$0xff] %v844_v39  ;;  %v880_v6 = vadd.f32 (!%p1161_p11), %v874_v57, %v860_v54  ;;  %v898_v12 = vadd.f32 (!%p1161_p11), %v890_v52, %v878_v4 }
 0x14e   : > { %v899_v13 = vadd.f32 %v891_v58, %v879_v5  ;;  %v905_v19 = vmax.f32 %v897_v11, 0.0 }
 0x14f   : > { %v900_v14 = vadd.f32 %v892_v59, %v880_v6  ;;  %v906_v20 = vmax.f32 %v898_v12, 0.0 }
 0x150   : > { %v907_v21 = vmax.f32 %v899_v13, 0.0 }
 0x151   : > { %v861_v55 = vld [vmem:[#allocation2 + $0x20] sm:$0xff]  ;;  %v908_v22 = vmax.f32 %v900_v14, 0.0  ;;  %v1172_v27 = vpack.c.bf16 %v906_v20, %v905_v19 }
 0x152   : > { %v862_v60 = vld [vmem:[#allocation2 + $0x28] sm:$0xff]  ;;  %v881_v7 = vadd.f32 %v870_v56, %v861_v55 }
 0x153   : > { %v863_v61 = vld [vmem:[#allocation2 + $0x30] sm:$0xff]  ;;  %v882_v8 = vadd.f32 %v874_v57, %v862_v60  ;;  %v1173_v28 = vpack.c.bf16 %v908_v22, %v907_v21  ;;  %937 = vst [vmem:[%s1533_s4] sm:$0xff] %v1172_v27 }
 0x154   : > { %v864_v62 = vld [vmem:[#allocation2 + $0x38] sm:$0xff]  ;;  %v883_v9 = vadd.f32 %v870_v56, %v863_v61  ;;  %v901_v15 = vadd.f32 %v893_v63, %v881_v7 }
 0x155   : > { %v884_v10 = vadd.f32 %v874_v57, %v864_v62  ;;  %v902_v16 = vadd.f32 %v894_v0, %v882_v8  ;;  %938 = vst [vmem:[%s1533_s4 + $0x8] sm:$0xff] %v1173_v28 }
 0x156   : > { %v903_v17 = vadd.f32 %v895_v1, %v883_v9  ;;  %v909_v23 = vmax.f32 %v901_v15, 0.0 }
 0x157   : > { %v904_v18 = vadd.f32 %v896_v2, %v884_v10  ;;  %v910_v24 = vmax.f32 %v902_v16, 0.0 }
 0x158   : > { %v911_v25 = vmax.f32 %v903_v17, 0.0 }
 0x159   : > { %v912_v26 = vmax.f32 %v904_v18, 0.0  ;;  %v1174_v29 = vpack.c.bf16 %v910_v24, %v909_v23 }
 0x15b   : > { %v1175_v30 = vpack.c.bf16 %v912_v26, %v911_v25  ;;  %939 = vst [vmem:[%s1533_s4 + $0x10] sm:$0xff] %v1174_v29 }
 0x15d   : > { %940 = vst [vmem:[%s1533_s4 + $0x18] sm:$0xff] %v1175_v30 }
 0x15e PF: > { %s14_s19 = sadd.s32 1, %s1346_s19   ;;  %s1534_s15 = smov %s1334_s16 }
 0x15f   : > { %p11_p12 = scmp.ge.s32.totalorder %s14_s19, 8   ;;  %s1535_s16 = smov %s1410_s23 }
 0x160   : > { %s1536_s17 = smov %s1342_s18  ;;  %s1537_s18 = smov %s1539_s20 }
 0x161   :  { %13 = sbr.rel (!%p11_p12) target bundleno = 3 (0x3), region = 120 }

// kernel: color_model_forward.34
= control target key start
LH: loop header
LB: loop body
LE: loop exit
PB: predicated region body
PF: predicated region fallthrough
CT: control target
= control target key end

     0   :  { %s1260_s12 = smov 0   ;;  %s1262_s13 = smov 0   ;;  %s1402_s0 = inlined_call_operand.vmem [shape: bf16[32,2304], index: 0, kind: input, shape index: {}]   ;;  %s1403_s1 = inlined_call_operand.vmem [shape: bf16[2304,256], index: 1, kind: input, shape index: {}]   ;;  %s1404_s2 = inlined_call_operand.vmem [shape: f32[1,256], index: 2, kind: input, shape index: {}]   ;;  %s1405_s3 = inlined_call_operand.vmem [shape: bf16[32,256], index: 3, kind: output, shape index: {}]  }
   0x1   :  { %s1264_s14 = smov 0   ;;  %s1266_s15 = smov 0  }
   0x2   :  { %s1268_s16 = smov 0  }
   0x3 LB: > { %s25_s17 = sadd.s32 1, %s1232_s15  ;;  %p48_p1 = scmp.ne.s32.totalorder %s1224_s13, %s1220_s12  ;;  %s1236_s16 = sphi %s1268_s16, %s13_s16   ;;  %s1232_s15 = sphi %s1266_s15, %s1409_s15   ;;  %s1228_s14 = sphi %s1264_s14, %s1408_s14   ;;  %s1224_s13 = sphi %s1262_s13, %s1407_s13   ;;  %s1220_s12 = sphi %s1260_s12, %s1406_s12  }
   0x4   : > { %p26_p0 = scmp.ge.s32.totalorder %s25_s17, 6  ;;  %p49_p2 = scmp.eq.s32.totalorder %s1236_s16, 0 }
   0x5   : > { %s41_s19 = sadd.s32 1, %s1224_s13  ;;  %p983_p5 = scmp.ge.s32.totalorder %s1236_s16, 6 }
   0x6   : > { %s1411_s17 = smov (%p26_p0, %s25_s17), 0  ;;  %p50_p3 = por %p49_p2, %p48_p1 }
   0x7   : > { %s37_s18 = ssub.s32 %s1232_s15, %s1411_s17  ;;  %164 = sbr.rel (%p983_p5) target bundleno = 23 (0x17), region = 20 }
   0x8   : > { %p39_p4 = scmp.eq.s32.totalorder %s37_s18, 0 }
   0xa   : > { %s1295_s20 = scalar_select %p39_p4, %s1224_s13, %s41_s19  }
   0xe   : > { %167 = sbr.rel (!%p50_p3) target bundleno = 23 (0x17), region = 24  ;;  %s169_s21 = sand.u32 (%p50_p3), 1, %s1224_s13  }
   0xf   : > { %s1060_s22 = smul.u32 (%p50_p3), 12, %s1232_s15 }
  0x10   : > { %s1074_s23 = smul.u32 (%p50_p3), 48, %s169_s21 }
  0x11   : > { %s177_s26 = scalar_lea.vmem (%p50_p3), %s1402_s0, %s1060_s22 }
  0x12   : > { %v192_v0 = vld [vmem:[%s177_s26] sm:$0xff] (%p50_p3)  ;;  %v194_v1 = vld [vmem:[%s177_s26 + $0x48] sm:$0xff] (%p50_p3)  ;;  %v196_v2 = vld [vmem:[%s177_s26 + $0x90] sm:$0xff] (%p50_p3)  ;;  %s171_s27 = scalar_lea.vmem (%p50_p3), [#allocation3], %s1074_s23 }
  0x13   : > { %193 = vst [vmem:[%s171_s27] sm:$0xff] (%p50_p3), %v192_v0  ;;  %195 = vst [vmem:[%s171_s27 + $0xc] sm:$0xff] (%p50_p3), %v194_v1  ;;  %v198_v3 = vld [vmem:[%s177_s26 + $0xd8] sm:$0xff] (%p50_p3)  ;;  %v985_v4 = vld [vmem:[%s177_s26 + $0x8] sm:$0xf] (%p50_p3) }
  0x14   : > { %197 = vst [vmem:[%s171_s27 + $0x18] sm:$0xff] (%p50_p3), %v196_v2  ;;  %v987_v5 = vld [vmem:[%s177_s26 + $0x50] sm:$0xf] (%p50_p3)  ;;  %199 = vst [vmem:[%s171_s27 + $0x24] sm:$0xff] (%p50_p3), %v198_v3  ;;  %v989_v6 = vld [vmem:[%s177_s26 + $0x98] sm:$0xf] (%p50_p3) }
  0x15   : > { %986 = vst [vmem:[%s171_s27 + $0x8] sm:$0xf] %v985_v4  ;;  %988 = vst [vmem:[%s171_s27 + $0x14] sm:$0xf] %v987_v5  ;;  %v991_v7 = vld [vmem:[%s177_s26 + $0xe0] sm:$0xf] }
  0x16   : > { %990 = vst [vmem:[%s171_s27 + $0x20] sm:$0xf] %v989_v6  ;;  %992 = vst [vmem:[%s171_s27 + $0x2c] sm:$0xf] %v991_v7 }
  0x17 PF: > { %p993_p6 = scmp.ge.s32.totalorder %s1236_s16, 1  ;;  %p234_p7 = scmp.lt.s32.totalorder %s1236_s16, 7 }
  0x19   : > { %p235_p8 = pnand %p993_p6, %p234_p7 }
  0x1a   : > { %s241_s28 = sand.u32 (!%p235_p8), 1, %s1220_s12   ;;  %s285_s29 = smul.u32 (!%p235_p8), 48, %s1228_s14 }
  0x1b   : > { %238 = sbr.rel (%p235_p8) target bundleno = 348 (0x15c), region = 54  ;;  %p996_p10 = scmp.ne.s32.totalorder (!%p235_p8), %s1228_s14, 0 }
  0x1c   : > { %s1075_s30 = smul.u32 (!%p235_p8), 48, %s241_s28  ;;  %p287_p9 = scmp.lt.s32.totalorder (!%p235_p8), %s285_s29, 287 }
  0x1e   : > { %s1312_s8 = scalar_lea.vmem (!%p235_p8), [#allocation3], %s1075_s30 }
  0x22   : > { %s1413_s29 = smov (!%p287_p9, %s285_s29), 287  ;;  %318 = sbr.rel (%p996_p10) target bundleno = 41 (0x29), region = 62 }
  0x23   : > { %s1061_s4 = sshll.u32 %s1413_s29, 3  ;;  %v1238_v8 = vmov (!%p996_p10), 0.0  }
  0x24   : > { %s1310_s7 = scalar_lea.vmem %s1403_s1, %s1061_s4  ;;  %319 = vst [vmem:[#allocation2] sm:$0xff] (!%p996_p10), %v1238_v8  ;;  %320 = vst [vmem:[#allocation2 + $0x8] sm:$0xff] (!%p996_p10), %v1238_v8 }
  0x25   : > { %321 = vst [vmem:[#allocation2 + $0x10] sm:$0xff] (!%p996_p10), %v1238_v8  ;;  %322 = vst [vmem:[#allocation2 + $0x18] sm:$0xff] (!%p996_p10), %v1238_v8 }
  0x26   : > { %323 = vst [vmem:[#allocation2 + $0x20] sm:$0xff] (!%p996_p10), %v1238_v8  ;;  %324 = vst [vmem:[#allocation2 + $0x28] sm:$0xff] (!%p996_p10), %v1238_v8 }
  0x27   : > { %325 = vst [vmem:[#allocation2 + $0x30] sm:$0xff] (!%p996_p10), %v1238_v8  ;;  %326 = vst [vmem:[#allocation2 + $0x38] sm:$0xff] (!%p996_p10), %v1238_v8 }
  0x29 PF: > { %v1118_v9 = vld [vmem:[%s1310_s7 + $0x4] ss:$8 sps:$4 sm:$0xff]   ;;  %v1120_v10 = vld [vmem:[%s1310_s7] ss:$8 sps:$4 sm:$0xff]   ;;  %v1239_v11 = vmov 0   ;;  %p1051_p11 = scmp.ne.s32.totalorder %s1228_s14, 5 }
  0x2a   : > { %748 = vmatprep.mubr.bf16.mxu0 %v1239_v11  ;;  %663 = vmatprep.subr.bf16.mxu1 %v1118_v9  ;;  %v1121_v12 = vld [vmem:[%s1310_s7 + $0x14] ss:$8 sps:$4 sm:$0xff]   ;;  %v1123_v13 = vld [vmem:[%s1310_s7 + $0x10] ss:$8 sps:$4 sm:$0xff]   ;;  %v1124_v14 = vld [vmem:[%s1310_s7 + $0x24] ss:$8 sps:$4 sm:$0xff]  }
  0x2b   : > { %664 = vmatpush1.bf16.msra.mxu1 %v1120_v10  ;;  %v1126_v15 = vld [vmem:[%s1310_s7 + $0x20] ss:$8 sps:$4 sm:$0xff]   ;;  %v1127_v16 = vld [vmem:[%s1310_s7 + $0x34] ss:$8 sps:$4 sm:$0xff]   ;;  %v1129_v17 = vld [vmem:[%s1310_s7 + $0x30] ss:$8 sps:$4 sm:$0xff]  }
  0x2c   : > { %665 = vmatprep.subr.bf16.mxu1 %v1121_v12  ;;  %v1142_v18 = vld [vmem:[%s1310_s7 + $0x104] ss:$8 sps:$4 sm:$0xff]   ;;  %v1144_v19 = vld [vmem:[%s1310_s7 + $0x100] ss:$8 sps:$4 sm:$0xff]   ;;  %v1148_v21 = vld [vmem:[%s1310_s7 + $0x114] ss:$8 sps:$4 sm:$0xff]  }
  0x2d   : > { %v1130_v20 = vld [vmem:[%s1310_s7 + $0x44] ss:$8 sps:$4 sm:$0xff]   ;;  %716 = vmatprep.subr.bf16.mxu0 %v1142_v18  ;;  %v1150_v22 = vld [vmem:[%s1310_s7 + $0x110] ss:$8 sps:$4 sm:$0xff]   ;;  %v1132_v23 = vld [vmem:[%s1310_s7 + $0x40] ss:$8 sps:$4 sm:$0xff]  }
  0x2e   : > { %717 = vmatpush1.bf16.msra.mxu0 %v1144_v19  ;;  %v1133_v24 = vld [vmem:[%s1310_s7 + $0x54] ss:$8 sps:$4 sm:$0xff]   ;;  %v1154_v25 = vld [vmem:[%s1310_s7 + $0x124] ss:$8 sps:$4 sm:$0xff]   ;;  %v1156_v26 = vld [vmem:[%s1310_s7 + $0x120] ss:$8 sps:$4 sm:$0xff]  }
  0x2f   : > { %666 = vmatpush1.bf16.msra.mxu1 %v1123_v13  ;;  %718 = vmatprep.subr.bf16.mxu0 %v1148_v21  ;;  %v1135_v27 = vld [vmem:[%s1310_s7 + $0x50] ss:$8 sps:$4 sm:$0xff]   ;;  %v1160_v28 = vld [vmem:[%s1310_s7 + $0x134] ss:$8 sps:$4 sm:$0xff]   ;;  %v1136_v29 = vld [vmem:[%s1310_s7 + $0x64] ss:$8 sps:$4 sm:$0xff]  }
  0x30   : > { %667 = vmatprep.subr.bf16.mxu1 %v1124_v14  ;;  %v1162_v30 = vld [vmem:[%s1310_s7 + $0x130] ss:$8 sps:$4 sm:$0xff]   ;;  %v1138_v31 = vld [vmem:[%s1310_s7 + $0x60] ss:$8 sps:$4 sm:$0xff]   ;;  %v1166_v32 = vld [vmem:[%s1310_s7 + $0x144] ss:$8 sps:$4 sm:$0xff]  }
  0x31   : > { %v1139_v33 = vld [vmem:[%s1310_s7 + $0x74] ss:$8 sps:$4 sm:$0xff]   ;;  %v1168_v34 = vld [vmem:[%s1310_s7 + $0x140] ss:$8 sps:$4 sm:$0xff]   ;;  %v1141_v35 = vld [vmem:[%s1310_s7 + $0x70] ss:$8 sps:$4 sm:$0xff]  }
  0x32   : > { %719 = vmatpush1.bf16.msra.mxu0 %v1150_v22  ;;  %v1172_v36 = vld [vmem:[%s1310_s7 + $0x154] ss:$8 sps:$4 sm:$0xff]   ;;  %v1145_v37 = vld [vmem:[%s1310_s7 + $0x84] ss:$8 sps:$4 sm:$0xff]   ;;  %v1174_v38 = vld [vmem:[%s1310_s7 + $0x150] ss:$8 sps:$4 sm:$0xff]  }
  0x33   : > { %668 = vmatpush1.bf16.msra.mxu1 %v1126_v15  ;;  %720 = vmatprep.subr.bf16.mxu0 %v1154_v25  ;;  %v1147_v39 = vld [vmem:[%s1310_s7 + $0x80] ss:$8 sps:$4 sm:$0xff]   ;;  %v1178_v40 = vld [vmem:[%s1310_s7 + $0x164] ss:$8 sps:$4 sm:$0xff]   ;;  %v1151_v41 = vld [vmem:[%s1310_s7 + $0x94] ss:$8 sps:$4 sm:$0xff]  }
  0x34   : > { %669 = vmatprep.subr.bf16.mxu1 %v1127_v16  ;;  %v1153_v42 = vld [vmem:[%s1310_s7 + $0x90] ss:$8 sps:$4 sm:$0xff]   ;;  %v1180_v43 = vld [vmem:[%s1310_s7 + $0x160] ss:$8 sps:$4 sm:$0xff]   ;;  %v1184_v45 = vld [vmem:[%s1310_s7 + $0x174] ss:$8 sps:$4 sm:$0xff]  }
  0x35   : > { %v1193_v44 = vld [vmem:[%s1312_s8 + $0x4] ss:$12 sps:$4 sm:$0xff]   ;;  %v1190_v50 = vld [vmem:[%s1312_s8 + $0x8] ss:$12 sps:$4 sm:$0xff]   ;;  %v1194_v55 = vld [vmem:[%s1312_s8 + $0x20] ss:$12 sps:$4 sm:$0xff]  }
  0x36   : > { %721 = vmatpush1.bf16.msra.mxu0 %v1156_v26  ;;  %v1157_v46 = vld [vmem:[%s1310_s7 + $0xa4] ss:$8 sps:$4 sm:$0xff]   ;;  %695 = vmatprep.mubr.bf16.mxu1 %v1193_v44  ;;  %v1186_v47 = vld [vmem:[%s1310_s7 + $0x170] ss:$8 sps:$4 sm:$0xff]   ;;  %v1159_v48 = vld [vmem:[%s1310_s7 + $0xa0] ss:$8 sps:$4 sm:$0xff]  }
  0x37   : > { %670 = vmatpush1.bf16.msra.mxu1 %v1129_v17  ;;  %722 = vmatprep.subr.bf16.mxu0 %v1160_v28  ;;  %v1163_v49 = vld [vmem:[%s1310_s7 + $0xb4] ss:$8 sps:$4 sm:$0xff]   ;;  %v1165_v51 = vld [vmem:[%s1310_s7 + $0xb0] ss:$8 sps:$4 sm:$0xff]   ;;  %v1169_v52 = vld [vmem:[%s1310_s7 + $0xc4] ss:$8 sps:$4 sm:$0xff]  }
  0x38   : > { %671 = vmatprep.subr.bf16.mxu1 %v1130_v20  ;;  %v1171_v53 = vld [vmem:[%s1310_s7 + $0xc0] ss:$8 sps:$4 sm:$0xff]   ;;  %v1175_v54 = vld [vmem:[%s1310_s7 + $0xd4] ss:$8 sps:$4 sm:$0xff]   ;;  %v1177_v56 = vld [vmem:[%s1310_s7 + $0xd0] ss:$8 sps:$4 sm:$0xff]  }
  0x39   : > { %v1181_v57 = vld [vmem:[%s1310_s7 + $0xe4] ss:$8 sps:$4 sm:$0xff]   ;;  %v1183_v58 = vld [vmem:[%s1310_s7 + $0xe0] ss:$8 sps:$4 sm:$0xff]   ;;  %v1187_v59 = vld [vmem:[%s1310_s7 + $0xf4] ss:$8 sps:$4 sm:$0xff]  }
  0x3a   : > { %723 = vmatpush1.bf16.msra.mxu0 %v1162_v30  ;;  %v1189_v60 = vld [vmem:[%s1310_s7 + $0xf0] ss:$8 sps:$4 sm:$0xff]   ;;  %v327_v8 = vld [vmem:[#allocation2] sm:$0xff] }
  0x3b   : > { %672 = vmatpush1.bf16.msra.mxu1 %v1132_v23  ;;  %724 = vmatprep.subr.bf16.mxu0 %v1166_v32  ;;  %v1191_v61 = vld [vmem:[%s1312_s8] ss:$12 sps:$4 sm:$0xff]   ;;  %v1195_v62 = vld [vmem:[%s1312_s8 + $0x1c] ss:$12 sps:$4 sm:$0xff]   ;;  %v1197_v63 = vld [vmem:[%s1312_s8 + $0x18] ss:$12 sps:$4 sm:$0xff]  }
  0x3c   : > { %673 = vmatprep.subr.bf16.mxu1 %v1133_v24  ;;  %v329_v14 = vld [vmem:[#allocation2 + $0x10] sm:$0xff]  ;;  %v330_v18 = vld [vmem:[#allocation2 + $0x18] sm:$0xff]  ;;  %v331_v24 = vld [vmem:[#allocation2 + $0x20] sm:$0xff] }
  0x3d   : > { %v333_v30 = vld [vmem:[#allocation2 + $0x30] sm:$0xff] }
  0x3e   : > { %725 = vmatpush1.bf16.msra.mxu0 %v1168_v34  ;;  %v334_v34 = vld [vmem:[#allocation2 + $0x38] sm:$0xff] }
  0x3f   : > { %674 = vmatpush1.bf16.msra.mxu1 %v1135_v27  ;;  %726 = vmatprep.subr.bf16.mxu0 %v1172_v36  ;;  %v332_v27 = vld [vmem:[#allocation2 + $0x28] sm:$0xff] }
  0x40   : > { %675 = vmatprep.subr.bf16.mxu1 %v1136_v29 }
  0x42   : > { %727 = vmatpush1.bf16.msra.mxu0 %v1174_v38 }
  0x43   : > { %676 = vmatpush1.bf16.msra.mxu1 %v1138_v31  ;;  %728 = vmatprep.subr.bf16.mxu0 %v1178_v40  ;;  %v799_v40 = vlaneseq (!%p1051_p11) }
  0x44   : > { %677 = vmatprep.subr.bf16.mxu1 %v1139_v33 }
  0x46   : > { %729 = vmatpush1.bf16.msra.mxu0 %v1180_v43 }
  0x47   : > { %678 = vmatpush1.bf16.msra.mxu1 %v1141_v35  ;;  %730 = vmatprep.subr.bf16.mxu0 %v1184_v45 }
  0x48   : > { %679 = vmatprep.subr.bf16.mxu1 %v1145_v37 }
  0x4a   : > { %731 = vmatpush1.bf16.msra.mxu0 %v1186_v47 }
  0x4b   : > { %680 = vmatpush1.bf16.msra.mxu1 %v1147_v39 }
  0x4c   : > { %681 = vmatprep.subr.bf16.mxu1 %v1151_v41  ;;  %v800_v41 = vshrl.u32 (!%p1051_p11), %v799_v40, 7 }
  0x4d   : > { %749 = vmatmul.mubr.bf16.vlgmr.msra.gmra.mrb[0].mxu0 %v1190_v50 }
  0x4e   : > { %758 = vmatprep.mubr.bf16.mxu0 %v1239_v11  ;;  %v328_v11 = vld [vmem:[#allocation2 + $0x8] sm:$0xff]  ;;  %v801_v45 = vsub.s32 (!%p1051_p11), 0, %v800_v41 }
  0x4f   : > { %682 = vmatpush1.bf16.msra.mxu1 %v1153_v42  ;;  %v797_v42 = vld [vmem:[%s1404_s2] sm:$0x3] (!%p1051_p11) }
  0x50   : > { %683 = vmatprep.subr.bf16.mxu1 %v1157_v46  ;;  %v805_v46 = vsub.s32 (!%p1051_p11), 1, %v800_v41  ;;  %v802_v50 = vrot.slane (!%p1051_p11), %v797_v42, %v801_v45 }
  0x53   : > { %684 = vmatpush1.bf16.msra.mxu1 %v1159_v48 }
  0x54   : > { %685 = vmatprep.subr.bf16.mxu1 %v1163_v49 }
  0x55   : > { %759 = vmatmul.mubr.bf16.gmra.mrb[4].mxu0 %v1194_v55 }
  0x57   : > { %686 = vmatpush1.bf16.msra.mxu1 %v1165_v51  ;;  %v806_v51 = vrot.slane (!%p1051_p11), %v797_v42, %v805_v46 }
  0x58   : > { %687 = vmatprep.subr.bf16.mxu1 %v1169_v52 }
  0x5b   : > { %688 = vmatpush1.bf16.msra.mxu1 %v1171_v53 }
  0x5c   : > { %689 = vmatprep.subr.bf16.mxu1 %v1175_v54 }
  0x5f   : > { %690 = vmatpush1.bf16.msra.mxu1 %v1177_v56 }
  0x60   : > { %691 = vmatprep.subr.bf16.mxu1 %v1181_v57 }
  0x63   : > { %692 = vmatpush1.bf16.msra.mxu1 %v1183_v58 }
  0x64   : > { %693 = vmatprep.subr.bf16.mxu1 %v1187_v59 }
  0x67   : > { %694 = vmatpush1.bf16.msra.mxu1 %v1189_v60 }
  0x6a   : > { %696 = vmatmul.mubr.bf16.vlgmr.msra.gmra.mrb[0].mxu1 %v1191_v61 }
  0x6b   : > { %705 = vmatprep.mubr.bf16.mxu1 %v1195_v62 }
  0x72   : > { %706 = vmatmul.mubr.bf16.gmra.mrb[4].mxu1 %v1197_v63 }
 0x120   : > { %v750_v0 = vpop.f32.mrb[0].mxu0 }
 0x121   : > { %v752_v1 = vpop.f32.mrb[1].mxu0 }
 0x122   : > { %v754_v2 = vpop.f32.mrb[2].mxu0 }
 0x123   : > { %v756_v3 = vpop.f32.mrb[3].mxu0 }
 0x128   : > { %v760_v4 = vpop.f32.mrb[4].mxu0 }
 0x129   : > { %v762_v5 = vpop.f32.mrb[5].mxu0 }
 0x12a   : > { %v764_v6 = vpop.f32.mrb[6].mxu0 }
 0x12b   : > { %v766_v7 = vpop.f32.mrb[7].mxu0 }
 0x13d   : > { %v697_v9 = vpop.f32.mrb[0].mxu1 }
 0x13e   : > { %v751_v10 = vadd.f32 %v750_v0, %v697_v9  ;;  %v699_v12 = vpop.f32.mrb[1].mxu1 }
 0x13f   : > { %v753_v13 = vadd.f32 %v752_v1, %v699_v12  ;;  %v701_v15 = vpop.f32.mrb[2].mxu1 }
 0x140   : > { %v769_v16 = vadd.f32 %v751_v10, %v327_v8  ;;  %v755_v17 = vadd.f32 %v754_v2, %v701_v15  ;;  %v703_v19 = vpop.f32.mrb[3].mxu1 }
 0x141   : > { %v770_v20 = vadd.f32 %v753_v13, %v328_v11  ;;  %v757_v21 = vadd.f32 %v756_v3, %v703_v19 }
 0x142   : > { %777 = vst [vmem:[#allocation2] sm:$0xff] %v769_v16  ;;  %v771_v22 = vadd.f32 %v755_v17, %v329_v14 }
 0x143   : > { %778 = vst [vmem:[#allocation2 + $0x8] sm:$0xff] %v770_v20  ;;  %v772_v23 = vadd.f32 %v757_v21, %v330_v18 }
 0x144   : > { %779 = vst [vmem:[#allocation2 + $0x10] sm:$0xff] %v771_v22 }
 0x145   : > { %780 = vst [vmem:[#allocation2 + $0x18] sm:$0xff] %v772_v23  ;;  %v707_v25 = vpop.f32.mrb[4].mxu1 }
 0x146   : > { %v761_v26 = vadd.f32 %v760_v4, %v707_v25  ;;  %v709_v28 = vpop.f32.mrb[5].mxu1 }
 0x147   : > { %v763_v29 = vadd.f32 %v762_v5, %v709_v28  ;;  %v711_v31 = vpop.f32.mrb[6].mxu1  ;;  %788 = sbr.rel (%p1051_p11) target bundleno = 348 (0x15c), region = 66 }
 0x148   : > { %v773_v32 = vadd.f32 %v761_v26, %v331_v24  ;;  %v765_v33 = vadd.f32 %v764_v6, %v711_v31  ;;  %v713_v35 = vpop.f32.mrb[7].mxu1 }
 0x149   : > { %v774_v36 = vadd.f32 %v763_v29, %v332_v27  ;;  %v767_v37 = vadd.f32 %v766_v7, %v713_v35  ;;  %v789_v43 = vld [vmem:[#allocation2] sm:$0xff] (!%p1051_p11) }
 0x14a   : > { %781 = vst [vmem:[#allocation2 + $0x20] sm:$0xff] %v773_v32  ;;  %v775_v38 = vadd.f32 %v765_v33, %v333_v30  ;;  %v790_v44 = vld [vmem:[#allocation2 + $0x8] sm:$0xff] (!%p1051_p11)  ;;  %v809_v55 = vadd.f32 (!%p1051_p11), %v802_v50, %v789_v43 }
 0x14b   : > { %782 = vst [vmem:[#allocation2 + $0x28] sm:$0xff] %v774_v36  ;;  %v776_v39 = vadd.f32 %v767_v37, %v334_v34  ;;  %v791_v47 = vld [vmem:[#allocation2 + $0x10] sm:$0xff] (!%p1051_p11)  ;;  %v810_v56 = vadd.f32 (!%p1051_p11), %v806_v51, %v790_v44 }
 0x14c   : > { %783 = vst [vmem:[#allocation2 + $0x30] sm:$0xff] %v775_v38  ;;  %v792_v48 = vld [vmem:[#allocation2 + $0x18] sm:$0xff] (!%p1051_p11)  ;;  %v811_v57 = vadd.f32 (!%p1051_p11), %v802_v50, %v791_v47  ;;  %v817_v63 = vmax.f32 (!%p1051_p11), %v809_v55, 0.0 }
 0x14d   : > { %784 = vst [vmem:[#allocation2 + $0x38] sm:$0xff] %v776_v39  ;;  %v812_v58 = vadd.f32 (!%p1051_p11), %v806_v51, %v792_v48  ;;  %v818_v0 = vmax.f32 (!%p1051_p11), %v810_v56, 0.0 }
 0x14e   : > { %v819_v1 = vmax.f32 %v811_v57, 0.0 }
 0x14f   : > { %v820_v2 = vmax.f32 %v812_v58, 0.0  ;;  %v1062_v7 = vpack.c.bf16 %v818_v0, %v817_v63 }
 0x151   : > { %v793_v49 = vld [vmem:[#allocation2 + $0x20] sm:$0xff]  ;;  %v1063_v8 = vpack.c.bf16 %v820_v2, %v819_v1  ;;  %849 = vst [vmem:[%s1405_s3] sm:$0xff] %v1062_v7 }
 0x152   : > { %v794_v52 = vld [vmem:[#allocation2 + $0x28] sm:$0xff]  ;;  %v813_v59 = vadd.f32 %v802_v50, %v793_v49 }
 0x153   : > { %v795_v53 = vld [vmem:[#allocation2 + $0x30] sm:$0xff]  ;;  %v814_v60 = vadd.f32 %v806_v51, %v794_v52  ;;  %850 = vst [vmem:[%s1405_s3 + $0x8] sm:$0xff] %v1063_v8 }
 0x154   : > { %v796_v54 = vld [vmem:[#allocation2 + $0x38] sm:$0xff]  ;;  %v815_v61 = vadd.f32 %v802_v50, %v795_v53  ;;  %v821_v3 = vmax.f32 %v813_v59, 0.0 }
 0x155   : > { %v816_v62 = vadd.f32 %v806_v51, %v796_v54  ;;  %v822_v4 = vmax.f32 %v814_v60, 0.0 }
 0x156   : > { %v823_v5 = vmax.f32 %v815_v61, 0.0 }
 0x157   : > { %v824_v6 = vmax.f32 %v816_v62, 0.0  ;;  %v1064_v9 = vpack.c.bf16 %v822_v4, %v821_v3 }
 0x159   : > { %v1065_v10 = vpack.c.bf16 %v824_v6, %v823_v5  ;;  %851 = vst [vmem:[%s1405_s3 + $0x10] sm:$0xff] %v1064_v9 }
 0x15b   : > { %852 = vst [vmem:[%s1405_s3 + $0x18] sm:$0xff] %v1065_v10 }
 0x15c PF: > { %s13_s16 = sadd.s32 1, %s1236_s16   ;;  %s1406_s12 = smov %s1224_s13 }
 0x15d   : > { %p10_p12 = scmp.ge.s32.totalorder %s13_s16, 8   ;;  %s1407_s13 = smov %s1295_s20 }
 0x15e   : > { %s1408_s14 = smov %s1232_s15  ;;  %s1409_s15 = smov %s1411_s17 }
 0x15f   :  { %12 = sbr.rel (!%p10_p12) target bundleno = 3 (0x3), region = 113 }

// kernel: color_model_forward.36
= control target key start
LH: loop header
LB: loop body
LE: loop exit
PB: predicated region body
PF: predicated region fallthrough
CT: control target
= control target key end

     0   :  { %s1705_s12 = smov 0   ;;  %s1707_s13 = smov 0   ;;  %s1890_s0 = inlined_call_operand.vmem [shape: bf16[16,2304], index: 0, kind: input, shape index: {}]   ;;  %s1891_s1 = inlined_call_operand.vmem [shape: bf16[2304,512], index: 1, kind: input, shape index: {}]   ;;  %s1892_s2 = inlined_call_operand.vmem [shape: f32[1,512], index: 2, kind: input, shape index: {}]   ;;  %s1893_s3 = inlined_call_operand.vmem [shape: bf16[16,512], index: 3, kind: output, shape index: {}]  }
   0x1   :  { %s1709_s14 = smov 0   ;;  %s1711_s15 = smov 0  }
   0x2   :  { %s1713_s16 = smov 0  }
   0x3 LB: > { %s25_s17 = sadd.s32 1, %s1677_s15  ;;  %p48_p1 = scmp.ne.s32.totalorder %s1669_s13, %s1665_s12  ;;  %s1681_s16 = sphi %s1713_s16, %s13_s16   ;;  %s1677_s15 = sphi %s1711_s15, %s1897_s15   ;;  %s1673_s14 = sphi %s1709_s14, %s1896_s14   ;;  %s1669_s13 = sphi %s1707_s13, %s1895_s13   ;;  %s1665_s12 = sphi %s1705_s12, %s1894_s12  }
   0x4   : > { %p26_p0 = scmp.ge.s32.totalorder %s25_s17, 6  ;;  %p49_p2 = scmp.eq.s32.totalorder %s1681_s16, 0 }
   0x5   : > { %s41_s19 = sadd.s32 1, %s1669_s13  ;;  %p1319_p5 = scmp.ge.s32.totalorder %s1681_s16, 6 }
   0x6   : > { %s1899_s17 = smov (%p26_p0, %s25_s17), 0  ;;  %p50_p3 = por %p49_p2, %p48_p1 }
   0x7   : > { %s37_s18 = ssub.s32 %s1677_s15, %s1899_s17  ;;  %164 = sbr.rel (%p1319_p5) target bundleno = 21 (0x15), region = 20 }
   0x8   : > { %p39_p4 = scmp.eq.s32.totalorder %s37_s18, 0 }
   0xa   : > { %s1740_s20 = scalar_select %p39_p4, %s1669_s13, %s41_s19  }
   0xe   : > { %167 = sbr.rel (!%p50_p3) target bundleno = 21 (0x15), region = 24  ;;  %s169_s21 = sand.u32 (%p50_p3), 1, %s1669_s13  }
   0xf   : > { %s1437_s22 = smul.u32 (%p50_p3), 12, %s1677_s15 }
  0x10   : > { %s1451_s23 = smul.u32 (%p50_p3), 24, %s169_s21 }
  0x11   : > { %s177_s26 = scalar_lea.vmem (%p50_p3), %s1890_s0, %s1437_s22 }
  0x12   : > { %v192_v0 = vld [vmem:[%s177_s26] sm:$0xff] (%p50_p3)  ;;  %v194_v1 = vld [vmem:[%s177_s26 + $0x48] sm:$0xff] (%p50_p3)  ;;  %s171_s27 = scalar_lea.vmem (%p50_p3), [#allocation3], %s1451_s23  ;;  %v1323_v3 = vld [vmem:[%s177_s26 + $0x50] sm:$0xf] (%p50_p3) }
  0x13   : > { %v1321_v2 = vld [vmem:[%s177_s26 + $0x8] sm:$0xf] (%p50_p3)  ;;  %193 = vst [vmem:[%s171_s27] sm:$0xff] (%p50_p3), %v192_v0  ;;  %195 = vst [vmem:[%s171_s27 + $0xc] sm:$0xff] (%p50_p3), %v194_v1 }
  0x14   : > { %1322 = vst [vmem:[%s171_s27 + $0x8] sm:$0xf] (%p50_p3), %v1321_v2  ;;  %1324 = vst [vmem:[%s171_s27 + $0x14] sm:$0xf] (%p50_p3), %v1323_v3 }
  0x15 PF: > { %p1325_p6 = scmp.ge.s32.totalorder %s1681_s16, 1  ;;  %p226_p7 = scmp.lt.s32.totalorder %s1681_s16, 7 }
  0x17   : > { %p227_p8 = pnand %p1325_p6, %p226_p7 }
  0x18   : > { %s233_s28 = sand.u32 (!%p227_p8), 1, %s1665_s12   ;;  %s277_s29 = smul.u32 (!%p227_p8), 48, %s1673_s14 }
  0x19   : > { %230 = sbr.rel (%p227_p8) target bundleno = 368 (0x170), region = 54  ;;  %p1328_p10 = scmp.ne.s32.totalorder (!%p227_p8), %s1673_s14, 0 }
  0x1a   : > { %s1452_s30 = smul.u32 (!%p227_p8), 24, %s233_s28  ;;  %p279_p9 = scmp.lt.s32.totalorder (!%p227_p8), %s277_s29, 287 }
  0x1c   : > { %s1757_s8 = scalar_lea.vmem (!%p227_p8), [#allocation3], %s1452_s30 }
  0x20   : > { %s1901_s29 = smov (!%p279_p9, %s277_s29), 287  ;;  %310 = sbr.rel (%p1328_p10) target bundleno = 39 (0x27), region = 62 }
  0x21   : > { %s1438_s4 = sshll.u32 %s1901_s29, 4  ;;  %v1683_v4 = vmov (!%p1328_p10), 0.0  }
  0x22   : > { %s1755_s7 = scalar_lea.vmem %s1891_s1, %s1438_s4  ;;  %311 = vst [vmem:[#allocation2] sm:$0xff] (!%p1328_p10), %v1683_v4  ;;  %312 = vst [vmem:[#allocation2 + $0x8] sm:$0xff] (!%p1328_p10), %v1683_v4 }
  0x23   : > { %313 = vst [vmem:[#allocation2 + $0x10] sm:$0xff] (!%p1328_p10), %v1683_v4  ;;  %314 = vst [vmem:[#allocation2 + $0x18] sm:$0xff] (!%p1328_p10), %v1683_v4 }
  0x24   : > { %315 = vst [vmem:[#allocation2 + $0x20] sm:$0xff] (!%p1328_p10), %v1683_v4  ;;  %316 = vst [vmem:[#allocation2 + $0x28] sm:$0xff] (!%p1328_p10), %v1683_v4 }
  0x25   : > { %317 = vst [vmem:[#allocation2 + $0x30] sm:$0xff] (!%p1328_p10), %v1683_v4  ;;  %318 = vst [vmem:[#allocation2 + $0x38] sm:$0xff] (!%p1328_p10), %v1683_v4 }
  0x27 PF: > { %v1495_v5 = vld [vmem:[%s1755_s7 + $0x4] ss:$16 sps:$4 sm:$0xff]   ;;  %v1497_v6 = vld [vmem:[%s1755_s7 + $0xc] ss:$16 sps:$4 sm:$0xff]   ;;  %v1499_v7 = vld [vmem:[%s1755_s7] ss:$16 sps:$4 sm:$0xff]  }
  0x28   : > { %923 = vmatprep.subr.bf16.mxu0 %v1495_v5  ;;  %v1500_v8 = vld [vmem:[%s1755_s7 + $0x8] ss:$16 sps:$4 sm:$0xff]   ;;  %1009 = vmatprep.subr.bf16.mxu1 %v1497_v6  ;;  %v1501_v9 = vld [vmem:[%s1755_s7 + $0x24] ss:$16 sps:$4 sm:$0xff]   ;;  %v1503_v10 = vld [vmem:[%s1755_s7 + $0x2c] ss:$16 sps:$4 sm:$0xff]  }
  0x29   : > { %924 = vmatpush1.bf16.msra.mxu0 %v1499_v7  ;;  %1010 = vmatpush1.bf16.msra.mxu1 %v1500_v8  ;;  %v1505_v11 = vld [vmem:[%s1755_s7 + $0x20] ss:$16 sps:$4 sm:$0xff]   ;;  %v1506_v12 = vld [vmem:[%s1755_s7 + $0x28] ss:$16 sps:$4 sm:$0xff]   ;;  %v1507_v13 = vld [vmem:[%s1755_s7 + $0x44] ss:$16 sps:$4 sm:$0xff]  }
  0x2a   : > { %925 = vmatprep.subr.bf16.mxu0 %v1501_v9  ;;  %1011 = vmatprep.subr.bf16.mxu1 %v1503_v10  ;;  %v1509_v14 = vld [vmem:[%s1755_s7 + $0x4c] ss:$16 sps:$4 sm:$0xff]   ;;  %v1511_v15 = vld [vmem:[%s1755_s7 + $0x40] ss:$16 sps:$4 sm:$0xff]   ;;  %v1512_v16 = vld [vmem:[%s1755_s7 + $0x48] ss:$16 sps:$4 sm:$0xff]  }
  0x2b   : > { %v1513_v17 = vld [vmem:[%s1755_s7 + $0x64] ss:$16 sps:$4 sm:$0xff]   ;;  %v1515_v18 = vld [vmem:[%s1755_s7 + $0x6c] ss:$16 sps:$4 sm:$0xff]   ;;  %v1517_v19 = vld [vmem:[%s1755_s7 + $0x60] ss:$16 sps:$4 sm:$0xff]  }
  0x2c   : > { %v1518_v20 = vld [vmem:[%s1755_s7 + $0x68] ss:$16 sps:$4 sm:$0xff]   ;;  %v1519_v21 = vld [vmem:[%s1755_s7 + $0x84] ss:$16 sps:$4 sm:$0xff]   ;;  %v1521_v22 = vld [vmem:[%s1755_s7 + $0x8c] ss:$16 sps:$4 sm:$0xff]  }
  0x2d   : > { %926 = vmatpush1.bf16.msra.mxu0 %v1505_v11  ;;  %1012 = vmatpush1.bf16.msra.mxu1 %v1506_v12  ;;  %v1523_v23 = vld [vmem:[%s1755_s7 + $0x80] ss:$16 sps:$4 sm:$0xff]   ;;  %v1524_v24 = vld [vmem:[%s1755_s7 + $0x88] ss:$16 sps:$4 sm:$0xff]   ;;  %v1525_v25 = vld [vmem:[%s1755_s7 + $0xa4] ss:$16 sps:$4 sm:$0xff]  }
  0x2e   : > { %927 = vmatprep.subr.bf16.mxu0 %v1507_v13  ;;  %1013 = vmatprep.subr.bf16.mxu1 %v1509_v14  ;;  %v1527_v26 = vld [vmem:[%s1755_s7 + $0xac] ss:$16 sps:$4 sm:$0xff]   ;;  %v1529_v27 = vld [vmem:[%s1755_s7 + $0xa0] ss:$16 sps:$4 sm:$0xff]   ;;  %v1530_v28 = vld [vmem:[%s1755_s7 + $0xa8] ss:$16 sps:$4 sm:$0xff]  }
  0x2f   : > { %v1531_v29 = vld [vmem:[%s1755_s7 + $0xc4] ss:$16 sps:$4 sm:$0xff]   ;;  %v1533_v30 = vld [vmem:[%s1755_s7 + $0xcc] ss:$16 sps:$4 sm:$0xff]   ;;  %v1535_v31 = vld [vmem:[%s1755_s7 + $0xc0] ss:$16 sps:$4 sm:$0xff]  }
  0x30   : > { %v1536_v32 = vld [vmem:[%s1755_s7 + $0xc8] ss:$16 sps:$4 sm:$0xff]   ;;  %v1537_v33 = vld [vmem:[%s1755_s7 + $0xe4] ss:$16 sps:$4 sm:$0xff]   ;;  %v1539_v34 = vld [vmem:[%s1755_s7 + $0xec] ss:$16 sps:$4 sm:$0xff]  }
  0x31   : > { %928 = vmatpush1.bf16.msra.mxu0 %v1511_v15  ;;  %1014 = vmatpush1.bf16.msra.mxu1 %v1512_v16  ;;  %v1541_v35 = vld [vmem:[%s1755_s7 + $0xe0] ss:$16 sps:$4 sm:$0xff]   ;;  %v1542_v36 = vld [vmem:[%s1755_s7 + $0xe8] ss:$16 sps:$4 sm:$0xff]   ;;  %v1543_v37 = vld [vmem:[%s1755_s7 + $0x104] ss:$16 sps:$4 sm:$0xff]  }
  0x32   : > { %929 = vmatprep.subr.bf16.mxu0 %v1513_v17  ;;  %1015 = vmatprep.subr.bf16.mxu1 %v1515_v18  ;;  %v1545_v38 = vld [vmem:[%s1755_s7 + $0x10c] ss:$16 sps:$4 sm:$0xff]   ;;  %v1547_v39 = vld [vmem:[%s1755_s7 + $0x100] ss:$16 sps:$4 sm:$0xff]   ;;  %v1548_v40 = vld [vmem:[%s1755_s7 + $0x108] ss:$16 sps:$4 sm:$0xff]  }
  0x33   : > { %v1549_v41 = vld [vmem:[%s1755_s7 + $0x124] ss:$16 sps:$4 sm:$0xff]   ;;  %v1551_v42 = vld [vmem:[%s1755_s7 + $0x12c] ss:$16 sps:$4 sm:$0xff]   ;;  %v1553_v43 = vld [vmem:[%s1755_s7 + $0x120] ss:$16 sps:$4 sm:$0xff]  }
  0x34   : > { %v1554_v44 = vld [vmem:[%s1755_s7 + $0x128] ss:$16 sps:$4 sm:$0xff]   ;;  %v1555_v45 = vld [vmem:[%s1755_s7 + $0x144] ss:$16 sps:$4 sm:$0xff]   ;;  %v1557_v46 = vld [vmem:[%s1755_s7 + $0x14c] ss:$16 sps:$4 sm:$0xff]  }
  0x35   : > { %930 = vmatpush1.bf16.msra.mxu0 %v1517_v19  ;;  %1016 = vmatpush1.bf16.msra.mxu1 %v1518_v20  ;;  %v1559_v47 = vld [vmem:[%s1755_s7 + $0x140] ss:$16 sps:$4 sm:$0xff]   ;;  %v1560_v48 = vld [vmem:[%s1755_s7 + $0x148] ss:$16 sps:$4 sm:$0xff]   ;;  %v1561_v49 = vld [vmem:[%s1755_s7 + $0x164] ss:$16 sps:$4 sm:$0xff]  }
  0x36   : > { %931 = vmatprep.subr.bf16.mxu0 %v1519_v21  ;;  %1017 = vmatprep.subr.bf16.mxu1 %v1521_v22  ;;  %v1563_v50 = vld [vmem:[%s1755_s7 + $0x16c] ss:$16 sps:$4 sm:$0xff]   ;;  %v1565_v51 = vld [vmem:[%s1755_s7 + $0x160] ss:$16 sps:$4 sm:$0xff]   ;;  %v1566_v52 = vld [vmem:[%s1755_s7 + $0x168] ss:$16 sps:$4 sm:$0xff]  }
  0x37   : > { %v1593_v53 = vld [vmem:[%s1757_s8 + $0x4] ss:$12 sps:$4 sm:$0xff]   ;;  %v1591_v8 = vld [vmem:[%s1757_s8] ss:$12 sps:$4 sm:$0xff]   ;;  %v1684_v17 = vmov 0   ;;  %p1428_p11 = scmp.ne.s32.totalorder %s1673_s14, 5 }
  0x38   : > { %v1567_v54 = vld [vmem:[%s1755_s7 + $0x184] ss:$16 sps:$4 sm:$0xff]   ;;  %v1569_v55 = vld [vmem:[%s1755_s7 + $0x18c] ss:$16 sps:$4 sm:$0xff]   ;;  %955 = vmatprep.mubr.bf16.mxu0 %v1593_v53  ;;  %1041 = vmatprep.mubr.bf16.mxu1 %v1593_v53  ;;  %v1571_v56 = vld [vmem:[%s1755_s7 + $0x180] ss:$16 sps:$4 sm:$0xff]  }
  0x39   : > { %932 = vmatpush1.bf16.msra.mxu0 %v1523_v23  ;;  %1018 = vmatpush1.bf16.msra.mxu1 %v1524_v24  ;;  %v1572_v57 = vld [vmem:[%s1755_s7 + $0x188] ss:$16 sps:$4 sm:$0xff]   ;;  %v1573_v58 = vld [vmem:[%s1755_s7 + $0x1a4] ss:$16 sps:$4 sm:$0xff]   ;;  %v1575_v59 = vld [vmem:[%s1755_s7 + $0x1ac] ss:$16 sps:$4 sm:$0xff]  }
  0x3a   : > { %933 = vmatprep.subr.bf16.mxu0 %v1525_v25  ;;  %1019 = vmatprep.subr.bf16.mxu1 %v1527_v26  ;;  %v1577_v60 = vld [vmem:[%s1755_s7 + $0x1a0] ss:$16 sps:$4 sm:$0xff]   ;;  %v1578_v61 = vld [vmem:[%s1755_s7 + $0x1a8] ss:$16 sps:$4 sm:$0xff]   ;;  %v1579_v62 = vld [vmem:[%s1755_s7 + $0x1c4] ss:$16 sps:$4 sm:$0xff]  }
  0x3b   : > { %v1581_v63 = vld [vmem:[%s1755_s7 + $0x1cc] ss:$16 sps:$4 sm:$0xff]   ;;  %v1583_v0 = vld [vmem:[%s1755_s7 + $0x1c0] ss:$16 sps:$4 sm:$0xff]   ;;  %v1584_v1 = vld [vmem:[%s1755_s7 + $0x1c8] ss:$16 sps:$4 sm:$0xff]  }
  0x3c   : > { %v1585_v2 = vld [vmem:[%s1755_s7 + $0x1e4] ss:$16 sps:$4 sm:$0xff]   ;;  %v1587_v3 = vld [vmem:[%s1755_s7 + $0x1ec] ss:$16 sps:$4 sm:$0xff]   ;;  %v1589_v4 = vld [vmem:[%s1755_s7 + $0x1e0] ss:$16 sps:$4 sm:$0xff]  }
  0x3d   : > { %934 = vmatpush1.bf16.msra.mxu0 %v1529_v27  ;;  %1020 = vmatpush1.bf16.msra.mxu1 %v1530_v28  ;;  %v1590_v5 = vld [vmem:[%s1755_s7 + $0x1e8] ss:$16 sps:$4 sm:$0xff]   ;;  %v1596_v6 = vld [vmem:[%s1755_s7 + $0x204] ss:$16 sps:$4 sm:$0xff]   ;;  %v1599_v7 = vld [vmem:[%s1755_s7 + $0x20c] ss:$16 sps:$4 sm:$0xff]  }
  0x3e   : > { %935 = vmatprep.subr.bf16.mxu0 %v1531_v29  ;;  %1021 = vmatprep.subr.bf16.mxu1 %v1533_v30  ;;  %v1594_v9 = vld [vmem:[%s1755_s7 + $0x200] ss:$16 sps:$4 sm:$0xff]   ;;  %v1597_v10 = vld [vmem:[%s1755_s7 + $0x208] ss:$16 sps:$4 sm:$0xff]   ;;  %v1602_v11 = vld [vmem:[%s1755_s7 + $0x224] ss:$16 sps:$4 sm:$0xff]  }
  0x3f   : > { %v1605_v12 = vld [vmem:[%s1755_s7 + $0x22c] ss:$16 sps:$4 sm:$0xff]   ;;  %v1600_v13 = vld [vmem:[%s1755_s7 + $0x220] ss:$16 sps:$4 sm:$0xff]   ;;  %v1603_v14 = vld [vmem:[%s1755_s7 + $0x228] ss:$16 sps:$4 sm:$0xff]  }
  0x40   : > { %v1608_v15 = vld [vmem:[%s1755_s7 + $0x244] ss:$16 sps:$4 sm:$0xff]   ;;  %v1611_v16 = vld [vmem:[%s1755_s7 + $0x24c] ss:$16 sps:$4 sm:$0xff]   ;;  %v1606_v18 = vld [vmem:[%s1755_s7 + $0x240] ss:$16 sps:$4 sm:$0xff]  }
  0x41   : > { %936 = vmatpush1.bf16.msra.mxu0 %v1535_v31  ;;  %1022 = vmatpush1.bf16.msra.mxu1 %v1536_v32  ;;  %v1609_v19 = vld [vmem:[%s1755_s7 + $0x248] ss:$16 sps:$4 sm:$0xff]   ;;  %v1614_v20 = vld [vmem:[%s1755_s7 + $0x264] ss:$16 sps:$4 sm:$0xff]   ;;  %v1617_v21 = vld [vmem:[%s1755_s7 + $0x26c] ss:$16 sps:$4 sm:$0xff]  }
  0x42   : > { %937 = vmatprep.subr.bf16.mxu0 %v1537_v33  ;;  %1023 = vmatprep.subr.bf16.mxu1 %v1539_v34  ;;  %v1612_v22 = vld [vmem:[%s1755_s7 + $0x260] ss:$16 sps:$4 sm:$0xff]   ;;  %v1615_v23 = vld [vmem:[%s1755_s7 + $0x268] ss:$16 sps:$4 sm:$0xff]   ;;  %v1620_v24 = vld [vmem:[%s1755_s7 + $0x284] ss:$16 sps:$4 sm:$0xff]  }
  0x43   : > { %v1623_v25 = vld [vmem:[%s1755_s7 + $0x28c] ss:$16 sps:$4 sm:$0xff]   ;;  %v1618_v26 = vld [vmem:[%s1755_s7 + $0x280] ss:$16 sps:$4 sm:$0xff]   ;;  %v1621_v27 = vld [vmem:[%s1755_s7 + $0x288] ss:$16 sps:$4 sm:$0xff]  }
  0x44   : > { %v1626_v28 = vld [vmem:[%s1755_s7 + $0x2a4] ss:$16 sps:$4 sm:$0xff]   ;;  %v1629_v29 = vld [vmem:[%s1755_s7 + $0x2ac] ss:$16 sps:$4 sm:$0xff]   ;;  %v1624_v30 = vld [vmem:[%s1755_s7 + $0x2a0] ss:$16 sps:$4 sm:$0xff]  }
  0x45   : > { %938 = vmatpush1.bf16.msra.mxu0 %v1541_v35  ;;  %1024 = vmatpush1.bf16.msra.mxu1 %v1542_v36  ;;  %v1627_v31 = vld [vmem:[%s1755_s7 + $0x2a8] ss:$16 sps:$4 sm:$0xff]   ;;  %v1632_v32 = vld [vmem:[%s1755_s7 + $0x2c4] ss:$16 sps:$4 sm:$0xff]   ;;  %v1635_v33 = vld [vmem:[%s1755_s7 + $0x2cc] ss:$16 sps:$4 sm:$0xff]  }
  0x46   : > { %939 = vmatprep.subr.bf16.mxu0 %v1543_v37  ;;  %1025 = vmatprep.subr.bf16.mxu1 %v1545_v38  ;;  %v1630_v34 = vld [vmem:[%s1755_s7 + $0x2c0] ss:$16 sps:$4 sm:$0xff]   ;;  %v1633_v35 = vld [vmem:[%s1755_s7 + $0x2c8] ss:$16 sps:$4 sm:$0xff]   ;;  %v1638_v36 = vld [vmem:[%s1755_s7 + $0x2e4] ss:$16 sps:$4 sm:$0xff]  }
  0x47   : > { %v1641_v37 = vld [vmem:[%s1755_s7 + $0x2ec] ss:$16 sps:$4 sm:$0xff]   ;;  %v1636_v38 = vld [vmem:[%s1755_s7 + $0x2e0] ss:$16 sps:$4 sm:$0xff]  }
  0x48   : > { %v324_v53 = vld [vmem:[#allocation2 + $0x28] sm:$0xff] }
  0x49   : > { %940 = vmatpush1.bf16.msra.mxu0 %v1547_v39  ;;  %1026 = vmatpush1.bf16.msra.mxu1 %v1548_v40  ;;  %v1639_v39 = vld [vmem:[%s1755_s7 + $0x2e8] ss:$16 sps:$4 sm:$0xff]  }
  0x4a   : > { %941 = vmatprep.subr.bf16.mxu0 %v1549_v41  ;;  %1027 = vmatprep.subr.bf16.mxu1 %v1551_v42  ;;  %v1642_v40 = vld [vmem:[%s1757_s8 + $0x8] ss:$12 sps:$4 sm:$0xff]  }
  0x4b   : > { %v319_v41 = vld [vmem:[#allocation2] sm:$0xff]  ;;  %v321_v42 = vld [vmem:[#allocation2 + $0x10] sm:$0xff] }
  0x4d   : > { %942 = vmatpush1.bf16.msra.mxu0 %v1553_v43  ;;  %1028 = vmatpush1.bf16.msra.mxu1 %v1554_v44  ;;  %v320_v43 = vld [vmem:[#allocation2 + $0x8] sm:$0xff]  ;;  %v322_v44 = vld [vmem:[#allocation2 + $0x18] sm:$0xff] }
  0x4e   : > { %943 = vmatprep.subr.bf16.mxu0 %v1555_v45  ;;  %1029 = vmatprep.subr.bf16.mxu1 %v1557_v46 }
  0x51   : > { %944 = vmatpush1.bf16.msra.mxu0 %v1559_v47  ;;  %1030 = vmatpush1.bf16.msra.mxu1 %v1560_v48  ;;  %v323_v47 = vld [vmem:[#allocation2 + $0x20] sm:$0xff]  ;;  %v325_v48 = vld [vmem:[#allocation2 + $0x30] sm:$0xff] }
  0x52   : > { %945 = vmatprep.subr.bf16.mxu0 %v1561_v49  ;;  %1031 = vmatprep.subr.bf16.mxu1 %v1563_v50 }
  0x55   : > { %946 = vmatpush1.bf16.msra.mxu0 %v1565_v51  ;;  %1032 = vmatpush1.bf16.msra.mxu1 %v1566_v52 }
  0x56   : > { %947 = vmatprep.subr.bf16.mxu0 %v1567_v54  ;;  %1033 = vmatprep.subr.bf16.mxu1 %v1569_v55  ;;  %v326_v54 = vld [vmem:[#allocation2 + $0x38] sm:$0xff] }
  0x59   : > { %948 = vmatpush1.bf16.msra.mxu0 %v1571_v56  ;;  %1034 = vmatpush1.bf16.msra.mxu1 %v1572_v57 }
  0x5a   : > { %949 = vmatprep.subr.bf16.mxu0 %v1573_v58  ;;  %1035 = vmatprep.subr.bf16.mxu1 %v1575_v59 }
  0x5d   : > { %950 = vmatpush1.bf16.msra.mxu0 %v1577_v60  ;;  %1036 = vmatpush1.bf16.msra.mxu1 %v1578_v61 }
  0x5e   : > { %951 = vmatprep.subr.bf16.mxu0 %v1579_v62  ;;  %1037 = vmatprep.subr.bf16.mxu1 %v1581_v63 }
  0x61   : > { %952 = vmatpush1.bf16.msra.mxu0 %v1583_v0  ;;  %1038 = vmatpush1.bf16.msra.mxu1 %v1584_v1  ;;  %v1125_v1 = vlaneseq (!%p1428_p11) }
  0x62   : > { %953 = vmatprep.subr.bf16.mxu0 %v1585_v2  ;;  %1039 = vmatprep.subr.bf16.mxu1 %v1587_v3  ;;  %v1123_v3 = vld [vmem:[%s1892_s2] sm:$0xf] (!%p1428_p11) }
  0x63   : > { %v1126_v2 = vshrl.u32 (!%p1428_p11), %v1125_v1, 7 }
  0x65   : > { %954 = vmatpush1.bf16.msra.mxu0 %v1589_v4  ;;  %1040 = vmatpush1.bf16.msra.mxu1 %v1590_v5 }
  0x66   : > { %966 = vmatprep.subr.bf16.mxu0 %v1596_v6  ;;  %1052 = vmatprep.subr.bf16.mxu1 %v1599_v7  ;;  %v1127_v6 = vsub.s32 (!%p1428_p11), 0, %v1126_v2  ;;  %v1131_v7 = vsub.s32 (!%p1428_p11), 1, %v1126_v2 }
  0x68   : > { %956 = vmatmul.mubr.bf16.vlgmr.msra.gmra.mrb[0].mxu0 %v1591_v8  ;;  %1042 = vmatmul.mubr.bf16.vlgmr.msra.gmra.mrb[0].mxu1 %v1591_v8  ;;  %v1135_v8 = vsub.s32 (!%p1428_p11), 2, %v1126_v2 }
  0x69   : > { %967 = vmatpush1.bf16.msra.mxu0 %v1594_v9  ;;  %1053 = vmatpush1.bf16.msra.mxu1 %v1597_v10  ;;  %v1139_v9 = vsub.s32 (!%p1428_p11), 3, %v1126_v2 }
  0x6a   : > { %968 = vmatprep.subr.bf16.mxu0 %v1602_v11  ;;  %1054 = vmatprep.subr.bf16.mxu1 %v1605_v12 }
  0x6b   : > { %998 = vmatprep.mubr.bf16.mxu0 %v1684_v17  ;;  %1084 = vmatprep.mubr.bf16.mxu1 %v1684_v17 }
  0x6d   : > { %969 = vmatpush1.bf16.msra.mxu0 %v1600_v13  ;;  %1055 = vmatpush1.bf16.msra.mxu1 %v1603_v14  ;;  %v1128_v13 = vrot.slane (!%p1428_p11), %v1123_v3, %v1127_v6  ;;  %v1132_v14 = vrot.slane (!%p1428_p11), %v1123_v3, %v1131_v7 }
  0x6e   : > { %970 = vmatprep.subr.bf16.mxu0 %v1608_v15  ;;  %1056 = vmatprep.subr.bf16.mxu1 %v1611_v16  ;;  %v1136_v15 = vrot.slane (!%p1428_p11), %v1123_v3, %v1135_v8  ;;  %v1140_v16 = vrot.slane (!%p1428_p11), %v1123_v3, %v1139_v9 }
  0x71   : > { %971 = vmatpush1.bf16.msra.mxu0 %v1606_v18  ;;  %1057 = vmatpush1.bf16.msra.mxu1 %v1609_v19 }
  0x72   : > { %972 = vmatprep.subr.bf16.mxu0 %v1614_v20  ;;  %1058 = vmatprep.subr.bf16.mxu1 %v1617_v21 }
  0x75   : > { %973 = vmatpush1.bf16.msra.mxu0 %v1612_v22  ;;  %1059 = vmatpush1.bf16.msra.mxu1 %v1615_v23 }
  0x76   : > { %974 = vmatprep.subr.bf16.mxu0 %v1620_v24  ;;  %1060 = vmatprep.subr.bf16.mxu1 %v1623_v25 }
  0x79   : > { %975 = vmatpush1.bf16.msra.mxu0 %v1618_v26  ;;  %1061 = vmatpush1.bf16.msra.mxu1 %v1621_v27 }
  0x7a   : > { %976 = vmatprep.subr.bf16.mxu0 %v1626_v28  ;;  %1062 = vmatprep.subr.bf16.mxu1 %v1629_v29 }
  0x7d   : > { %977 = vmatpush1.bf16.msra.mxu0 %v1624_v30  ;;  %1063 = vmatpush1.bf16.msra.mxu1 %v1627_v31 }
  0x7e   : > { %978 = vmatprep.subr.bf16.mxu0 %v1632_v32  ;;  %1064 = vmatprep.subr.bf16.mxu1 %v1635_v33 }
  0x81   : > { %979 = vmatpush1.bf16.msra.mxu0 %v1630_v34  ;;  %1065 = vmatpush1.bf16.msra.mxu1 %v1633_v35 }
  0x82   : > { %980 = vmatprep.subr.bf16.mxu0 %v1638_v36  ;;  %1066 = vmatprep.subr.bf16.mxu1 %v1641_v37 }
  0x85   : > { %981 = vmatpush1.bf16.msra.mxu0 %v1636_v38  ;;  %1067 = vmatpush1.bf16.msra.mxu1 %v1639_v39 }
  0x88   : > { %999 = vmatmul.mubr.bf16.vlgmr.msra.gmra.mrb[0].mxu0 %v1642_v40  ;;  %1085 = vmatmul.mubr.bf16.vlgmr.msra.gmra.mrb[0].mxu1 %v1642_v40 }
 0x15b   : > { %v1000_v45 = vpop.f32.mrb[0].mxu0  ;;  %v1086_v46 = vpop.f32.mrb[0].mxu1  ;;  %1114 = sbr.rel (%p1428_p11) target bundleno = 368 (0x170), region = 66 }
 0x15c   : > { %v1095_v49 = vadd.f32 %v1000_v45, %v319_v41  ;;  %v1097_v50 = vadd.f32 %v1086_v46, %v321_v42  ;;  %v1002_v51 = vpop.f32.mrb[1].mxu0  ;;  %v1088_v52 = vpop.f32.mrb[1].mxu1 }
 0x15d   : > { %v1096_v55 = vadd.f32 %v1002_v51, %v320_v43  ;;  %v1098_v56 = vadd.f32 %v1088_v52, %v322_v44  ;;  %v1004_v57 = vpop.f32.mrb[2].mxu0  ;;  %v1090_v58 = vpop.f32.mrb[2].mxu1 }
 0x15e   : > { %1103 = vst [vmem:[#allocation2] sm:$0xff] %v1095_v49  ;;  %1105 = vst [vmem:[#allocation2 + $0x10] sm:$0xff] %v1097_v50  ;;  %v1099_v59 = vadd.f32 %v1004_v57, %v323_v47  ;;  %v1101_v60 = vadd.f32 %v1090_v58, %v325_v48  ;;  %v1006_v61 = vpop.f32.mrb[3].mxu0  ;;  %v1092_v62 = vpop.f32.mrb[3].mxu1 }
 0x15f   : > { %1104 = vst [vmem:[#allocation2 + $0x8] sm:$0xff] %v1096_v55  ;;  %1106 = vst [vmem:[#allocation2 + $0x18] sm:$0xff] %v1098_v56  ;;  %v1100_v63 = vadd.f32 %v1006_v61, %v324_v53  ;;  %v1102_v0 = vadd.f32 %v1092_v62, %v326_v54 }
 0x160   : > { %1107 = vst [vmem:[#allocation2 + $0x20] sm:$0xff] %v1099_v59  ;;  %1109 = vst [vmem:[#allocation2 + $0x30] sm:$0xff] %v1101_v60 }
 0x161   : > { %1108 = vst [vmem:[#allocation2 + $0x28] sm:$0xff] %v1100_v63  ;;  %1110 = vst [vmem:[#allocation2 + $0x38] sm:$0xff] %v1102_v0 }
 0x165   : > { %v1115_v4 = vld [vmem:[#allocation2] sm:$0xff]  ;;  %v1117_v10 = vld [vmem:[#allocation2 + $0x10] sm:$0xff] }
 0x166   : > { %v1116_v5 = vld [vmem:[#allocation2 + $0x8] sm:$0xff]  ;;  %v1118_v11 = vld [vmem:[#allocation2 + $0x18] sm:$0xff]  ;;  %v1145_v20 = vadd.f32 %v1128_v13, %v1115_v4  ;;  %v1147_v22 = vadd.f32 %v1136_v15, %v1117_v10 }
 0x167   : > { %v1119_v12 = vld [vmem:[#allocation2 + $0x20] sm:$0xff]  ;;  %v1121_v18 = vld [vmem:[#allocation2 + $0x30] sm:$0xff]  ;;  %v1146_v21 = vadd.f32 %v1132_v14, %v1116_v5  ;;  %v1148_v23 = vadd.f32 %v1140_v16, %v1118_v11 }
 0x168   : > { %v1120_v17 = vld [vmem:[#allocation2 + $0x28] sm:$0xff]  ;;  %v1122_v19 = vld [vmem:[#allocation2 + $0x38] sm:$0xff]  ;;  %v1149_v24 = vadd.f32 %v1128_v13, %v1119_v12  ;;  %v1151_v26 = vadd.f32 %v1136_v15, %v1121_v18  ;;  %v1153_v28 = vmax.f32 %v1145_v20, 0.0  ;;  %v1155_v30 = vmax.f32 %v1147_v22, 0.0 }
 0x169   : > { %v1150_v25 = vadd.f32 %v1132_v14, %v1120_v17  ;;  %v1152_v27 = vadd.f32 %v1140_v16, %v1122_v19  ;;  %v1154_v29 = vmax.f32 %v1146_v21, 0.0  ;;  %v1156_v31 = vmax.f32 %v1148_v23, 0.0 }
 0x16a   : > { %v1157_v32 = vmax.f32 %v1149_v24, 0.0  ;;  %v1159_v34 = vmax.f32 %v1151_v26, 0.0 }
 0x16b   : > { %v1158_v33 = vmax.f32 %v1150_v25, 0.0  ;;  %v1160_v35 = vmax.f32 %v1152_v27, 0.0  ;;  %v1439_v36 = vpack.c.bf16 %v1154_v29, %v1153_v28  ;;  %v1440_v37 = vpack.c.bf16 %v1156_v31, %v1155_v30 }
 0x16d   : > { %v1441_v38 = vpack.c.bf16 %v1158_v33, %v1157_v32  ;;  %v1442_v39 = vpack.c.bf16 %v1160_v35, %v1159_v34  ;;  %1185 = vst [vmem:[%s1893_s3] sm:$0xff] %v1439_v36  ;;  %1186 = vst [vmem:[%s1893_s3 + $0x8] sm:$0xff] %v1440_v37 }
 0x16f   : > { %1187 = vst [vmem:[%s1893_s3 + $0x10] sm:$0xff] %v1441_v38  ;;  %1188 = vst [vmem:[%s1893_s3 + $0x18] sm:$0xff] %v1442_v39 }
 0x170 PF: > { %s13_s16 = sadd.s32 1, %s1681_s16   ;;  %s1894_s12 = smov %s1669_s13 }
 0x171   : > { %p10_p12 = scmp.ge.s32.totalorder %s13_s16, 8   ;;  %s1895_s13 = smov %s1740_s20 }
 0x172   : > { %s1896_s14 = smov %s1677_s15  ;;  %s1897_s15 = smov %s1899_s17 }
 0x173   :  { %12 = sbr.rel (!%p10_p12) target bundleno = 3 (0x3), region = 113 }

// kernel: color_model_forward.37
= control target key start
LH: loop header
LB: loop body
LE: loop exit
PB: predicated region body
PF: predicated region fallthrough
CT: control target
= control target key end

     0   :  { %s1011_s1 = inlined_call_operand.vmem [shape: bf16[256,512], index: 1, kind: input, shape index: {}]   ;;  %s1012_s0 = inlined_call_operand.vmem [shape: bf16[16,256], index: 0, kind: input, shape index: {}]   ;;  %s1013_s2 = inlined_call_operand.vmem [shape: f32[1,512], index: 2, kind: input, shape index: {}]   ;;  %s1014_s3 = inlined_call_operand.vmem [shape: bf16[16,512], index: 3, kind: output, shape index: {}]  }
   0x1   :  { %v679_v0 = vld [vmem:[%s1011_s1 + $0x4] ss:$16 sps:$4 sm:$0xff]   ;;  %v681_v1 = vld [vmem:[%s1011_s1 + $0xc] ss:$16 sps:$4 sm:$0xff]   ;;  %v683_v2 = vld [vmem:[%s1011_s1] ss:$16 sps:$4 sm:$0xff]  }
   0x2   :  { %430 = vmatprep.subr.bf16.mxu0 %v679_v0  ;;  %v684_v3 = vld [vmem:[%s1011_s1 + $0x8] ss:$16 sps:$4 sm:$0xff]   ;;  %473 = vmatprep.subr.bf16.mxu1 %v681_v1  ;;  %v685_v4 = vld [vmem:[%s1011_s1 + $0x24] ss:$16 sps:$4 sm:$0xff]   ;;  %v687_v5 = vld [vmem:[%s1011_s1 + $0x2c] ss:$16 sps:$4 sm:$0xff]  }
   0x3   :  { %431 = vmatpush1.bf16.msra.mxu0 %v683_v2  ;;  %474 = vmatpush1.bf16.msra.mxu1 %v684_v3  ;;  %v689_v6 = vld [vmem:[%s1011_s1 + $0x20] ss:$16 sps:$4 sm:$0xff]   ;;  %v690_v7 = vld [vmem:[%s1011_s1 + $0x28] ss:$16 sps:$4 sm:$0xff]   ;;  %v691_v8 = vld [vmem:[%s1011_s1 + $0x44] ss:$16 sps:$4 sm:$0xff]   ;;  %v545_v2 = vlaneseq }
   0x4   :  { %432 = vmatprep.subr.bf16.mxu0 %v685_v4  ;;  %475 = vmatprep.subr.bf16.mxu1 %v687_v5  ;;  %v693_v9 = vld [vmem:[%s1011_s1 + $0x4c] ss:$16 sps:$4 sm:$0xff]   ;;  %v695_v10 = vld [vmem:[%s1011_s1 + $0x40] ss:$16 sps:$4 sm:$0xff]   ;;  %v696_v11 = vld [vmem:[%s1011_s1 + $0x48] ss:$16 sps:$4 sm:$0xff]  }
   0x5   :  { %v697_v12 = vld [vmem:[%s1011_s1 + $0x64] ss:$16 sps:$4 sm:$0xff]   ;;  %v699_v13 = vld [vmem:[%s1011_s1 + $0x6c] ss:$16 sps:$4 sm:$0xff]   ;;  %v701_v14 = vld [vmem:[%s1011_s1 + $0x60] ss:$16 sps:$4 sm:$0xff]  }
   0x6   :  { %v702_v15 = vld [vmem:[%s1011_s1 + $0x68] ss:$16 sps:$4 sm:$0xff]   ;;  %v703_v16 = vld [vmem:[%s1011_s1 + $0x84] ss:$16 sps:$4 sm:$0xff]   ;;  %v705_v17 = vld [vmem:[%s1011_s1 + $0x8c] ss:$16 sps:$4 sm:$0xff]  }
   0x7   :  { %433 = vmatpush1.bf16.msra.mxu0 %v689_v6  ;;  %476 = vmatpush1.bf16.msra.mxu1 %v690_v7  ;;  %v707_v18 = vld [vmem:[%s1011_s1 + $0x80] ss:$16 sps:$4 sm:$0xff]   ;;  %v708_v19 = vld [vmem:[%s1011_s1 + $0x88] ss:$16 sps:$4 sm:$0xff]   ;;  %v709_v20 = vld [vmem:[%s1011_s1 + $0xa4] ss:$16 sps:$4 sm:$0xff]  }
   0x8   :  { %434 = vmatprep.subr.bf16.mxu0 %v691_v8  ;;  %477 = vmatprep.subr.bf16.mxu1 %v693_v9  ;;  %v711_v21 = vld [vmem:[%s1011_s1 + $0xac] ss:$16 sps:$4 sm:$0xff]   ;;  %v713_v22 = vld [vmem:[%s1011_s1 + $0xa0] ss:$16 sps:$4 sm:$0xff]   ;;  %v714_v23 = vld [vmem:[%s1011_s1 + $0xa8] ss:$16 sps:$4 sm:$0xff]  }
   0x9   :  { %v715_v24 = vld [vmem:[%s1011_s1 + $0xc4] ss:$16 sps:$4 sm:$0xff]   ;;  %v717_v25 = vld [vmem:[%s1011_s1 + $0xcc] ss:$16 sps:$4 sm:$0xff]   ;;  %v719_v26 = vld [vmem:[%s1011_s1 + $0xc0] ss:$16 sps:$4 sm:$0xff]  }
   0xa   :  { %v720_v27 = vld [vmem:[%s1011_s1 + $0xc8] ss:$16 sps:$4 sm:$0xff]   ;;  %v721_v28 = vld [vmem:[%s1011_s1 + $0xe4] ss:$16 sps:$4 sm:$0xff]   ;;  %v723_v29 = vld [vmem:[%s1011_s1 + $0xec] ss:$16 sps:$4 sm:$0xff]  }
   0xb   :  { %435 = vmatpush1.bf16.msra.mxu0 %v695_v10  ;;  %478 = vmatpush1.bf16.msra.mxu1 %v696_v11  ;;  %v725_v30 = vld [vmem:[%s1011_s1 + $0xe0] ss:$16 sps:$4 sm:$0xff]   ;;  %v726_v31 = vld [vmem:[%s1011_s1 + $0xe8] ss:$16 sps:$4 sm:$0xff]   ;;  %v727_v32 = vld [vmem:[%s1011_s1 + $0x104] ss:$16 sps:$4 sm:$0xff]  }
   0xc   :  { %436 = vmatprep.subr.bf16.mxu0 %v697_v12  ;;  %479 = vmatprep.subr.bf16.mxu1 %v699_v13  ;;  %v729_v33 = vld [vmem:[%s1011_s1 + $0x10c] ss:$16 sps:$4 sm:$0xff]   ;;  %v731_v34 = vld [vmem:[%s1011_s1 + $0x100] ss:$16 sps:$4 sm:$0xff]   ;;  %v732_v35 = vld [vmem:[%s1011_s1 + $0x108] ss:$16 sps:$4 sm:$0xff]  }
   0xd   :  { %v733_v36 = vld [vmem:[%s1011_s1 + $0x124] ss:$16 sps:$4 sm:$0xff]   ;;  %v735_v37 = vld [vmem:[%s1011_s1 + $0x12c] ss:$16 sps:$4 sm:$0xff]   ;;  %v737_v38 = vld [vmem:[%s1011_s1 + $0x120] ss:$16 sps:$4 sm:$0xff]  }
   0xe   :  { %v738_v39 = vld [vmem:[%s1011_s1 + $0x128] ss:$16 sps:$4 sm:$0xff]   ;;  %v739_v40 = vld [vmem:[%s1011_s1 + $0x144] ss:$16 sps:$4 sm:$0xff]   ;;  %v741_v41 = vld [vmem:[%s1011_s1 + $0x14c] ss:$16 sps:$4 sm:$0xff]  }
   0xf   :  { %437 = vmatpush1.bf16.msra.mxu0 %v701_v14  ;;  %480 = vmatpush1.bf16.msra.mxu1 %v702_v15  ;;  %v743_v42 = vld [vmem:[%s1011_s1 + $0x140] ss:$16 sps:$4 sm:$0xff]   ;;  %v744_v43 = vld [vmem:[%s1011_s1 + $0x148] ss:$16 sps:$4 sm:$0xff]   ;;  %v745_v44 = vld [vmem:[%s1011_s1 + $0x164] ss:$16 sps:$4 sm:$0xff]  }
  0x10   :  { %438 = vmatprep.subr.bf16.mxu0 %v703_v16  ;;  %481 = vmatprep.subr.bf16.mxu1 %v705_v17  ;;  %v747_v45 = vld [vmem:[%s1011_s1 + $0x16c] ss:$16 sps:$4 sm:$0xff]   ;;  %v749_v47 = vld [vmem:[%s1011_s1 + $0x160] ss:$16 sps:$4 sm:$0xff]   ;;  %v750_v48 = vld [vmem:[%s1011_s1 + $0x168] ss:$16 sps:$4 sm:$0xff]  }
  0x11   :  { %v777_v46 = vld [vmem:[%s1012_s0 + $0x4] ss:$8 sps:$4 sm:$0xff]   ;;  %v755_v51 = vld [vmem:[%s1011_s1 + $0x180] ss:$16 sps:$4 sm:$0xff]   ;;  %v756_v52 = vld [vmem:[%s1011_s1 + $0x188] ss:$16 sps:$4 sm:$0xff]  }
  0x12   :  { %v751_v49 = vld [vmem:[%s1011_s1 + $0x184] ss:$16 sps:$4 sm:$0xff]   ;;  %v753_v50 = vld [vmem:[%s1011_s1 + $0x18c] ss:$16 sps:$4 sm:$0xff]   ;;  %462 = vmatprep.mubr.bf16.mxu0 %v777_v46  ;;  %505 = vmatprep.mubr.bf16.mxu1 %v777_v46  ;;  %v761_v55 = vld [vmem:[%s1011_s1 + $0x1a0] ss:$16 sps:$4 sm:$0xff]  }
  0x13   :  { %439 = vmatpush1.bf16.msra.mxu0 %v707_v18  ;;  %482 = vmatpush1.bf16.msra.mxu1 %v708_v19  ;;  %v757_v53 = vld [vmem:[%s1011_s1 + $0x1a4] ss:$16 sps:$4 sm:$0xff]   ;;  %v759_v54 = vld [vmem:[%s1011_s1 + $0x1ac] ss:$16 sps:$4 sm:$0xff]   ;;  %v762_v56 = vld [vmem:[%s1011_s1 + $0x1a8] ss:$16 sps:$4 sm:$0xff]  }
  0x14   :  { %440 = vmatprep.subr.bf16.mxu0 %v709_v20  ;;  %483 = vmatprep.subr.bf16.mxu1 %v711_v21  ;;  %v763_v57 = vld [vmem:[%s1011_s1 + $0x1c4] ss:$16 sps:$4 sm:$0xff]   ;;  %v765_v58 = vld [vmem:[%s1011_s1 + $0x1cc] ss:$16 sps:$4 sm:$0xff]   ;;  %v767_v59 = vld [vmem:[%s1011_s1 + $0x1c0] ss:$16 sps:$4 sm:$0xff]  }
  0x15   :  { %v768_v60 = vld [vmem:[%s1011_s1 + $0x1c8] ss:$16 sps:$4 sm:$0xff]   ;;  %v769_v61 = vld [vmem:[%s1011_s1 + $0x1e4] ss:$16 sps:$4 sm:$0xff]   ;;  %v771_v62 = vld [vmem:[%s1011_s1 + $0x1ec] ss:$16 sps:$4 sm:$0xff]  }
  0x16   :  { %v773_v63 = vld [vmem:[%s1011_s1 + $0x1e0] ss:$16 sps:$4 sm:$0xff]   ;;  %v774_v0 = vld [vmem:[%s1011_s1 + $0x1e8] ss:$16 sps:$4 sm:$0xff]   ;;  %v546_v3 = vshrl.u32 %v545_v2, 7 }
  0x17   :  { %441 = vmatpush1.bf16.msra.mxu0 %v713_v22  ;;  %484 = vmatpush1.bf16.msra.mxu1 %v714_v23  ;;  %v775_v1 = vld [vmem:[%s1012_s0] ss:$8 sps:$4 sm:$0xff]  }
  0x18   :  { %442 = vmatprep.subr.bf16.mxu0 %v715_v24  ;;  %485 = vmatprep.subr.bf16.mxu1 %v717_v25  ;;  %v547_v4 = vsub.s32 0, %v546_v3  ;;  %v555_v5 = vsub.s32 2, %v546_v3  ;;  %v543_v6 = vld [vmem:[%s1013_s2] sm:$0xf]  ;;  %v551_v7 = vsub.s32 1, %v546_v3  ;;  %v559_v8 = vsub.s32 3, %v546_v3 }
  0x1a   :  { %v548_v9 = vrot.slane %v543_v6, %v547_v4  ;;  %v556_v10 = vrot.slane %v543_v6, %v555_v5  ;;  %v552_v11 = vrot.slane %v543_v6, %v551_v7  ;;  %v560_v12 = vrot.slane %v543_v6, %v559_v8 }
  0x1b   :  { %443 = vmatpush1.bf16.msra.mxu0 %v719_v26  ;;  %486 = vmatpush1.bf16.msra.mxu1 %v720_v27 }
  0x1c   :  { %444 = vmatprep.subr.bf16.mxu0 %v721_v28  ;;  %487 = vmatprep.subr.bf16.mxu1 %v723_v29 }
  0x1f   :  { %445 = vmatpush1.bf16.msra.mxu0 %v725_v30  ;;  %488 = vmatpush1.bf16.msra.mxu1 %v726_v31 }
  0x20   :  { %446 = vmatprep.subr.bf16.mxu0 %v727_v32  ;;  %489 = vmatprep.subr.bf16.mxu1 %v729_v33 }
  0x23   :  { %447 = vmatpush1.bf16.msra.mxu0 %v731_v34  ;;  %490 = vmatpush1.bf16.msra.mxu1 %v732_v35 }
  0x24   :  { %448 = vmatprep.subr.bf16.mxu0 %v733_v36  ;;  %491 = vmatprep.subr.bf16.mxu1 %v735_v37 }
  0x27   :  { %449 = vmatpush1.bf16.msra.mxu0 %v737_v38  ;;  %492 = vmatpush1.bf16.msra.mxu1 %v738_v39 }
  0x28   :  { %450 = vmatprep.subr.bf16.mxu0 %v739_v40  ;;  %493 = vmatprep.subr.bf16.mxu1 %v741_v41 }
  0x2b   :  { %451 = vmatpush1.bf16.msra.mxu0 %v743_v42  ;;  %494 = vmatpush1.bf16.msra.mxu1 %v744_v43 }
  0x2c   :  { %452 = vmatprep.subr.bf16.mxu0 %v745_v44  ;;  %495 = vmatprep.subr.bf16.mxu1 %v747_v45 }
  0x2f   :  { %453 = vmatpush1.bf16.msra.mxu0 %v749_v47  ;;  %496 = vmatpush1.bf16.msra.mxu1 %v750_v48 }
  0x30   :  { %454 = vmatprep.subr.bf16.mxu0 %v751_v49  ;;  %497 = vmatprep.subr.bf16.mxu1 %v753_v50 }
  0x33   :  { %455 = vmatpush1.bf16.msra.mxu0 %v755_v51  ;;  %498 = vmatpush1.bf16.msra.mxu1 %v756_v52 }
  0x34   :  { %456 = vmatprep.subr.bf16.mxu0 %v757_v53  ;;  %499 = vmatprep.subr.bf16.mxu1 %v759_v54 }
  0x37   :  { %457 = vmatpush1.bf16.msra.mxu0 %v761_v55  ;;  %500 = vmatpush1.bf16.msra.mxu1 %v762_v56 }
  0x38   :  { %458 = vmatprep.subr.bf16.mxu0 %v763_v57  ;;  %501 = vmatprep.subr.bf16.mxu1 %v765_v58 }
  0x3b   :  { %459 = vmatpush1.bf16.msra.mxu0 %v767_v59  ;;  %502 = vmatpush1.bf16.msra.mxu1 %v768_v60 }
  0x3c   :  { %460 = vmatprep.subr.bf16.mxu0 %v769_v61  ;;  %503 = vmatprep.subr.bf16.mxu1 %v771_v62 }
  0x3f   :  { %461 = vmatpush1.bf16.msra.mxu0 %v773_v63  ;;  %504 = vmatpush1.bf16.msra.mxu1 %v774_v0 }
  0x42   :  { %463 = vmatmul.mubr.bf16.vlgmr.msra.gmra.mrb[0].mxu0 %v775_v1  ;;  %506 = vmatmul.mubr.bf16.vlgmr.msra.gmra.mrb[0].mxu1 %v775_v1 }
 0x115   :  { %v464_v13 = vpop.f32.mrb[0].mxu0  ;;  %v507_v14 = vpop.f32.mrb[0].mxu1 }
 0x116   :  { %v565_v15 = vadd.f32 %v548_v9, %v464_v13  ;;  %v567_v16 = vadd.f32 %v556_v10, %v507_v14  ;;  %v466_v17 = vpop.f32.mrb[1].mxu0  ;;  %v509_v18 = vpop.f32.mrb[1].mxu1 }
 0x117   :  { %v566_v19 = vadd.f32 %v552_v11, %v466_v17  ;;  %v568_v20 = vadd.f32 %v560_v12, %v509_v18  ;;  %v468_v21 = vpop.f32.mrb[2].mxu0  ;;  %v511_v22 = vpop.f32.mrb[2].mxu1 }
 0x118   :  { %v569_v23 = vadd.f32 %v548_v9, %v468_v21  ;;  %v571_v24 = vadd.f32 %v556_v10, %v511_v22  ;;  %v470_v25 = vpop.f32.mrb[3].mxu0  ;;  %v513_v26 = vpop.f32.mrb[3].mxu1 }
 0x119   :  { %v675_v27 = vpack.c.bf16 %v566_v19, %v565_v15  ;;  %v676_v28 = vpack.c.bf16 %v568_v20, %v567_v16  ;;  %v570_v29 = vadd.f32 %v552_v11, %v470_v25  ;;  %v572_v30 = vadd.f32 %v560_v12, %v513_v26 }
 0x11b   :  { %597 = vst [vmem:[%s1014_s3] sm:$0xff] %v675_v27  ;;  %598 = vst [vmem:[%s1014_s3 + $0x8] sm:$0xff] %v676_v28  ;;  %v677_v31 = vpack.c.bf16 %v570_v29, %v569_v23  ;;  %v678_v32 = vpack.c.bf16 %v572_v30, %v571_v24 }
 0x11d   :  { %599 = vst [vmem:[%s1014_s3 + $0x10] sm:$0xff] %v677_v31  ;;  %600 = vst [vmem:[%s1014_s3 + $0x18] sm:$0xff] %v678_v32 }

// kernel: color_model_forward.39
= control target key start
LH: loop header
LB: loop body
LE: loop exit
PB: predicated region body
PF: predicated region fallthrough
CT: control target
= control target key end

     0   :  { %s1966_s12 = smov 0   ;;  %s1968_s13 = smov 0   ;;  %s2184_s0 = inlined_call_operand.vmem [shape: bf16[16,4608], index: 0, kind: input, shape index: {}]   ;;  %s2185_s1 = inlined_call_operand.vmem [shape: bf16[4608,512], index: 1, kind: input, shape index: {}]   ;;  %s2186_s2 = inlined_call_operand.vmem [shape: f32[1,512], index: 2, kind: input, shape index: {}]   ;;  %s2187_s3 = inlined_call_operand.vmem [shape: bf16[16,512], index: 3, kind: output, shape index: {}]  }
   0x1   :  { %s1970_s14 = smov 0   ;;  %s1972_s15 = smov 0  }
   0x2   :  { %s1974_s16 = smov 0  }
   0x3 LB: > { %s25_s17 = sadd.s32 1, %s1939_s15  ;;  %p48_p1 = scmp.ne.s32.totalorder %s1931_s13, %s1927_s12  ;;  %s1943_s16 = sphi %s1974_s16, %s13_s16   ;;  %s1939_s15 = sphi %s1972_s15, %s2191_s15   ;;  %s1935_s14 = sphi %s1970_s14, %s2190_s14   ;;  %s1931_s13 = sphi %s1968_s13, %s2189_s13   ;;  %s1927_s12 = sphi %s1966_s12, %s2188_s12  }
   0x4   : > { %p26_p0 = scmp.ge.s32.totalorder %s25_s17, 9  ;;  %p49_p2 = scmp.eq.s32.totalorder %s1943_s16, 0 }
   0x5   : > { %s41_s19 = sadd.s32 1, %s1931_s13  ;;  %p1501_p5 = scmp.ge.s32.totalorder %s1943_s16, 9 }
   0x6   : > { %s2193_s17 = smov (%p26_p0, %s25_s17), 0  ;;  %p50_p3 = por %p49_p2, %p48_p1 }
   0x7   : > { %s37_s18 = ssub.s32 %s1939_s15, %s2193_s17  ;;  %164 = sbr.rel (%p1501_p5) target bundleno = 21 (0x15), region = 20 }
   0x8   : > { %p39_p4 = scmp.eq.s32.totalorder %s37_s18, 0 }
   0xa   : > { %s2001_s20 = scalar_select %p39_p4, %s1931_s13, %s41_s19  }
   0xe   : > { %167 = sbr.rel (!%p50_p3) target bundleno = 21 (0x15), region = 24  ;;  %s169_s21 = sand.u32 (%p50_p3), 1, %s1931_s13  }
   0xf   : > { %s1652_s22 = sshll.u32 (%p50_p3), %s1939_s15, 4  ;;  %s1502_s23 = sshll.u32 (%p50_p3), %s169_s21, 5 }
  0x10   : > { %s177_s26 = scalar_lea.vmem (%p50_p3), %s2184_s0, %s1652_s22  ;;  %s171_s27 = scalar_lea.vmem (%p50_p3), [#allocation3], %s1502_s23 }
  0x11   : > { %v190_v0 = vld [vmem:[%s177_s26] sm:$0xff] (%p50_p3)  ;;  %v192_v1 = vld [vmem:[%s177_s26 + $0x8] sm:$0xff] (%p50_p3)  ;;  %v194_v2 = vld [vmem:[%s177_s26 + $0x90] sm:$0xff] (%p50_p3) }
  0x12   : > { %191 = vst [vmem:[%s171_s27] sm:$0xff] (%p50_p3), %v190_v0  ;;  %193 = vst [vmem:[%s171_s27 + $0x8] sm:$0xff] (%p50_p3), %v192_v1  ;;  %v196_v3 = vld [vmem:[%s177_s26 + $0x98] sm:$0xff] (%p50_p3) }
  0x13   : > { %195 = vst [vmem:[%s171_s27 + $0x10] sm:$0xff] (%p50_p3), %v194_v2  ;;  %197 = vst [vmem:[%s171_s27 + $0x18] sm:$0xff] (%p50_p3), %v196_v3 }
  0x15 PF: > { %p1505_p6 = scmp.ge.s32.totalorder %s1943_s16, 1  ;;  %p217_p7 = scmp.lt.s32.totalorder %s1943_s16, 10 }
  0x17   : > { %p218_p8 = pnand %p1505_p6, %p217_p7 }
  0x18   : > { %s224_s28 = sand.u32 (!%p218_p8), 1, %s1927_s12   ;;  %s1507_s29 = sshll.u32 (!%p218_p8), %s1935_s14, 6 }
  0x19   : > { %221 = sbr.rel (%p218_p8) target bundleno = 400 (0x190), region = 51  ;;  %s1506_s30 = sshll.u32 (!%p218_p8), %s224_s28, 5 }
  0x1a   : > { %p270_p9 = scmp.lt.s32.totalorder (!%p218_p8), %s1507_s29, 575  ;;  %s2018_s8 = scalar_lea.vmem (!%p218_p8), [#allocation3], %s1506_s30 }
  0x1b   : > { %p1510_p10 = scmp.ne.s32.totalorder (!%p218_p8), %s1935_s14, 0 }
  0x20   : > { %s2195_s29 = smov (!%p270_p9, %s1507_s29), 575  ;;  %300 = sbr.rel (%p1510_p10) target bundleno = 39 (0x27), region = 59 }
  0x21   : > { %s1653_s4 = sshll.u32 %s2195_s29, 4  ;;  %v1945_v4 = vmov (!%p1510_p10), 0.0  }
  0x22   : > { %s2016_s7 = scalar_lea.vmem %s2185_s1, %s1653_s4  ;;  %301 = vst [vmem:[#allocation2] sm:$0xff] (!%p1510_p10), %v1945_v4  ;;  %302 = vst [vmem:[#allocation2 + $0x8] sm:$0xff] (!%p1510_p10), %v1945_v4 }
  0x23   : > { %303 = vst [vmem:[#allocation2 + $0x10] sm:$0xff] (!%p1510_p10), %v1945_v4  ;;  %304 = vst [vmem:[#allocation2 + $0x18] sm:$0xff] (!%p1510_p10), %v1945_v4 }
  0x24   : > { %305 = vst [vmem:[#allocation2 + $0x20] sm:$0xff] (!%p1510_p10), %v1945_v4  ;;  %306 = vst [vmem:[#allocation2 + $0x28] sm:$0xff] (!%p1510_p10), %v1945_v4 }
  0x25   : > { %307 = vst [vmem:[#allocation2 + $0x30] sm:$0xff] (!%p1510_p10), %v1945_v4  ;;  %308 = vst [vmem:[#allocation2 + $0x38] sm:$0xff] (!%p1510_p10), %v1945_v4 }
  0x27 PF: > { %v1707_v5 = vld [vmem:[%s2016_s7 + $0x4] ss:$16 sps:$4 sm:$0xff]   ;;  %v1709_v6 = vld [vmem:[%s2016_s7 + $0xc] ss:$16 sps:$4 sm:$0xff]   ;;  %v1711_v7 = vld [vmem:[%s2016_s7] ss:$16 sps:$4 sm:$0xff]  }
  0x28   : > { %1109 = vmatprep.subr.bf16.mxu0 %v1707_v5  ;;  %v1712_v8 = vld [vmem:[%s2016_s7 + $0x8] ss:$16 sps:$4 sm:$0xff]   ;;  %1195 = vmatprep.subr.bf16.mxu1 %v1709_v6  ;;  %v1713_v9 = vld [vmem:[%s2016_s7 + $0x24] ss:$16 sps:$4 sm:$0xff]   ;;  %v1715_v10 = vld [vmem:[%s2016_s7 + $0x2c] ss:$16 sps:$4 sm:$0xff]  }
  0x29   : > { %1110 = vmatpush1.bf16.msra.mxu0 %v1711_v7  ;;  %1196 = vmatpush1.bf16.msra.mxu1 %v1712_v8  ;;  %v1717_v11 = vld [vmem:[%s2016_s7 + $0x20] ss:$16 sps:$4 sm:$0xff]   ;;  %v1718_v12 = vld [vmem:[%s2016_s7 + $0x28] ss:$16 sps:$4 sm:$0xff]   ;;  %v1719_v13 = vld [vmem:[%s2016_s7 + $0x44] ss:$16 sps:$4 sm:$0xff]  }
  0x2a   : > { %1111 = vmatprep.subr.bf16.mxu0 %v1713_v9  ;;  %1197 = vmatprep.subr.bf16.mxu1 %v1715_v10  ;;  %v1721_v14 = vld [vmem:[%s2016_s7 + $0x4c] ss:$16 sps:$4 sm:$0xff]   ;;  %v1723_v15 = vld [vmem:[%s2016_s7 + $0x40] ss:$16 sps:$4 sm:$0xff]   ;;  %v1724_v16 = vld [vmem:[%s2016_s7 + $0x48] ss:$16 sps:$4 sm:$0xff]  }
  0x2b   : > { %v1725_v17 = vld [vmem:[%s2016_s7 + $0x64] ss:$16 sps:$4 sm:$0xff]   ;;  %v1727_v18 = vld [vmem:[%s2016_s7 + $0x6c] ss:$16 sps:$4 sm:$0xff]   ;;  %v1729_v19 = vld [vmem:[%s2016_s7 + $0x60] ss:$16 sps:$4 sm:$0xff]  }
  0x2c   : > { %v1730_v20 = vld [vmem:[%s2016_s7 + $0x68] ss:$16 sps:$4 sm:$0xff]   ;;  %v1731_v21 = vld [vmem:[%s2016_s7 + $0x84] ss:$16 sps:$4 sm:$0xff]   ;;  %v1733_v22 = vld [vmem:[%s2016_s7 + $0x8c] ss:$16 sps:$4 sm:$0xff]  }
  0x2d   : > { %1112 = vmatpush1.bf16.msra.mxu0 %v1717_v11  ;;  %1198 = vmatpush1.bf16.msra.mxu1 %v1718_v12  ;;  %v1735_v23 = vld [vmem:[%s2016_s7 + $0x80] ss:$16 sps:$4 sm:$0xff]   ;;  %v1736_v24 = vld [vmem:[%s2016_s7 + $0x88] ss:$16 sps:$4 sm:$0xff]   ;;  %v1737_v25 = vld [vmem:[%s2016_s7 + $0xa4] ss:$16 sps:$4 sm:$0xff]  }
  0x2e   : > { %1113 = vmatprep.subr.bf16.mxu0 %v1719_v13  ;;  %1199 = vmatprep.subr.bf16.mxu1 %v1721_v14  ;;  %v1739_v26 = vld [vmem:[%s2016_s7 + $0xac] ss:$16 sps:$4 sm:$0xff]   ;;  %v1741_v27 = vld [vmem:[%s2016_s7 + $0xa0] ss:$16 sps:$4 sm:$0xff]   ;;  %v1742_v28 = vld [vmem:[%s2016_s7 + $0xa8] ss:$16 sps:$4 sm:$0xff]  }
  0x2f   : > { %v1743_v29 = vld [vmem:[%s2016_s7 + $0xc4] ss:$16 sps:$4 sm:$0xff]   ;;  %v1745_v30 = vld [vmem:[%s2016_s7 + $0xcc] ss:$16 sps:$4 sm:$0xff]   ;;  %v1747_v31 = vld [vmem:[%s2016_s7 + $0xc0] ss:$16 sps:$4 sm:$0xff]  }
  0x30   : > { %v1748_v32 = vld [vmem:[%s2016_s7 + $0xc8] ss:$16 sps:$4 sm:$0xff]   ;;  %v1749_v33 = vld [vmem:[%s2016_s7 + $0xe4] ss:$16 sps:$4 sm:$0xff]   ;;  %v1751_v34 = vld [vmem:[%s2016_s7 + $0xec] ss:$16 sps:$4 sm:$0xff]  }
  0x31   : > { %1114 = vmatpush1.bf16.msra.mxu0 %v1723_v15  ;;  %1200 = vmatpush1.bf16.msra.mxu1 %v1724_v16  ;;  %v1753_v35 = vld [vmem:[%s2016_s7 + $0xe0] ss:$16 sps:$4 sm:$0xff]   ;;  %v1754_v36 = vld [vmem:[%s2016_s7 + $0xe8] ss:$16 sps:$4 sm:$0xff]   ;;  %v1755_v37 = vld [vmem:[%s2016_s7 + $0x104] ss:$16 sps:$4 sm:$0xff]  }
  0x32   : > { %1115 = vmatprep.subr.bf16.mxu0 %v1725_v17  ;;  %1201 = vmatprep.subr.bf16.mxu1 %v1727_v18  ;;  %v1757_v38 = vld [vmem:[%s2016_s7 + $0x10c] ss:$16 sps:$4 sm:$0xff]   ;;  %v1759_v39 = vld [vmem:[%s2016_s7 + $0x100] ss:$16 sps:$4 sm:$0xff]   ;;  %v1760_v40 = vld [vmem:[%s2016_s7 + $0x108] ss:$16 sps:$4 sm:$0xff]  }
  0x33   : > { %v1761_v41 = vld [vmem:[%s2016_s7 + $0x124] ss:$16 sps:$4 sm:$0xff]   ;;  %v1763_v42 = vld [vmem:[%s2016_s7 + $0x12c] ss:$16 sps:$4 sm:$0xff]   ;;  %v1765_v43 = vld [vmem:[%s2016_s7 + $0x120] ss:$16 sps:$4 sm:$0xff]  }
  0x34   : > { %v1766_v44 = vld [vmem:[%s2016_s7 + $0x128] ss:$16 sps:$4 sm:$0xff]   ;;  %v1767_v45 = vld [vmem:[%s2016_s7 + $0x144] ss:$16 sps:$4 sm:$0xff]   ;;  %v1769_v46 = vld [vmem:[%s2016_s7 + $0x14c] ss:$16 sps:$4 sm:$0xff]  }
  0x35   : > { %1116 = vmatpush1.bf16.msra.mxu0 %v1729_v19  ;;  %1202 = vmatpush1.bf16.msra.mxu1 %v1730_v20  ;;  %v1771_v47 = vld [vmem:[%s2016_s7 + $0x140] ss:$16 sps:$4 sm:$0xff]   ;;  %v1772_v48 = vld [vmem:[%s2016_s7 + $0x148] ss:$16 sps:$4 sm:$0xff]   ;;  %v1773_v49 = vld [vmem:[%s2016_s7 + $0x164] ss:$16 sps:$4 sm:$0xff]  }
  0x36   : > { %1117 = vmatprep.subr.bf16.mxu0 %v1731_v21  ;;  %1203 = vmatprep.subr.bf16.mxu1 %v1733_v22  ;;  %v1775_v50 = vld [vmem:[%s2016_s7 + $0x16c] ss:$16 sps:$4 sm:$0xff]   ;;  %v1777_v51 = vld [vmem:[%s2016_s7 + $0x160] ss:$16 sps:$4 sm:$0xff]   ;;  %v1778_v52 = vld [vmem:[%s2016_s7 + $0x168] ss:$16 sps:$4 sm:$0xff]  }
  0x37   : > { %v1805_v53 = vld [vmem:[%s2018_s8 + $0x4] ss:$16 sps:$4 sm:$0xff]   ;;  %v1781_v55 = vld [vmem:[%s2016_s7 + $0x18c] ss:$16 sps:$4 sm:$0xff]   ;;  %v1783_v56 = vld [vmem:[%s2016_s7 + $0x180] ss:$16 sps:$4 sm:$0xff]  }
  0x38   : > { %v1779_v54 = vld [vmem:[%s2016_s7 + $0x184] ss:$16 sps:$4 sm:$0xff]   ;;  %1141 = vmatprep.mubr.bf16.mxu0 %v1805_v53  ;;  %1227 = vmatprep.mubr.bf16.mxu1 %v1805_v53  ;;  %v1784_v57 = vld [vmem:[%s2016_s7 + $0x188] ss:$16 sps:$4 sm:$0xff]   ;;  %v1787_v59 = vld [vmem:[%s2016_s7 + $0x1ac] ss:$16 sps:$4 sm:$0xff]  }
  0x39   : > { %1118 = vmatpush1.bf16.msra.mxu0 %v1735_v23  ;;  %1204 = vmatpush1.bf16.msra.mxu1 %v1736_v24  ;;  %v1785_v58 = vld [vmem:[%s2016_s7 + $0x1a4] ss:$16 sps:$4 sm:$0xff]   ;;  %v1789_v60 = vld [vmem:[%s2016_s7 + $0x1a0] ss:$16 sps:$4 sm:$0xff]   ;;  %v1790_v61 = vld [vmem:[%s2016_s7 + $0x1a8] ss:$16 sps:$4 sm:$0xff]  }
  0x3a   : > { %1119 = vmatprep.subr.bf16.mxu0 %v1737_v25  ;;  %1205 = vmatprep.subr.bf16.mxu1 %v1739_v26  ;;  %v1791_v62 = vld [vmem:[%s2016_s7 + $0x1c4] ss:$16 sps:$4 sm:$0xff]   ;;  %v1793_v63 = vld [vmem:[%s2016_s7 + $0x1cc] ss:$16 sps:$4 sm:$0xff]   ;;  %v1795_v0 = vld [vmem:[%s2016_s7 + $0x1c0] ss:$16 sps:$4 sm:$0xff]  }
  0x3b   : > { %v1796_v1 = vld [vmem:[%s2016_s7 + $0x1c8] ss:$16 sps:$4 sm:$0xff]   ;;  %v1797_v2 = vld [vmem:[%s2016_s7 + $0x1e4] ss:$16 sps:$4 sm:$0xff]   ;;  %v1799_v3 = vld [vmem:[%s2016_s7 + $0x1ec] ss:$16 sps:$4 sm:$0xff]  }
  0x3c   : > { %v1801_v4 = vld [vmem:[%s2016_s7 + $0x1e0] ss:$16 sps:$4 sm:$0xff]   ;;  %v1802_v5 = vld [vmem:[%s2016_s7 + $0x1e8] ss:$16 sps:$4 sm:$0xff]   ;;  %v1808_v6 = vld [vmem:[%s2016_s7 + $0x204] ss:$16 sps:$4 sm:$0xff]  }
  0x3d   : > { %1120 = vmatpush1.bf16.msra.mxu0 %v1741_v27  ;;  %1206 = vmatpush1.bf16.msra.mxu1 %v1742_v28  ;;  %v1811_v7 = vld [vmem:[%s2016_s7 + $0x20c] ss:$16 sps:$4 sm:$0xff]   ;;  %v1803_v8 = vld [vmem:[%s2018_s8] ss:$16 sps:$4 sm:$0xff]   ;;  %v1809_v10 = vld [vmem:[%s2016_s7 + $0x208] ss:$16 sps:$4 sm:$0xff]  }
  0x3e   : > { %1121 = vmatprep.subr.bf16.mxu0 %v1743_v29  ;;  %1207 = vmatprep.subr.bf16.mxu1 %v1745_v30  ;;  %v1806_v9 = vld [vmem:[%s2016_s7 + $0x200] ss:$16 sps:$4 sm:$0xff]   ;;  %v1814_v11 = vld [vmem:[%s2016_s7 + $0x224] ss:$16 sps:$4 sm:$0xff]   ;;  %v1817_v12 = vld [vmem:[%s2016_s7 + $0x22c] ss:$16 sps:$4 sm:$0xff]  }
  0x3f   : > { %v1812_v13 = vld [vmem:[%s2016_s7 + $0x220] ss:$16 sps:$4 sm:$0xff]   ;;  %v1815_v14 = vld [vmem:[%s2016_s7 + $0x228] ss:$16 sps:$4 sm:$0xff]   ;;  %v1820_v15 = vld [vmem:[%s2016_s7 + $0x244] ss:$16 sps:$4 sm:$0xff]  }
  0x40   : > { %v1823_v16 = vld [vmem:[%s2016_s7 + $0x24c] ss:$16 sps:$4 sm:$0xff]   ;;  %v1818_v17 = vld [vmem:[%s2016_s7 + $0x240] ss:$16 sps:$4 sm:$0xff]   ;;  %v1821_v18 = vld [vmem:[%s2016_s7 + $0x248] ss:$16 sps:$4 sm:$0xff]  }
  0x41   : > { %1122 = vmatpush1.bf16.msra.mxu0 %v1747_v31  ;;  %1208 = vmatpush1.bf16.msra.mxu1 %v1748_v32  ;;  %v1826_v19 = vld [vmem:[%s2016_s7 + $0x264] ss:$16 sps:$4 sm:$0xff]   ;;  %v1829_v20 = vld [vmem:[%s2016_s7 + $0x26c] ss:$16 sps:$4 sm:$0xff]   ;;  %v1824_v21 = vld [vmem:[%s2016_s7 + $0x260] ss:$16 sps:$4 sm:$0xff]  }
  0x42   : > { %1123 = vmatprep.subr.bf16.mxu0 %v1749_v33  ;;  %1209 = vmatprep.subr.bf16.mxu1 %v1751_v34  ;;  %v1827_v22 = vld [vmem:[%s2016_s7 + $0x268] ss:$16 sps:$4 sm:$0xff]   ;;  %v1832_v23 = vld [vmem:[%s2016_s7 + $0x284] ss:$16 sps:$4 sm:$0xff]   ;;  %v1835_v24 = vld [vmem:[%s2016_s7 + $0x28c] ss:$16 sps:$4 sm:$0xff]  }
  0x43   : > { %v1830_v25 = vld [vmem:[%s2016_s7 + $0x280] ss:$16 sps:$4 sm:$0xff]   ;;  %v1833_v26 = vld [vmem:[%s2016_s7 + $0x288] ss:$16 sps:$4 sm:$0xff]   ;;  %v1838_v27 = vld [vmem:[%s2016_s7 + $0x2a4] ss:$16 sps:$4 sm:$0xff]  }
  0x44   : > { %v1841_v28 = vld [vmem:[%s2016_s7 + $0x2ac] ss:$16 sps:$4 sm:$0xff]   ;;  %v1836_v29 = vld [vmem:[%s2016_s7 + $0x2a0] ss:$16 sps:$4 sm:$0xff]   ;;  %v1839_v30 = vld [vmem:[%s2016_s7 + $0x2a8] ss:$16 sps:$4 sm:$0xff]  }
  0x45   : > { %1124 = vmatpush1.bf16.msra.mxu0 %v1753_v35  ;;  %1210 = vmatpush1.bf16.msra.mxu1 %v1754_v36  ;;  %v1844_v31 = vld [vmem:[%s2016_s7 + $0x2c4] ss:$16 sps:$4 sm:$0xff]   ;;  %v1847_v32 = vld [vmem:[%s2016_s7 + $0x2cc] ss:$16 sps:$4 sm:$0xff]   ;;  %v1842_v34 = vld [vmem:[%s2016_s7 + $0x2c0] ss:$16 sps:$4 sm:$0xff]  }
  0x46   : > { %1125 = vmatprep.subr.bf16.mxu0 %v1755_v37  ;;  %1211 = vmatprep.subr.bf16.mxu1 %v1757_v38  ;;  %v1904_v33 = vld [vmem:[%s2018_s8 + $0xc] ss:$16 sps:$4 sm:$0xff]   ;;  %v1845_v35 = vld [vmem:[%s2016_s7 + $0x2c8] ss:$16 sps:$4 sm:$0xff]   ;;  %v1850_v36 = vld [vmem:[%s2016_s7 + $0x2e4] ss:$16 sps:$4 sm:$0xff]  }
  0x47   : > { %v1853_v37 = vld [vmem:[%s2016_s7 + $0x2ec] ss:$16 sps:$4 sm:$0xff]   ;;  %v1848_v38 = vld [vmem:[%s2016_s7 + $0x2e0] ss:$16 sps:$4 sm:$0xff]   ;;  %p1643_p11 = scmp.ne.s32.totalorder %s1935_s14, 8 }
  0x48   : > { %v1877_v53 = vld [vmem:[%s2016_s7 + $0x36c] ss:$16 sps:$4 sm:$0xff]  }
  0x49   : > { %1126 = vmatpush1.bf16.msra.mxu0 %v1759_v39  ;;  %1212 = vmatpush1.bf16.msra.mxu1 %v1760_v40  ;;  %v1851_v39 = vld [vmem:[%s2016_s7 + $0x2e8] ss:$16 sps:$4 sm:$0xff]   ;;  %v1856_v40 = vld [vmem:[%s2016_s7 + $0x304] ss:$16 sps:$4 sm:$0xff]  }
  0x4a   : > { %1127 = vmatprep.subr.bf16.mxu0 %v1761_v41  ;;  %1213 = vmatprep.subr.bf16.mxu1 %v1763_v42  ;;  %v1859_v41 = vld [vmem:[%s2016_s7 + $0x30c] ss:$16 sps:$4 sm:$0xff]   ;;  %v1854_v42 = vld [vmem:[%s2016_s7 + $0x300] ss:$16 sps:$4 sm:$0xff]  }
  0x4d   : > { %1128 = vmatpush1.bf16.msra.mxu0 %v1765_v43  ;;  %1214 = vmatpush1.bf16.msra.mxu1 %v1766_v44  ;;  %v1857_v43 = vld [vmem:[%s2016_s7 + $0x308] ss:$16 sps:$4 sm:$0xff]   ;;  %v1862_v44 = vld [vmem:[%s2016_s7 + $0x324] ss:$16 sps:$4 sm:$0xff]  }
  0x4e   : > { %1129 = vmatprep.subr.bf16.mxu0 %v1767_v45  ;;  %1215 = vmatprep.subr.bf16.mxu1 %v1769_v46  ;;  %v1865_v45 = vld [vmem:[%s2016_s7 + $0x32c] ss:$16 sps:$4 sm:$0xff]   ;;  %v1860_v46 = vld [vmem:[%s2016_s7 + $0x320] ss:$16 sps:$4 sm:$0xff]  }
  0x51   : > { %1130 = vmatpush1.bf16.msra.mxu0 %v1771_v47  ;;  %1216 = vmatpush1.bf16.msra.mxu1 %v1772_v48  ;;  %v1863_v47 = vld [vmem:[%s2016_s7 + $0x328] ss:$16 sps:$4 sm:$0xff]   ;;  %v1868_v48 = vld [vmem:[%s2016_s7 + $0x344] ss:$16 sps:$4 sm:$0xff]  }
  0x52   : > { %1131 = vmatprep.subr.bf16.mxu0 %v1773_v49  ;;  %1217 = vmatprep.subr.bf16.mxu1 %v1775_v50  ;;  %v1871_v49 = vld [vmem:[%s2016_s7 + $0x34c] ss:$16 sps:$4 sm:$0xff]   ;;  %v1866_v50 = vld [vmem:[%s2016_s7 + $0x340] ss:$16 sps:$4 sm:$0xff]  }
  0x55   : > { %1132 = vmatpush1.bf16.msra.mxu0 %v1777_v51  ;;  %1218 = vmatpush1.bf16.msra.mxu1 %v1778_v52  ;;  %v1869_v51 = vld [vmem:[%s2016_s7 + $0x348] ss:$16 sps:$4 sm:$0xff]   ;;  %v1874_v52 = vld [vmem:[%s2016_s7 + $0x364] ss:$16 sps:$4 sm:$0xff]  }
  0x56   : > { %1133 = vmatprep.subr.bf16.mxu0 %v1779_v54  ;;  %1219 = vmatprep.subr.bf16.mxu1 %v1781_v55  ;;  %v1872_v54 = vld [vmem:[%s2016_s7 + $0x360] ss:$16 sps:$4 sm:$0xff]   ;;  %v1875_v55 = vld [vmem:[%s2016_s7 + $0x368] ss:$16 sps:$4 sm:$0xff]  }
  0x59   : > { %1134 = vmatpush1.bf16.msra.mxu0 %v1783_v56  ;;  %1220 = vmatpush1.bf16.msra.mxu1 %v1784_v57  ;;  %v1880_v56 = vld [vmem:[%s2016_s7 + $0x384] ss:$16 sps:$4 sm:$0xff]   ;;  %v1883_v57 = vld [vmem:[%s2016_s7 + $0x38c] ss:$16 sps:$4 sm:$0xff]  }
  0x5a   : > { %1135 = vmatprep.subr.bf16.mxu0 %v1785_v58  ;;  %1221 = vmatprep.subr.bf16.mxu1 %v1787_v59  ;;  %v1878_v58 = vld [vmem:[%s2016_s7 + $0x380] ss:$16 sps:$4 sm:$0xff]   ;;  %v1881_v59 = vld [vmem:[%s2016_s7 + $0x388] ss:$16 sps:$4 sm:$0xff]  }
  0x5d   : > { %1136 = vmatpush1.bf16.msra.mxu0 %v1789_v60  ;;  %1222 = vmatpush1.bf16.msra.mxu1 %v1790_v61  ;;  %v1886_v60 = vld [vmem:[%s2016_s7 + $0x3a4] ss:$16 sps:$4 sm:$0xff]   ;;  %v1889_v61 = vld [vmem:[%s2016_s7 + $0x3ac] ss:$16 sps:$4 sm:$0xff]  }
  0x5e   : > { %1137 = vmatprep.subr.bf16.mxu0 %v1791_v62  ;;  %1223 = vmatprep.subr.bf16.mxu1 %v1793_v63  ;;  %v1884_v62 = vld [vmem:[%s2016_s7 + $0x3a0] ss:$16 sps:$4 sm:$0xff]   ;;  %v1887_v63 = vld [vmem:[%s2016_s7 + $0x3a8] ss:$16 sps:$4 sm:$0xff]  }
  0x61   : > { %1138 = vmatpush1.bf16.msra.mxu0 %v1795_v0  ;;  %1224 = vmatpush1.bf16.msra.mxu1 %v1796_v1  ;;  %v1892_v0 = vld [vmem:[%s2016_s7 + $0x3c4] ss:$16 sps:$4 sm:$0xff]   ;;  %v1895_v1 = vld [vmem:[%s2016_s7 + $0x3cc] ss:$16 sps:$4 sm:$0xff]  }
  0x62   : > { %1139 = vmatprep.subr.bf16.mxu0 %v1797_v2  ;;  %1225 = vmatprep.subr.bf16.mxu1 %v1799_v3  ;;  %v1890_v2 = vld [vmem:[%s2016_s7 + $0x3c0] ss:$16 sps:$4 sm:$0xff]   ;;  %v1893_v3 = vld [vmem:[%s2016_s7 + $0x3c8] ss:$16 sps:$4 sm:$0xff]  }
  0x65   : > { %1140 = vmatpush1.bf16.msra.mxu0 %v1801_v4  ;;  %1226 = vmatpush1.bf16.msra.mxu1 %v1802_v5  ;;  %v1898_v4 = vld [vmem:[%s2016_s7 + $0x3e4] ss:$16 sps:$4 sm:$0xff]   ;;  %v1901_v5 = vld [vmem:[%s2016_s7 + $0x3ec] ss:$16 sps:$4 sm:$0xff]  }
  0x66   : > { %1152 = vmatprep.subr.bf16.mxu0 %v1808_v6  ;;  %1238 = vmatprep.subr.bf16.mxu1 %v1811_v7  ;;  %v1896_v6 = vld [vmem:[%s2016_s7 + $0x3e0] ss:$16 sps:$4 sm:$0xff]   ;;  %v1899_v7 = vld [vmem:[%s2016_s7 + $0x3e8] ss:$16 sps:$4 sm:$0xff]  }
  0x68   : > { %1142 = vmatmul.mubr.bf16.vlgmr.msra.gmra.mrb[0].mxu0 %v1803_v8  ;;  %1228 = vmatmul.mubr.bf16.vlgmr.msra.gmra.mrb[0].mxu1 %v1803_v8  ;;  %v1902_v8 = vld [vmem:[%s2018_s8 + $0x8] ss:$16 sps:$4 sm:$0xff]  }
  0x69   : > { %1153 = vmatpush1.bf16.msra.mxu0 %v1806_v9  ;;  %1239 = vmatpush1.bf16.msra.mxu1 %v1809_v10  ;;  %v309_v9 = vld [vmem:[#allocation2] sm:$0xff]  ;;  %v311_v10 = vld [vmem:[#allocation2 + $0x10] sm:$0xff] }
  0x6a   : > { %1154 = vmatprep.subr.bf16.mxu0 %v1814_v11  ;;  %1240 = vmatprep.subr.bf16.mxu1 %v1817_v12  ;;  %v310_v11 = vld [vmem:[#allocation2 + $0x8] sm:$0xff]  ;;  %v312_v12 = vld [vmem:[#allocation2 + $0x18] sm:$0xff] }
  0x6b   : > { %1184 = vmatprep.mubr.bf16.mxu0 %v1904_v33  ;;  %1270 = vmatprep.mubr.bf16.mxu1 %v1904_v33  ;;  %v1311_v33 = vlaneseq (!%p1643_p11) }
  0x6d   : > { %1155 = vmatpush1.bf16.msra.mxu0 %v1812_v13  ;;  %1241 = vmatpush1.bf16.msra.mxu1 %v1815_v14 }
  0x6e   : > { %1156 = vmatprep.subr.bf16.mxu0 %v1820_v15  ;;  %1242 = vmatprep.subr.bf16.mxu1 %v1823_v16  ;;  %v313_v15 = vld [vmem:[#allocation2 + $0x20] sm:$0xff]  ;;  %v315_v16 = vld [vmem:[#allocation2 + $0x30] sm:$0xff] }
  0x71   : > { %1157 = vmatpush1.bf16.msra.mxu0 %v1818_v17  ;;  %1243 = vmatpush1.bf16.msra.mxu1 %v1821_v18 }
  0x72   : > { %1158 = vmatprep.subr.bf16.mxu0 %v1826_v19  ;;  %1244 = vmatprep.subr.bf16.mxu1 %v1829_v20 }
  0x75   : > { %1159 = vmatpush1.bf16.msra.mxu0 %v1824_v21  ;;  %1245 = vmatpush1.bf16.msra.mxu1 %v1827_v22  ;;  %v314_v21 = vld [vmem:[#allocation2 + $0x28] sm:$0xff]  ;;  %v316_v22 = vld [vmem:[#allocation2 + $0x38] sm:$0xff] }
  0x76   : > { %1160 = vmatprep.subr.bf16.mxu0 %v1832_v23  ;;  %1246 = vmatprep.subr.bf16.mxu1 %v1835_v24 }
  0x79   : > { %1161 = vmatpush1.bf16.msra.mxu0 %v1830_v25  ;;  %1247 = vmatpush1.bf16.msra.mxu1 %v1833_v26 }
  0x7a   : > { %1162 = vmatprep.subr.bf16.mxu0 %v1838_v27  ;;  %1248 = vmatprep.subr.bf16.mxu1 %v1841_v28 }
  0x7d   : > { %1163 = vmatpush1.bf16.msra.mxu0 %v1836_v29  ;;  %1249 = vmatpush1.bf16.msra.mxu1 %v1839_v30 }
  0x7e   : > { %1164 = vmatprep.subr.bf16.mxu0 %v1844_v31  ;;  %1250 = vmatprep.subr.bf16.mxu1 %v1847_v32 }
  0x81   : > { %1165 = vmatpush1.bf16.msra.mxu0 %v1842_v34  ;;  %1251 = vmatpush1.bf16.msra.mxu1 %v1845_v35  ;;  %v1312_v34 = vshrl.u32 (!%p1643_p11), %v1311_v33, 7  ;;  %v1309_v35 = vld [vmem:[%s2186_s2] sm:$0xf] (!%p1643_p11) }
  0x82   : > { %1166 = vmatprep.subr.bf16.mxu0 %v1850_v36  ;;  %1252 = vmatprep.subr.bf16.mxu1 %v1853_v37 }
  0x85   : > { %1167 = vmatpush1.bf16.msra.mxu0 %v1848_v38  ;;  %1253 = vmatpush1.bf16.msra.mxu1 %v1851_v39  ;;  %v1313_v38 = vsub.s32 (!%p1643_p11), 0, %v1312_v34  ;;  %v1317_v39 = vsub.s32 (!%p1643_p11), 1, %v1312_v34 }
  0x86   : > { %1168 = vmatprep.subr.bf16.mxu0 %v1856_v40  ;;  %1254 = vmatprep.subr.bf16.mxu1 %v1859_v41  ;;  %v1321_v40 = vsub.s32 (!%p1643_p11), 2, %v1312_v34  ;;  %v1325_v41 = vsub.s32 (!%p1643_p11), 3, %v1312_v34 }
  0x89   : > { %1169 = vmatpush1.bf16.msra.mxu0 %v1854_v42  ;;  %1255 = vmatpush1.bf16.msra.mxu1 %v1857_v43 }
  0x8a   : > { %1170 = vmatprep.subr.bf16.mxu0 %v1862_v44  ;;  %1256 = vmatprep.subr.bf16.mxu1 %v1865_v45  ;;  %v1314_v45 = vrot.slane (!%p1643_p11), %v1309_v35, %v1313_v38 }
  0x8d   : > { %1171 = vmatpush1.bf16.msra.mxu0 %v1860_v46  ;;  %1257 = vmatpush1.bf16.msra.mxu1 %v1863_v47  ;;  %v1318_v46 = vrot.slane (!%p1643_p11), %v1309_v35, %v1317_v39  ;;  %v1322_v47 = vrot.slane (!%p1643_p11), %v1309_v35, %v1321_v40 }
  0x8e   : > { %1172 = vmatprep.subr.bf16.mxu0 %v1868_v48  ;;  %1258 = vmatprep.subr.bf16.mxu1 %v1871_v49  ;;  %v1326_v48 = vrot.slane (!%p1643_p11), %v1309_v35, %v1325_v41 }
  0x91   : > { %1173 = vmatpush1.bf16.msra.mxu0 %v1866_v50  ;;  %1259 = vmatpush1.bf16.msra.mxu1 %v1869_v51 }
  0x92   : > { %1174 = vmatprep.subr.bf16.mxu0 %v1874_v52  ;;  %1260 = vmatprep.subr.bf16.mxu1 %v1877_v53 }
  0x95   : > { %1175 = vmatpush1.bf16.msra.mxu0 %v1872_v54  ;;  %1261 = vmatpush1.bf16.msra.mxu1 %v1875_v55 }
  0x96   : > { %1176 = vmatprep.subr.bf16.mxu0 %v1880_v56  ;;  %1262 = vmatprep.subr.bf16.mxu1 %v1883_v57 }
  0x99   : > { %1177 = vmatpush1.bf16.msra.mxu0 %v1878_v58  ;;  %1263 = vmatpush1.bf16.msra.mxu1 %v1881_v59 }
  0x9a   : > { %1178 = vmatprep.subr.bf16.mxu0 %v1886_v60  ;;  %1264 = vmatprep.subr.bf16.mxu1 %v1889_v61 }
  0x9d   : > { %1179 = vmatpush1.bf16.msra.mxu0 %v1884_v62  ;;  %1265 = vmatpush1.bf16.msra.mxu1 %v1887_v63 }
  0x9e   : > { %1180 = vmatprep.subr.bf16.mxu0 %v1892_v0  ;;  %1266 = vmatprep.subr.bf16.mxu1 %v1895_v1 }
  0xa1   : > { %1181 = vmatpush1.bf16.msra.mxu0 %v1890_v2  ;;  %1267 = vmatpush1.bf16.msra.mxu1 %v1893_v3 }
  0xa2   : > { %1182 = vmatprep.subr.bf16.mxu0 %v1898_v4  ;;  %1268 = vmatprep.subr.bf16.mxu1 %v1901_v5 }
  0xa5   : > { %1183 = vmatpush1.bf16.msra.mxu0 %v1896_v6  ;;  %1269 = vmatpush1.bf16.msra.mxu1 %v1899_v7 }
  0xa8   : > { %1185 = vmatmul.mubr.bf16.vlgmr.msra.gmra.mrb[0].mxu0 %v1902_v8  ;;  %1271 = vmatmul.mubr.bf16.vlgmr.msra.gmra.mrb[0].mxu1 %v1902_v8 }
 0x17b   : > { %v1186_v13 = vpop.f32.mrb[0].mxu0  ;;  %v1272_v14 = vpop.f32.mrb[0].mxu1  ;;  %1300 = sbr.rel (%p1643_p11) target bundleno = 400 (0x190), region = 63 }
 0x17c   : > { %v1281_v17 = vadd.f32 %v1186_v13, %v309_v9  ;;  %v1283_v18 = vadd.f32 %v1272_v14, %v311_v10  ;;  %v1188_v19 = vpop.f32.mrb[1].mxu0  ;;  %v1274_v20 = vpop.f32.mrb[1].mxu1 }
 0x17d   : > { %v1282_v23 = vadd.f32 %v1188_v19, %v310_v11  ;;  %v1284_v24 = vadd.f32 %v1274_v20, %v312_v12  ;;  %v1190_v25 = vpop.f32.mrb[2].mxu0  ;;  %v1276_v26 = vpop.f32.mrb[2].mxu1 }
 0x17e   : > { %1289 = vst [vmem:[#allocation2] sm:$0xff] %v1281_v17  ;;  %1291 = vst [vmem:[#allocation2 + $0x10] sm:$0xff] %v1283_v18  ;;  %v1285_v27 = vadd.f32 %v1190_v25, %v313_v15  ;;  %v1287_v28 = vadd.f32 %v1276_v26, %v315_v16  ;;  %v1192_v29 = vpop.f32.mrb[3].mxu0  ;;  %v1278_v30 = vpop.f32.mrb[3].mxu1 }
 0x17f   : > { %1290 = vst [vmem:[#allocation2 + $0x8] sm:$0xff] %v1282_v23  ;;  %1292 = vst [vmem:[#allocation2 + $0x18] sm:$0xff] %v1284_v24  ;;  %v1286_v31 = vadd.f32 %v1192_v29, %v314_v21  ;;  %v1288_v32 = vadd.f32 %v1278_v30, %v316_v22 }
 0x180   : > { %1293 = vst [vmem:[#allocation2 + $0x20] sm:$0xff] %v1285_v27  ;;  %1295 = vst [vmem:[#allocation2 + $0x30] sm:$0xff] %v1287_v28 }
 0x181   : > { %1294 = vst [vmem:[#allocation2 + $0x28] sm:$0xff] %v1286_v31  ;;  %1296 = vst [vmem:[#allocation2 + $0x38] sm:$0xff] %v1288_v32 }
 0x185   : > { %v1301_v36 = vld [vmem:[#allocation2] sm:$0xff]  ;;  %v1303_v42 = vld [vmem:[#allocation2 + $0x10] sm:$0xff] }
 0x186   : > { %v1302_v37 = vld [vmem:[#allocation2 + $0x8] sm:$0xff]  ;;  %v1304_v43 = vld [vmem:[#allocation2 + $0x18] sm:$0xff]  ;;  %v1331_v52 = vadd.f32 %v1314_v45, %v1301_v36  ;;  %v1333_v54 = vadd.f32 %v1322_v47, %v1303_v42 }
 0x187   : > { %v1305_v44 = vld [vmem:[#allocation2 + $0x20] sm:$0xff]  ;;  %v1307_v50 = vld [vmem:[#allocation2 + $0x30] sm:$0xff]  ;;  %v1332_v53 = vadd.f32 %v1318_v46, %v1302_v37  ;;  %v1334_v55 = vadd.f32 %v1326_v48, %v1304_v43 }
 0x188   : > { %v1306_v49 = vld [vmem:[#allocation2 + $0x28] sm:$0xff]  ;;  %v1308_v51 = vld [vmem:[#allocation2 + $0x38] sm:$0xff]  ;;  %v1335_v56 = vadd.f32 %v1314_v45, %v1305_v44  ;;  %v1337_v58 = vadd.f32 %v1322_v47, %v1307_v50  ;;  %v1339_v60 = vmax.f32 %v1331_v52, 0.0  ;;  %v1341_v62 = vmax.f32 %v1333_v54, 0.0 }
 0x189   : > { %v1336_v57 = vadd.f32 %v1318_v46, %v1306_v49  ;;  %v1338_v59 = vadd.f32 %v1326_v48, %v1308_v51  ;;  %v1340_v61 = vmax.f32 %v1332_v53, 0.0  ;;  %v1342_v63 = vmax.f32 %v1334_v55, 0.0 }
 0x18a   : > { %v1343_v0 = vmax.f32 %v1335_v56, 0.0  ;;  %v1345_v2 = vmax.f32 %v1337_v58, 0.0 }
 0x18b   : > { %v1344_v1 = vmax.f32 %v1336_v57, 0.0  ;;  %v1346_v3 = vmax.f32 %v1338_v59, 0.0  ;;  %v1654_v4 = vpack.c.bf16 %v1340_v61, %v1339_v60  ;;  %v1655_v5 = vpack.c.bf16 %v1342_v63, %v1341_v62 }
 0x18d   : > { %v1656_v6 = vpack.c.bf16 %v1344_v1, %v1343_v0  ;;  %v1657_v7 = vpack.c.bf16 %v1346_v3, %v1345_v2  ;;  %1371 = vst [vmem:[%s2187_s3] sm:$0xff] %v1654_v4  ;;  %1372 = vst [vmem:[%s2187_s3 + $0x8] sm:$0xff] %v1655_v5 }
 0x18f   : > { %1373 = vst [vmem:[%s2187_s3 + $0x10] sm:$0xff] %v1656_v6  ;;  %1374 = vst [vmem:[%s2187_s3 + $0x18] sm:$0xff] %v1657_v7 }
 0x190 PF: > { %s13_s16 = sadd.s32 1, %s1943_s16   ;;  %s2188_s12 = smov %s1931_s13 }
 0x191   : > { %p10_p12 = scmp.ge.s32.totalorder %s13_s16, 11   ;;  %s2189_s13 = smov %s2001_s20 }
 0x192   : > { %s2190_s14 = smov %s1939_s15  ;;  %s2191_s15 = smov %s2193_s17 }
 0x193   :  { %12 = sbr.rel (!%p10_p12) target bundleno = 3 (0x3), region = 104 }

// kernel: color_model_forward.38
= control target key start
LH: loop header
LB: loop body
LE: loop exit
PB: predicated region body
PF: predicated region fallthrough
CT: control target
= control target key end

     0   :  { %s2081_s15 = smov 0   ;;  %s2083_s16 = smov 0   ;;  %s2311_s0 = inlined_call_operand.vmem [shape: bf16[16,4608], index: 0, kind: input, shape index: {}]   ;;  %s2312_s1 = inlined_call_operand.vmem [shape: bf16[4608,512], index: 1, kind: input, shape index: {}]   ;;  %s2313_s2 = inlined_call_operand.vmem [shape: f32[1,512], index: 2, kind: input, shape index: {}]   ;;  %s2314_s3 = inlined_call_operand.vmem [shape: bf16[16,512], index: 3, kind: input, shape index: {}]   ;;  %s2315_s4 = inlined_call_operand.vmem [shape: bf16[16,512], index: 4, kind: output, shape index: {}]  }
   0x1   :  { %s2085_s17 = smov 0   ;;  %s2087_s18 = smov 0  }
   0x2   :  { %s2089_s19 = smov 0  }
   0x3 LB: > { %s26_s20 = sadd.s32 1, %s2049_s18  ;;  %p49_p1 = scmp.ne.s32.totalorder %s2041_s16, %s2037_s15  ;;  %s2053_s19 = sphi %s2089_s19, %s14_s19   ;;  %s2049_s18 = sphi %s2087_s18, %s2319_s18   ;;  %s2045_s17 = sphi %s2085_s17, %s2318_s17   ;;  %s2041_s16 = sphi %s2083_s16, %s2317_s16   ;;  %s2037_s15 = sphi %s2081_s15, %s2316_s15  }
   0x4   : > { %p27_p0 = scmp.ge.s32.totalorder %s26_s20, 9  ;;  %p50_p2 = scmp.eq.s32.totalorder %s2053_s19, 0 }
   0x5   : > { %s42_s22 = sadd.s32 1, %s2041_s16  ;;  %p1611_p5 = scmp.ge.s32.totalorder %s2053_s19, 9 }
   0x6   : > { %s2321_s20 = smov (%p27_p0, %s26_s20), 0  ;;  %p51_p3 = por %p50_p2, %p49_p1 }
   0x7   : > { %s38_s21 = ssub.s32 %s2049_s18, %s2321_s20  ;;  %208 = sbr.rel (%p1611_p5) target bundleno = 21 (0x15), region = 24 }
   0x8   : > { %p40_p4 = scmp.eq.s32.totalorder %s38_s21, 0 }
   0xa   : > { %s2116_s23 = scalar_select %p40_p4, %s2041_s16, %s42_s22  }
   0xe   : > { %211 = sbr.rel (!%p51_p3) target bundleno = 21 (0x15), region = 28  ;;  %s213_s24 = sand.u32 (%p51_p3), 1, %s2041_s16  }
   0xf   : > { %s1762_s25 = sshll.u32 (%p51_p3), %s2049_s18, 4  ;;  %s1612_s26 = sshll.u32 (%p51_p3), %s213_s24, 5 }
  0x10   : > { %s221_s29 = scalar_lea.vmem (%p51_p3), %s2311_s0, %s1762_s25  ;;  %s215_s30 = scalar_lea.vmem (%p51_p3), [#allocation3], %s1612_s26 }
  0x11   : > { %v234_v0 = vld [vmem:[%s221_s29] sm:$0xff] (%p51_p3)  ;;  %v236_v1 = vld [vmem:[%s221_s29 + $0x8] sm:$0xff] (%p51_p3)  ;;  %v238_v2 = vld [vmem:[%s221_s29 + $0x90] sm:$0xff] (%p51_p3) }
  0x12   : > { %235 = vst [vmem:[%s215_s30] sm:$0xff] (%p51_p3), %v234_v0  ;;  %237 = vst [vmem:[%s215_s30 + $0x8] sm:$0xff] (%p51_p3), %v236_v1  ;;  %v240_v3 = vld [vmem:[%s221_s29 + $0x98] sm:$0xff] (%p51_p3) }
  0x13   : > { %239 = vst [vmem:[%s215_s30 + $0x10] sm:$0xff] (%p51_p3), %v238_v2  ;;  %241 = vst [vmem:[%s215_s30 + $0x18] sm:$0xff] (%p51_p3), %v240_v3 }
  0x15 PF: > { %p1615_p6 = scmp.ge.s32.totalorder %s2053_s19, 1  ;;  %p261_p7 = scmp.lt.s32.totalorder %s2053_s19, 10 }
  0x17   : > { %p262_p8 = pnand %p1615_p6, %p261_p7 }
  0x18   : > { %s268_s5 = sand.u32 (!%p262_p8), 1, %s2037_s15   ;;  %s1617_s6 = sshll.u32 (!%p262_p8), %s2045_s17, 6 }
  0x19   : > { %265 = sbr.rel (%p262_p8) target bundleno = 402 (0x192), region = 55  ;;  %s1616_s7 = sshll.u32 (!%p262_p8), %s268_s5, 5 }
  0x1a   : > { %p326_p9 = scmp.lt.s32.totalorder (!%p262_p8), %s1617_s6, 575  ;;  %s2133_s12 = scalar_lea.vmem (!%p262_p8), [#allocation3], %s1616_s7 }
  0x1b   : > { %p1620_p10 = scmp.ne.s32.totalorder (!%p262_p8), %s2045_s17, 0 }
  0x20   : > { %s2323_s6 = smov (!%p326_p9, %s1617_s6), 575  ;;  %368 = sbr.rel (%p1620_p10) target bundleno = 39 (0x27), region = 63 }
  0x21   : > { %s1763_s8 = sshll.u32 %s2323_s6, 4  ;;  %v2055_v4 = vmov (!%p1620_p10), 0.0  }
  0x22   : > { %s2131_s11 = scalar_lea.vmem %s2312_s1, %s1763_s8  ;;  %369 = vst [vmem:[#allocation2] sm:$0xff] (!%p1620_p10), %v2055_v4  ;;  %370 = vst [vmem:[#allocation2 + $0x8] sm:$0xff] (!%p1620_p10), %v2055_v4 }
  0x23   : > { %371 = vst [vmem:[#allocation2 + $0x10] sm:$0xff] (!%p1620_p10), %v2055_v4  ;;  %372 = vst [vmem:[#allocation2 + $0x18] sm:$0xff] (!%p1620_p10), %v2055_v4 }
  0x24   : > { %373 = vst [vmem:[#allocation2 + $0x20] sm:$0xff] (!%p1620_p10), %v2055_v4  ;;  %374 = vst [vmem:[#allocation2 + $0x28] sm:$0xff] (!%p1620_p10), %v2055_v4 }
  0x25   : > { %375 = vst [vmem:[#allocation2 + $0x30] sm:$0xff] (!%p1620_p10), %v2055_v4  ;;  %376 = vst [vmem:[#allocation2 + $0x38] sm:$0xff] (!%p1620_p10), %v2055_v4 }
  0x27 PF: > { %v1817_v5 = vld [vmem:[%s2131_s11 + $0x4] ss:$16 sps:$4 sm:$0xff]   ;;  %v1819_v6 = vld [vmem:[%s2131_s11 + $0xc] ss:$16 sps:$4 sm:$0xff]   ;;  %v1821_v7 = vld [vmem:[%s2131_s11] ss:$16 sps:$4 sm:$0xff]  }
  0x28   : > { %1177 = vmatprep.subr.bf16.mxu0 %v1817_v5  ;;  %v1822_v8 = vld [vmem:[%s2131_s11 + $0x8] ss:$16 sps:$4 sm:$0xff]   ;;  %1263 = vmatprep.subr.bf16.mxu1 %v1819_v6  ;;  %v1823_v9 = vld [vmem:[%s2131_s11 + $0x24] ss:$16 sps:$4 sm:$0xff]   ;;  %v1825_v10 = vld [vmem:[%s2131_s11 + $0x2c] ss:$16 sps:$4 sm:$0xff]  }
  0x29   : > { %1178 = vmatpush1.bf16.msra.mxu0 %v1821_v7  ;;  %1264 = vmatpush1.bf16.msra.mxu1 %v1822_v8  ;;  %v1827_v11 = vld [vmem:[%s2131_s11 + $0x20] ss:$16 sps:$4 sm:$0xff]   ;;  %v1828_v12 = vld [vmem:[%s2131_s11 + $0x28] ss:$16 sps:$4 sm:$0xff]   ;;  %v1829_v13 = vld [vmem:[%s2131_s11 + $0x44] ss:$16 sps:$4 sm:$0xff]  }
  0x2a   : > { %1179 = vmatprep.subr.bf16.mxu0 %v1823_v9  ;;  %1265 = vmatprep.subr.bf16.mxu1 %v1825_v10  ;;  %v1831_v14 = vld [vmem:[%s2131_s11 + $0x4c] ss:$16 sps:$4 sm:$0xff]   ;;  %v1833_v15 = vld [vmem:[%s2131_s11 + $0x40] ss:$16 sps:$4 sm:$0xff]   ;;  %v1834_v16 = vld [vmem:[%s2131_s11 + $0x48] ss:$16 sps:$4 sm:$0xff]  }
  0x2b   : > { %v1835_v17 = vld [vmem:[%s2131_s11 + $0x64] ss:$16 sps:$4 sm:$0xff]   ;;  %v1837_v18 = vld [vmem:[%s2131_s11 + $0x6c] ss:$16 sps:$4 sm:$0xff]   ;;  %v1839_v19 = vld [vmem:[%s2131_s11 + $0x60] ss:$16 sps:$4 sm:$0xff]  }
  0x2c   : > { %v1840_v20 = vld [vmem:[%s2131_s11 + $0x68] ss:$16 sps:$4 sm:$0xff]   ;;  %v1841_v21 = vld [vmem:[%s2131_s11 + $0x84] ss:$16 sps:$4 sm:$0xff]   ;;  %v1843_v22 = vld [vmem:[%s2131_s11 + $0x8c] ss:$16 sps:$4 sm:$0xff]  }
  0x2d   : > { %1180 = vmatpush1.bf16.msra.mxu0 %v1827_v11  ;;  %1266 = vmatpush1.bf16.msra.mxu1 %v1828_v12  ;;  %v1845_v23 = vld [vmem:[%s2131_s11 + $0x80] ss:$16 sps:$4 sm:$0xff]   ;;  %v1846_v24 = vld [vmem:[%s2131_s11 + $0x88] ss:$16 sps:$4 sm:$0xff]   ;;  %v1847_v25 = vld [vmem:[%s2131_s11 + $0xa4] ss:$16 sps:$4 sm:$0xff]  }
  0x2e   : > { %1181 = vmatprep.subr.bf16.mxu0 %v1829_v13  ;;  %1267 = vmatprep.subr.bf16.mxu1 %v1831_v14  ;;  %v1849_v26 = vld [vmem:[%s2131_s11 + $0xac] ss:$16 sps:$4 sm:$0xff]   ;;  %v1851_v27 = vld [vmem:[%s2131_s11 + $0xa0] ss:$16 sps:$4 sm:$0xff]   ;;  %v1852_v28 = vld [vmem:[%s2131_s11 + $0xa8] ss:$16 sps:$4 sm:$0xff]  }
  0x2f   : > { %v1853_v29 = vld [vmem:[%s2131_s11 + $0xc4] ss:$16 sps:$4 sm:$0xff]   ;;  %v1855_v30 = vld [vmem:[%s2131_s11 + $0xcc] ss:$16 sps:$4 sm:$0xff]   ;;  %v1857_v31 = vld [vmem:[%s2131_s11 + $0xc0] ss:$16 sps:$4 sm:$0xff]  }
  0x30   : > { %v1858_v32 = vld [vmem:[%s2131_s11 + $0xc8] ss:$16 sps:$4 sm:$0xff]   ;;  %v1859_v33 = vld [vmem:[%s2131_s11 + $0xe4] ss:$16 sps:$4 sm:$0xff]   ;;  %v1861_v34 = vld [vmem:[%s2131_s11 + $0xec] ss:$16 sps:$4 sm:$0xff]  }
  0x31   : > { %1182 = vmatpush1.bf16.msra.mxu0 %v1833_v15  ;;  %1268 = vmatpush1.bf16.msra.mxu1 %v1834_v16  ;;  %v1863_v35 = vld [vmem:[%s2131_s11 + $0xe0] ss:$16 sps:$4 sm:$0xff]   ;;  %v1864_v36 = vld [vmem:[%s2131_s11 + $0xe8] ss:$16 sps:$4 sm:$0xff]   ;;  %v1865_v37 = vld [vmem:[%s2131_s11 + $0x104] ss:$16 sps:$4 sm:$0xff]  }
  0x32   : > { %1183 = vmatprep.subr.bf16.mxu0 %v1835_v17  ;;  %1269 = vmatprep.subr.bf16.mxu1 %v1837_v18  ;;  %v1867_v38 = vld [vmem:[%s2131_s11 + $0x10c] ss:$16 sps:$4 sm:$0xff]   ;;  %v1869_v39 = vld [vmem:[%s2131_s11 + $0x100] ss:$16 sps:$4 sm:$0xff]   ;;  %v1870_v40 = vld [vmem:[%s2131_s11 + $0x108] ss:$16 sps:$4 sm:$0xff]  }
  0x33   : > { %v1871_v41 = vld [vmem:[%s2131_s11 + $0x124] ss:$16 sps:$4 sm:$0xff]   ;;  %v1873_v42 = vld [vmem:[%s2131_s11 + $0x12c] ss:$16 sps:$4 sm:$0xff]   ;;  %v1875_v43 = vld [vmem:[%s2131_s11 + $0x120] ss:$16 sps:$4 sm:$0xff]  }
  0x34   : > { %v1876_v44 = vld [vmem:[%s2131_s11 + $0x128] ss:$16 sps:$4 sm:$0xff]   ;;  %v1877_v45 = vld [vmem:[%s2131_s11 + $0x144] ss:$16 sps:$4 sm:$0xff]   ;;  %v1879_v46 = vld [vmem:[%s2131_s11 + $0x14c] ss:$16 sps:$4 sm:$0xff]  }
  0x35   : > { %1184 = vmatpush1.bf16.msra.mxu0 %v1839_v19  ;;  %1270 = vmatpush1.bf16.msra.mxu1 %v1840_v20  ;;  %v1881_v47 = vld [vmem:[%s2131_s11 + $0x140] ss:$16 sps:$4 sm:$0xff]   ;;  %v1882_v48 = vld [vmem:[%s2131_s11 + $0x148] ss:$16 sps:$4 sm:$0xff]   ;;  %v1883_v49 = vld [vmem:[%s2131_s11 + $0x164] ss:$16 sps:$4 sm:$0xff]  }
  0x36   : > { %1185 = vmatprep.subr.bf16.mxu0 %v1841_v21  ;;  %1271 = vmatprep.subr.bf16.mxu1 %v1843_v22  ;;  %v1885_v50 = vld [vmem:[%s2131_s11 + $0x16c] ss:$16 sps:$4 sm:$0xff]   ;;  %v1887_v51 = vld [vmem:[%s2131_s11 + $0x160] ss:$16 sps:$4 sm:$0xff]   ;;  %v1888_v52 = vld [vmem:[%s2131_s11 + $0x168] ss:$16 sps:$4 sm:$0xff]  }
  0x37   : > { %v1915_v53 = vld [vmem:[%s2133_s12 + $0x4] ss:$16 sps:$4 sm:$0xff]   ;;  %v1891_v55 = vld [vmem:[%s2131_s11 + $0x18c] ss:$16 sps:$4 sm:$0xff]   ;;  %v1893_v56 = vld [vmem:[%s2131_s11 + $0x180] ss:$16 sps:$4 sm:$0xff]  }
  0x38   : > { %v1889_v54 = vld [vmem:[%s2131_s11 + $0x184] ss:$16 sps:$4 sm:$0xff]   ;;  %1209 = vmatprep.mubr.bf16.mxu0 %v1915_v53  ;;  %1295 = vmatprep.mubr.bf16.mxu1 %v1915_v53  ;;  %v1894_v57 = vld [vmem:[%s2131_s11 + $0x188] ss:$16 sps:$4 sm:$0xff]   ;;  %v1897_v59 = vld [vmem:[%s2131_s11 + $0x1ac] ss:$16 sps:$4 sm:$0xff]  }
  0x39   : > { %1186 = vmatpush1.bf16.msra.mxu0 %v1845_v23  ;;  %1272 = vmatpush1.bf16.msra.mxu1 %v1846_v24  ;;  %v1895_v58 = vld [vmem:[%s2131_s11 + $0x1a4] ss:$16 sps:$4 sm:$0xff]   ;;  %v1899_v60 = vld [vmem:[%s2131_s11 + $0x1a0] ss:$16 sps:$4 sm:$0xff]   ;;  %v1900_v61 = vld [vmem:[%s2131_s11 + $0x1a8] ss:$16 sps:$4 sm:$0xff]  }
  0x3a   : > { %1187 = vmatprep.subr.bf16.mxu0 %v1847_v25  ;;  %1273 = vmatprep.subr.bf16.mxu1 %v1849_v26  ;;  %v1901_v62 = vld [vmem:[%s2131_s11 + $0x1c4] ss:$16 sps:$4 sm:$0xff]   ;;  %v1903_v63 = vld [vmem:[%s2131_s11 + $0x1cc] ss:$16 sps:$4 sm:$0xff]   ;;  %v1905_v0 = vld [vmem:[%s2131_s11 + $0x1c0] ss:$16 sps:$4 sm:$0xff]  }
  0x3b   : > { %v1906_v1 = vld [vmem:[%s2131_s11 + $0x1c8] ss:$16 sps:$4 sm:$0xff]   ;;  %v1907_v2 = vld [vmem:[%s2131_s11 + $0x1e4] ss:$16 sps:$4 sm:$0xff]   ;;  %v1909_v3 = vld [vmem:[%s2131_s11 + $0x1ec] ss:$16 sps:$4 sm:$0xff]  }
  0x3c   : > { %v1911_v4 = vld [vmem:[%s2131_s11 + $0x1e0] ss:$16 sps:$4 sm:$0xff]   ;;  %v1912_v5 = vld [vmem:[%s2131_s11 + $0x1e8] ss:$16 sps:$4 sm:$0xff]   ;;  %v1918_v6 = vld [vmem:[%s2131_s11 + $0x204] ss:$16 sps:$4 sm:$0xff]  }
  0x3d   : > { %1188 = vmatpush1.bf16.msra.mxu0 %v1851_v27  ;;  %1274 = vmatpush1.bf16.msra.mxu1 %v1852_v28  ;;  %v1921_v7 = vld [vmem:[%s2131_s11 + $0x20c] ss:$16 sps:$4 sm:$0xff]   ;;  %v1913_v8 = vld [vmem:[%s2133_s12] ss:$16 sps:$4 sm:$0xff]   ;;  %v1919_v10 = vld [vmem:[%s2131_s11 + $0x208] ss:$16 sps:$4 sm:$0xff]  }
  0x3e   : > { %1189 = vmatprep.subr.bf16.mxu0 %v1853_v29  ;;  %1275 = vmatprep.subr.bf16.mxu1 %v1855_v30  ;;  %v1916_v9 = vld [vmem:[%s2131_s11 + $0x200] ss:$16 sps:$4 sm:$0xff]   ;;  %v1924_v11 = vld [vmem:[%s2131_s11 + $0x224] ss:$16 sps:$4 sm:$0xff]   ;;  %v1927_v12 = vld [vmem:[%s2131_s11 + $0x22c] ss:$16 sps:$4 sm:$0xff]  }
  0x3f   : > { %v1922_v13 = vld [vmem:[%s2131_s11 + $0x220] ss:$16 sps:$4 sm:$0xff]   ;;  %v1925_v14 = vld [vmem:[%s2131_s11 + $0x228] ss:$16 sps:$4 sm:$0xff]   ;;  %v1930_v15 = vld [vmem:[%s2131_s11 + $0x244] ss:$16 sps:$4 sm:$0xff]  }
  0x40   : > { %v1933_v16 = vld [vmem:[%s2131_s11 + $0x24c] ss:$16 sps:$4 sm:$0xff]   ;;  %v1928_v17 = vld [vmem:[%s2131_s11 + $0x240] ss:$16 sps:$4 sm:$0xff]   ;;  %v1931_v18 = vld [vmem:[%s2131_s11 + $0x248] ss:$16 sps:$4 sm:$0xff]  }
  0x41   : > { %1190 = vmatpush1.bf16.msra.mxu0 %v1857_v31  ;;  %1276 = vmatpush1.bf16.msra.mxu1 %v1858_v32  ;;  %v1936_v19 = vld [vmem:[%s2131_s11 + $0x264] ss:$16 sps:$4 sm:$0xff]   ;;  %v1939_v20 = vld [vmem:[%s2131_s11 + $0x26c] ss:$16 sps:$4 sm:$0xff]   ;;  %v1934_v21 = vld [vmem:[%s2131_s11 + $0x260] ss:$16 sps:$4 sm:$0xff]  }
  0x42   : > { %1191 = vmatprep.subr.bf16.mxu0 %v1859_v33  ;;  %1277 = vmatprep.subr.bf16.mxu1 %v1861_v34  ;;  %v1937_v22 = vld [vmem:[%s2131_s11 + $0x268] ss:$16 sps:$4 sm:$0xff]   ;;  %v1942_v23 = vld [vmem:[%s2131_s11 + $0x284] ss:$16 sps:$4 sm:$0xff]   ;;  %v1945_v24 = vld [vmem:[%s2131_s11 + $0x28c] ss:$16 sps:$4 sm:$0xff]  }
  0x43   : > { %v1940_v25 = vld [vmem:[%s2131_s11 + $0x280] ss:$16 sps:$4 sm:$0xff]   ;;  %v1943_v26 = vld [vmem:[%s2131_s11 + $0x288] ss:$16 sps:$4 sm:$0xff]   ;;  %v1948_v27 = vld [vmem:[%s2131_s11 + $0x2a4] ss:$16 sps:$4 sm:$0xff]  }
  0x44   : > { %v1951_v28 = vld [vmem:[%s2131_s11 + $0x2ac] ss:$16 sps:$4 sm:$0xff]   ;;  %v1946_v29 = vld [vmem:[%s2131_s11 + $0x2a0] ss:$16 sps:$4 sm:$0xff]   ;;  %v1949_v30 = vld [vmem:[%s2131_s11 + $0x2a8] ss:$16 sps:$4 sm:$0xff]  }
  0x45   : > { %1192 = vmatpush1.bf16.msra.mxu0 %v1863_v35  ;;  %1278 = vmatpush1.bf16.msra.mxu1 %v1864_v36  ;;  %v1954_v31 = vld [vmem:[%s2131_s11 + $0x2c4] ss:$16 sps:$4 sm:$0xff]   ;;  %v1957_v32 = vld [vmem:[%s2131_s11 + $0x2cc] ss:$16 sps:$4 sm:$0xff]   ;;  %v1952_v34 = vld [vmem:[%s2131_s11 + $0x2c0] ss:$16 sps:$4 sm:$0xff]  }
  0x46   : > { %1193 = vmatprep.subr.bf16.mxu0 %v1865_v37  ;;  %1279 = vmatprep.subr.bf16.mxu1 %v1867_v38  ;;  %v2014_v33 = vld [vmem:[%s2133_s12 + $0xc] ss:$16 sps:$4 sm:$0xff]   ;;  %v1955_v35 = vld [vmem:[%s2131_s11 + $0x2c8] ss:$16 sps:$4 sm:$0xff]   ;;  %v1960_v36 = vld [vmem:[%s2131_s11 + $0x2e4] ss:$16 sps:$4 sm:$0xff]  }
  0x47   : > { %v1963_v37 = vld [vmem:[%s2131_s11 + $0x2ec] ss:$16 sps:$4 sm:$0xff]   ;;  %v1958_v38 = vld [vmem:[%s2131_s11 + $0x2e0] ss:$16 sps:$4 sm:$0xff]   ;;  %p1753_p11 = scmp.ne.s32.totalorder %s2045_s17, 8 }
  0x48   : > { %v1987_v53 = vld [vmem:[%s2131_s11 + $0x36c] ss:$16 sps:$4 sm:$0xff]  }
  0x49   : > { %1194 = vmatpush1.bf16.msra.mxu0 %v1869_v39  ;;  %1280 = vmatpush1.bf16.msra.mxu1 %v1870_v40  ;;  %v1961_v39 = vld [vmem:[%s2131_s11 + $0x2e8] ss:$16 sps:$4 sm:$0xff]   ;;  %v1966_v40 = vld [vmem:[%s2131_s11 + $0x304] ss:$16 sps:$4 sm:$0xff]  }
  0x4a   : > { %1195 = vmatprep.subr.bf16.mxu0 %v1871_v41  ;;  %1281 = vmatprep.subr.bf16.mxu1 %v1873_v42  ;;  %v1969_v41 = vld [vmem:[%s2131_s11 + $0x30c] ss:$16 sps:$4 sm:$0xff]   ;;  %v1964_v42 = vld [vmem:[%s2131_s11 + $0x300] ss:$16 sps:$4 sm:$0xff]  }
  0x4d   : > { %1196 = vmatpush1.bf16.msra.mxu0 %v1875_v43  ;;  %1282 = vmatpush1.bf16.msra.mxu1 %v1876_v44  ;;  %v1967_v43 = vld [vmem:[%s2131_s11 + $0x308] ss:$16 sps:$4 sm:$0xff]   ;;  %v1972_v44 = vld [vmem:[%s2131_s11 + $0x324] ss:$16 sps:$4 sm:$0xff]  }
  0x4e   : > { %1197 = vmatprep.subr.bf16.mxu0 %v1877_v45  ;;  %1283 = vmatprep.subr.bf16.mxu1 %v1879_v46  ;;  %v1975_v45 = vld [vmem:[%s2131_s11 + $0x32c] ss:$16 sps:$4 sm:$0xff]   ;;  %v1970_v46 = vld [vmem:[%s2131_s11 + $0x320] ss:$16 sps:$4 sm:$0xff]  }
  0x51   : > { %1198 = vmatpush1.bf16.msra.mxu0 %v1881_v47  ;;  %1284 = vmatpush1.bf16.msra.mxu1 %v1882_v48  ;;  %v1973_v47 = vld [vmem:[%s2131_s11 + $0x328] ss:$16 sps:$4 sm:$0xff]   ;;  %v1978_v48 = vld [vmem:[%s2131_s11 + $0x344] ss:$16 sps:$4 sm:$0xff]  }
  0x52   : > { %1199 = vmatprep.subr.bf16.mxu0 %v1883_v49  ;;  %1285 = vmatprep.subr.bf16.mxu1 %v1885_v50  ;;  %v1981_v49 = vld [vmem:[%s2131_s11 + $0x34c] ss:$16 sps:$4 sm:$0xff]   ;;  %v1976_v50 = vld [vmem:[%s2131_s11 + $0x340] ss:$16 sps:$4 sm:$0xff]  }
  0x55   : > { %1200 = vmatpush1.bf16.msra.mxu0 %v1887_v51  ;;  %1286 = vmatpush1.bf16.msra.mxu1 %v1888_v52  ;;  %v1979_v51 = vld [vmem:[%s2131_s11 + $0x348] ss:$16 sps:$4 sm:$0xff]   ;;  %v1984_v52 = vld [vmem:[%s2131_s11 + $0x364] ss:$16 sps:$4 sm:$0xff]  }
  0x56   : > { %1201 = vmatprep.subr.bf16.mxu0 %v1889_v54  ;;  %1287 = vmatprep.subr.bf16.mxu1 %v1891_v55  ;;  %v1982_v54 = vld [vmem:[%s2131_s11 + $0x360] ss:$16 sps:$4 sm:$0xff]   ;;  %v1985_v55 = vld [vmem:[%s2131_s11 + $0x368] ss:$16 sps:$4 sm:$0xff]  }
  0x59   : > { %1202 = vmatpush1.bf16.msra.mxu0 %v1893_v56  ;;  %1288 = vmatpush1.bf16.msra.mxu1 %v1894_v57  ;;  %v1990_v56 = vld [vmem:[%s2131_s11 + $0x384] ss:$16 sps:$4 sm:$0xff]   ;;  %v1993_v57 = vld [vmem:[%s2131_s11 + $0x38c] ss:$16 sps:$4 sm:$0xff]  }
  0x5a   : > { %1203 = vmatprep.subr.bf16.mxu0 %v1895_v58  ;;  %1289 = vmatprep.subr.bf16.mxu1 %v1897_v59  ;;  %v1988_v58 = vld [vmem:[%s2131_s11 + $0x380] ss:$16 sps:$4 sm:$0xff]   ;;  %v1991_v59 = vld [vmem:[%s2131_s11 + $0x388] ss:$16 sps:$4 sm:$0xff]  }
  0x5d   : > { %1204 = vmatpush1.bf16.msra.mxu0 %v1899_v60  ;;  %1290 = vmatpush1.bf16.msra.mxu1 %v1900_v61  ;;  %v1996_v60 = vld [vmem:[%s2131_s11 + $0x3a4] ss:$16 sps:$4 sm:$0xff]   ;;  %v1999_v61 = vld [vmem:[%s2131_s11 + $0x3ac] ss:$16 sps:$4 sm:$0xff]  }
  0x5e   : > { %1205 = vmatprep.subr.bf16.mxu0 %v1901_v62  ;;  %1291 = vmatprep.subr.bf16.mxu1 %v1903_v63  ;;  %v1994_v62 = vld [vmem:[%s2131_s11 + $0x3a0] ss:$16 sps:$4 sm:$0xff]   ;;  %v1997_v63 = vld [vmem:[%s2131_s11 + $0x3a8] ss:$16 sps:$4 sm:$0xff]  }
  0x61   : > { %1206 = vmatpush1.bf16.msra.mxu0 %v1905_v0  ;;  %1292 = vmatpush1.bf16.msra.mxu1 %v1906_v1  ;;  %v2002_v0 = vld [vmem:[%s2131_s11 + $0x3c4] ss:$16 sps:$4 sm:$0xff]   ;;  %v2005_v1 = vld [vmem:[%s2131_s11 + $0x3cc] ss:$16 sps:$4 sm:$0xff]  }
  0x62   : > { %1207 = vmatprep.subr.bf16.mxu0 %v1907_v2  ;;  %1293 = vmatprep.subr.bf16.mxu1 %v1909_v3  ;;  %v2000_v2 = vld [vmem:[%s2131_s11 + $0x3c0] ss:$16 sps:$4 sm:$0xff]   ;;  %v2003_v3 = vld [vmem:[%s2131_s11 + $0x3c8] ss:$16 sps:$4 sm:$0xff]  }
  0x65   : > { %1208 = vmatpush1.bf16.msra.mxu0 %v1911_v4  ;;  %1294 = vmatpush1.bf16.msra.mxu1 %v1912_v5  ;;  %v2008_v4 = vld [vmem:[%s2131_s11 + $0x3e4] ss:$16 sps:$4 sm:$0xff]   ;;  %v2011_v5 = vld [vmem:[%s2131_s11 + $0x3ec] ss:$16 sps:$4 sm:$0xff]  }
  0x66   : > { %1220 = vmatprep.subr.bf16.mxu0 %v1918_v6  ;;  %1306 = vmatprep.subr.bf16.mxu1 %v1921_v7  ;;  %v2006_v6 = vld [vmem:[%s2131_s11 + $0x3e0] ss:$16 sps:$4 sm:$0xff]   ;;  %v2009_v7 = vld [vmem:[%s2131_s11 + $0x3e8] ss:$16 sps:$4 sm:$0xff]  }
  0x68   : > { %1210 = vmatmul.mubr.bf16.vlgmr.msra.gmra.mrb[0].mxu0 %v1913_v8  ;;  %1296 = vmatmul.mubr.bf16.vlgmr.msra.gmra.mrb[0].mxu1 %v1913_v8  ;;  %v2012_v8 = vld [vmem:[%s2133_s12 + $0x8] ss:$16 sps:$4 sm:$0xff]  }
  0x69   : > { %1221 = vmatpush1.bf16.msra.mxu0 %v1916_v9  ;;  %1307 = vmatpush1.bf16.msra.mxu1 %v1919_v10  ;;  %v377_v9 = vld [vmem:[#allocation2] sm:$0xff]  ;;  %v379_v10 = vld [vmem:[#allocation2 + $0x10] sm:$0xff] }
  0x6a   : > { %1222 = vmatprep.subr.bf16.mxu0 %v1924_v11  ;;  %1308 = vmatprep.subr.bf16.mxu1 %v1927_v12  ;;  %v378_v11 = vld [vmem:[#allocation2 + $0x8] sm:$0xff]  ;;  %v380_v12 = vld [vmem:[#allocation2 + $0x18] sm:$0xff] }
  0x6b   : > { %1252 = vmatprep.mubr.bf16.mxu0 %v2014_v33  ;;  %1338 = vmatprep.mubr.bf16.mxu1 %v2014_v33  ;;  %v1379_v33 = vlaneseq (!%p1753_p11) }
  0x6d   : > { %1223 = vmatpush1.bf16.msra.mxu0 %v1922_v13  ;;  %1309 = vmatpush1.bf16.msra.mxu1 %v1925_v14 }
  0x6e   : > { %1224 = vmatprep.subr.bf16.mxu0 %v1930_v15  ;;  %1310 = vmatprep.subr.bf16.mxu1 %v1933_v16  ;;  %v381_v15 = vld [vmem:[#allocation2 + $0x20] sm:$0xff]  ;;  %v383_v16 = vld [vmem:[#allocation2 + $0x30] sm:$0xff] }
  0x71   : > { %1225 = vmatpush1.bf16.msra.mxu0 %v1928_v17  ;;  %1311 = vmatpush1.bf16.msra.mxu1 %v1931_v18 }
  0x72   : > { %1226 = vmatprep.subr.bf16.mxu0 %v1936_v19  ;;  %1312 = vmatprep.subr.bf16.mxu1 %v1939_v20 }
  0x75   : > { %1227 = vmatpush1.bf16.msra.mxu0 %v1934_v21  ;;  %1313 = vmatpush1.bf16.msra.mxu1 %v1937_v22  ;;  %v382_v21 = vld [vmem:[#allocation2 + $0x28] sm:$0xff]  ;;  %v384_v22 = vld [vmem:[#allocation2 + $0x38] sm:$0xff] }
  0x76   : > { %1228 = vmatprep.subr.bf16.mxu0 %v1942_v23  ;;  %1314 = vmatprep.subr.bf16.mxu1 %v1945_v24 }
  0x79   : > { %1229 = vmatpush1.bf16.msra.mxu0 %v1940_v25  ;;  %1315 = vmatpush1.bf16.msra.mxu1 %v1943_v26 }
  0x7a   : > { %1230 = vmatprep.subr.bf16.mxu0 %v1948_v27  ;;  %1316 = vmatprep.subr.bf16.mxu1 %v1951_v28 }
  0x7d   : > { %1231 = vmatpush1.bf16.msra.mxu0 %v1946_v29  ;;  %1317 = vmatpush1.bf16.msra.mxu1 %v1949_v30 }
  0x7e   : > { %1232 = vmatprep.subr.bf16.mxu0 %v1954_v31  ;;  %1318 = vmatprep.subr.bf16.mxu1 %v1957_v32 }
  0x81   : > { %1233 = vmatpush1.bf16.msra.mxu0 %v1952_v34  ;;  %1319 = vmatpush1.bf16.msra.mxu1 %v1955_v35  ;;  %v1380_v34 = vshrl.u32 (!%p1753_p11), %v1379_v33, 7  ;;  %v1407_v35 = vld [vmem:[%s2314_s3] sm:$0xff] (!%p1753_p11) }
  0x82   : > { %1234 = vmatprep.subr.bf16.mxu0 %v1960_v36  ;;  %1320 = vmatprep.subr.bf16.mxu1 %v1963_v37  ;;  %v1408_v36 = vld [vmem:[%s2314_s3 + $0x8] sm:$0xff] (!%p1753_p11) }
  0x85   : > { %1235 = vmatpush1.bf16.msra.mxu0 %v1958_v38  ;;  %1321 = vmatpush1.bf16.msra.mxu1 %v1961_v39  ;;  %v1377_v39 = vld [vmem:[%s2313_s2] sm:$0xf] (!%p1753_p11) }
  0x86   : > { %1236 = vmatprep.subr.bf16.mxu0 %v1966_v40  ;;  %1322 = vmatprep.subr.bf16.mxu1 %v1969_v41  ;;  %v1381_v40 = vsub.s32 (!%p1753_p11), 0, %v1380_v34  ;;  %v1385_v41 = vsub.s32 (!%p1753_p11), 1, %v1380_v34 }
  0x89   : > { %1237 = vmatpush1.bf16.msra.mxu0 %v1964_v42  ;;  %1323 = vmatpush1.bf16.msra.mxu1 %v1967_v43  ;;  %v1389_v42 = vsub.s32 (!%p1753_p11), 2, %v1380_v34  ;;  %v1393_v43 = vsub.s32 (!%p1753_p11), 3, %v1380_v34 }
  0x8a   : > { %1238 = vmatprep.subr.bf16.mxu0 %v1972_v44  ;;  %1324 = vmatprep.subr.bf16.mxu1 %v1975_v45  ;;  %v1409_v44 = vld [vmem:[%s2314_s3 + $0x10] sm:$0xff] (!%p1753_p11)  ;;  %v1410_v45 = vld [vmem:[%s2314_s3 + $0x18] sm:$0xff] (!%p1753_p11) }
  0x8d   : > { %1239 = vmatpush1.bf16.msra.mxu0 %v1970_v46  ;;  %1325 = vmatpush1.bf16.msra.mxu1 %v1973_v47  ;;  %v1411_v46 = vunpack.c.l.bf16 (!%p1753_p11), %v1407_v35  ;;  %v1412_v47 = vunpack.c.h.bf16 (!%p1753_p11), %v1407_v35 }
  0x8e   : > { %1240 = vmatprep.subr.bf16.mxu0 %v1978_v48  ;;  %1326 = vmatprep.subr.bf16.mxu1 %v1981_v49 }
  0x91   : > { %1241 = vmatpush1.bf16.msra.mxu0 %v1976_v50  ;;  %1327 = vmatpush1.bf16.msra.mxu1 %v1979_v51  ;;  %v1413_v50 = vunpack.c.l.bf16 (!%p1753_p11), %v1408_v36  ;;  %v1414_v51 = vunpack.c.h.bf16 (!%p1753_p11), %v1408_v36 }
  0x92   : > { %1242 = vmatprep.subr.bf16.mxu0 %v1984_v52  ;;  %1328 = vmatprep.subr.bf16.mxu1 %v1987_v53  ;;  %v1382_v53 = vrot.slane (!%p1753_p11), %v1377_v39, %v1381_v40 }
  0x95   : > { %1243 = vmatpush1.bf16.msra.mxu0 %v1982_v54  ;;  %1329 = vmatpush1.bf16.msra.mxu1 %v1985_v55  ;;  %v1386_v54 = vrot.slane (!%p1753_p11), %v1377_v39, %v1385_v41  ;;  %v1390_v55 = vrot.slane (!%p1753_p11), %v1377_v39, %v1389_v42 }
  0x96   : > { %1244 = vmatprep.subr.bf16.mxu0 %v1990_v56  ;;  %1330 = vmatprep.subr.bf16.mxu1 %v1993_v57  ;;  %v1394_v56 = vrot.slane (!%p1753_p11), %v1377_v39, %v1393_v43 }
  0x99   : > { %1245 = vmatpush1.bf16.msra.mxu0 %v1988_v58  ;;  %1331 = vmatpush1.bf16.msra.mxu1 %v1991_v59 }
  0x9a   : > { %1246 = vmatprep.subr.bf16.mxu0 %v1996_v60  ;;  %1332 = vmatprep.subr.bf16.mxu1 %v1999_v61  ;;  %v1415_v60 = vunpack.c.l.bf16 (!%p1753_p11), %v1409_v44  ;;  %v1416_v61 = vunpack.c.h.bf16 (!%p1753_p11), %v1409_v44 }
  0x9d   : > { %1247 = vmatpush1.bf16.msra.mxu0 %v1994_v62  ;;  %1333 = vmatpush1.bf16.msra.mxu1 %v1997_v63  ;;  %v1417_v62 = vunpack.c.l.bf16 (!%p1753_p11), %v1410_v45  ;;  %v1418_v63 = vunpack.c.h.bf16 (!%p1753_p11), %v1410_v45 }
  0x9e   : > { %1248 = vmatprep.subr.bf16.mxu0 %v2002_v0  ;;  %1334 = vmatprep.subr.bf16.mxu1 %v2005_v1 }
  0xa1   : > { %1249 = vmatpush1.bf16.msra.mxu0 %v2000_v2  ;;  %1335 = vmatpush1.bf16.msra.mxu1 %v2003_v3 }
  0xa2   : > { %1250 = vmatprep.subr.bf16.mxu0 %v2008_v4  ;;  %1336 = vmatprep.subr.bf16.mxu1 %v2011_v5 }
  0xa5   : > { %1251 = vmatpush1.bf16.msra.mxu0 %v2006_v6  ;;  %1337 = vmatpush1.bf16.msra.mxu1 %v2009_v7 }
  0xa8   : > { %1253 = vmatmul.mubr.bf16.vlgmr.msra.gmra.mrb[0].mxu0 %v2012_v8  ;;  %1339 = vmatmul.mubr.bf16.vlgmr.msra.gmra.mrb[0].mxu1 %v2012_v8 }
 0x17b   : > { %v1254_v13 = vpop.f32.mrb[0].mxu0  ;;  %v1340_v14 = vpop.f32.mrb[0].mxu1  ;;  %1368 = sbr.rel (%p1753_p11) target bundleno = 402 (0x192), region = 67 }
 0x17c   : > { %v1349_v17 = vadd.f32 %v1254_v13, %v377_v9  ;;  %v1351_v18 = vadd.f32 %v1340_v14, %v379_v10  ;;  %v1256_v19 = vpop.f32.mrb[1].mxu0  ;;  %v1342_v20 = vpop.f32.mrb[1].mxu1 }
 0x17d   : > { %v1350_v23 = vadd.f32 %v1256_v19, %v378_v11  ;;  %v1352_v24 = vadd.f32 %v1342_v20, %v380_v12  ;;  %v1258_v25 = vpop.f32.mrb[2].mxu0  ;;  %v1344_v26 = vpop.f32.mrb[2].mxu1 }
 0x17e   : > { %1357 = vst [vmem:[#allocation2] sm:$0xff] %v1349_v17  ;;  %1359 = vst [vmem:[#allocation2 + $0x10] sm:$0xff] %v1351_v18  ;;  %v1353_v27 = vadd.f32 %v1258_v25, %v381_v15  ;;  %v1355_v28 = vadd.f32 %v1344_v26, %v383_v16  ;;  %v1260_v29 = vpop.f32.mrb[3].mxu0  ;;  %v1346_v30 = vpop.f32.mrb[3].mxu1 }
 0x17f   : > { %1358 = vst [vmem:[#allocation2 + $0x8] sm:$0xff] %v1350_v23  ;;  %1360 = vst [vmem:[#allocation2 + $0x18] sm:$0xff] %v1352_v24  ;;  %v1354_v31 = vadd.f32 %v1260_v29, %v382_v21  ;;  %v1356_v32 = vadd.f32 %v1346_v30, %v384_v22 }
 0x180   : > { %1361 = vst [vmem:[#allocation2 + $0x20] sm:$0xff] %v1353_v27  ;;  %1363 = vst [vmem:[#allocation2 + $0x30] sm:$0xff] %v1355_v28 }
 0x181   : > { %1362 = vst [vmem:[#allocation2 + $0x28] sm:$0xff] %v1354_v31  ;;  %1364 = vst [vmem:[#allocation2 + $0x38] sm:$0xff] %v1356_v32 }
 0x185   : > { %v1369_v37 = vld [vmem:[#allocation2] sm:$0xff]  ;;  %v1371_v48 = vld [vmem:[#allocation2 + $0x10] sm:$0xff] }
 0x186   : > { %v1370_v38 = vld [vmem:[#allocation2 + $0x8] sm:$0xff]  ;;  %v1372_v49 = vld [vmem:[#allocation2 + $0x18] sm:$0xff]  ;;  %v1399_v0 = vadd.f32 %v1382_v53, %v1369_v37  ;;  %v1401_v2 = vadd.f32 %v1390_v55, %v1371_v48 }
 0x187   : > { %v1373_v52 = vld [vmem:[#allocation2 + $0x20] sm:$0xff]  ;;  %v1375_v58 = vld [vmem:[#allocation2 + $0x30] sm:$0xff]  ;;  %v1400_v1 = vadd.f32 %v1386_v54, %v1370_v38  ;;  %v1402_v3 = vadd.f32 %v1394_v56, %v1372_v49 }
 0x188   : > { %v1374_v57 = vld [vmem:[#allocation2 + $0x28] sm:$0xff]  ;;  %v1376_v59 = vld [vmem:[#allocation2 + $0x38] sm:$0xff]  ;;  %v1403_v4 = vadd.f32 %v1382_v53, %v1373_v52  ;;  %v1405_v6 = vadd.f32 %v1390_v55, %v1375_v58  ;;  %v1419_v8 = vadd.f32 %v1411_v46, %v1399_v0  ;;  %v1421_v10 = vadd.f32 %v1413_v50, %v1401_v2 }
 0x189   : > { %v1404_v5 = vadd.f32 %v1386_v54, %v1374_v57  ;;  %v1406_v7 = vadd.f32 %v1394_v56, %v1376_v59  ;;  %v1420_v9 = vadd.f32 %v1412_v47, %v1400_v1  ;;  %v1422_v11 = vadd.f32 %v1414_v51, %v1402_v3 }
 0x18a   : > { %v1423_v12 = vadd.f32 %v1415_v60, %v1403_v4  ;;  %v1425_v14 = vadd.f32 %v1417_v62, %v1405_v6  ;;  %v1427_v16 = vmax.f32 %v1419_v8, 0.0  ;;  %v1429_v18 = vmax.f32 %v1421_v10, 0.0 }
 0x18b   : > { %v1424_v13 = vadd.f32 %v1416_v61, %v1404_v5  ;;  %v1426_v15 = vadd.f32 %v1418_v63, %v1406_v7  ;;  %v1428_v17 = vmax.f32 %v1420_v9, 0.0  ;;  %v1430_v19 = vmax.f32 %v1422_v11, 0.0 }
 0x18c   : > { %v1431_v20 = vmax.f32 %v1423_v12, 0.0  ;;  %v1433_v22 = vmax.f32 %v1425_v14, 0.0 }
 0x18d   : > { %v1432_v21 = vmax.f32 %v1424_v13, 0.0  ;;  %v1434_v23 = vmax.f32 %v1426_v15, 0.0  ;;  %v1764_v24 = vpack.c.bf16 %v1428_v17, %v1427_v16  ;;  %v1765_v25 = vpack.c.bf16 %v1430_v19, %v1429_v18 }
 0x18f   : > { %v1766_v26 = vpack.c.bf16 %v1432_v21, %v1431_v20  ;;  %v1767_v27 = vpack.c.bf16 %v1434_v23, %v1433_v22  ;;  %1459 = vst [vmem:[%s2315_s4] sm:$0xff] %v1764_v24  ;;  %1460 = vst [vmem:[%s2315_s4 + $0x8] sm:$0xff] %v1765_v25 }
 0x191   : > { %1461 = vst [vmem:[%s2315_s4 + $0x10] sm:$0xff] %v1766_v26  ;;  %1462 = vst [vmem:[%s2315_s4 + $0x18] sm:$0xff] %v1767_v27 }
 0x192 PF: > { %s14_s19 = sadd.s32 1, %s2053_s19   ;;  %s2316_s15 = smov %s2041_s16 }
 0x193   : > { %p11_p12 = scmp.ge.s32.totalorder %s14_s19, 11   ;;  %s2317_s16 = smov %s2116_s23 }
 0x194   : > { %s2318_s17 = smov %s2049_s18  ;;  %s2319_s18 = smov %s2321_s20 }
 0x195   :  { %13 = sbr.rel (!%p11_p12) target bundleno = 3 (0x3), region = 111 }

// kernel: color_model_forward.41
= control target key start
LH: loop header
LB: loop body
LE: loop exit
PB: predicated region body
PF: predicated region fallthrough
CT: control target
= control target key end

     0   :  { %s665_s1 = inlined_call_operand.vmem [shape: bf16[512,128], index: 1, kind: input, shape index: {}]   ;;  %s666_s0 = inlined_call_operand.vmem [shape: bf16[16,512], index: 0, kind: input, shape index: {}]   ;;  %s667_s2 = inlined_call_operand.vmem [shape: f32[1,128], index: 2, kind: input, shape index: {}]   ;;  %s668_s3 = inlined_call_operand.vmem [shape: f32[16,128], index: 3, kind: output, shape index: {}]  }
   0x1   :  { %v490_v0 = vld [vmem:[%s665_s1 + $0x40] sm:$0xff]   ;;  %v494_v4 = vld [vmem:[%s665_s1 + $0x48] sm:$0xff]   ;;  %v498_v8 = vld [vmem:[%s665_s1 + $0x50] sm:$0xff]  }
   0x2   :  { %v491_v1 = vld [vmem:[%s665_s1 + $0xc0] sm:$0xff]   ;;  %446 = vmatprep.subr.bf16.mxu0 %v490_v0  ;;  %v495_v5 = vld [vmem:[%s665_s1 + $0xc8] sm:$0xff]   ;;  %v499_v9 = vld [vmem:[%s665_s1 + $0xd0] sm:$0xff]  }
   0x3   :  { %v492_v2 = vld [vmem:[%s665_s1] sm:$0xff]   ;;  %468 = vmatprep.subr.bf16.mxu1 %v491_v1  ;;  %v496_v6 = vld [vmem:[%s665_s1 + $0x8] sm:$0xff]   ;;  %v500_v10 = vld [vmem:[%s665_s1 + $0x10] sm:$0xff]  }
   0x4   :  { %v493_v3 = vld [vmem:[%s665_s1 + $0x80] sm:$0xff]   ;;  %447 = vmatpush3.bf16.msra.mxu0 %v492_v2  ;;  %v497_v7 = vld [vmem:[%s665_s1 + $0x88] sm:$0xff]   ;;  %v501_v11 = vld [vmem:[%s665_s1 + $0x90] sm:$0xff]  }
   0x5   :  { %469 = vmatpush3.bf16.msra.mxu1 %v493_v3  ;;  %448 = vmatprep.subr.bf16.mxu0 %v494_v4  ;;  %v502_v12 = vld [vmem:[%s665_s1 + $0x58] sm:$0xff]   ;;  %v506_v16 = vld [vmem:[%s665_s1 + $0x60] sm:$0xff]   ;;  %v510_v20 = vld [vmem:[%s665_s1 + $0x68] sm:$0xff]  }
   0x6   :  { %470 = vmatprep.subr.bf16.mxu1 %v495_v5  ;;  %v503_v13 = vld [vmem:[%s665_s1 + $0xd8] sm:$0xff]   ;;  %v507_v17 = vld [vmem:[%s665_s1 + $0xe0] sm:$0xff]   ;;  %v511_v21 = vld [vmem:[%s665_s1 + $0xe8] sm:$0xff]  }
   0x7   :  { %v504_v14 = vld [vmem:[%s665_s1 + $0x18] sm:$0xff]   ;;  %v508_v18 = vld [vmem:[%s665_s1 + $0x20] sm:$0xff]   ;;  %v512_v22 = vld [vmem:[%s665_s1 + $0x28] sm:$0xff]  }
   0x8   :  { %449 = vmatpush3.bf16.msra.mxu0 %v496_v6  ;;  %v505_v15 = vld [vmem:[%s665_s1 + $0x98] sm:$0xff]   ;;  %v509_v19 = vld [vmem:[%s665_s1 + $0xa0] sm:$0xff]   ;;  %v513_v23 = vld [vmem:[%s665_s1 + $0xa8] sm:$0xff]  }
   0x9   :  { %471 = vmatpush3.bf16.msra.mxu1 %v497_v7  ;;  %450 = vmatprep.subr.bf16.mxu0 %v498_v8  ;;  %v514_v24 = vld [vmem:[%s665_s1 + $0x70] sm:$0xff]   ;;  %v518_v28 = vld [vmem:[%s665_s1 + $0x78] sm:$0xff]   ;;  %v445_v45 = vld [vmem:[%s667_s2] ss:$0 sm:$0xff] }
   0xa   :  { %472 = vmatprep.subr.bf16.mxu1 %v499_v9  ;;  %v515_v25 = vld [vmem:[%s665_s1 + $0xf0] sm:$0xff]   ;;  %v519_v29 = vld [vmem:[%s665_s1 + $0xf8] sm:$0xff]  }
   0xb   :  { %v516_v26 = vld [vmem:[%s665_s1 + $0x30] sm:$0xff]   ;;  %v520_v30 = vld [vmem:[%s665_s1 + $0x38] sm:$0xff]  }
   0xc   :  { %451 = vmatpush3.bf16.msra.mxu0 %v500_v10  ;;  %v517_v27 = vld [vmem:[%s665_s1 + $0xb0] sm:$0xff]   ;;  %v521_v31 = vld [vmem:[%s665_s1 + $0xb8] sm:$0xff]  }
   0xd   :  { %473 = vmatpush3.bf16.msra.mxu1 %v501_v11  ;;  %452 = vmatprep.subr.bf16.mxu0 %v502_v12  ;;  %v522_v32 = vld [vmem:[%s666_s0] ss:$16 sps:$4 sm:$0xff]   ;;  %v524_v33 = vld [vmem:[%s666_s0 + $0x4] ss:$16 sps:$4 sm:$0xff]   ;;  %v525_v34 = vld [vmem:[%s666_s0 + $0x8] ss:$16 sps:$4 sm:$0xff]  }
   0xe   :  { %474 = vmatprep.subr.bf16.mxu1 %v503_v13  ;;  %v527_v35 = vld [vmem:[%s666_s0 + $0xc] ss:$16 sps:$4 sm:$0xff]   ;;  %335 = vmatprep.mubr.bf16.mxu0 %v524_v33 }
   0xf   :  { %376 = vmatprep.mubr.bf16.mxu1 %v527_v35 }
  0x10   :  { %453 = vmatpush3.bf16.msra.mxu0 %v504_v14 }
  0x11   :  { %475 = vmatpush3.bf16.msra.mxu1 %v505_v15  ;;  %454 = vmatprep.subr.bf16.mxu0 %v506_v16 }
  0x12   :  { %476 = vmatprep.subr.bf16.mxu1 %v507_v17 }
  0x14   :  { %455 = vmatpush3.bf16.msra.mxu0 %v508_v18 }
  0x15   :  { %477 = vmatpush3.bf16.msra.mxu1 %v509_v19  ;;  %456 = vmatprep.subr.bf16.mxu0 %v510_v20 }
  0x16   :  { %478 = vmatprep.subr.bf16.mxu1 %v511_v21 }
  0x18   :  { %457 = vmatpush3.bf16.msra.mxu0 %v512_v22 }
  0x19   :  { %479 = vmatpush3.bf16.msra.mxu1 %v513_v23  ;;  %458 = vmatprep.subr.bf16.mxu0 %v514_v24 }
  0x1a   :  { %480 = vmatprep.subr.bf16.mxu1 %v515_v25 }
  0x1c   :  { %459 = vmatpush3.bf16.msra.mxu0 %v516_v26 }
  0x1d   :  { %481 = vmatpush3.bf16.msra.mxu1 %v517_v27  ;;  %460 = vmatprep.subr.bf16.mxu0 %v518_v28 }
  0x1e   :  { %482 = vmatprep.subr.bf16.mxu1 %v519_v29 }
  0x20   :  { %461 = vmatpush3.bf16.msra.mxu0 %v520_v30 }
  0x21   :  { %483 = vmatpush3.bf16.msra.mxu1 %v521_v31 }
  0x23   :  { %336 = vmatmul.mubr.bf16.vlgmr.msra.gmra.mrb[0].mxu0 %v522_v32 }
  0x24   :  { %377 = vmatmul.mubr.bf16.vlgmr.msra.gmra.mrb[0].mxu1 %v525_v34 }
  0xf6   :  { %v462_v36 = vpop.f32.mrb[0].mxu0 }
  0xf7   :  { %v484_v37 = vpop.f32.mrb[0].mxu1  ;;  %v463_v38 = vpop.f32.mrb[1].mxu0 }
  0xf8   :  { %v464_v39 = vadd.f32 %v463_v38, %v462_v36  ;;  %v485_v40 = vpop.f32.mrb[1].mxu1  ;;  %v465_v41 = vpop.f32.mrb[2].mxu0 }
  0xf9   :  { %v486_v42 = vadd.f32 %v485_v40, %v484_v37  ;;  %v487_v43 = vpop.f32.mrb[2].mxu1  ;;  %v466_v44 = vpop.f32.mrb[3].mxu0 }
  0xfa   :  { %v467_v46 = vadd.f32 %v466_v44, %v465_v41  ;;  %v488_v47 = vpop.f32.mrb[3].mxu1 }
  0xfb   :  { %v379_v48 = vadd.f32 %v486_v42, %v464_v39  ;;  %v489_v49 = vadd.f32 %v488_v47, %v487_v43 }
  0xfd   :  { %v401_v50 = vadd.f32 %v445_v45, %v379_v48  ;;  %v382_v51 = vadd.f32 %v489_v49, %v467_v46 }
  0xff   :  { %403 = vst [vmem:[%s668_s3] sm:$0xff] %v401_v50  ;;  %v402_v52 = vadd.f32 %v445_v45, %v382_v51 }
 0x101   :  { %404 = vst [vmem:[%s668_s3 + $0x8] sm:$0xff] %v402_v52 }

</bundles_post_ra>
